<compile_context>
chip_gen: v6e
topology: v6e:2x2x1
jax: 0.10.0
libtpu: 0.0.40
codegen_flags: <defaults>
</compile_context>

<pallas_src>
import math

import jax
import jax.numpy as jnp
from jax import lax
from jax.experimental import pallas as pl
from jax.experimental.pallas import tpu as pltpu

_LANE = 128
_NEG_BIG = -1e30
_NT_DIMS = (((1,), (1,)), ((), ()))  # contract last dims:  A @ B^T


def _round_up(x, m):
    return ((x + m - 1) // m) * m


def gat_decoder_kernel(x_row_ref, x_col_ref, adj_ref, w_ref, wadst_ref, wasrc_ref,
                       b_ref, o_ref, e_dst_scr, m_scr, l_scr, acc_scr):
    j = pl.program_id(1)
    nj = pl.num_programs(1)

    @pl.when(j == 0)
    def _init():
        m_scr[...] = jnp.full_like(m_scr, _NEG_BIG)
        l_scr[...] = jnp.zeros_like(l_scr)
        acc_scr[...] = jnp.zeros_like(acc_scr)
        # Target-node logit contribution: a_dst . (W x_i) == x_i @ (W a_dst^T).
        # wadst is lane-padded to 128 (only column 0 is non-zero) -> MXU matmul.
        e_dst_scr[...] = jnp.dot(
            x_row_ref[...], wadst_ref[...],
            preferred_element_type=jnp.float32)[:, 0:1]                 # (TM, 1)

    x_col = x_col_ref[...]                                              # (TN, F_in) bf16

    # Source-node logits directly in lane layout: (8, F_in) @ (TN, F_in)^T -> (8, TN),
    # keep row 0 -> (1, TN).  No XLU transpose.
    e_src = lax.dot_general(
        wasrc_ref[...], x_col, _NT_DIMS,
        preferred_element_type=jnp.float32)[0:1, :]                     # (1, TN)

    scores = e_dst_scr[...] + e_src                                     # (TM, TN)
    scores = jnp.maximum(scores, 0.2 * scores)                          # LeakyReLU(0.2)

    mask = adj_ref[...].astype(jnp.float32) > 0.0                       # int8 adjacency tile
    scores = jnp.where(mask, scores, _NEG_BIG)

    # ---- online softmax update (flash-attention style) ----
    m_prev = m_scr[...]
    m_new = jnp.maximum(m_prev, jnp.max(scores, axis=-1, keepdims=True))
    alpha = jnp.exp(m_prev - m_new)
    p = jnp.where(mask, jnp.exp(scores - m_new), 0.0)                   # (TM, TN)

    # Transformed neighbour features for this column tile (bf16 MXU, f32 acc).
    h_col = jnp.dot(x_col, w_ref[...], preferred_element_type=jnp.float32)   # (TN, F_pad)

    l_scr[...] = alpha * l_scr[...] + jnp.sum(p, axis=-1, keepdims=True)
    acc_scr[...] = alpha * acc_scr[...] + jnp.dot(
        p.astype(jnp.bfloat16), h_col.astype(jnp.bfloat16),
        preferred_element_type=jnp.float32)
    m_scr[...] = m_new

    @pl.when(j == nj - 1)
    def _finalize():
        inv_l = pl.reciprocal(l_scr[...], approx=True)                  # EUP reciprocal
        out = acc_scr[...] * inv_l + b_ref[...]
        o_ref[...] = jnp.maximum(out, 0.0).astype(o_ref.dtype)          # lane-dense store


def graph_decoder_forward(x, edge_index, w, a_src, a_dst, bias,
                          *, block_m=256, block_n=512):
    """GraphDecoder forward.  x:(N,F_in) f32, edge_index:(2,E) int (row0=src, row1=dst)."""
    n, f_in = x.shape
    f_out = w.shape[1]
    f_pad = _round_up(f_out, _LANE)

    block_m = max(32, block_m)      # int8 adjacency sublane tiling
    block_n = max(_LANE, block_n)
    n_pad = _round_up(n, math.lcm(block_m, block_n))
    grid = (n_pad // block_m, n_pad // block_n)

    # Dense adjacency mask adj[i, j] = 1 iff edge j -> i, int8, self-loops on the
    # full padded diagonal (guarantees every softmax row has >= 1 unmasked entry).
    src = edge_index[0]
    dst = edge_index[1]
    adj = jnp.zeros((n_pad, n_pad), jnp.int8).at[dst, src].set(1)
    diag = jnp.arange(n_pad)
    adj = adj.at[diag, diag].set(1)

    # bf16 operands for the MXU; small projections folded in f32 then downcast.
    x_p = jnp.zeros((n_pad, f_in), jnp.bfloat16).at[:n].set(x.astype(jnp.bfloat16))
    w_p = jnp.zeros((f_in, f_pad), jnp.bfloat16).at[:, :f_out].set(w.astype(jnp.bfloat16))
    b_p = jnp.zeros((1, f_pad), jnp.float32).at[:, :f_out].set(bias.astype(jnp.float32))

    wa_dst = w.astype(jnp.float32) @ a_dst.astype(jnp.float32).T        # (F_in, 1)
    wadst_p = (jnp.zeros((f_in, _LANE), jnp.float32)
               .at[:, 0:1].set(wa_dst)).astype(jnp.bfloat16)            # (F_in, 128)
    wa_src = (w.astype(jnp.float32) @ a_src.astype(jnp.float32).T).T    # (1, F_in)
    wasrc_p = jnp.broadcast_to(wa_src, (8, f_in)).astype(jnp.bfloat16)  # (8, F_in)

    out = pl.pallas_call(
        gat_decoder_kernel,
        out_shape=jax.ShapeDtypeStruct((n_pad, f_pad), jnp.float32),
        grid_spec=pltpu.PrefetchScalarGridSpec(
            num_scalar_prefetch=0,
            grid=grid,
            in_specs=[
                pl.BlockSpec((block_m, f_in), lambda i, j: (i, 0)),      # x (target rows)
                pl.BlockSpec((block_n, f_in), lambda i, j: (j, 0)),      # x (source rows)
                pl.BlockSpec((block_m, block_n), lambda i, j: (i, j)),   # adjacency tile
                pl.BlockSpec((f_in, f_pad), lambda i, j: (0, 0)),        # W (padded)
                pl.BlockSpec((f_in, _LANE), lambda i, j: (0, 0)),        # W @ a_dst^T (lane-padded)
                pl.BlockSpec((8, f_in), lambda i, j: (0, 0)),            # (W @ a_src^T)^T (replicated)
                pl.BlockSpec((1, f_pad), lambda i, j: (0, 0)),           # bias
            ],
            out_specs=pl.BlockSpec((block_m, f_pad), lambda i, j: (i, 0)),
            scratch_shapes=[
                pltpu.VMEM((block_m, 1), jnp.float32),      # e_dst
                pltpu.VMEM((block_m, 1), jnp.float32),      # running max
                pltpu.VMEM((block_m, 1), jnp.float32),      # running denom
                pltpu.VMEM((block_m, f_pad), jnp.float32),  # output accumulator
            ],
        ),
        compiler_params=pltpu.CompilerParams(
            dimension_semantics=("parallel", "arbitrary"),
            vmem_limit_bytes=32 * 1024 * 1024,
        ),
    )(x_p, x_p, adj, w_p, wadst_p, wasrc_p, b_p)

    return out[:n, :f_out]


def _reference(x, edge_index, w, a_src, a_dst, bias):
    n = x.shape[0]
    adj = jnp.zeros((n, n), jnp.float32).at[edge_index[1], edge_index[0]].set(1.0)
    adj = jnp.maximum(adj, jnp.eye(n, dtype=jnp.float32))
    h = x @ w
    e_src = jnp.sum(h * a_src, axis=-1)
    e_dst = jnp.sum(h * a_dst, axis=-1)
    s = e_dst[:, None] + e_src[None, :]
    s = jnp.where(s > 0, s, 0.2 * s)
    s = jnp.where(adj > 0, s, -jnp.inf)
    attn = jax.nn.softmax(s, axis=-1)
    return jnp.maximum(attn @ h + bias, 0.0)


if __name__ == "__main__":
    # GraphDecoder(hidden_dim=8, output_dim=16, dropout=0.1, num_heads=4)
    # -> GATConv(in = hidden_dim * num_heads = 32, out = 16, heads = 1)
    N = 8
    hidden_dim, num_heads, output_dim = 8, 4, 16
    f_in = hidden_dim * num_heads

    key = jax.random.PRNGKey(0)
    k_x, k_w, k_as, k_ad, k_b, k_x2 = jax.random.split(key, 6)

    x = jax.random.normal(k_x, (N, f_in), jnp.float32)
    w = jax.random.normal(k_w, (f_in, output_dim), jnp.float32) * (1.0 / jnp.sqrt(f_in))
    a_src = jax.random.normal(k_as, (1, output_dim), jnp.float32) * 0.1
    a_dst = jax.random.normal(k_ad, (1, output_dim), jnp.float32) * 0.1
    bias = jax.random.normal(k_b, (1, output_dim), jnp.float32) * 0.1

    # Deterministic ring graph (both directions); edge_index = [sources; targets].
    idx = jnp.arange(N)
    src = jnp.concatenate([idx, (idx + 1) % N])
    dst = jnp.concatenate([(idx + 1) % N, idx])
    edge_index = jnp.stack([src, dst]).astype(jnp.int32)

    out = graph_decoder_forward(x, edge_index, w, a_src, a_dst, bias)
    out = jax.block_until_ready(out)
    ref = _reference(x, edge_index, w, a_src, a_dst, bias)
    assert out.shape == (N, output_dim)
    assert jnp.allclose(out, ref, atol=5e-2, rtol=5e-2), "small-graph mismatch vs reference"

    # Second check: multi-tile grid exercising the online softmax across both axes.
    N2 = 300
    x2 = jax.random.normal(k_x2, (N2, f_in), jnp.float32)
    idx2 = jnp.arange(N2)
    src2 = jnp.concatenate([idx2, (idx2 + 1) % N2, (idx2 + 5) % N2])
    dst2 = jnp.concatenate([(idx2 + 1) % N2, idx2, idx2])
    edge_index2 = jnp.stack([src2, dst2]).astype(jnp.int32)

    out2 = graph_decoder_forward(x2, edge_index2, w, a_src, a_dst, bias,
                                 block_m=128, block_n=256)
    out2 = jax.block_until_ready(out2)
    ref2 = _reference(x2, edge_index2, w, a_src, a_dst, bias)
    assert out2.shape == (N2, output_dim)
    assert jnp.allclose(out2, ref2, atol=5e-2, rtol=5e-2), "tiled-graph mismatch vs reference"

    print("KERNEL_OK")
</pallas_src>

<mosaic_0001>
module attributes {stable_mosaic.version = 11 : i64} {
  func.func @gat_decoder_kernel(%arg0: i32, %arg1: i32, %arg2: memref<256x32xbf16, #tpu.memory_space<vmem>>, %arg3: memref<512x32xbf16, #tpu.memory_space<vmem>>, %arg4: memref<256x512xi8, #tpu.memory_space<vmem>>, %arg5: memref<32x128xbf16, #tpu.memory_space<vmem>>, %arg6: memref<32x128xbf16, #tpu.memory_space<vmem>>, %arg7: memref<8x32xbf16, #tpu.memory_space<vmem>>, %arg8: memref<1x128xf32, #tpu.memory_space<vmem>>, %arg9: memref<256x128xf32, #tpu.memory_space<vmem>>, %arg10: memref<256x1xf32, #tpu.memory_space<vmem>>, %arg11: memref<256x1xf32, #tpu.memory_space<vmem>>, %arg12: memref<256x1xf32, #tpu.memory_space<vmem>>, %arg13: memref<256x128xf32, #tpu.memory_space<vmem>>) attributes {dimension_semantics = [#tpu.dimension_semantics<parallel>, #tpu.dimension_semantics<arbitrary>], iteration_bounds = array<i64: 2, 1>, scalar_prefetch = 0 : i64, scratch_operands = 4 : i64, tpu.core_type = #tpu.core_type<tc>, window_params = [{transform_indices = @transform_0, window_bounds = array<i64: 256, 32>}, {transform_indices = @transform_1, window_bounds = array<i64: 512, 32>}, {transform_indices = @transform_2, window_bounds = array<i64: 256, 512>}, {pipeline_mode = #tpu.pipeline_mode<synchronous>, transform_indices = @transform_3, window_bounds = array<i64: 32, 128>}, {pipeline_mode = #tpu.pipeline_mode<synchronous>, transform_indices = @transform_4, window_bounds = array<i64: 32, 128>}, {pipeline_mode = #tpu.pipeline_mode<synchronous>, transform_indices = @transform_5, window_bounds = array<i64: 8, 32>}, {pipeline_mode = #tpu.pipeline_mode<synchronous>, transform_indices = @transform_6, window_bounds = array<i64: 1, 128>}, {transform_indices = @transform_7, window_bounds = array<i64: 256, 128>}]} {
    %c0_i32 = arith.constant 0 : i32
    %0 = arith.cmpi eq, %arg1, %c0_i32 : i32
    %1 = arith.extui %0 : i1 to i32
    %c0_i32_0 = arith.constant 0 : i32
    %2 = arith.cmpi ne, %1, %c0_i32_0 : i32
    scf.if %2 {
      %cst_32 = arith.constant -1.000000e+30 : f32
      %51 = vector.broadcast %cst_32 : f32 to vector<256x1xf32>
      %c0_33 = arith.constant 0 : index
      %c0_34 = arith.constant 0 : index
      %52 = vector.load %arg11[%c0_33, %c0_34] : memref<256x1xf32, #tpu.memory_space<vmem>>, vector<256x1xf32>
      tpu.vector_store %arg11[%c0_33, %c0_34], %51 {strides = array<i32>} : memref<256x1xf32, #tpu.memory_space<vmem>>, vector<256x1xf32>,
      %cst_35 = arith.constant 0.000000e+00 : f32
      %53 = vector.broadcast %cst_35 : f32 to vector<256x1xf32>
      %c0_36 = arith.constant 0 : index
      %c0_37 = arith.constant 0 : index
      %54 = vector.load %arg12[%c0_36, %c0_37] : memref<256x1xf32, #tpu.memory_space<vmem>>, vector<256x1xf32>
      tpu.vector_store %arg12[%c0_36, %c0_37], %53 {strides = array<i32>} : memref<256x1xf32, #tpu.memory_space<vmem>>, vector<256x1xf32>,
      %cst_38 = arith.constant 0.000000e+00 : f32
      %55 = vector.broadcast %cst_38 : f32 to vector<256x128xf32>
      %c0_39 = arith.constant 0 : index
      %c0_40 = arith.constant 0 : index
      %56 = vector.load %arg13[%c0_39, %c0_40] : memref<256x128xf32, #tpu.memory_space<vmem>>, vector<256x128xf32>
      tpu.vector_store %arg13[%c0_39, %c0_40], %55 {strides = array<i32>} : memref<256x128xf32, #tpu.memory_space<vmem>>, vector<256x128xf32>,
      %c0_41 = arith.constant 0 : index
      %c0_42 = arith.constant 0 : index
      %57 = vector.load %arg2[%c0_41, %c0_42] : memref<256x32xbf16, #tpu.memory_space<vmem>>, vector<256x32xbf16>
      %c0_43 = arith.constant 0 : index
      %c0_44 = arith.constant 0 : index
      %58 = vector.load %arg6[%c0_43, %c0_44] : memref<32x128xbf16, #tpu.memory_space<vmem>>, vector<32x128xbf16>
      %cst_45 = arith.constant dense<0.000000e+00> : vector<256x128xf32>
      %59 = tpu.matmul %57, %58, %cst_45 {dimension_numbers = #tpu.dot_dimension_numbers<[1], [0], [0], [1], [0, 0, 1, 1], [], []>} : vector<256x32xbf16>, vector<32x128xbf16>, vector<256x128xf32> -> vector<256x128xf32>
      %60 = vector.extract_strided_slice %59 {offsets = [0, 0], sizes = [256, 1], strides = [1, 1]} : vector<256x128xf32> to vector<256x1xf32>
      %c0_46 = arith.constant 0 : index
      %c0_47 = arith.constant 0 : index
      %61 = vector.load %arg10[%c0_46, %c0_47] : memref<256x1xf32, #tpu.memory_space<vmem>>, vector<256x1xf32>
      tpu.vector_store %arg10[%c0_46, %c0_47], %60 {strides = array<i32>} : memref<256x1xf32, #tpu.memory_space<vmem>>, vector<256x1xf32>,
    } else {
    }
    %c0 = arith.constant 0 : index
    %c0_1 = arith.constant 0 : index
    %3 = vector.load %arg3[%c0, %c0_1] : memref<512x32xbf16, #tpu.memory_space<vmem>>, vector<512x32xbf16>
    %c0_2 = arith.constant 0 : index
    %c0_3 = arith.constant 0 : index
    %4 = vector.load %arg7[%c0_2, %c0_3] : memref<8x32xbf16, #tpu.memory_space<vmem>>, vector<8x32xbf16>
    %cst = arith.constant dense<0.000000e+00> : vector<8x512xf32>
    %5 = tpu.matmul %4, %3, %cst {dimension_numbers = #tpu.dot_dimension_numbers<[1], [1], [0], [0], [0, 0, 1, 0], [], []>} : vector<8x32xbf16>, vector<512x32xbf16>, vector<8x512xf32> -> vector<8x512xf32>
    %6 = vector.extract_strided_slice %5 {offsets = [0, 0], sizes = [1, 512], strides = [1, 1]} : vector<8x512xf32> to vector<1x512xf32>
    %c0_4 = arith.constant 0 : index
    %c0_5 = arith.constant 0 : index
    %7 = vector.load %arg10[%c0_4, %c0_5] : memref<256x1xf32, #tpu.memory_space<vmem>>, vector<256x1xf32>
    %8 = vector.broadcast %7 : vector<256x1xf32> to vector<256x512xf32>
    %9 = vector.broadcast %6 : vector<1x512xf32> to vector<256x512xf32>
    %10 = arith.addf %8, %9 : vector<256x512xf32>
    %cst_6 = arith.constant 2.000000e-01 : f32
    %11 = vector.broadcast %cst_6 : f32 to vector<256x512xf32>
    %12 = arith.mulf %11, %10 : vector<256x512xf32>
    %13 = arith.maximumf %10, %12 : vector<256x512xf32>
    %c0_7 = arith.constant 0 : index
    %c0_8 = arith.constant 0 : index
    %14 = vector.load %arg4[%c0_7, %c0_8] : memref<256x512xi8, #tpu.memory_space<vmem>>, vector<256x512xi8>
    %15 = arith.sitofp %14 : vector<256x512xi8> to vector<256x512xf32>
    %cst_9 = arith.constant 0.000000e+00 : f32
    %16 = vector.broadcast %cst_9 : f32 to vector<256x512xf32>
    %17 = arith.cmpf ogt, %15, %16 : vector<256x512xf32>
    %cst_10 = arith.constant -1.000000e+30 : f32
    %18 = vector.broadcast %cst_10 : f32 to vector<256x512xf32>
    %19 = arith.select %17, %13, %18 : vector<256x512xi1>, vector<256x512xf32>
    %c0_11 = arith.constant 0 : index
    %c0_12 = arith.constant 0 : index
    %20 = vector.load %arg11[%c0_11, %c0_12] : memref<256x1xf32, #tpu.memory_space<vmem>>, vector<256x1xf32>
    %cst_13 = arith.constant dense<0xFF800000> : vector<256xf32>
    %21 = vector.multi_reduction <maximumf>, %19, %cst_13 [1] : vector<256x512xf32> to vector<256xf32>
    %22 = vector.shape_cast %21 : vector<256xf32> to vector<256x1xf32>
    %23 = arith.maximumf %20, %22 : vector<256x1xf32>
    %24 = arith.subf %20, %23 : vector<256x1xf32>
    %25 = math.exp %24 : vector<256x1xf32>
    %26 = vector.broadcast %23 : vector<256x1xf32> to vector<256x512xf32>
    %27 = arith.subf %19, %26 : vector<256x512xf32>
    %28 = math.exp %27 : vector<256x512xf32>
    %cst_14 = arith.constant 0.000000e+00 : f32
    %29 = vector.broadcast %cst_14 : f32 to vector<256x512xf32>
    %30 = arith.select %17, %28, %29 : vector<256x512xi1>, vector<256x512xf32>
    %c0_15 = arith.constant 0 : index
    %c0_16 = arith.constant 0 : index
    %31 = vector.load %arg5[%c0_15, %c0_16] : memref<32x128xbf16, #tpu.memory_space<vmem>>, vector<32x128xbf16>
    %cst_17 = arith.constant dense<0.000000e+00> : vector<512x128xf32>
    %32 = tpu.matmul %3, %31, %cst_17 {dimension_numbers = #tpu.dot_dimension_numbers<[1], [0], [0], [1], [0, 0, 1, 1], [], []>} : vector<512x32xbf16>, vector<32x128xbf16>, vector<512x128xf32> -> vector<512x128xf32>
    %c0_18 = arith.constant 0 : index
    %c0_19 = arith.constant 0 : index
    %33 = vector.load %arg12[%c0_18, %c0_19] : memref<256x1xf32, #tpu.memory_space<vmem>>, vector<256x1xf32>
    %34 = arith.mulf %25, %33 : vector<256x1xf32>
    %cst_20 = arith.constant dense<0.000000e+00> : vector<256xf32>
    %35 = vector.multi_reduction <add>, %30, %cst_20 [1] : vector<256x512xf32> to vector<256xf32>
    %36 = vector.shape_cast %35 : vector<256xf32> to vector<256x1xf32>
    %37 = arith.addf %34, %36 : vector<256x1xf32>
    %c0_21 = arith.constant 0 : index
    %c0_22 = arith.constant 0 : index
    %38 = vector.load %arg12[%c0_21, %c0_22] : memref<256x1xf32, #tpu.memory_space<vmem>>, vector<256x1xf32>
    tpu.vector_store %arg12[%c0_21, %c0_22], %37 {strides = array<i32>} : memref<256x1xf32, #tpu.memory_space<vmem>>, vector<256x1xf32>,
    %c0_23 = arith.constant 0 : index
    %c0_24 = arith.constant 0 : index
    %39 = vector.load %arg13[%c0_23, %c0_24] : memref<256x128xf32, #tpu.memory_space<vmem>>, vector<256x128xf32>
    %40 = vector.broadcast %25 : vector<256x1xf32> to vector<256x128xf32>
    %41 = arith.mulf %40, %39 : vector<256x128xf32>
    %42 = arith.truncf %30 : vector<256x512xf32> to vector<256x512xbf16>
    %43 = arith.truncf %32 : vector<512x128xf32> to vector<512x128xbf16>
    %cst_25 = arith.constant dense<0.000000e+00> : vector<256x128xf32>
    %44 = tpu.matmul %42, %43, %cst_25 {dimension_numbers = #tpu.dot_dimension_numbers<[1], [0], [0], [1], [0, 0, 1, 1], [], []>} : vector<256x512xbf16>, vector<512x128xbf16>, vector<256x128xf32> -> vector<256x128xf32>
    %45 = arith.addf %41, %44 : vector<256x128xf32>
    %c0_26 = arith.constant 0 : index
    %c0_27 = arith.constant 0 : index
    %46 = vector.load %arg13[%c0_26, %c0_27] : memref<256x128xf32, #tpu.memory_space<vmem>>, vector<256x128xf32>
    tpu.vector_store %arg13[%c0_26, %c0_27], %45 {strides = array<i32>} : memref<256x128xf32, #tpu.memory_space<vmem>>, vector<256x128xf32>,
    %c0_28 = arith.constant 0 : index
    %c0_29 = arith.constant 0 : index
    %47 = vector.load %arg11[%c0_28, %c0_29] : memref<256x1xf32, #tpu.memory_space<vmem>>, vector<256x1xf32>
    tpu.vector_store %arg11[%c0_28, %c0_29], %23 {strides = array<i32>} : memref<256x1xf32, #tpu.memory_space<vmem>>, vector<256x1xf32>,
    %c0_i32_30 = arith.constant 0 : i32
    %48 = arith.cmpi eq, %arg1, %c0_i32_30 : i32
    %49 = arith.extui %48 : i1 to i32
    %c0_i32_31 = arith.constant 0 : i32
    %50 = arith.cmpi ne, %49, %c0_i32_31 : i32
    scf.if %50 {
      %c0_32 = arith.constant 0 : index
      %c0_33 = arith.constant 0 : index
      %51 = vector.load %arg12[%c0_32, %c0_33] : memref<256x1xf32, #tpu.memory_space<vmem>>, vector<256x1xf32>
      %52 = tpu.reciprocal %51 {approx = true} : vector<256x1xf32> -> vector<256x1xf32>
      %c0_34 = arith.constant 0 : index
      %c0_35 = arith.constant 0 : index
      %53 = vector.load %arg13[%c0_34, %c0_35] : memref<256x128xf32, #tpu.memory_space<vmem>>, vector<256x128xf32>
      %54 = vector.broadcast %52 : vector<256x1xf32> to vector<256x128xf32>
      %55 = arith.mulf %53, %54 : vector<256x128xf32>
      %c0_36 = arith.constant 0 : index
      %c0_37 = arith.constant 0 : index
      %56 = vector.load %arg8[%c0_36, %c0_37] : memref<1x128xf32, #tpu.memory_space<vmem>>, vector<1x128xf32>
      %57 = vector.broadcast %56 : vector<1x128xf32> to vector<256x128xf32>
      %58 = arith.addf %55, %57 : vector<256x128xf32>
      %cst_38 = arith.constant 0.000000e+00 : f32
      %59 = vector.broadcast %cst_38 : f32 to vector<256x128xf32>
      %60 = arith.maximumf %58, %59 : vector<256x128xf32>
      %c0_39 = arith.constant 0 : index
      %c0_40 = arith.constant 0 : index
      %61 = vector.load %arg9[%c0_39, %c0_40] : memref<256x128xf32, #tpu.memory_space<vmem>>, vector<256x128xf32>
      tpu.vector_store %arg9[%c0_39, %c0_40], %60 {strides = array<i32>} : memref<256x128xf32, #tpu.memory_space<vmem>>, vector<256x128xf32>,
    } else {
    }
    return
  }
  func.func @transform_0(%arg0: i32, %arg1: i32) -> (i32, i32) {
    %c0_i32 = arith.constant 0 : i32
    %c0_i32_0 = arith.constant 0 : i32
    return %arg0, %c0_i32 : i32, i32
  }
  func.func @transform_1(%arg0: i32, %arg1: i32) -> (i32, i32) {
    %c0_i32 = arith.constant 0 : i32
    %c0_i32_0 = arith.constant 0 : i32
    return %arg1, %c0_i32 : i32, i32
  }
  func.func @transform_2(%arg0: i32, %arg1: i32) -> (i32, i32) {
    %c0_i32 = arith.constant 0 : i32
    return %arg0, %arg1 : i32, i32
  }
  func.func @transform_3(%arg0: i32, %arg1: i32) -> (i32, i32) {
    %c0_i32 = arith.constant 0 : i32
    %c0_i32_0 = arith.constant 0 : i32
    %c0_i32_1 = arith.constant 0 : i32
    return %c0_i32, %c0_i32_0 : i32, i32
  }
  func.func @transform_4(%arg0: i32, %arg1: i32) -> (i32, i32) {
    %c0_i32 = arith.constant 0 : i32
    %c0_i32_0 = arith.constant 0 : i32
    %c0_i32_1 = arith.constant 0 : i32
    return %c0_i32, %c0_i32_0 : i32, i32
  }
  func.func @transform_5(%arg0: i32, %arg1: i32) -> (i32, i32) {
    %c0_i32 = arith.constant 0 : i32
    %c0_i32_0 = arith.constant 0 : i32
    %c0_i32_1 = arith.constant 0 : i32
    return %c0_i32, %c0_i32_0 : i32, i32
  }
  func.func @transform_6(%arg0: i32, %arg1: i32) -> (i32, i32) {
    %c0_i32 = arith.constant 0 : i32
    %c0_i32_0 = arith.constant 0 : i32
    %c0_i32_1 = arith.constant 0 : i32
    return %c0_i32, %c0_i32_0 : i32, i32
  }
  func.func @transform_7(%arg0: i32, %arg1: i32) -> (i32, i32) {
    %c0_i32 = arith.constant 0 : i32
    %c0_i32_0 = arith.constant 0 : i32
    return %arg0, %c0_i32 : i32, i32
  }
}

</mosaic_0001>

<bundles_post_ra>
// kernel: tpu_custom_call.1
= control target key start
LH: loop header
LB: loop body
LE: loop exit
PB: predicated region body
PF: predicated region fallthrough
CT: control target
= control target key end

     0   :  { %12 = vsyncpa [#allocation7], 0  ;;  %s11625_s0 = inlined_call_operand.vmem [shape: bf16[512,32], index: 0, kind: input, shape index: {}]   ;;  %s11626_s1 = inlined_call_operand.vmem [shape: bf16[512,32], index: 1, kind: input, shape index: {}]   ;;  %s11627_s2 = inlined_call_operand.vmem [shape: s8[512,512], index: 2, kind: input, shape index: {}]   ;;  %s11628_s3 = inlined_call_operand.vmem [shape: bf16[32,128], index: 3, kind: input, shape index: {}]   ;;  %s11629_s4 = inlined_call_operand.vmem [shape: bf16[32,128], index: 4, kind: input, shape index: {}]   ;;  %s11630_s5 = inlined_call_operand.vmem [shape: bf16[8,32], index: 5, kind: input, shape index: {}]   ;;  %s11631_s6 = inlined_call_operand.vmem [shape: f32[1,128], index: 6, kind: input, shape index: {}]   ;;  %s11632_s7 = inlined_call_operand.hbm [shape: f32[512,128], index: 7, kind: output, shape index: {}]  }
   0x1   :  { %14 = vsyncpa [#allocation7 + $0x1], 0  ;;  %s6581_s24 = smov 0   ;;  %s6583_s25 = smov 0  }
   0x2   :  { %s6585_s26 = smov 0   ;;  %s6587_s27 = smov 0  }
   0x3   :  { %s6589_s28 = smov 0   ;;  %s6591_s29 = smov 0  }
   0x4 LB: > { %s5205_s30 = sadd.s32 4294967295, %s6533_s29   ;;  %s5206_s8 = sadd.s32 4294967294, %s6533_s29   ;;  %s6533_s29 = sphi %s6591_s29, %s20_s29   ;;  %s6529_s28 = sphi %s6589_s28, %s13674_s28   ;;  %s6525_s27 = sphi %s6587_s27, %s13673_s27   ;;  %s6521_s26 = sphi %s6585_s26, %s13672_s26   ;;  %s6517_s25 = sphi %s6583_s25, %s13671_s25   ;;  %s6513_s24 = sphi %s6581_s24, %s13670_s24  }
   0x5   : > { %s32_s9 = sadd.s32 1, %s6529_s28  ;;  %s203_s10 = sadd.s32 1, %s6521_s26 }
   0x6   : > { %p34_p0 = scmp.ge.s32.totalorder %s32_s9, 2  ;;  %p213_p1 = scmp.ne.s32.totalorder %s6521_s26, %s6517_s25 }
   0x7   : > { %p214_p2 = scmp.eq.s32.totalorder %s5205_s30, 1  ;;  %p219_p3 = scmp.ne.s32.totalorder %s6517_s25, %s6513_s24 }
   0x8   : > { %s13676_s9 = smov (%p34_p0, %s32_s9), 0  ;;  %p220_p5 = scmp.eq.s32.totalorder %s5206_s8, 1 }
   0x9   : > { %p6621_p4 = por %p214_p2, %p213_p1  ;;  %s200_s12 = ssub.s32 %s6529_s28, %s13676_s9 }
   0xa   : > { %p5210_p6 = scmp.ge.s32.totalorder %s6533_s29, 1  ;;  %p201_p7 = scmp.eq.s32.totalorder %s200_s12, 0 }
   0xb   : > { %p6628_p8 = por %p220_p5, %p219_p3  ;;  %p283_p9 = scmp.lt.s32.totalorder %s6533_s29, 3 }
   0xc   : > { %s6634_s14 = scalar_select %p201_p7, %s6521_s26, %s203_s10  }
   0xd   : > { %p284_p10 = pnand %p5210_p6, %p283_p9 }
   0xf   : > { %287 = sbr.rel (%p284_p10) target bundleno = 1217 (0x4c1), region = 48 }
  0x14   : > { %v6017_v0 = vld [vmem:[%s11629_s4 + $0x8] sm:$0xff]   ;;  %s5212_s17 = sshll.u32 %s6525_s27, 5  ;;  %v6018_v1 = vld [vmem:[%s11629_s4] sm:$0xff]   ;;  %vm585_vm0 = vcmask 261120   ;;  %v6646_v2 = vld [vmem:[%s11626_s1 + $0x78] sm:$0xff]   ;;  %vm12140_vm1 = vcmask 7168  }
  0x15   : > { %p331_p11 = scmp.lt.s32.totalorder %s5212_s17, 63  ;;  %5831 = vmatprep.subr.bf16.mxu0 %v6017_v0  ;;  %v6651_v3 = vld [vmem:[%s11626_s1 + $0x38] sm:$0xff]   ;;  %5939 = vmatprep.subr.msk.bf16.mxu1 %vm585_vm0, %v6646_v2  ;;  %v6691_v15 = vld [vmem:[%s11626_s1 + $0x70] sm:$0xff]   ;;  %v6717_v20 = vld [vmem:[%s11626_s1 + $0x68] sm:$0xff]   ;;  %s5214_s20 = sshll.u32 %s6525_s27, 3 }
  0x16   : > { %5832 = vmatpush3.bf16.msra.mxu0 %v6017_v0  ;;  %v6658_v4 = vld [vmem:[%s11626_s1 + $0xf8] sm:$0xff]   ;;  %v1078_v5 = vsel %vm585_vm0, %v6651_v3, 0  ;;  %v6696_v16 = vld [vmem:[%s11626_s1 + $0x30] sm:$0xff]   ;;  %v6727_v23 = vld [vmem:[%s11626_s1 + $0x28] sm:$0xff]   ;;  %p344_p12 = scmp.lt.s32.totalorder %s5214_s20, 15  ;;  %s5518_s18 = sshll.u32 %s6525_s27, 12 }
  0x17   : > { %s13678_s17 = smov (!%p331_p11, %s5212_s17), 63  ;;  %5833 = vmatprep.subr.bf16.mxu0 %v6018_v1  ;;  %5538 = vmatpush3.bf16.xpose.msra.mxu1 %v1078_v5  ;;  %v6670_v6 = vld [vmem:[%s11626_s1 + $0xb8] sm:$0xff]   ;;  %v6703_v17 = vld [vmem:[%s11626_s1 + $0xf0] sm:$0xff]   ;;  %v1075_v18 = vsel %vm585_vm0, %v6696_v16, 0  ;;  %v6734_v24 = vld [vmem:[%s11626_s1 + $0xe8] sm:$0xff]   ;;  %v1072_v27 = vsel %vm585_vm0, %v6727_v23, 0 }
  0x18   : > { %s5213_s10 = sshll.u32 %s13678_s17, 2  ;;  %v1126_v9 = vsel %vm585_vm0, %v6670_v6, 0  ;;  %5940 = vmatprep.subr.msk.bf16.mxu1 %vm585_vm0, %v6691_v15  ;;  %v6711_v19 = vld [vmem:[%s11626_s1 + $0xb0] sm:$0xff]   ;;  %v6739_v25 = vld [vmem:[%s11626_s1 + $0xa8] sm:$0xff]   ;;  %v6749_v28 = vld [vmem:[%s11626_s1 + $0x60] sm:$0xff]   ;;  %s13680_s20 = smov (!%p344_p12, %s5214_s20), 15 }
  0x19   : > { %s6665_s16 = scalar_lea.vmem %s11625_s0, %s5213_s10  ;;  %v1123_v22 = vsel %vm585_vm0, %v6711_v19, 0  ;;  %v1120_v29 = vsel %vm585_vm0, %v6739_v25, 0  ;;  %v6757_v30 = vld [vmem:[%s11626_s1 + $0xe0] sm:$0xff]   ;;  %v6781_v36 = vld [vmem:[%s11626_s1 + $0x58] sm:$0xff]   ;;  %v6813_v44 = vld [vmem:[%s11626_s1 + $0x50] sm:$0xff]   ;;  %s5517_s21 = sshll.u32 %s13680_s20, 5 }
  0x1a   : > { %5834 = vmatpush3.bf16.msra.mxu0 %v6018_v1  ;;  %v6019_v7 = vld [vmem:[%s6665_s16] sm:$0xff]   ;;  %v6020_v8 = vld [vmem:[%s6665_s16 + $0x8] sm:$0xff]   ;;  %v6021_v10 = vld [vmem:[%s6665_s16 + $0x10] sm:$0xff]   ;;  %s6977_s30 = scalar_lea.vmem %s11627_s2, %s5517_s21  ;;  %s11573_s21 = scalar_lea.hbm %s11632_s7, %s5518_s18 }
  0x1b   : > { %5947 = vmatprep.subr.msk.bf16.mxu0 %vm585_vm0, %v6658_v4  ;;  %5835 = vmatprep.mubr.msk.bf16.mxu0 %vm585_vm0, %v6019_v7  ;;  %v6022_v11 = vld [vmem:[%s6665_s16 + $0x18] sm:$0xff]   ;;  %v6023_v12 = vld [vmem:[%s6665_s16 + $0x20] sm:$0xff]   ;;  %v6024_v13 = vld [vmem:[%s6665_s16 + $0x28] sm:$0xff]   ;;  %v6535_v7 = vmov 0   ;;  %s6538_s23 = smov [#allocation6]  }
  0x1c   : > { %v6025_v14 = vld [vmem:[%s6665_s16 + $0x30] sm:$0xff]   ;;  %v6026_v21 = vld [vmem:[%s6665_s16 + $0x38] sm:$0xff]   ;;  %v6027_v26 = vld [vmem:[%s6665_s16 + $0x40] sm:$0xff]   ;;  %6015 = vset.pattern.permute.xlu1 %v6535_v7  ;;  %6016 = vset.pattern.permute.xlu0 %v6535_v7 }
  0x1d   : > { %5836 = vmatmul.mubr.msk.bf16.vlgmr.msra.gmra.mxu0 %vm585_vm0, %v6020_v8  ;;  %v6765_v31 = vld [vmem:[%s11626_s1 + $0x20] sm:$0xff]   ;;  %v6028_v32 = vld [vmem:[%s6665_s16 + $0x48] sm:$0xff]   ;;  %v6029_v34 = vld [vmem:[%s6665_s16 + $0x50] sm:$0xff]  }
  0x1e   : > { %5839 = vmatprep.mubr.msk.bf16.mxu0 %vm585_vm0, %v6021_v10  ;;  %5556 = vmatpush3.bf16.xpose.msra.mxu0 %v1126_v9  ;;  %v6773_v33 = vld [vmem:[%s11626_s1 + $0xa0] sm:$0xff]   ;;  %v1069_v35 = vsel %vm585_vm0, %v6765_v31, 0  ;;  %v6789_v38 = vld [vmem:[%s11626_s1 + $0xd8] sm:$0xff]   ;;  %v6821_v46 = vld [vmem:[%s11626_s1 + $0xd0] sm:$0xff]  }
  0x1f   : > { %5540 = vmatpush3.bf16.xpose.msra.mxu1 %v1075_v18  ;;  %5948 = vmatprep.subr.msk.bf16.mxu0 %vm585_vm0, %v6703_v17  ;;  %v1117_v37 = vsel %vm585_vm0, %v6773_v33, 0  ;;  %v6797_v39 = vld [vmem:[%s11626_s1 + $0x18] sm:$0xff]   ;;  %v6031_v42 = vld [vmem:[%s6665_s16 + $0x60] sm:$0xff]   ;;  %v6056_v48 = vld [vmem:[%s11626_s1 + $0x10] sm:$0xff]  }
  0x20   : > { %5941 = vmatprep.subr.msk.bf16.mxu1 %vm585_vm0, %v6717_v20  ;;  %v6030_v40 = vld [vmem:[%s6665_s16 + $0x58] sm:$0xff]   ;;  %v1066_v43 = vsel %vm585_vm0, %v6797_v39, 0  ;;  %v891_v47 = vld [vmem:[%s11630_s5] sm:$0xf]  ;;  %v6032_v49 = vld [vmem:[%s6665_s16 + $0x68] sm:$0xff]   ;;  %v1063_v52 = vsel %vm585_vm0, %v6056_v48, 0 }
  0x21   : > { %v6805_v41 = vld [vmem:[%s11626_s1 + $0x98] sm:$0xff]   ;;  %5553 = vmatprep.mubr.msk.bf16.mxu1 %vm585_vm0, %v891_v47  ;;  %v6058_v50 = vld [vmem:[%s11626_s1 + $0x90] sm:$0xff]   ;;  %v6059_v53 = vld [vmem:[%s11626_s1 + $0x48] sm:$0xff]  }
  0x22   : > { %v1114_v45 = vsel %vm585_vm0, %v6805_v41, 0  ;;  %v6033_v51 = vld [vmem:[%s6665_s16 + $0x70] sm:$0xff]   ;;  %v1111_v54 = vsel %vm585_vm0, %v6058_v50, 0  ;;  %v6061_v55 = vld [vmem:[%s11626_s1 + $0xc8] sm:$0xff]   ;;  %v6034_v57 = vld [vmem:[%s6665_s16 + $0x78] sm:$0xff]   ;;  %s327_s16 = sand.u32 1, %s6517_s25  }
  0x23   : > { %v6060_v56 = vld [vmem:[%s11626_s1 + $0x8] sm:$0xff]   ;;  %v6063_v60 = vld [vmem:[%s11626_s1 + $0x40] sm:$0xff]   ;;  %s5211_s12 = sshll.u32 %s327_s16, 8  ;;  %s11580_s27 = scalar_lea.sflag [#allocation7], %s327_s16 }
  0x24   : > { %v6062_v58 = vld [vmem:[%s11626_s1 + $0x88] sm:$0xff]   ;;  %v1060_v59 = vsel %vm585_vm0, %v6060_v56, 0  ;;  %v6065_v62 = vld [vmem:[%s11626_s1 + $0xc0] sm:$0xff]   ;;  %s11301_s15 = scalar_lea.vmem [#allocation6], %s5211_s12 }
  0x25   : > { %5840 = vmatmul.mubr.msk.bf16.gmra.mxu0 %vm585_vm0, %v6022_v11  ;;  %v1108_v61 = vsel %vm585_vm0, %v6062_v58, 0  ;;  %v6064_v63 = vld [vmem:[%s11626_s1] sm:$0xff]   ;;  %v6067_v8 = vld [vmem:[%s11628_s3 + $0x8] sm:$0xff]   ;;  %s5102_s19 = sshll.u32 %s11301_s15, 4  ;;  %s11575_s19 = int_to_ptr.vmem [resolvable:$true] %s5102_s19 }
  0x26   : > { %5843 = vmatprep.mubr.msk.bf16.mxu0 %vm585_vm0, %v6023_v12  ;;  %5558 = vmatpush3.bf16.xpose.msra.mxu0 %v1123_v22  ;;  %v6066_v0 = vld [vmem:[%s11626_s1 + $0x80] sm:$0xff]   ;;  %v1057_v1 = vsel %vm585_vm0, %v6064_v63, 0  ;;  %s6457_s22 = scalar_lea.vmem %s11575_s19, 4096 }
  0x27   : > { %5949 = vmatprep.subr.msk.bf16.mxu0 %vm585_vm0, %v6734_v24  ;;  %5542 = vmatpush3.bf16.xpose.msra.mxu1 %v1072_v27  ;;  %v1105_v5 = vsel %vm585_vm0, %v6066_v0, 0  ;;  %v6068_v9 = vld [vmem:[%s11628_s3] sm:$0xff]   ;;  %p6458_p13 = scmp.ne.s32.totalorder %s11575_s19, %s6457_s22 }
  0x28   : > { %5942 = vmatprep.subr.msk.bf16.mxu1 %vm585_vm0, %v6749_v28 }
  0x29   : > { %p6459_p0 = pnand %p6458_p13, %p6621_p4 }
  0x2b   : > { %p6460_p1 = pneg %p6459_p0 }
  0x2d   : > { %5844 = vmatmul.mubr.msk.bf16.gmra.mxu0 %vm585_vm0, %v6024_v13 }
  0x2e   : > { %5847 = vmatprep.mubr.msk.bf16.mxu0 %vm585_vm0, %v6025_v14  ;;  %5560 = vmatpush3.bf16.xpose.msra.mxu0 %v1120_v29 }
  0x2f   : > { %5950 = vmatprep.subr.msk.bf16.mxu0 %vm585_vm0, %v6757_v30  ;;  %5544 = vmatpush3.bf16.xpose.msra.mxu1 %v1069_v35 }
  0x30   : > { %5943 = vmatprep.subr.msk.bf16.mxu1 %vm585_vm0, %v6781_v36 }
  0x35   : > { %5848 = vmatmul.mubr.msk.bf16.gmra.mxu0 %vm585_vm0, %v6026_v21 }
  0x36   : > { %5851 = vmatprep.mubr.msk.bf16.mxu0 %vm585_vm0, %v6027_v26  ;;  %5562 = vmatpush3.bf16.xpose.msra.mxu0 %v1117_v37 }
  0x37   : > { %5951 = vmatprep.subr.msk.bf16.mxu0 %vm585_vm0, %v6789_v38  ;;  %5546 = vmatpush3.bf16.xpose.msra.mxu1 %v1066_v43 }
  0x38   : > { %5944 = vmatprep.subr.msk.bf16.mxu1 %vm585_vm0, %v6813_v44 }
  0x3d   : > { %5852 = vmatmul.mubr.msk.bf16.gmra.mxu0 %vm585_vm0, %v6028_v32 }
  0x3e   : > { %5855 = vmatprep.mubr.msk.bf16.mxu0 %vm585_vm0, %v6029_v34  ;;  %5564 = vmatpush3.bf16.xpose.msra.mxu0 %v1114_v45 }
  0x3f   : > { %5952 = vmatprep.subr.msk.bf16.mxu0 %vm585_vm0, %v6821_v46  ;;  %5548 = vmatpush3.bf16.xpose.msra.mxu1 %v1063_v52 }
  0x40   : > { %5945 = vmatprep.subr.msk.bf16.mxu1 %vm585_vm0, %v6059_v53 }
  0x45   : > { %5856 = vmatmul.mubr.msk.bf16.gmra.mxu0 %vm585_vm0, %v6030_v40 }
  0x46   : > { %5859 = vmatprep.mubr.msk.bf16.mxu0 %vm585_vm0, %v6031_v42  ;;  %5566 = vmatpush3.bf16.xpose.msra.mxu0 %v1111_v54 }
  0x47   : > { %5953 = vmatprep.subr.msk.bf16.mxu0 %vm585_vm0, %v6061_v55  ;;  %5550 = vmatpush3.bf16.xpose.msra.mxu1 %v1060_v59 }
  0x48   : > { %5946 = vmatprep.subr.msk.bf16.mxu1 %vm585_vm0, %v6063_v60 }
  0x4d   : > { %5860 = vmatmul.mubr.msk.bf16.gmra.mxu0 %vm585_vm0, %v6032_v49 }
  0x4e   : > { %5863 = vmatprep.mubr.msk.bf16.mxu0 %vm585_vm0, %v6033_v51  ;;  %5568 = vmatpush3.bf16.xpose.msra.mxu0 %v1108_v61 }
  0x4f   : > { %5954 = vmatprep.subr.msk.bf16.mxu0 %vm585_vm0, %v6065_v62  ;;  %5552 = vmatpush3.bf16.xpose.msra.mxu1 %v1057_v1 }
  0x50   : > { %5935 = vmatprep.subr.bf16.mxu1 %v6067_v8 }
  0x55   : > { %5864 = vmatmul.mubr.msk.bf16.gmra.mxu0 %vm585_vm0, %v6034_v57 }
  0x56   : > { %5571 = vmatprep.mubr.msk.bf16.mxu0 %vm585_vm0, %v891_v47  ;;  %5570 = vmatpush3.bf16.xpose.msra.mxu0 %v1105_v5 }
  0x57   : > { %5554 = vmatmul.mubr.msk.bf16.vlgmr.msra.gmra.mxu1 %vm585_vm0, %v891_v47  ;;  %5867 = vmatprep.subr.bf16.mxu0 %v6067_v8 }
  0x58   : > { %5899 = vmatprep.mubr.msk.bf16.mxu1 %vm585_vm0, %v6691_v15  ;;  %5937 = vmatpush3.bf16.msra.mxu1 %v6067_v8 }
  0x59   : > { %5936 = vmatprep.subr.bf16.mxu1 %v6068_v9 }
  0x5c   : > { %5938 = vmatpush3.bf16.msra.mxu1 %v6068_v9 }
  0x5d   : > { %5572 = vmatmul.mubr.msk.bf16.vlgmr.msra.gmra.mxu0 %vm585_vm0, %v891_v47 }
  0x5e   : > { %5871 = vmatprep.mubr.msk.bf16.mxu0 %vm585_vm0, %v6064_v63  ;;  %5868 = vmatpush3.bf16.msra.mxu0 %v6067_v8 }
  0x5f   : > { %5869 = vmatprep.subr.bf16.mxu0 %v6068_v9  ;;  %5900 = vmatmul.mubr.msk.bf16.vlgmr.msra.gmra.mxu1 %vm585_vm0, %v6646_v2 }
  0x60   : > { %5903 = vmatprep.mubr.msk.bf16.mxu1 %vm585_vm0, %v6066_v0 }
  0x62   : > { %5870 = vmatpush3.bf16.msra.mxu0 %v6068_v9 }
  0x65   : > { %5872 = vmatmul.mubr.msk.bf16.vlgmr.msra.gmra.mxu0 %vm585_vm0, %v6060_v56 }
  0x66   : > { %5875 = vmatprep.mubr.msk.bf16.mxu0 %vm585_vm0, %v6056_v48 }
  0x67   : > { %5904 = vmatmul.mubr.msk.bf16.gmra.mxu1 %vm585_vm0, %v6062_v58 }
  0x68   : > { %5907 = vmatprep.mubr.msk.bf16.mxu1 %vm585_vm0, %v6058_v50 }
  0x6d   : > { %5876 = vmatmul.mubr.msk.bf16.gmra.mxu0 %vm585_vm0, %v6797_v39 }
  0x6e   : > { %5879 = vmatprep.mubr.msk.bf16.mxu0 %vm585_vm0, %v6765_v31 }
  0x6f   : > { %5908 = vmatmul.mubr.msk.bf16.gmra.mxu1 %vm585_vm0, %v6805_v41 }
  0x70   : > { %5911 = vmatprep.mubr.msk.bf16.mxu1 %vm585_vm0, %v6773_v33 }
  0x75   : > { %5880 = vmatmul.mubr.msk.bf16.gmra.mxu0 %vm585_vm0, %v6727_v23 }
  0x76   : > { %5883 = vmatprep.mubr.msk.bf16.mxu0 %vm585_vm0, %v6696_v16 }
  0x77   : > { %5912 = vmatmul.mubr.msk.bf16.gmra.mxu1 %vm585_vm0, %v6739_v25 }
  0x78   : > { %5915 = vmatprep.mubr.msk.bf16.mxu1 %vm585_vm0, %v6711_v19 }
  0x7d   : > { %5884 = vmatmul.mubr.msk.bf16.gmra.mxu0 %vm585_vm0, %v6651_v3 }
  0x7e   : > { %5887 = vmatprep.mubr.msk.bf16.mxu0 %vm585_vm0, %v6063_v60 }
  0x7f   : > { %5916 = vmatmul.mubr.msk.bf16.gmra.mxu1 %vm585_vm0, %v6670_v6 }
  0x80   : > { %5919 = vmatprep.mubr.msk.bf16.mxu1 %vm585_vm0, %v6065_v62 }
  0x85   : > { %5888 = vmatmul.mubr.msk.bf16.gmra.mxu0 %vm585_vm0, %v6059_v53 }
  0x86   : > { %5891 = vmatprep.mubr.msk.bf16.mxu0 %vm585_vm0, %v6813_v44 }
  0x87   : > { %5920 = vmatmul.mubr.msk.bf16.gmra.mxu1 %vm585_vm0, %v6061_v55 }
  0x88   : > { %5923 = vmatprep.mubr.msk.bf16.mxu1 %vm585_vm0, %v6821_v46 }
  0x8d   : > { %5892 = vmatmul.mubr.msk.bf16.gmra.mxu0 %vm585_vm0, %v6781_v36 }
  0x8e   : > { %5895 = vmatprep.mubr.msk.bf16.mxu0 %vm585_vm0, %v6749_v28 }
  0x8f   : > { %5924 = vmatmul.mubr.msk.bf16.gmra.mxu1 %vm585_vm0, %v6789_v38 }
  0x90   : > { %5927 = vmatprep.mubr.msk.bf16.mxu1 %vm585_vm0, %v6757_v30 }
  0x95   : > { %5896 = vmatmul.mubr.msk.bf16.gmra.mxu0 %vm585_vm0, %v6717_v20 }
  0x97   : > { %5928 = vmatmul.mubr.msk.bf16.gmra.mxu1 %vm585_vm0, %v6734_v24 }
  0x98   : > { %5931 = vmatprep.mubr.msk.bf16.mxu1 %vm585_vm0, %v6703_v17 }
  0x9f   : > { %5932 = vmatmul.mubr.msk.bf16.gmra.mxu1 %vm585_vm0, %v6658_v4 }
  0xdd   : > { %v5837_v2 = vpop.f32.mrf.mxu0 }
  0xde   : > { %797 = vst.msk [vmem:[#allocation2 + $0x10] sm:$0xff] %vm12140_vm1, %v5837_v2 }
  0xdf   : > { %v668_v3 = vpop.f32.mrf.mxu0 }
  0xe0   : > { %795 = vst.msk [vmem:[#allocation2] sm:$0xff] %vm12140_vm1, %v668_v3  ;;  %v1426_v3 = vlaneseq }
  0xe1   : > { %v5838_v6 = vpop.f32.mrf.mxu0 }
  0xe2   : > { %798 = vst.msk [vmem:[#allocation2 + $0x18] sm:$0xff] %vm12140_vm1, %v5838_v6 }
  0xe3   : > { %v671_v10 = vpop.f32.mrf.mxu0 }
  0xe4   : > { %796 = vst.msk [vmem:[#allocation2 + $0x8] sm:$0xff] %vm12140_vm1, %v671_v10 }
  0xe5   : > { %v5841_v11 = vpop.f32.mrf.mxu0  ;;  %v1236_v12 = vld [vmem:[#allocation2 + $0x10] sm:$0xff] }
  0xe6   : > { %801 = vst.msk [vmem:[#allocation2 + $0x30] sm:$0xff] %vm12140_vm1, %v5841_v11  ;;  %1278 = vperm.xlu1 %6015, %v1236_v12   ;;  %v1826_v11 = vld [vmem:[%s6977_s30] sm:$0xff]  ;;  %v1827_v12 = vld [vmem:[%s6977_s30 + $0x8] sm:$0xff] }
  0xe7   : > { %v684_v13 = vpop.f32.mrf.mxu0  ;;  %v1234_v4 = vld [vmem:[#allocation2] sm:$0xff] }
  0xe8   : > { %799 = vst.msk [vmem:[#allocation2 + $0x20] sm:$0xff] %vm12140_vm1, %v684_v13  ;;  %1268 = vperm.xlu0 %6016, %v1234_v4   ;;  %v1828_v13 = vld [vmem:[%s6977_s30 + $0x10] sm:$0xff]  ;;  %v1829_v4 = vld [vmem:[%s6977_s30 + $0x18] sm:$0xff] }
  0xe9   : > { %v5842_v14 = vpop.f32.mrf.mxu0  ;;  %v1237_v15 = vld [vmem:[#allocation2 + $0x18] sm:$0xff] }
  0xea   : > { %802 = vst.msk [vmem:[#allocation2 + $0x38] sm:$0xff] %vm12140_vm1, %v5842_v14  ;;  %1283 = vperm.xlu1 %6015, %v1237_v15  }
  0xeb   : > { %v687_v16 = vpop.f32.mrf.mxu0  ;;  %v1235_v17 = vld [vmem:[#allocation2 + $0x8] sm:$0xff] }
  0xec   : > { %800 = vst.msk [vmem:[#allocation2 + $0x28] sm:$0xff] %vm12140_vm1, %v687_v16  ;;  %1273 = vperm.xlu0 %6016, %v1235_v17   ;;  %v1427_v16 = vshrl.u32 %v1426_v3, 7  ;;  %v1866_v17 = vunpack.c.2.s8 %v1826_v11 }
  0xed   : > { %v5845_v18 = vpop.f32.mrf.mxu0  ;;  %v1240_v20 = vld [vmem:[#allocation2 + $0x30] sm:$0xff] }
  0xee   : > { %805 = vst.msk [vmem:[#allocation2 + $0x50] sm:$0xff] %vm12140_vm1, %v5845_v18  ;;  %v1867_v18 = vunpack.c.2.s8 %v1827_v12 }
  0xef   : > { %v700_v19 = vpop.f32.mrf.mxu0  ;;  %v1238_v24 = vld [vmem:[#allocation2 + $0x20] sm:$0xff] }
  0xf0   : > { %803 = vst.msk [vmem:[#allocation2 + $0x40] sm:$0xff] %vm12140_vm1, %v700_v19  ;;  %1298 = vperm.xlu0 %6016, %v1240_v20  }
  0xf1   : > { %v5846_v21 = vpop.f32.mrf.mxu0  ;;  %v1241_v22 = vld [vmem:[#allocation2 + $0x38] sm:$0xff] }
  0xf2   : > { %806 = vst.msk [vmem:[#allocation2 + $0x58] sm:$0xff] %vm12140_vm1, %v5846_v21  ;;  %1303 = vperm.xlu1 %6015, %v1241_v22   ;;  %v1868_v21 = vunpack.c.2.s8 %v1828_v13  ;;  %v1869_v22 = vunpack.c.2.s8 %v1829_v4 }
  0xf3   : > { %v703_v23 = vpop.f32.mrf.mxu0  ;;  %v1239_v26 = vld [vmem:[#allocation2 + $0x28] sm:$0xff] }
  0xf4   : > { %804 = vst.msk [vmem:[#allocation2 + $0x48] sm:$0xff] %vm12140_vm1, %v703_v23  ;;  %1288 = vperm.xlu0 %6016, %v1238_v24   ;;  %v1858_v23 = vunpack.c.0.s8 %v1826_v11  ;;  %v1859_v24 = vunpack.c.0.s8 %v1827_v12 }
  0xf5   : > { %v5849_v25 = vpop.f32.mrf.mxu0  ;;  %v1244_v28 = vld [vmem:[#allocation2 + $0x50] sm:$0xff] }
  0xf6   : > { %809 = vst.msk [vmem:[#allocation2 + $0x70] sm:$0xff] %vm12140_vm1, %v5849_v25  ;;  %1293 = vperm.xlu1 %6015, %v1239_v26   ;;  %v1860_v25 = vunpack.c.0.s8 %v1828_v13 }
  0xf7   : > { %v716_v27 = vpop.f32.mrf.mxu0  ;;  %v1242_v32 = vld [vmem:[#allocation2 + $0x40] sm:$0xff] }
  0xf8   : > { %807 = vst.msk [vmem:[#allocation2 + $0x60] sm:$0xff] %vm12140_vm1, %v716_v27  ;;  %1318 = vperm.xlu0 %6016, %v1244_v28   ;;  %v1861_v27 = vunpack.c.0.s8 %v1829_v4  ;;  %v6991_v28 = vsub.s32 0, %v1427_v16 }
  0xf9   : > { %v5850_v29 = vpop.f32.mrf.mxu0  ;;  %v1245_v30 = vld [vmem:[#allocation2 + $0x58] sm:$0xff] }
  0xfa   : > { %810 = vst.msk [vmem:[#allocation2 + $0x78] sm:$0xff] %vm12140_vm1, %v5850_v29  ;;  %1323 = vperm.xlu1 %6015, %v1245_v30   ;;  %v6993_v29 = vcvt.s32.f32 %v1866_v17  ;;  %v6995_v30 = vcvt.s32.f32 %v1867_v18  ;;  %v1836_v17 = vld [vmem:[%s6977_s30 + $0x50] sm:$0xff]  ;;  %v1837_v18 = vld [vmem:[%s6977_s30 + $0x58] sm:$0xff] }
  0xfb   : > { %v719_v31 = vpop.f32.mrf.mxu0  ;;  %v1243_v34 = vld [vmem:[#allocation2 + $0x48] sm:$0xff] }
  0xfc   : > { %808 = vst.msk [vmem:[#allocation2 + $0x68] sm:$0xff] %vm12140_vm1, %v719_v31  ;;  %1308 = vperm.xlu0 %6016, %v1242_v32   ;;  %12264 = vst [vmem:[#allocation9_spill] sm:$0xff] %v6993_v29  ;;  %v6997_v31 = vcvt.s32.f32 %v1868_v21  ;;  %v6999_v32 = vcvt.s32.f32 %v1869_v22  ;;  %vm11726_vm2 = vcmp.gt.f32.partialorder %v6993_v29, 0.0  ;;  %vm11728_vm3 = vcmp.gt.f32.partialorder %v6995_v30, 0.0 }
  0xfd   : > { %v5853_v33 = vpop.f32.mrf.mxu0  ;;  %v1248_v36 = vld [vmem:[#allocation2 + $0x70] sm:$0xff]  ;;  %12265 = vst [vmem:[#allocation10_spill] sm:$0xff] %v6995_v30 }
  0xfe   : > { %813 = vst.msk [vmem:[#allocation2 + $0x90] sm:$0xff] %vm12140_vm1, %v5853_v33  ;;  %1313 = vperm.xlu1 %6015, %v1243_v34   ;;  %12266 = vst [vmem:[#allocation11_spill] sm:$0xff] %v6997_v31  ;;  %v7001_v33 = vcvt.s32.f32 %v1858_v23  ;;  %v1862_v34 = vunpack.c.1.s8 %v1826_v11  ;;  %vm11714_vm4 = vcmp.gt.f32.partialorder %v6997_v31, 0.0  ;;  %vm11727_vm5 = vcmp.gt.f32.partialorder %v6999_v32, 0.0 }
  0xff   : > { %v732_v35 = vpop.f32.mrf.mxu0  ;;  %v1246_v40 = vld [vmem:[#allocation2 + $0x60] sm:$0xff]  ;;  %12267 = vst [vmem:[#allocation12_spill] sm:$0xff] %v6999_v32 }
 0x100   : > { %811 = vst.msk [vmem:[#allocation2 + $0x80] sm:$0xff] %vm12140_vm1, %v732_v35  ;;  %1338 = vperm.xlu0 %6016, %v1248_v36   ;;  %12268 = vst [vmem:[#allocation13_spill] sm:$0xff] %v7001_v33  ;;  %v1830_v35 = vld [vmem:[%s6977_s30 + $0x20] sm:$0xff]  ;;  %v1831_v36 = vld [vmem:[%s6977_s30 + $0x28] sm:$0xff]  ;;  %vm11748_vm6 = vcmp.gt.f32.partialorder %v7001_v33, 0.0 }
 0x101   : > { %v5854_v37 = vpop.f32.mrf.mxu0  ;;  %v1249_v38 = vld [vmem:[#allocation2 + $0x78] sm:$0xff]  ;;  %v1874_v3 = vunpack.c.0.s8 %v1830_v35  ;;  %v1878_v21 = vunpack.c.1.s8 %v1830_v35  ;;  %v1879_v22 = vunpack.c.1.s8 %v1831_v36 }
 0x102   : > { %814 = vst.msk [vmem:[#allocation2 + $0x98] sm:$0xff] %vm12140_vm1, %v5854_v37  ;;  %1343 = vperm.xlu1 %6015, %v1249_v38   ;;  %v7005_v37 = vcvt.s32.f32 %v1859_v24  ;;  %v7007_v38 = vcvt.s32.f32 %v1860_v25 }
 0x103   : > { %v735_v39 = vpop.f32.mrf.mxu0  ;;  %v1247_v42 = vld [vmem:[#allocation2 + $0x68] sm:$0xff] }
 0x104   : > { %812 = vst.msk [vmem:[#allocation2 + $0x88] sm:$0xff] %vm12140_vm1, %v735_v39  ;;  %1328 = vperm.xlu0 %6016, %v1246_v40   ;;  %12269 = vst [vmem:[#allocation14_spill] sm:$0xff] %v7005_v37  ;;  %v1863_v39 = vunpack.c.1.s8 %v1827_v12  ;;  %v1864_v40 = vunpack.c.1.s8 %v1828_v13  ;;  %vm2115_vm7 = vcmp.gt.f32.partialorder %v7005_v37, 0.0  ;;  %vm11729_vm8 = vcmp.gt.f32.partialorder %v7007_v38, 0.0 }
 0x105   : > { %v5857_v41 = vpop.f32.mrf.mxu0  ;;  %v1252_v44 = vld [vmem:[#allocation2 + $0x90] sm:$0xff]  ;;  %12270 = vst [vmem:[#allocation15_spill] sm:$0xff] %v7007_v38 }
 0x106   : > { %817 = vst.msk [vmem:[#allocation2 + $0xb0] sm:$0xff] %vm12140_vm1, %v5857_v41  ;;  %1333 = vperm.xlu1 %6015, %v1247_v42   ;;  %v1832_v41 = vld [vmem:[%s6977_s30 + $0x30] sm:$0xff]  ;;  %v1833_v42 = vld [vmem:[%s6977_s30 + $0x38] sm:$0xff] }
 0x107   : > { %v748_v43 = vpop.f32.mrf.mxu0  ;;  %v1250_v48 = vld [vmem:[#allocation2 + $0x80] sm:$0xff]  ;;  %v1876_v16 = vunpack.c.0.s8 %v1832_v41  ;;  %v1880_v23 = vunpack.c.1.s8 %v1832_v41  ;;  %v1881_v24 = vunpack.c.1.s8 %v1833_v42 }
 0x108   : > { %815 = vst.msk [vmem:[#allocation2 + $0xa0] sm:$0xff] %vm12140_vm1, %v748_v43  ;;  %1358 = vperm.xlu0 %6016, %v1252_v44   ;;  %v7011_v43 = vcvt.s32.f32 %v1861_v27  ;;  %v1865_v44 = vunpack.c.1.s8 %v1829_v4  ;;  %v7049_v27 = vcvt.s32.f32 %v1874_v3  ;;  %v7079_v3 = vld [vmem:[%s6977_s30 + $0x68] sm:$0xff] }
 0x109   : > { %v5858_v45 = vpop.f32.mrf.mxu0  ;;  %v1253_v46 = vld [vmem:[#allocation2 + $0x98] sm:$0xff] }
 0x10a   : > { %818 = vst.msk [vmem:[#allocation2 + $0xb8] sm:$0xff] %vm12140_vm1, %v5858_v45  ;;  %1363 = vperm.xlu1 %6015, %v1253_v46   ;;  %12271 = vst [vmem:[#allocation16_spill] sm:$0xff] %v7011_v43  ;;  %v1870_v45 = vunpack.c.3.s8 %v1826_v11  ;;  %v1871_v46 = vunpack.c.3.s8 %v1827_v12  ;;  %v1834_v11 = vld [vmem:[%s6977_s30 + $0x40] sm:$0xff]  ;;  %v1835_v12 = vld [vmem:[%s6977_s30 + $0x48] sm:$0xff]  ;;  %vm2117_vm9 = vcmp.gt.f32.partialorder %v7011_v43, 0.0 }
 0x10b   : > { %v751_v47 = vpop.f32.mrf.mxu0  ;;  %v1251_v50 = vld [vmem:[#allocation2 + $0x88] sm:$0xff]  ;;  %v1898_v25 = vunpack.c.2.s8 %v1834_v11  ;;  %12288 = vst [vmem:[#allocation33_spill] sm:$0xff] %v7049_v27 }
 0x10c   : > { %816 = vst.msk [vmem:[#allocation2 + $0xa8] sm:$0xff] %vm12140_vm1, %v751_v47  ;;  %1348 = vperm.xlu0 %6016, %v1250_v48   ;;  %v1872_v47 = vunpack.c.3.s8 %v1828_v13  ;;  %v1873_v48 = vunpack.c.3.s8 %v1829_v4 }
 0x10d   : > { %v5861_v49 = vpop.f32.mrf.mxu0  ;;  %v1256_v52 = vld [vmem:[#allocation2 + $0xb0] sm:$0xff] }
 0x10e   : > { %821 = vst.msk [vmem:[#allocation2 + $0xd0] sm:$0xff] %vm12140_vm1, %v5861_v49  ;;  %1353 = vperm.xlu1 %6015, %v1251_v50   ;;  %v1882_v49 = vunpack.c.2.s8 %v1830_v35  ;;  %v1883_v50 = vunpack.c.2.s8 %v1831_v36 }
 0x10f   : > { %v764_v51 = vpop.f32.mrf.mxu0  ;;  %v1254_v56 = vld [vmem:[#allocation2 + $0xa0] sm:$0xff] }
 0x110   : > { %819 = vst.msk [vmem:[#allocation2 + $0xc0] sm:$0xff] %vm12140_vm1, %v764_v51  ;;  %1378 = vperm.xlu0 %6016, %v1256_v52   ;;  %v7013_v51 = vcvt.s32.f32 %v1862_v34  ;;  %v1884_v52 = vunpack.c.2.s8 %v1832_v41  ;;  %v1900_v34 = vunpack.c.2.s8 %v1836_v17 }
 0x111   : > { %v5862_v53 = vpop.f32.mrf.mxu0  ;;  %v1257_v54 = vld [vmem:[#allocation2 + $0xb8] sm:$0xff] }
 0x112   : > { %822 = vst.msk [vmem:[#allocation2 + $0xd8] sm:$0xff] %vm12140_vm1, %v5862_v53  ;;  %1383 = vperm.xlu1 %6015, %v1257_v54   ;;  %12272 = vst [vmem:[#allocation17_spill] sm:$0xff] %v7013_v51  ;;  %v1885_v53 = vunpack.c.2.s8 %v1833_v42  ;;  %v1886_v54 = vunpack.c.3.s8 %v1830_v35  ;;  %v7057_v35 = vcvt.s32.f32 %v1878_v21  ;;  %v1892_v21 = vunpack.c.0.s8 %v1836_v17 }
 0x113   : > { %v767_v55 = vpop.f32.mrf.mxu0  ;;  %v1255_v58 = vld [vmem:[#allocation2 + $0xa8] sm:$0xff]  ;;  %vm11747_vm10 = vcmp.gt.f32.partialorder %v7013_v51, 0.0 }
 0x114   : > { %820 = vst.msk [vmem:[#allocation2 + $0xc8] sm:$0xff] %vm12140_vm1, %v767_v55  ;;  %1368 = vperm.xlu0 %6016, %v1254_v56   ;;  %v7015_v55 = vcvt.s32.f32 %v1863_v39  ;;  %v7017_v56 = vcvt.s32.f32 %v1864_v40  ;;  %v1901_v39 = vunpack.c.2.s8 %v1837_v18  ;;  %v1902_v40 = vunpack.c.3.s8 %v1834_v11  ;;  %12292 = vst [vmem:[#allocation37_spill] sm:$0xff] %v7057_v35 }
 0x115   : > { %v5865_v57 = vpop.f32.mrf.mxu0  ;;  %v1260_v60 = vld [vmem:[#allocation2 + $0xd0] sm:$0xff] }
 0x116   : > { %825 = vst.msk [vmem:[#allocation2 + $0xf0] sm:$0xff] %vm12140_vm1, %v5865_v57  ;;  %1373 = vperm.xlu1 %6015, %v1255_v58   ;;  %12273 = vst [vmem:[#allocation18_spill] sm:$0xff] %v7015_v55  ;;  %v1887_v57 = vunpack.c.3.s8 %v1831_v36  ;;  %v1888_v58 = vunpack.c.3.s8 %v1832_v41  ;;  %v1905_v41 = vunpack.c.3.s8 %v1837_v18  ;;  %vm2119_vm11 = vcmp.gt.f32.partialorder %v7015_v55, 0.0 }
 0x117   : > { %v780_v59 = vpop.f32.mrf.mxu0  ;;  %v1258_v0 = vld [vmem:[#allocation2 + $0xc0] sm:$0xff]  ;;  %v6979_v2 = vpop.f32.mrf.mxu1  ;;  %12274 = vst [vmem:[#allocation19_spill] sm:$0xff] %v7017_v56  ;;  %vm11744_vm12 = vcmp.gt.f32.partialorder %v7017_v56, 0.0 }
 0x118   : > { %823 = vst.msk [vmem:[#allocation2 + $0xe0] sm:$0xff] %vm12140_vm1, %v780_v59  ;;  %1398 = vperm.xlu0 %6016, %v1260_v60   ;;  %v7019_v59 = vcvt.s32.f32 %v1865_v44  ;;  %v7021_v60 = vcvt.s32.f32 %v1870_v45  ;;  %v7041_v13 = vcvt.s32.f32 %v1887_v57  ;;  %v7043_v4 = vcvt.s32.f32 %v1888_v58 }
 0x119   : > { %v5866_v61 = vpop.f32.mrf.mxu0  ;;  %v1261_v62 = vld [vmem:[#allocation2 + $0xd8] sm:$0xff]  ;;  %v6981_v6 = vpop.f32.mrf.mxu1  ;;  %v7053_v45 = vcvt.s32.f32 %v1876_v16  ;;  %v7073_v57 = vcvt.s32.f32 %v1902_v40  ;;  %v1890_v58 = vunpack.c.0.s8 %v1834_v11  ;;  %v1897_v40 = vunpack.c.1.s8 %v1837_v18 }
 0x11a   : > { %826 = vst.msk [vmem:[#allocation2 + $0xf8] sm:$0xff] %vm12140_vm1, %v5866_v61  ;;  %1403 = vperm.xlu1 %6015, %v1261_v62   ;;  %12275 = vst [vmem:[#allocation20_spill] sm:$0xff] %v7019_v59  ;;  %v7023_v61 = vcvt.s32.f32 %v1871_v46  ;;  %v1889_v62 = vunpack.c.3.s8 %v1833_v42  ;;  %v1903_v46 = vunpack.c.3.s8 %v1835_v12  ;;  %vm11763_vm13 = vcmp.gt.f32.partialorder %v7019_v59, 0.0 }
 0x11b   : > { %v783_v63 = vpop.f32.mrf.mxu0  ;;  %v1259_v1 = vld [vmem:[#allocation2 + $0xc8] sm:$0xff]  ;;  %v1190_v14 = vpop.f32.mrf.mxu1  ;;  %12276 = vst [vmem:[#allocation21_spill] sm:$0xff] %v7021_v60  ;;  %12285 = vst [vmem:[#allocation30_spill] sm:$0xff] %v7041_v13  ;;  %vm11746_vm14 = vcmp.gt.f32.partialorder %v7021_v60, 0.0 }
 0x11c   : > { %824 = vst.msk [vmem:[#allocation2 + $0xe8] sm:$0xff] %vm12140_vm1, %v783_v63  ;;  %1388 = vperm.xlu0 %6016, %v1258_v0   ;;  %12277 = vst [vmem:[#allocation22_spill] sm:$0xff] %v7023_v61  ;;  %v7025_v63 = vcvt.s32.f32 %v1872_v47  ;;  %v7027_v0 = vcvt.s32.f32 %v1873_v48  ;;  %v1875_v14 = vunpack.c.0.s8 %v1831_v36  ;;  %v1904_v47 = vunpack.c.3.s8 %v1836_v17 }
 0x11d   : > { %v1264_v5 = vld [vmem:[#allocation2 + $0xf0] sm:$0xff]  ;;  %v6983_v10 = vpop.f32.mrf.mxu0  ;;  %v1191_v19 = vpop.f32.mrf.mxu1  ;;  %12286 = vst [vmem:[#allocation31_spill] sm:$0xff] %v7043_v4  ;;  %12290 = vst [vmem:[#allocation35_spill] sm:$0xff] %v7053_v45  ;;  %v7059_v36 = vcvt.s32.f32 %v1879_v22  ;;  %vm11762_vm15 = vcmp.gt.f32.partialorder %v7023_v61, 0.0 }
 0x11e   : > { %1393 = vperm.xlu1 %6015, %v1259_v1   ;;  %12278 = vst [vmem:[#allocation23_spill] sm:$0xff] %v7025_v63  ;;  %12279 = vst [vmem:[#allocation24_spill] sm:$0xff] %v7027_v0  ;;  %v7029_v1 = vcvt.s32.f32 %v1882_v49  ;;  %v7047_v19 = vcvt.s32.f32 %v1889_v62  ;;  %v7051_v44 = vcvt.s32.f32 %v1875_v14  ;;  %v7063_v49 = vcvt.s32.f32 %v1881_v24  ;;  %v7076_v62 = vld [vmem:[%s6977_s30 + $0x60] sm:$0xff]  ;;  %v1840_v22 = vld [vmem:[%s6977_s30 + $0x70] sm:$0xff] }
 0x11f   : > { %v1262_v8 = vld [vmem:[#allocation2 + $0xe0] sm:$0xff]  ;;  %v6989_v15 = vpop.f32.mrf.mxu0  ;;  %12293 = vst [vmem:[#allocation38_spill] sm:$0xff] %v7059_v36  ;;  %12300 = vst [vmem:[#allocation45_spill] sm:$0xff] %v7073_v57  ;;  %v7081_v14 = vcvt.s32.f32 %v1903_v46  ;;  %v7083_v16 = vcvt.s32.f32 %v1904_v47  ;;  %v7087_v24 = vcvt.s32.f32 %v1905_v41  ;;  %v1914_v57 = vunpack.c.2.s8 %v7076_v62 }
 0x120   : > { %1418 = vperm.xlu0 %6016, %v1264_v5   ;;  %12280 = vst [vmem:[#allocation25_spill] sm:$0xff] %v7029_v1  ;;  %v7031_v5 = vcvt.s32.f32 %v1883_v50  ;;  %12287 = vst [vmem:[#allocation32_spill] sm:$0xff] %v7047_v19  ;;  %v7065_v50 = vcvt.s32.f32 %v1898_v25  ;;  %v1893_v25 = vunpack.c.0.s8 %v1837_v18  ;;  %v1916_v46 = vunpack.c.2.s8 %v1840_v22 }
 0x121   : > { %v1265_v7 = vld [vmem:[#allocation2 + $0xf8] sm:$0xff]  ;;  %v1231_v20 = vpop.f32.mrf.mxu0  ;;  %12289 = vst [vmem:[#allocation34_spill] sm:$0xff] %v7051_v44  ;;  %12295 = vst [vmem:[#allocation40_spill] sm:$0xff] %v7063_v49  ;;  %v1919_v41 = vunpack.c.3.s8 %v7079_v3  ;;  %vm11757_vm0 = vcmp.gt.f32.partialorder %v7025_v63, 0.0 }
 0x122   : > { %1423 = vperm.xlu1 %6015, %v1265_v7   ;;  %12281 = vst [vmem:[#allocation26_spill] sm:$0xff] %v7031_v5  ;;  %v7033_v7 = vcvt.s32.f32 %v1884_v52  ;;  %v1877_v20 = vunpack.c.0.s8 %v1833_v42  ;;  %v7061_v42 = vcvt.s32.f32 %v1880_v23  ;;  %12296 = vst [vmem:[#allocation41_spill] sm:$0xff] %v7065_v50  ;;  %v1841_v23 = vld [vmem:[%s6977_s30 + $0x78] sm:$0xff] }
 0x123   : > { %v1263_v9 = vld [vmem:[#allocation2 + $0xe8] sm:$0xff]  ;;  %v1232_v26 = vpop.f32.mrf.mxu0  ;;  %12301 = vst [vmem:[#allocation46_spill] sm:$0xff] %v7081_v14  ;;  %12302 = vst [vmem:[#allocation47_spill] sm:$0xff] %v7083_v16  ;;  %v1917_v47 = vunpack.c.2.s8 %v1841_v23  ;;  %v1918_v16 = vunpack.c.3.s8 %v7076_v62 }
 0x124   : > { %1408 = vperm.xlu0 %6016, %v1262_v8   ;;  %12282 = vst [vmem:[#allocation27_spill] sm:$0xff] %v7033_v7  ;;  %v7035_v8 = vcvt.s32.f32 %v1885_v53  ;;  %v1899_v26 = vunpack.c.2.s8 %v1835_v12  ;;  %v7055_v48 = vcvt.s32.f32 %v1877_v20  ;;  %12294 = vst [vmem:[#allocation39_spill] sm:$0xff] %v7061_v42  ;;  %v7069_v53 = vcvt.s32.f32 %v1900_v34 }
 0x125   : > { %v1891_v20 = vunpack.c.0.s8 %v1835_v12  ;;  %12303 = vst [vmem:[#allocation48_spill] sm:$0xff] %v7087_v24  ;;  %v1895_v34 = vunpack.c.1.s8 %v1835_v12  ;;  %v7099_v12 = vcvt.s32.f32 %v1893_v25  ;;  %v7107_v24 = vcvt.s32.f32 %v1897_v40 }
 0x126   : > { %1413 = vperm.xlu1 %6015, %v1263_v9   ;;  %12283 = vst [vmem:[#allocation28_spill] sm:$0xff] %v7035_v8  ;;  %v7037_v9 = vcvt.s32.f32 %v1886_v54  ;;  %12291 = vst [vmem:[#allocation36_spill] sm:$0xff] %v7055_v48  ;;  %v7067_v52 = vcvt.s32.f32 %v1899_v26  ;;  %v7071_v54 = vcvt.s32.f32 %v1901_v39  ;;  %v1894_v26 = vunpack.c.1.s8 %v1834_v11 }
 0x127   : > { %12298 = vst [vmem:[#allocation43_spill] sm:$0xff] %v7069_v53  ;;  %v1896_v39 = vunpack.c.1.s8 %v1836_v17  ;;  %v7091_v53 = vcvt.s32.f32 %v1890_v58  ;;  %v7094_v14 = vcvt.s32.f32 %v1891_v20  ;;  %v1920_v11 = vunpack.c.3.s8 %v1840_v22  ;;  %12307 = vst [vmem:[#allocation52_spill] sm:$0xff] %v7099_v12 }
 0x128   : > { %12284 = vst [vmem:[#allocation29_spill] sm:$0xff] %v7037_v9  ;;  %12297 = vst [vmem:[#allocation42_spill] sm:$0xff] %v7067_v52  ;;  %v7096_v52 = vcvt.s32.f32 %v1892_v21  ;;  %v7101_v17 = vcvt.s32.f32 %v1894_v26  ;;  %v7103_v18 = vcvt.s32.f32 %v1895_v34  ;;  %v1921_v58 = vunpack.c.3.s8 %v1841_v23 }
 0x129   : > { %12299 = vst [vmem:[#allocation44_spill] sm:$0xff] %v7071_v54  ;;  %v1915_v54 = vunpack.c.2.s8 %v7079_v3  ;;  %12304 = vst [vmem:[#allocation49_spill] sm:$0xff] %v7091_v53  ;;  %v7105_v53 = vcvt.s32.f32 %v1896_v39  ;;  %v7109_v20 = vcvt.s32.f32 %v1914_v57  ;;  %v7115_v25 = vrot.slane %v6979_v2, %v6991_v28 }
 0x12a   : > { %12305 = vst [vmem:[#allocation50_spill] sm:$0xff] %v7094_v14  ;;  %12306 = vst [vmem:[#allocation51_spill] sm:$0xff] %v7096_v52  ;;  %v7117_v26 = vcvt.s32.f32 %v1916_v46  ;;  %v7121_v34 = vcvt.s32.f32 %v1918_v16  ;;  %v7123_v39 = vcvt.s32.f32 %v1919_v41  ;;  %v7125_v40 = vcvt.s32.f32 %v1920_v11  ;;  %v1844_v16 = vld [vmem:[%s6977_s30 + $0x90] sm:$0xff] }
 0x12b   : > { %12308 = vst [vmem:[#allocation53_spill] sm:$0xff] %v7101_v17  ;;  %12309 = vst [vmem:[#allocation54_spill] sm:$0xff] %v7103_v18  ;;  %v7111_v21 = vcvt.s32.f32 %v1915_v54  ;;  %v7119_v17 = vcvt.s32.f32 %v1917_v47  ;;  %v1906_v57 = vunpack.c.0.s8 %v7076_v62  ;;  %v1907_v54 = vunpack.c.0.s8 %v7079_v3 }
 0x12c   : > { %12310 = vst [vmem:[#allocation55_spill] sm:$0xff] %v7105_v53  ;;  %12311 = vst [vmem:[#allocation56_spill] sm:$0xff] %v7107_v24  ;;  %v7133_v2 = vrot.slane %v6981_v6, %v6991_v28  ;;  %v7135_v46 = vcvt.s32.f32 %v1921_v58  ;;  %v1908_v47 = vunpack.c.0.s8 %v1840_v22  ;;  %v7141_v41 = vrot.slane %v6983_v10, %v6991_v28 }
 0x12d   : > { %12312 = vst [vmem:[#allocation57_spill] sm:$0xff] %v7109_v20  ;;  %12313 = vst [vmem:[#allocation58_spill] sm:$0xff] %v7111_v21  ;;  %v1842_v21 = vld [vmem:[%s6977_s30 + $0x80] sm:$0xff]  ;;  %v1843_v20 = vld [vmem:[%s6977_s30 + $0x88] sm:$0xff]  ;;  %v7145_v11 = vrot.slane %v6989_v15, %v6991_v28  ;;  %v1912_v6 = vunpack.c.1.s8 %v1840_v22  ;;  %v7149_v24 = vcvt.s32.f32 %v1906_v57  ;;  %v7151_v53 = vcvt.s32.f32 %v1907_v54 }
 0x12e   : > { %12314 = vst [vmem:[#allocation59_spill] sm:$0xff] %v7117_v26  ;;  %12315 = vst [vmem:[#allocation60_spill] sm:$0xff] %v7119_v17  ;;  %v1909_v17 = vunpack.c.0.s8 %v1841_v23  ;;  %v1913_v26 = vunpack.c.1.s8 %v1841_v23  ;;  %v1930_v58 = vunpack.c.2.s8 %v1842_v21  ;;  %v1932_v18 = vunpack.c.2.s8 %v1844_v16 }
 0x12f   : > { %12316 = vst [vmem:[#allocation61_spill] sm:$0xff] %v7121_v34  ;;  %12317 = vst [vmem:[#allocation62_spill] sm:$0xff] %v7123_v39  ;;  %v1845_v34 = vld [vmem:[%s6977_s30 + $0x98] sm:$0xff]  ;;  %v1911_v39 = vunpack.c.1.s8 %v7079_v3  ;;  %v7153_v10 = vcvt.s32.f32 %v1908_v47  ;;  %v1934_v15 = vunpack.c.3.s8 %v1842_v21  ;;  %v1935_v28 = vunpack.c.3.s8 %v1843_v20 }
 0x130   : > { %12318 = vst [vmem:[#allocation63_spill] sm:$0xff] %v7125_v40  ;;  %12319 = vst [vmem:[#allocation64_spill] sm:$0xff] %v7135_v46  ;;  %v1910_v40 = vunpack.c.1.s8 %v7076_v62  ;;  %v1931_v46 = vunpack.c.2.s8 %v1843_v20  ;;  %v1933_v12 = vunpack.c.2.s8 %v1845_v34  ;;  %v7155_v52 = vcvt.s32.f32 %v1909_v17 }
 0x131   : > { %12320 = vst [vmem:[#allocation65_spill] sm:$0xff] %v7149_v24  ;;  %12321 = vst [vmem:[#allocation66_spill] sm:$0xff] %v7151_v53  ;;  %v7159_v3 = vcvt.s32.f32 %v1911_v39  ;;  %v1936_v22 = vunpack.c.3.s8 %v1844_v16  ;;  %v1937_v23 = vunpack.c.3.s8 %v1845_v34  ;;  %v7161_v57 = vcvt.s32.f32 %v1912_v6  ;;  %v7174_v39 = vld [vmem:[%s6977_s30 + $0xa0] sm:$0xff] }
 0x132   : > { %12322 = vst [vmem:[#allocation67_spill] sm:$0xff] %v7153_v10  ;;  %12323 = vst [vmem:[#allocation68_spill] sm:$0xff] %v7155_v52  ;;  %v7157_v62 = vcvt.s32.f32 %v1910_v40  ;;  %v7163_v54 = vcvt.s32.f32 %v1913_v26  ;;  %v7165_v47 = vcvt.s32.f32 %v1930_v58  ;;  %v7167_v10 = vcvt.s32.f32 %v1931_v46  ;;  %v1848_v58 = vld [vmem:[%s6977_s30 + $0xb0] sm:$0xff] }
 0x133   : > { %12325 = vst [vmem:[#allocation70_spill] sm:$0xff] %v7159_v3  ;;  %12326 = vst [vmem:[#allocation71_spill] sm:$0xff] %v7161_v57  ;;  %v7169_v17 = vcvt.s32.f32 %v1932_v18  ;;  %v7171_v52 = vcvt.s32.f32 %v1933_v12  ;;  %v1922_v40 = vunpack.c.0.s8 %v1842_v21  ;;  %v7177_v3 = vld [vmem:[%s6977_s30 + $0xa8] sm:$0xff]  ;;  %v7179_v53 = vcvt.s32.f32 %v1934_v15 }
 0x134   : > { %12324 = vst [vmem:[#allocation69_spill] sm:$0xff] %v7157_v62  ;;  %12327 = vst [vmem:[#allocation72_spill] sm:$0xff] %v7163_v54  ;;  %v1923_v62 = vunpack.c.0.s8 %v1843_v20  ;;  %v7181_v6 = vcvt.s32.f32 %v1935_v28  ;;  %v1924_v26 = vunpack.c.0.s8 %v1844_v16  ;;  %v1925_v54 = vunpack.c.0.s8 %v1845_v34 }
 0x135   : > { %12328 = vst [vmem:[#allocation73_spill] sm:$0xff] %v7165_v47  ;;  %12329 = vst [vmem:[#allocation74_spill] sm:$0xff] %v7167_v10  ;;  %v1849_v47 = vld [vmem:[%s6977_s30 + $0xb8] sm:$0xff]  ;;  %v7185_v46 = vcvt.s32.f32 %v1936_v22  ;;  %v7187_v18 = vcvt.s32.f32 %v1937_v23  ;;  %v1926_v12 = vunpack.c.1.s8 %v1842_v21  ;;  %v1929_v10 = vunpack.c.1.s8 %v1845_v34 }
 0x136   : > { %12330 = vst [vmem:[#allocation75_spill] sm:$0xff] %v7169_v17  ;;  %12331 = vst [vmem:[#allocation76_spill] sm:$0xff] %v7171_v52  ;;  %v1927_v52 = vunpack.c.1.s8 %v1843_v20  ;;  %v1928_v17 = vunpack.c.1.s8 %v1844_v16  ;;  %v1946_v57 = vunpack.c.2.s8 %v7174_v39  ;;  %v1947_v24 = vunpack.c.2.s8 %v7177_v3 }
 0x137   : > { %12332 = vst [vmem:[#allocation77_spill] sm:$0xff] %v7179_v53  ;;  %12333 = vst [vmem:[#allocation78_spill] sm:$0xff] %v7181_v6  ;;  %v7191_v15 = vcvt.s32.f32 %v1922_v40  ;;  %v7193_v28 = vcvt.s32.f32 %v1923_v62  ;;  %v1948_v6 = vunpack.c.2.s8 %v1848_v58  ;;  %v1949_v53 = vunpack.c.2.s8 %v1849_v47 }
 0x138   : > { %12334 = vst [vmem:[#allocation79_spill] sm:$0xff] %v7185_v46  ;;  %12335 = vst [vmem:[#allocation80_spill] sm:$0xff] %v7187_v18  ;;  %v7195_v14 = vcvt.s32.f32 %v1924_v26  ;;  %v7197_v22 = vcvt.s32.f32 %v1925_v54  ;;  %v1950_v20 = vunpack.c.3.s8 %v7174_v39  ;;  %v1951_v21 = vunpack.c.3.s8 %v7177_v3 }
 0x139   : > { %12336 = vst [vmem:[#allocation81_spill] sm:$0xff] %v7191_v15  ;;  %12337 = vst [vmem:[#allocation82_spill] sm:$0xff] %v7193_v28  ;;  %v7201_v34 = vcvt.s32.f32 %v1926_v12  ;;  %v7203_v16 = vcvt.s32.f32 %v1927_v52  ;;  %v1952_v23 = vunpack.c.3.s8 %v1848_v58  ;;  %v1953_v62 = vunpack.c.3.s8 %v1849_v47 }
 0x13a   : > { %12338 = vst [vmem:[#allocation83_spill] sm:$0xff] %v7195_v14  ;;  %12339 = vst [vmem:[#allocation84_spill] sm:$0xff] %v7197_v22  ;;  %v7205_v40 = vcvt.s32.f32 %v1928_v17  ;;  %v7207_v26 = vcvt.s32.f32 %v1929_v10  ;;  %v7209_v14 = vcvt.s32.f32 %v1946_v57  ;;  %v7211_v54 = vcvt.s32.f32 %v1947_v24  ;;  %v7226_v57 = vld [vmem:[%s6977_s30 + $0xd0] sm:$0xff]  ;;  %v7229_v24 = vld [vmem:[%s6977_s30 + $0xd8] sm:$0xff] }
 0x13b   : > { %12340 = vst [vmem:[#allocation85_spill] sm:$0xff] %v7201_v34  ;;  %12341 = vst [vmem:[#allocation86_spill] sm:$0xff] %v7203_v16  ;;  %v7213_v22 = vcvt.s32.f32 %v1948_v6  ;;  %v7215_v28 = vcvt.s32.f32 %v1949_v53  ;;  %v1938_v12 = vunpack.c.0.s8 %v7174_v39  ;;  %v1939_v52 = vunpack.c.0.s8 %v7177_v3  ;;  %v1850_v16 = vld [vmem:[%s6977_s30 + $0xc0] sm:$0xff]  ;;  %v1851_v34 = vld [vmem:[%s6977_s30 + $0xc8] sm:$0xff] }
 0x13c   : > { %12342 = vst [vmem:[#allocation87_spill] sm:$0xff] %v7205_v40  ;;  %12343 = vst [vmem:[#allocation88_spill] sm:$0xff] %v7207_v26  ;;  %v7221_v15 = vcvt.s32.f32 %v1950_v20  ;;  %v7223_v17 = vcvt.s32.f32 %v1951_v21  ;;  %v1940_v10 = vunpack.c.0.s8 %v1848_v58  ;;  %v1941_v26 = vunpack.c.0.s8 %v1849_v47 }
 0x13d   : > { %12344 = vst [vmem:[#allocation89_spill] sm:$0xff] %v7209_v14  ;;  %12345 = vst [vmem:[#allocation90_spill] sm:$0xff] %v7211_v54  ;;  %v7231_v6 = vcvt.s32.f32 %v1952_v23  ;;  %v7233_v53 = vcvt.s32.f32 %v1953_v62  ;;  %v1944_v54 = vunpack.c.1.s8 %v1848_v58  ;;  %v1945_v14 = vunpack.c.1.s8 %v1849_v47 }
 0x13e   : > { %12346 = vst [vmem:[#allocation91_spill] sm:$0xff] %v7213_v22  ;;  %12347 = vst [vmem:[#allocation92_spill] sm:$0xff] %v7215_v28  ;;  %v1942_v28 = vunpack.c.1.s8 %v7174_v39  ;;  %v1943_v22 = vunpack.c.1.s8 %v7177_v3  ;;  %v1962_v20 = vunpack.c.2.s8 %v1850_v16  ;;  %v7237_v21 = vcvt.s32.f32 %v1938_v12 }
 0x13f   : > { %12348 = vst [vmem:[#allocation93_spill] sm:$0xff] %v7221_v15  ;;  %12349 = vst [vmem:[#allocation94_spill] sm:$0xff] %v7223_v17  ;;  %v1963_v15 = vunpack.c.2.s8 %v1851_v34  ;;  %v7239_v17 = vcvt.s32.f32 %v1939_v52  ;;  %v1964_v40 = vunpack.c.2.s8 %v7226_v57  ;;  %v1965_v18 = vunpack.c.2.s8 %v7229_v24 }
 0x140   : > { %12350 = vst [vmem:[#allocation95_spill] sm:$0xff] %v7226_v57  ;;  %12351 = vst [vmem:[#allocation96_spill] sm:$0xff] %v7229_v24  ;;  %v7245_v23 = vcvt.s32.f32 %v1940_v10  ;;  %v7247_v39 = vcvt.s32.f32 %v1941_v26  ;;  %v1966_v3 = vunpack.c.3.s8 %v1850_v16  ;;  %v1967_v47 = vunpack.c.3.s8 %v1851_v34 }
 0x141   : > { %12352 = vst [vmem:[#allocation97_spill] sm:$0xff] %v7231_v6  ;;  %12353 = vst [vmem:[#allocation98_spill] sm:$0xff] %v7233_v53  ;;  %v7251_v58 = vcvt.s32.f32 %v1942_v28  ;;  %v7253_v62 = vcvt.s32.f32 %v1943_v22  ;;  %v1968_v12 = vunpack.c.3.s8 %v7226_v57  ;;  %v1969_v52 = vunpack.c.3.s8 %v7229_v24 }
 0x142   : > { %12354 = vst [vmem:[#allocation99_spill] sm:$0xff] %v7237_v21  ;;  %12355 = vst [vmem:[#allocation100_spill] sm:$0xff] %v7239_v17  ;;  %v7257_v17 = vcvt.s32.f32 %v1944_v54  ;;  %v7259_v10 = vcvt.s32.f32 %v1945_v14  ;;  %v7261_v26 = vcvt.s32.f32 %v1962_v20  ;;  %v7267_v21 = vcvt.s32.f32 %v1965_v18 }
 0x143   : > { %12356 = vst [vmem:[#allocation101_spill] sm:$0xff] %v7245_v23  ;;  %12357 = vst [vmem:[#allocation102_spill] sm:$0xff] %v7247_v39  ;;  %v7263_v39 = vcvt.s32.f32 %v1963_v15  ;;  %v7265_v23 = vcvt.s32.f32 %v1964_v40  ;;  %v1954_v28 = vunpack.c.0.s8 %v1850_v16  ;;  %v7272_v53 = vcvt.s32.f32 %v1967_v47 }
 0x144   : > { %12358 = vst [vmem:[#allocation103_spill] sm:$0xff] %v7251_v58  ;;  %12359 = vst [vmem:[#allocation104_spill] sm:$0xff] %v7253_v62  ;;  %v1955_v58 = vunpack.c.0.s8 %v1851_v34  ;;  %v7270_v62 = vcvt.s32.f32 %v1966_v3  ;;  %v7274_v54 = vcvt.s32.f32 %v1968_v12  ;;  %v7276_v14 = vcvt.s32.f32 %v1969_v52 }
 0x145   : > { %12360 = vst [vmem:[#allocation105_spill] sm:$0xff] %v7257_v17  ;;  %12361 = vst [vmem:[#allocation106_spill] sm:$0xff] %v7259_v10  ;;  %v7287_v47 = vcvt.s32.f32 %v1954_v28 }
 0x146   : > { %12362 = vst [vmem:[#allocation107_spill] sm:$0xff] %v7261_v26  ;;  %12363 = vst [vmem:[#allocation108_spill] sm:$0xff] %v7263_v39  ;;  %v7289_v12 = vcvt.s32.f32 %v1955_v58 }
 0x147   : > { %12364 = vst [vmem:[#allocation109_spill] sm:$0xff] %v7265_v23  ;;  %12365 = vst [vmem:[#allocation110_spill] sm:$0xff] %v7267_v21 }
 0x148   : > { %12366 = vst [vmem:[#allocation111_spill] sm:$0xff] %v7270_v62  ;;  %12367 = vst [vmem:[#allocation112_spill] sm:$0xff] %v7272_v53 }
 0x149   : > { %12368 = vst [vmem:[#allocation113_spill] sm:$0xff] %v7274_v54  ;;  %12369 = vst [vmem:[#allocation114_spill] sm:$0xff] %v7276_v14 }
 0x14a   : > { %12370 = vst [vmem:[#allocation115_spill] sm:$0xff] %v7287_v47  ;;  %12371 = vst [vmem:[#allocation116_spill] sm:$0xff] %v7289_v12 }
 0x161   : > { %v1279_v22 = vpop.permute.xlu1 %1278 }
 0x162   : > { %v1450_v15 = vadd.f32 %v7115_v25, %v1279_v22  ;;  %v1451_v40 = vadd.f32 %v7133_v2, %v1279_v22  ;;  %v1452_v18 = vadd.f32 %v7141_v41, %v1279_v22  ;;  %v1453_v16 = vadd.f32 %v7145_v11, %v1279_v22 }
 0x163   : > { %v1269_v34 = vpop.permute.xlu0 %1268 }
 0x164   : > { %v1442_v52 = vadd.f32 %v7115_v25, %v1269_v34  ;;  %v1443_v14 = vadd.f32 %v7133_v2, %v1269_v34  ;;  %v1578_v22 = vmul.f32 0.2, %v1450_v15  ;;  %v1579_v54 = vmul.f32 0.2, %v1451_v40 }
 0x165   : > { %v7293_v53 = vpop.permute.xlu1 %1283  ;;  %v1580_v62 = vmul.f32 0.2, %v1452_v18  ;;  %v1581_v21 = vmul.f32 0.2, %v1453_v16  ;;  %v1444_v23 = vadd.f32 %v7141_v41, %v1269_v34  ;;  %v1445_v20 = vadd.f32 %v7145_v11, %v1269_v34 }
 0x166   : > { %v7299_v28 = vadd.f32 %v7115_v25, %v7293_v53  ;;  %v7303_v58 = vadd.f32 %v7133_v2, %v7293_v53  ;;  %v1706_v3 = vmax.f32 %v1450_v15, %v1578_v22  ;;  %v1707_v12 = vmax.f32 %v1451_v40, %v1579_v54 }
 0x167   : > { %v1274_v47 = vpop.permute.xlu0 %1273  ;;  %v1708_v24 = vmax.f32 %v1452_v18, %v1580_v62  ;;  %v1709_v57 = vmax.f32 %v1453_v16, %v1581_v21  ;;  %v1570_v39 = vmul.f32 0.2, %v1442_v52  ;;  %v1571_v26 = vmul.f32 0.2, %v1443_v14 }
 0x168   : > { %v1446_v34 = vadd.f32 %v7115_v25, %v1274_v47  ;;  %v1447_v10 = vadd.f32 %v7133_v2, %v1274_v47  ;;  %v7311_v17 = vsel %vm11726_vm2, %v1706_v3, -1e+30  ;;  %v7315_v54 = vsel %vm11728_vm3, %v1707_v12, -1e+30 }
 0x169   : > { %12372 = vst [vmem:[#allocation117_spill] sm:$0xff] %v7311_v17  ;;  %12373 = vst [vmem:[#allocation118_spill] sm:$0xff] %v7315_v54  ;;  %v7321_v21 = vsel %vm11714_vm4, %v1708_v24, -1e+30  ;;  %v7325_v62 = vsel %vm11727_vm5, %v1709_v57, -1e+30  ;;  %v2412_v15 = vmax.f32 %v7311_v17, %v7315_v54  ;;  %v1698_v16 = vmax.f32 %v1442_v52, %v1570_v39 }
 0x16a   : > { %12374 = vst [vmem:[#allocation119_spill] sm:$0xff] %v7321_v21  ;;  %12375 = vst [vmem:[#allocation120_spill] sm:$0xff] %v7325_v62  ;;  %v1572_v40 = vmul.f32 0.2, %v1444_v23  ;;  %v1573_v18 = vmul.f32 0.2, %v1445_v20  ;;  %v1699_v3 = vmax.f32 %v1443_v14, %v1571_v26  ;;  %v1448_v12 = vadd.f32 %v7141_v41, %v1274_v47 }
 0x16b   : > { %v7330_v22 = vpop.permute.xlu0 %1298  ;;  %v2413_v29 = vmax.f32 %v2412_v15, %v7321_v21  ;;  %v1449_v24 = vadd.f32 %v7145_v11, %v1274_v47  ;;  %v1574_v30 = vmul.f32 0.2, %v1446_v34  ;;  %v7344_v26 = vsel %vm11748_vm6, %v1698_v16, -1e+30 }
 0x16c   : > { %v1700_v31 = vmax.f32 %v1444_v23, %v1572_v40  ;;  %v7336_v57 = vadd.f32 %v7115_v25, %v7330_v22  ;;  %v7340_v32 = vadd.f32 %v7133_v2, %v7330_v22  ;;  %v1701_v39 = vmax.f32 %v1445_v20, %v1573_v18  ;;  %12376 = vst [vmem:[#allocation121_spill] sm:$0xff] %v7344_v26 }
 0x16d   : > { %v7347_v14 = vpop.permute.xlu1 %1303  ;;  %v2414_v23 = vmax.f32 %v2413_v29, %v7325_v62  ;;  %v7352_v47 = vsel %vm2115_vm7, %v1699_v3, -1e+30  ;;  %v1575_v15 = vmul.f32 0.2, %v1447_v10  ;;  %vm11761_vm4 = vcmp.gt.f32.partialorder %v7027_v0, 0.0 }
 0x16e   : > { %12377 = vst [vmem:[#allocation122_spill] sm:$0xff] %v7352_v47  ;;  %v7356_v52 = vsel %vm11729_vm8, %v1700_v31, -1e+30  ;;  %v7361_v20 = vadd.f32 %v7115_v25, %v7347_v14  ;;  %v7365_v40 = vadd.f32 %v7133_v2, %v7347_v14  ;;  %v7369_v29 = vsel %vm2117_vm9, %v1701_v39, -1e+30 }
 0x16f   : > { %12378 = vst [vmem:[#allocation123_spill] sm:$0xff] %v7356_v52  ;;  %12379 = vst [vmem:[#allocation124_spill] sm:$0xff] %v7369_v29  ;;  %v2402_v18 = vmax.f32 %v7344_v26, %v7352_v47  ;;  %v7375_v31 = vpop.permute.xlu0 %1288  ;;  %2415 = vmax.xlane.f32.xlu0 %v2414_v23  ;;  %v1576_v16 = vmul.f32 0.2, %v1448_v12  ;;  %v1577_v3 = vmul.f32 0.2, %v1449_v24  ;;  %v1702_v38 = vmax.f32 %v1446_v34, %v1574_v30 }
 0x170   : > { %v1703_v33 = vmax.f32 %v1447_v10, %v1575_v15  ;;  %v7379_v37 = vadd.f32 %v7115_v25, %v7375_v31  ;;  %v7383_v39 = vadd.f32 %v7133_v2, %v7375_v31  ;;  %v1456_v62 = vadd.f32 %v7141_v41, %v7293_v53 }
 0x171   : > { %v2403_v43 = vmax.f32 %v2402_v18, %v7356_v52  ;;  %v7388_v21 = vpop.permute.xlu1 %1293  ;;  %v1704_v23 = vmax.f32 %v1448_v12, %v1576_v16  ;;  %v1705_v54 = vmax.f32 %v1449_v24, %v1577_v3  ;;  %v7392_v30 = vsel %vm11747_vm10, %v1702_v38, -1e+30 }
 0x172   : > { %12380 = vst [vmem:[#allocation125_spill] sm:$0xff] %v7392_v30  ;;  %v7396_v10 = vsel %vm2119_vm11, %v1703_v33, -1e+30  ;;  %v7400_v34 = vadd.f32 %v7115_v25, %v7388_v21  ;;  %v7404_v15 = vadd.f32 %v7133_v2, %v7388_v21  ;;  %vm11771_vm2 = vcmp.gt.f32.partialorder %v7029_v1, 0.0 }
 0x173   : > { %12381 = vst [vmem:[#allocation126_spill] sm:$0xff] %v7396_v10  ;;  %v2404_v18 = vmax.f32 %v2403_v43, %v7369_v29  ;;  %v2407_v12 = vmax.f32 %v7392_v30, %v7396_v10  ;;  %vm11779_vm5 = vcmp.gt.f32.partialorder %v7031_v5, 0.0  ;;  %v7411_v38 = vpop.permute.xlu0 %1318  ;;  %v7415_v33 = vsel %vm11744_vm12, %v1704_v23, -1e+30 }
 0x174   : > { %12382 = vst [vmem:[#allocation127_spill] sm:$0xff] %v7415_v33  ;;  %v7419_v24 = vsel %vm11763_vm13, %v1705_v54, -1e+30  ;;  %v1457_v43 = vadd.f32 %v7145_v11, %v7293_v53  ;;  %v1582_v16 = vmul.f32 0.2, %v7299_v28  ;;  %vm11770_vm3 = vcmp.gt.f32.partialorder %v7033_v7, 0.0 }
 0x175   : > { %12383 = vst [vmem:[#allocation128_spill] sm:$0xff] %v7419_v24  ;;  %vm11778_vm8 = vcmp.gt.f32.partialorder %v7035_v8, 0.0  ;;  %v7428_v3 = vadd.f32 %v7115_v25, %v7411_v38  ;;  %v7432_v23 = vadd.f32 %v7133_v2, %v7411_v38  ;;  %2405 = vmax.xlane.f32.xlu0 %v2404_v18  ;;  %v2408_v54 = vmax.f32 %v2407_v12, %v7415_v33  ;;  %v7436_v53 = vpop.permute.xlu1 %1323 }
 0x176   : > { %v1583_v56 = vmul.f32 0.2, %v7303_v58  ;;  %v1584_v51 = vmul.f32 0.2, %v1456_v62  ;;  %v1585_v59 = vmul.f32 0.2, %v1457_v43  ;;  %v1710_v55 = vmax.f32 %v7299_v28, %v1582_v16 }
 0x177   : > { %v1468_v10 = vadd.f32 %v7141_v41, %v7330_v22  ;;  %v7443_v30 = vadd.f32 %v7115_v25, %v7436_v53  ;;  %v7447_v18 = vadd.f32 %v7133_v2, %v7436_v53  ;;  %v2409_v12 = vmax.f32 %v2408_v54, %v7419_v24  ;;  %v7451_v17 = vpop.permute.xlu0 %1308 }
 0x178   : > { %v1711_v33 = vmax.f32 %v7303_v58, %v1583_v56  ;;  %v1712_v29 = vmax.f32 %v1456_v62, %v1584_v51  ;;  %v1713_v52 = vmax.f32 %v1457_v43, %v1585_v59  ;;  %v7455_v28 = vsel %vm11746_vm14, %v1710_v55, -1e+30 }
 0x179   : > { %12384 = vst [vmem:[#allocation129_spill] sm:$0xff] %v7455_v28  ;;  %v1469_v16 = vadd.f32 %v7145_v11, %v7330_v22  ;;  %vm11783_vm12 = vcmp.gt.f32.partialorder %v7037_v9, 0.0  ;;  %2410 = vmax.xlane.f32.xlu1 %v2409_v12  ;;  %v7462_v47 = vadd.f32 %v7115_v25, %v7451_v17  ;;  %v7466_v56 = vadd.f32 %v7133_v2, %v7451_v17  ;;  %v7486_v22 = vpop.permute.xlu1 %1313 }
 0x17a   : > { %v7470_v51 = vsel %vm11762_vm15, %v1711_v33, -1e+30  ;;  %v1594_v55 = vmul.f32 0.2, %v7336_v57  ;;  %vm11792_vm14 = vcmp.gt.f32.partialorder %v7041_v13, 0.0  ;;  %vm11780_vm10 = vcmp.gt.f32.partialorder %v7043_v4, 0.0 }
 0x17b   : > { %12385 = vst [vmem:[#allocation130_spill] sm:$0xff] %v7470_v51  ;;  %vm11786_vm6 = vcmp.gt.f32.partialorder %v7047_v19, 0.0  ;;  %v7478_v59 = vsel %vm11757_vm0, %v1712_v29, -1e+30  ;;  %v7482_v58 = vsel %vm11761_vm4, %v1713_v52, -1e+30  ;;  %v2417_v62 = vmax.f32 %v7455_v28, %v7470_v51  ;;  %v7500_v0 = vpop.permute.xlu0 %1338 }
 0x17c   : > { %12386 = vst [vmem:[#allocation131_spill] sm:$0xff] %v7478_v59  ;;  %12387 = vst [vmem:[#allocation132_spill] sm:$0xff] %v7482_v58  ;;  %v1595_v33 = vmul.f32 0.2, %v7340_v32  ;;  %v7491_v43 = vadd.f32 %v7115_v25, %v7486_v22  ;;  %v7495_v54 = vadd.f32 %v7133_v2, %v7486_v22  ;;  %v1596_v29 = vmul.f32 0.2, %v1468_v10 }
 0x17d   : > { %v1597_v12 = vmul.f32 0.2, %v1469_v16  ;;  %v2418_v52 = vmax.f32 %v2417_v62, %v7478_v59  ;;  %v1722_v63 = vmax.f32 %v7336_v57, %v1594_v55  ;;  %v1472_v61 = vadd.f32 %v7141_v41, %v7347_v14  ;;  %v7525_v55 = vpop.permute.xlu1 %1343  ;;  %v12396_v4 = vld [vmem:[#allocation42_spill] sm:$0xff] }
 0x17e   : > { %v1723_v60 = vmax.f32 %v7340_v32, %v1595_v33  ;;  %vm11803_vm0 = vcmp.gt.f32.partialorder %v7049_v27, 0.0  ;;  %v1724_v24 = vmax.f32 %v1468_v10, %v1596_v29  ;;  %v7507_v28 = vadd.f32 %v7115_v25, %v7500_v0 }
 0x17f   : > { %v1725_v51 = vmax.f32 %v1469_v16, %v1597_v12  ;;  %v7511_v62 = vadd.f32 %v7133_v2, %v7500_v0  ;;  %vm11806_vm4 = vcmp.gt.f32.partialorder %v7051_v44, 0.0  ;;  %v2419_v32 = vmax.f32 %v2418_v52, %v7482_v58 }
 0x180   : > { %v7517_v57 = vsel %vm11771_vm2, %v1722_v63, -1e+30  ;;  %v7521_v10 = vsel %vm11779_vm5, %v1723_v60, -1e+30  ;;  %v1473_v16 = vadd.f32 %v7145_v11, %v7347_v14  ;;  %vm11802_vm15 = vcmp.gt.f32.partialorder %v7053_v45, 0.0 }
 0x181   : > { %12388 = vst [vmem:[#allocation133_spill] sm:$0xff] %v7517_v57  ;;  %12389 = vst [vmem:[#allocation134_spill] sm:$0xff] %v7521_v10  ;;  %vm11804_vm13 = vcmp.gt.f32.partialorder %v7055_v48, 0.0  ;;  %v7531_v33 = vsel %vm11770_vm3, %v1724_v24, -1e+30  ;;  %v2432_v60 = vmax.f32 %v7517_v57, %v7521_v10  ;;  %2420 = vmax.xlane.f32.xlu0 %v2419_v32  ;;  %v7543_v1 = vadd.f32 %v7115_v25, %v7525_v55  ;;  %v7553_v32 = vpop.permute.xlu0 %1328 }
 0x182   : > { %12390 = vst [vmem:[#allocation135_spill] sm:$0xff] %v7531_v33  ;;  %v7535_v63 = vsel %vm11778_vm8, %v1725_v51, -1e+30  ;;  %v1598_v29 = vmul.f32 0.2, %v7361_v20  ;;  %v7549_v51 = vadd.f32 %v7133_v2, %v7525_v55  ;;  %v1460_v8 = vadd.f32 %v7141_v41, %v7375_v31 }
 0x183   : > { %12391 = vst [vmem:[#allocation136_spill] sm:$0xff] %v7535_v63  ;;  %v1599_v14 = vmul.f32 0.2, %v7365_v40  ;;  %v1600_v12 = vmul.f32 0.2, %v1472_v61  ;;  %v2433_v24 = vmax.f32 %v2432_v60, %v7531_v33  ;;  %vm11819_vm3 = vcmp.gt.f32.partialorder %v7057_v35, 0.0 }
 0x184   : > { %v1601_v52 = vmul.f32 0.2, %v1473_v16  ;;  %v1726_v7 = vmax.f32 %v7361_v20, %v1598_v29  ;;  %vm11821_vm2 = vcmp.gt.f32.partialorder %v7059_v36, 0.0  ;;  %v1461_v20 = vadd.f32 %v7145_v11, %v7375_v31 }
 0x185   : > { %v1727_v5 = vmax.f32 %v7365_v40, %v1599_v14  ;;  %v1728_v10 = vmax.f32 %v1472_v61, %v1600_v12  ;;  %v2434_v60 = vmax.f32 %v2433_v24, %v7535_v63  ;;  %v1586_v33 = vmul.f32 0.2, %v7379_v37  ;;  %v7640_v48 = vpop.permute.xlu0 %1358 }
 0x186   : > { %v1729_v57 = vmax.f32 %v1473_v16, %v1601_v52  ;;  %v7563_v29 = vsel %vm11783_vm12, %v1726_v7, -1e+30  ;;  %v1587_v58 = vmul.f32 0.2, %v7383_v39  ;;  %vm11815_vm8 = vcmp.gt.f32.partialorder %v7061_v42, 0.0  ;;  %v7588_v52 = vpop.permute.xlu1 %1333  ;;  %v12411_v42 = vld [vmem:[#allocation49_spill] sm:$0xff] }
 0x187   : > { %12392 = vst [vmem:[#allocation137_spill] sm:$0xff] %v7563_v29  ;;  %vm11820_vm5 = vcmp.gt.f32.partialorder %v7063_v49, 0.0  ;;  %v7571_v61 = vsel %vm11792_vm14, %v1727_v5, -1e+30  ;;  %v7575_v40 = vsel %vm11780_vm10, %v1728_v10, -1e+30  ;;  %v7583_v31 = vadd.f32 %v7115_v25, %v7553_v32  ;;  %2435 = vmax.xlane.f32.xlu1 %v2434_v60 }
 0x188   : > { %12393 = vst [vmem:[#allocation138_spill] sm:$0xff] %v7571_v61  ;;  %12394 = vst [vmem:[#allocation139_spill] sm:$0xff] %v7575_v40  ;;  %v7579_v7 = vsel %vm11786_vm6, %v1729_v57, -1e+30  ;;  %v2437_v16 = vmax.f32 %v7563_v29, %v7571_v61  ;;  %v1588_v14 = vmul.f32 0.2, %v1460_v8  ;;  %v1714_v5 = vmax.f32 %v7379_v37, %v1586_v33 }
 0x189   : > { %12395 = vst [vmem:[#allocation140_spill] sm:$0xff] %v7579_v7  ;;  %v1589_v12 = vmul.f32 0.2, %v1461_v20  ;;  %v1715_v10 = vmax.f32 %v7383_v39, %v1587_v58  ;;  %v7593_v57 = vadd.f32 %v7133_v2, %v7553_v32  ;;  %v1464_v24 = vadd.f32 %v7141_v41, %v7388_v21  ;;  %v12398_v58 = vld [vmem:[#allocation43_spill] sm:$0xff] }
 0x18a   : > { %v1465_v60 = vadd.f32 %v7145_v11, %v7388_v21  ;;  %vm11836_vm10 = vcmp.gt.f32.partialorder %v7065_v50, 0.0  ;;  %vm11835_vm12 = vcmp.gt.f32.partialorder %v12396_v4, 0.0  ;;  %v2438_v37 = vmax.f32 %v2437_v16, %v7575_v40  ;;  %v12408_v40 = vld [vmem:[#allocation48_spill] sm:$0xff] }
 0x18b   : > { %v1716_v33 = vmax.f32 %v1460_v8, %v1588_v14  ;;  %v1717_v9 = vmax.f32 %v1461_v20, %v1589_v12  ;;  %v7604_v39 = vsel %vm11803_vm0, %v1714_v5, -1e+30  ;;  %vm11830_vm6 = vcmp.gt.f32.partialorder %v12398_v58, 0.0  ;;  %v12400_v8 = vld [vmem:[#allocation44_spill] sm:$0xff] }
 0x18c   : > { %12397 = vst [vmem:[#allocation141_spill] sm:$0xff] %v7604_v39  ;;  %v7609_v19 = vsel %vm11806_vm4, %v1715_v10, -1e+30  ;;  %v1590_v21 = vmul.f32 0.2, %v7400_v34  ;;  %v7615_v61 = vadd.f32 %v7115_v25, %v7588_v52  ;;  %vm11828_vm14 = vcmp.gt.f32.partialorder %v12400_v8, 0.0 }
 0x18d   : > { %12399 = vst [vmem:[#allocation142_spill] sm:$0xff] %v7609_v19  ;;  %v1591_v13 = vmul.f32 0.2, %v7404_v15  ;;  %v2439_v20 = vmax.f32 %v2438_v37, %v7579_v7  ;;  %v7621_v16 = vsel %vm11802_vm15, %v1716_v33, -1e+30  ;;  %v2422_v12 = vmax.f32 %v7604_v39, %v7609_v19  ;;  %v12403_v7 = vld [vmem:[#allocation45_spill] sm:$0xff] }
 0x18e   : > { %12401 = vst [vmem:[#allocation143_spill] sm:$0xff] %v7621_v16  ;;  %v7625_v14 = vsel %vm11804_vm13, %v1717_v9, -1e+30  ;;  %v1592_v5 = vmul.f32 0.2, %v1464_v24  ;;  %v1718_v27 = vmax.f32 %v7400_v34, %v1590_v21  ;;  %v7634_v33 = vadd.f32 %v7133_v2, %v7588_v52  ;;  %v12404_v34 = vld [vmem:[#allocation46_spill] sm:$0xff] }
 0x18f   : > { %12402 = vst [vmem:[#allocation144_spill] sm:$0xff] %v7625_v14  ;;  %v1593_v10 = vmul.f32 0.2, %v1465_v60  ;;  %v1719_v44 = vmax.f32 %v7404_v15, %v1591_v13  ;;  %2440 = vmax.xlane.f32.xlu0 %v2439_v20  ;;  %v2423_v37 = vmax.f32 %v2422_v12, %v7621_v16  ;;  %v1484_v9 = vadd.f32 %v7141_v41, %v7411_v38  ;;  %v12407_v12 = vld [vmem:[#allocation47_spill] sm:$0xff]  ;;  %v12420_v8 = vld [vmem:[#allocation54_spill] sm:$0xff] }
 0x190   : > { %v1485_v45 = vadd.f32 %v7145_v11, %v7411_v38  ;;  %vm11860_vm15 = vcmp.gt.f32.partialorder %v12403_v7, 0.0  ;;  %vm11848_vm0 = vcmp.gt.f32.partialorder %v12404_v34, 0.0  ;;  %v1720_v13 = vmax.f32 %v1464_v24, %v1592_v5 }
 0x191   : > { %v1721_v15 = vmax.f32 %v1465_v60, %v1593_v10  ;;  %v7646_v21 = vsel %vm11819_vm3, %v1718_v27, -1e+30  ;;  %v7650_v20 = vsel %vm11821_vm2, %v1719_v44, -1e+30  ;;  %vm11846_vm13 = vcmp.gt.f32.partialorder %v12407_v12, 0.0 }
 0x192   : > { %12405 = vst [vmem:[#allocation145_spill] sm:$0xff] %v7646_v21  ;;  %12406 = vst [vmem:[#allocation146_spill] sm:$0xff] %v7650_v20  ;;  %vm11843_vm4 = vcmp.gt.f32.partialorder %v12408_v40, 0.0  ;;  %v2424_v38 = vmax.f32 %v2423_v37, %v7625_v14  ;;  %v2427_v29 = vmax.f32 %v7646_v21, %v7650_v20  ;;  %v1610_v24 = vmul.f32 0.2, %v7428_v3  ;;  %v7683_v20 = vpop.permute.xlu1 %1363 }
 0x193   : > { %v1611_v60 = vmul.f32 0.2, %v7432_v23  ;;  %v7661_v27 = vsel %vm11815_vm8, %v1720_v13, -1e+30  ;;  %v7665_v44 = vsel %vm11820_vm5, %v1721_v15, -1e+30  ;;  %v7669_v10 = vadd.f32 %v7115_v25, %v7640_v48 }
 0x194   : > { %12409 = vst [vmem:[#allocation147_spill] sm:$0xff] %v7661_v27  ;;  %12410 = vst [vmem:[#allocation148_spill] sm:$0xff] %v7665_v44  ;;  %v1612_v5 = vmul.f32 0.2, %v1484_v9  ;;  %2425 = vmax.xlane.f32.xlu1 %v2424_v38  ;;  %v2428_v37 = vmax.f32 %v2427_v29, %v7661_v27  ;;  %v1613_v35 = vmul.f32 0.2, %v1485_v45  ;;  %v1738_v36 = vmax.f32 %v7428_v3, %v1610_v24 }
 0x195   : > { %v1739_v63 = vmax.f32 %v7432_v23, %v1611_v60  ;;  %vm11851_vm8 = vcmp.gt.f32.partialorder %v12411_v42, 0.0  ;;  %v7677_v15 = vadd.f32 %v7133_v2, %v7640_v48  ;;  %v1488_v49 = vadd.f32 %v7141_v41, %v7436_v53  ;;  %v12412_v29 = vld [vmem:[#allocation50_spill] sm:$0xff]  ;;  %v12415_v60 = vld [vmem:[#allocation51_spill] sm:$0xff] }
 0x196   : > { %v1740_v13 = vmax.f32 %v1484_v9, %v1612_v5  ;;  %v1489_v38 = vadd.f32 %v7145_v11, %v7436_v53  ;;  %vm11863_vm3 = vcmp.gt.f32.partialorder %v12412_v29, 0.0  ;;  %v2429_v3 = vmax.f32 %v2428_v37, %v7665_v44  ;;  %v12416_v5 = vld [vmem:[#allocation52_spill] sm:$0xff] }
 0x197   : > { %v1741_v23 = vmax.f32 %v1485_v45, %v1613_v35  ;;  %v7689_v9 = vsel %vm11836_vm10, %v1738_v36, -1e+30  ;;  %v7693_v24 = vsel %vm11835_vm12, %v1739_v63, -1e+30  ;;  %vm11859_vm5 = vcmp.gt.f32.partialorder %v12415_v60, 0.0 }
 0x198   : > { %12413 = vst [vmem:[#allocation149_spill] sm:$0xff] %v7689_v9  ;;  %12414 = vst [vmem:[#allocation150_spill] sm:$0xff] %v7693_v24  ;;  %vm11861_vm2 = vcmp.gt.f32.partialorder %v12416_v5, 0.0  ;;  %v7699_v53 = vsel %vm11830_vm6, %v1740_v13, -1e+30  ;;  %v2452_v37 = vmax.f32 %v7689_v9, %v7693_v24  ;;  %2430 = vmax.xlane.f32.xlu0 %v2429_v3  ;;  %v7711_v50 = vadd.f32 %v7115_v25, %v7683_v20  ;;  %v7713_v13 = vpop.f32.mrf.mxu1 }
 0x199   : > { %12417 = vst [vmem:[#allocation151_spill] sm:$0xff] %v7699_v53  ;;  %v1614_v45 = vmul.f32 0.2, %v7443_v30  ;;  %v1615_v35 = vmul.f32 0.2, %v7447_v18  ;;  %v7720_v3 = vadd.f32 %v7133_v2, %v7683_v20  ;;  %vm11878_vm6 = vcmp.gt.f32.partialorder %v12420_v8, 0.0 }
 0x19a   : > { %v7707_v36 = vsel %vm11828_vm14, %v1741_v23, -1e+30  ;;  %v1616_v63 = vmul.f32 0.2, %v1488_v49  ;;  %v1617_v4 = vmul.f32 0.2, %v1489_v38  ;;  %v2453_v58 = vmax.f32 %v2452_v37, %v7699_v53  ;;  %v7728_v53 = vpop.permute.xlu0 %1348 }
 0x19b   : > { %12418 = vst [vmem:[#allocation152_spill] sm:$0xff] %v7707_v36  ;;  %v1742_v24 = vmax.f32 %v7443_v30, %v1614_v45  ;;  %v1743_v9 = vmax.f32 %v7447_v18, %v1615_v35  ;;  %v12419_v23 = vld [vmem:[#allocation53_spill] sm:$0xff]  ;;  %v1476_v21 = vadd.f32 %v7141_v41, %v7451_v17  ;;  %v1477_v37 = vadd.f32 %v7145_v11, %v7451_v17  ;;  %v12421_v30 = vld [vmem:[#allocation55_spill] sm:$0xff]  ;;  %v7731_v18 = vpop.f32.mrf.mxu1 }
 0x19c   : > { %vm11876_vm14 = vcmp.gt.f32.partialorder %v12419_v23, 0.0  ;;  %v1744_v44 = vmax.f32 %v1488_v49, %v1616_v63  ;;  %v1745_v27 = vmax.f32 %v1489_v38, %v1617_v4  ;;  %vm11872_vm12 = vcmp.gt.f32.partialorder %v12421_v30, 0.0  ;;  %12422 = vst [vmem:[#allocation153_spill] sm:$0xff] %v7731_v18  ;;  %v12425_v38 = vld [vmem:[#allocation56_spill] sm:$0xff] }
 0x19d   : > { %v2454_v45 = vmax.f32 %v2453_v58, %v7707_v36  ;;  %v7736_v35 = vsel %vm11860_vm15, %v1742_v24, -1e+30  ;;  %v7740_v4 = vsel %vm11848_vm0, %v1743_v9, -1e+30  ;;  %v1602_v49 = vmul.f32 0.2, %v7462_v47  ;;  %v7755_v34 = vpop.f32.mrf.mxu1 }
 0x19e   : > { %12423 = vst [vmem:[#allocation154_spill] sm:$0xff] %v7736_v35  ;;  %12424 = vst [vmem:[#allocation155_spill] sm:$0xff] %v7740_v4  ;;  %vm11877_vm10 = vcmp.gt.f32.partialorder %v12425_v38, 0.0  ;;  %v7746_v17 = vsel %vm11846_vm13, %v1744_v44, -1e+30  ;;  %v2457_v58 = vmax.f32 %v7736_v35, %v7740_v4  ;;  %v7760_v44 = vadd.f32 %v7115_v25, %v7728_v53 }
 0x19f   : > { %12426 = vst [vmem:[#allocation156_spill] sm:$0xff] %v7746_v17  ;;  %v7750_v63 = vsel %vm11843_vm4, %v1745_v27, -1e+30  ;;  %v1603_v24 = vmul.f32 0.2, %v7466_v56  ;;  %2455 = vmax.xlane.f32.xlu1 %v2454_v45  ;;  %v1730_v36 = vmax.f32 %v7462_v47, %v1602_v49  ;;  %v7766_v12 = vadd.f32 %v7133_v2, %v7728_v53  ;;  %v12428_v45 = vld [vmem:[#allocation57_spill] sm:$0xff]  ;;  %v7771_v35 = vpop.f32.mrf.mxu1 }
 0x1a0   : > { %12427 = vst [vmem:[#allocation157_spill] sm:$0xff] %v7750_v63  ;;  %v1604_v9 = vmul.f32 0.2, %v1476_v21  ;;  %v1605_v7 = vmul.f32 0.2, %v1477_v37  ;;  %v2458_v40 = vmax.f32 %v2457_v58, %v7746_v17  ;;  %v1480_v4 = vadd.f32 %v7141_v41, %v7486_v22  ;;  %12429 = vst [vmem:[#allocation158_spill] sm:$0xff] %v7771_v35  ;;  %v7779_v58 = vpop.permute.xlu1 %1353 }
 0x1a1   : > { %v1731_v27 = vmax.f32 %v7466_v56, %v1603_v24  ;;  %vm11889_vm4 = vcmp.gt.f32.partialorder %v12428_v45, 0.0  ;;  %v7775_v14 = vsel %vm11851_vm8, %v1730_v36, -1e+30  ;;  %v1481_v56 = vadd.f32 %v7145_v11, %v7486_v22  ;;  %v12431_v24 = vld [vmem:[#allocation58_spill] sm:$0xff]  ;;  %v12432_v17 = vld [vmem:[#allocation59_spill] sm:$0xff]  ;;  %v12434_v36 = vld [vmem:[#allocation60_spill] sm:$0xff] }
 0x1a2   : > { %v1732_v47 = vmax.f32 %v1476_v21, %v1604_v9  ;;  %v1733_v49 = vmax.f32 %v1477_v37, %v1605_v7  ;;  %12430 = vst [vmem:[#allocation159_spill] sm:$0xff] %v7775_v14  ;;  %vm11888_vm13 = vcmp.gt.f32.partialorder %v12431_v24, 0.0  ;;  %vm11884_vm0 = vcmp.gt.f32.partialorder %v12432_v17, 0.0  ;;  %v7791_v37 = vpop.f32.mrf.mxu1 }
 0x1a3   : > { %v2459_v16 = vmax.f32 %v2458_v40, %v7750_v63  ;;  %v7786_v19 = vsel %vm11863_vm3, %v1731_v27, -1e+30  ;;  %v1606_v7 = vmul.f32 0.2, %v7491_v43  ;;  %v1607_v21 = vmul.f32 0.2, %v7495_v54 }
 0x1a4   : > { %12433 = vst [vmem:[#allocation160_spill] sm:$0xff] %v7786_v19  ;;  %vm11882_vm8 = vcmp.gt.f32.partialorder %v12434_v36, 0.0  ;;  %12435 = vst [vmem:[#allocation161_spill] sm:$0xff] %v7791_v37  ;;  %v7795_v22 = vsel %vm11859_vm5, %v1732_v47, -1e+30  ;;  %v2442_v40 = vmax.f32 %v7775_v14, %v7786_v19  ;;  %v7807_v39 = vadd.f32 %v7115_v25, %v7779_v58  ;;  %v7809_v47 = vpop.f32.mrf.mxu1  ;;  %v7818_v19 = vpop.permute.xlu0 %1378  ;;  %v12459_v36 = vld [vmem:[#allocation70_spill] sm:$0xff] }
 0x1a5   : > { %12436 = vst [vmem:[#allocation162_spill] sm:$0xff] %v7795_v22  ;;  %v7799_v9 = vsel %vm11861_vm2, %v1733_v49, -1e+30  ;;  %v1608_v27 = vmul.f32 0.2, %v1480_v4  ;;  %2460 = vmax.xlane.f32.xlu0 %v2459_v16  ;;  %v1734_v29 = vmax.f32 %v7491_v43, %v1606_v7  ;;  %v1735_v63 = vmax.f32 %v7495_v54, %v1607_v21  ;;  %12438 = vst [vmem:[#allocation164_spill] sm:$0xff] %v7809_v47 }
 0x1a6   : > { %12437 = vst [vmem:[#allocation163_spill] sm:$0xff] %v7799_v9  ;;  %v1609_v42 = vmul.f32 0.2, %v1481_v56  ;;  %v2443_v60 = vmax.f32 %v2442_v40, %v7795_v22  ;;  %v7814_v5 = vadd.f32 %v7133_v2, %v7779_v58  ;;  %v1500_v16 = vadd.f32 %v7141_v41, %v7500_v0  ;;  %v12439_v43 = vld [vmem:[#allocation61_spill] sm:$0xff]  ;;  %v12440_v54 = vld [vmem:[#allocation62_spill] sm:$0xff]  ;;  %v12444_v22 = vld [vmem:[#allocation64_spill] sm:$0xff]  ;;  %v7834_v14 = vpop.f32.mrf.mxu1 }
 0x1a7   : > { %v1736_v49 = vmax.f32 %v1480_v4, %v1608_v27  ;;  %vm11902_vm5 = vcmp.gt.f32.partialorder %v12439_v43, 0.0  ;;  %vm11900_vm15 = vcmp.gt.f32.partialorder %v12440_v54, 0.0  ;;  %v7824_v21 = vsel %vm11876_vm14, %v1734_v29, -1e+30  ;;  %v12443_v27 = vld [vmem:[#allocation63_spill] sm:$0xff]  ;;  %12445 = vst [vmem:[#allocation167_spill] sm:$0xff] %v7834_v14 }
 0x1a8   : > { %v1737_v7 = vmax.f32 %v1481_v56, %v1609_v42  ;;  %12441 = vst [vmem:[#allocation165_spill] sm:$0xff] %v7824_v21  ;;  %v7828_v4 = vsel %vm11878_vm6, %v1735_v63, -1e+30  ;;  %v1501_v40 = vadd.f32 %v7145_v11, %v7500_v0  ;;  %vm11897_vm2 = vcmp.gt.f32.partialorder %v12443_v27, 0.0  ;;  %v12451_v47 = vld [vmem:[#allocation66_spill] sm:$0xff]  ;;  %v12452_v14 = vld [vmem:[#allocation67_spill] sm:$0xff]  ;;  %v7899_v24 = vpop.permute.xlu0 %1368 }
 0x1a9   : > { %12442 = vst [vmem:[#allocation166_spill] sm:$0xff] %v7828_v4  ;;  %vm11895_vm3 = vcmp.gt.f32.partialorder %v12444_v22, 0.0  ;;  %v2444_v59 = vmax.f32 %v2443_v60, %v7799_v9  ;;  %v7839_v42 = vsel %vm11872_vm12, %v1736_v49, -1e+30  ;;  %v2447_v29 = vmax.f32 %v7824_v21, %v7828_v4  ;;  %v7853_v60 = vpop.f32.mrf.mxu1  ;;  %v12449_v21 = vld [vmem:[#allocation65_spill] sm:$0xff] }
 0x1aa   : > { %12446 = vst [vmem:[#allocation168_spill] sm:$0xff] %v7839_v42  ;;  %v1626_v63 = vmul.f32 0.2, %v7507_v28  ;;  %v7846_v0 = vsel %vm11877_vm10, %v1737_v7, -1e+30  ;;  %v7851_v8 = vadd.f32 %v7115_v25, %v7818_v19  ;;  %12448 = vst [vmem:[#allocation170_spill] sm:$0xff] %v7853_v60  ;;  %v7859_v38 = vadd.f32 %v7133_v2, %v7818_v19  ;;  %v7861_v7 = vpop.permute.xlu1 %1383 }
 0x1ab   : > { %12447 = vst [vmem:[#allocation169_spill] sm:$0xff] %v7846_v0  ;;  %v1627_v56 = vmul.f32 0.2, %v7511_v62  ;;  %v1628_v23 = vmul.f32 0.2, %v1500_v16  ;;  %2445 = vmax.xlane.f32.xlu1 %v2444_v59  ;;  %v2448_v49 = vmax.f32 %v2447_v29, %v7839_v42  ;;  %vm11909_vm12 = vcmp.gt.f32.partialorder %v12449_v21, 0.0 }
 0x1ac   : > { %v1629_v30 = vmul.f32 0.2, %v1501_v40  ;;  %v1754_v4 = vmax.f32 %v7507_v28, %v1626_v63  ;;  %v1504_v60 = vadd.f32 %v7141_v41, %v7525_v55  ;;  %v1505_v59 = vadd.f32 %v7145_v11, %v7525_v55 }
 0x1ad   : > { %v1755_v9 = vmax.f32 %v7511_v62, %v1627_v56  ;;  %v1756_v26 = vmax.f32 %v1500_v16, %v1628_v23  ;;  %v2449_v29 = vmax.f32 %v2448_v49, %v7846_v0  ;;  %v1630_v42 = vmul.f32 0.2, %v7543_v1  ;;  %v12453_v62 = vld [vmem:[#allocation68_spill] sm:$0xff]  ;;  %v7878_v23 = vpop.f32.mrf.mxu1 }
 0x1ae   : > { %v1757_v28 = vmax.f32 %v1501_v40, %v1629_v30  ;;  %v7872_v63 = vsel %vm11889_vm4, %v1754_v4, -1e+30  ;;  %vm11908_vm14 = vcmp.gt.f32.partialorder %v12451_v47, 0.0  ;;  %vm11905_vm10 = vcmp.gt.f32.partialorder %v12452_v14, 0.0  ;;  %12454 = vst [vmem:[#allocation172_spill] sm:$0xff] %v7878_v23  ;;  %v7953_v27 = vpop.permute.xlu1 %1373 }
 0x1af   : > { %12450 = vst [vmem:[#allocation171_spill] sm:$0xff] %v7872_v63  ;;  %vm11907_vm6 = vcmp.gt.f32.partialorder %v12453_v62, 0.0  ;;  %v7882_v55 = vsel %vm11888_vm13, %v1755_v9, -1e+30  ;;  %v7886_v30 = vsel %vm11884_vm0, %v1756_v26, -1e+30  ;;  %v7891_v4 = vadd.f32 %v7115_v25, %v7861_v7  ;;  %2450 = vmax.xlane.f32.xlu0 %v2449_v29 }
 0x1b0   : > { %12455 = vst [vmem:[#allocation173_spill] sm:$0xff] %v7882_v55  ;;  %12456 = vst [vmem:[#allocation174_spill] sm:$0xff] %v7886_v30  ;;  %v1631_v16 = vmul.f32 0.2, %v7549_v51  ;;  %v7895_v40 = vsel %vm11882_vm8, %v1757_v28, -1e+30  ;;  %v2472_v56 = vmax.f32 %v7872_v63, %v7882_v55  ;;  %v1758_v26 = vmax.f32 %v7543_v1, %v1630_v42 }
 0x1b1   : > { %12457 = vst [vmem:[#allocation175_spill] sm:$0xff] %v7895_v40  ;;  %v1632_v9 = vmul.f32 0.2, %v1504_v60  ;;  %v1633_v49 = vmul.f32 0.2, %v1505_v59  ;;  %v7905_v45 = vadd.f32 %v7133_v2, %v7861_v7  ;;  %v1492_v29 = vadd.f32 %v7141_v41, %v7553_v32  ;;  %v12458_v28 = vld [vmem:[#allocation69_spill] sm:$0xff] }
 0x1b2   : > { %v1759_v17 = vmax.f32 %v7549_v51, %v1631_v16  ;;  %vm11922_vm8 = vcmp.gt.f32.partialorder %v12458_v28, 0.0  ;;  %vm11921_vm0 = vcmp.gt.f32.partialorder %v12459_v36, 0.0  ;;  %v2473_v55 = vmax.f32 %v2472_v56, %v7886_v30  ;;  %v12460_v42 = vld [vmem:[#allocation71_spill] sm:$0xff]  ;;  %v7915_v51 = vpop.f32.mrf.mxu1  ;;  %v12472_v30 = vld [vmem:[#allocation76_spill] sm:$0xff]  ;;  %v12477_v62 = vld [vmem:[#allocation77_spill] sm:$0xff] }
 0x1b3   : > { %v1760_v63 = vmax.f32 %v1504_v60, %v1632_v9  ;;  %v1761_v0 = vmax.f32 %v1505_v59, %v1633_v49  ;;  %v1493_v1 = vadd.f32 %v7145_v11, %v7553_v32  ;;  %vm11917_vm13 = vcmp.gt.f32.partialorder %v12460_v42, 0.0  ;;  %12461 = vst [vmem:[#allocation176_spill] sm:$0xff] %v7915_v51  ;;  %v12464_v59 = vld [vmem:[#allocation72_spill] sm:$0xff] }
 0x1b4   : > { %v7919_v16 = vsel %vm11902_vm5, %v1758_v26, -1e+30  ;;  %v7923_v37 = vsel %vm11900_vm15, %v1759_v17, -1e+30  ;;  %v1618_v23 = vmul.f32 0.2, %v7583_v31  ;;  %v7928_v60 = vadd.f32 %v7115_v25, %v7899_v24 }
 0x1b5   : > { %12462 = vst [vmem:[#allocation177_spill] sm:$0xff] %v7919_v16  ;;  %12463 = vst [vmem:[#allocation178_spill] sm:$0xff] %v7923_v37  ;;  %vm11920_vm4 = vcmp.gt.f32.partialorder %v12464_v59, 0.0  ;;  %v2474_v32 = vmax.f32 %v2473_v55, %v7895_v40  ;;  %v7934_v56 = vsel %vm11897_vm2, %v1760_v63, -1e+30  ;;  %v2477_v17 = vmax.f32 %v7919_v16, %v7923_v37  ;;  %v12467_v37 = vld [vmem:[#allocation73_spill] sm:$0xff] }
 0x1b6   : > { %12465 = vst [vmem:[#allocation179_spill] sm:$0xff] %v7934_v56  ;;  %v7938_v9 = vsel %vm11895_vm3, %v1761_v0, -1e+30  ;;  %v1619_v49 = vmul.f32 0.2, %v7593_v57  ;;  %v1746_v43 = vmax.f32 %v7583_v31, %v1618_v23  ;;  %v7947_v63 = vadd.f32 %v7133_v2, %v7899_v24  ;;  %v12468_v16 = vld [vmem:[#allocation74_spill] sm:$0xff]  ;;  %v7957_v31 = vpop.f32.mrf.mxu1 }
 0x1b7   : > { %12466 = vst [vmem:[#allocation180_spill] sm:$0xff] %v7938_v9  ;;  %v1620_v26 = vmul.f32 0.2, %v1492_v29  ;;  %v1621_v54 = vmul.f32 0.2, %v1493_v1  ;;  %2475 = vmax.xlane.f32.xlu1 %v2474_v32  ;;  %v2478_v55 = vmax.f32 %v2477_v17, %v7934_v56  ;;  %v1496_v0 = vadd.f32 %v7141_v41, %v7588_v52  ;;  %12469 = vst [vmem:[#allocation181_spill] sm:$0xff] %v7957_v31 }
 0x1b8   : > { %v1497_v22 = vadd.f32 %v7145_v11, %v7588_v52  ;;  %vm11938_vm3 = vcmp.gt.f32.partialorder %v12467_v37, 0.0  ;;  %vm11937_vm2 = vcmp.gt.f32.partialorder %v12468_v16, 0.0  ;;  %v1747_v23 = vmax.f32 %v7593_v57, %v1619_v49  ;;  %v12471_v40 = vld [vmem:[#allocation75_spill] sm:$0xff]  ;;  %v12497_v31 = vld [vmem:[#allocation88_spill] sm:$0xff] }
 0x1b9   : > { %v1748_v32 = vmax.f32 %v1492_v29, %v1620_v26  ;;  %v1749_v17 = vmax.f32 %v1493_v1, %v1621_v54  ;;  %v7962_v56 = vsel %vm11909_vm12, %v1746_v43, -1e+30  ;;  %vm11931_vm15 = vcmp.gt.f32.partialorder %v12471_v40, 0.0 }
 0x1ba   : > { %12470 = vst [vmem:[#allocation182_spill] sm:$0xff] %v7962_v56  ;;  %vm11929_vm5 = vcmp.gt.f32.partialorder %v12472_v30, 0.0  ;;  %v2479_v52 = vmax.f32 %v2478_v55, %v7938_v9  ;;  %v1622_v51 = vmul.f32 0.2, %v7615_v61  ;;  %v1623_v35 = vmul.f32 0.2, %v7634_v33 }
 0x1bb   : > { %v1624_v18 = vmul.f32 0.2, %v1496_v0  ;;  %v7971_v57 = vsel %vm11908_vm14, %v1747_v23, -1e+30  ;;  %v7975_v54 = vsel %vm11905_vm10, %v1748_v32, -1e+30  ;;  %v7983_v29 = vadd.f32 %v7115_v25, %v7953_v27  ;;  %v7989_v23 = vpop.f32.mrf.mxu1 }
 0x1bc   : > { %12473 = vst [vmem:[#allocation183_spill] sm:$0xff] %v7971_v57  ;;  %12474 = vst [vmem:[#allocation184_spill] sm:$0xff] %v7975_v54  ;;  %v7979_v43 = vsel %vm11907_vm6, %v1749_v17, -1e+30  ;;  %2480 = vmax.xlane.f32.xlu0 %v2479_v52  ;;  %v2462_v1 = vmax.f32 %v7962_v56, %v7971_v57  ;;  %v1625_v49 = vmul.f32 0.2, %v1497_v22  ;;  %v1750_v26 = vmax.f32 %v7615_v61, %v1622_v51 }
 0x1bd   : > { %12475 = vst [vmem:[#allocation185_spill] sm:$0xff] %v7979_v43  ;;  %v1751_v55 = vmax.f32 %v7634_v33, %v1623_v35  ;;  %12476 = vst [vmem:[#allocation186_spill] sm:$0xff] %v7989_v23  ;;  %v1752_v32 = vmax.f32 %v1496_v0, %v1624_v18  ;;  %v7993_v17 = vadd.f32 %v7133_v2, %v7953_v27  ;;  %vm11950_vm10 = vcmp.gt.f32.partialorder %v12477_v62, 0.0  ;;  %v8009_v35 = vpop.permute.xlu0 %1398  ;;  %v12480_v51 = vld [vmem:[#allocation78_spill] sm:$0xff]  ;;  %v8027_v28 = vpop.f32.mrf.mxu1  ;;  %v12496_v23 = vld [vmem:[#allocation87_spill] sm:$0xff] }
 0x1be   : > { %v1516_v14 = vadd.f32 %v7141_v41, %v7640_v48  ;;  %v1517_v52 = vadd.f32 %v7145_v11, %v7640_v48  ;;  %v2463_v47 = vmax.f32 %v2462_v1, %v7975_v54  ;;  %v1753_v61 = vmax.f32 %v1497_v22, %v1625_v49  ;;  %v12481_v48 = vld [vmem:[#allocation80_spill] sm:$0xff] }
 0x1bf   : > { %v8003_v33 = vsel %vm11922_vm8, %v1750_v26, -1e+30  ;;  %v8007_v18 = vsel %vm11921_vm0, %v1751_v55, -1e+30  ;;  %vm11946_vm6 = vcmp.gt.f32.partialorder %v12480_v51, 0.0  ;;  %vm11944_vm14 = vcmp.gt.f32.partialorder %v7185_v46, 0.0 }
 0x1c0   : > { %12478 = vst [vmem:[#allocation187_spill] sm:$0xff] %v8003_v33  ;;  %12479 = vst [vmem:[#allocation188_spill] sm:$0xff] %v8007_v18  ;;  %vm11942_vm12 = vcmp.gt.f32.partialorder %v12481_v48, 0.0  ;;  %v8016_v0 = vsel %vm11917_vm13, %v1752_v32, -1e+30  ;;  %v2467_v22 = vmax.f32 %v8003_v33, %v8007_v18  ;;  %v2464_v26 = vmax.f32 %v2463_v47, %v7979_v43  ;;  %v12484_v33 = vld [vmem:[#allocation81_spill] sm:$0xff] }
 0x1c1   : > { %12482 = vst [vmem:[#allocation189_spill] sm:$0xff] %v8016_v0  ;;  %v1642_v1 = vmul.f32 0.2, %v7669_v10  ;;  %v1643_v49 = vmul.f32 0.2, %v7677_v15  ;;  %v8034_v18 = vadd.f32 %v7115_v25, %v8009_v35  ;;  %vm11960_vm13 = vcmp.gt.f32.partialorder %v12484_v33, 0.0 }
 0x1c2   : > { %v8025_v55 = vsel %vm11920_vm4, %v1753_v61, -1e+30  ;;  %v1644_v21 = vmul.f32 0.2, %v1516_v14  ;;  %v1645_v36 = vmul.f32 0.2, %v1517_v52  ;;  %v2468_v32 = vmax.f32 %v2467_v22, %v8016_v0  ;;  %2465 = vmax.xlane.f32.xlu1 %v2464_v26  ;;  %v8043_v0 = vpop.permute.xlu1 %1403 }
 0x1c3   : > { %12483 = vst [vmem:[#allocation190_spill] sm:$0xff] %v8025_v55  ;;  %v1770_v42 = vmax.f32 %v7669_v10, %v1642_v1  ;;  %v1771_v9 = vmax.f32 %v7677_v15, %v1643_v49  ;;  %v8039_v59 = vadd.f32 %v7133_v2, %v8009_v35  ;;  %v1520_v22 = vadd.f32 %v7141_v41, %v7683_v20  ;;  %v12485_v10 = vld [vmem:[#allocation82_spill] sm:$0xff]  ;;  %v12501_v46 = vld [vmem:[#allocation89_spill] sm:$0xff] }
 0x1c4   : > { %v1772_v47 = vmax.f32 %v1516_v14, %v1644_v21  ;;  %v1773_v61 = vmax.f32 %v1517_v52, %v1645_v36  ;;  %vm11959_vm4 = vcmp.gt.f32.partialorder %v12485_v10, 0.0  ;;  %v2469_v15 = vmax.f32 %v2468_v32, %v8025_v55  ;;  %v12488_v21 = vld [vmem:[#allocation83_spill] sm:$0xff]  ;;  %v12489_v52 = vld [vmem:[#allocation84_spill] sm:$0xff]  ;;  %v8070_v32 = vpop.f32.mrf.mxu1  ;;  %v12494_v55 = vld [vmem:[#allocation86_spill] sm:$0xff] }
 0x1c5   : > { %v8049_v1 = vsel %vm11938_vm3, %v1770_v42, -1e+30  ;;  %v8053_v14 = vsel %vm11937_vm2, %v1771_v9, -1e+30  ;;  %v1521_v36 = vadd.f32 %v7145_v11, %v7683_v20  ;;  %vm11958_vm0 = vcmp.gt.f32.partialorder %v12488_v21, 0.0  ;;  %12492 = vst [vmem:[#allocation195_spill] sm:$0xff] %v8070_v32 }
 0x1c6   : > { %12486 = vst [vmem:[#allocation191_spill] sm:$0xff] %v8049_v1  ;;  %12487 = vst [vmem:[#allocation192_spill] sm:$0xff] %v8053_v14  ;;  %vm11957_vm8 = vcmp.gt.f32.partialorder %v12489_v52, 0.0  ;;  %v8061_v49 = vsel %vm11931_vm15, %v1772_v47, -1e+30  ;;  %v2492_v42 = vmax.f32 %v8049_v1, %v8053_v14  ;;  %2470 = vmax.xlane.f32.xlu0 %v2469_v15  ;;  %v8075_v47 = vadd.f32 %v7115_v25, %v8043_v0  ;;  %v8085_v15 = vpop.permute.xlu0 %1388  ;;  %v12493_v1 = vld [vmem:[#allocation85_spill] sm:$0xff] }
 0x1c7   : > { %12490 = vst [vmem:[#allocation193_spill] sm:$0xff] %v8061_v49  ;;  %v8065_v26 = vsel %vm11929_vm5, %v1773_v61, -1e+30  ;;  %v1646_v9 = vmul.f32 0.2, %v7711_v50  ;;  %v8081_v40 = vadd.f32 %v7133_v2, %v8043_v0  ;;  %v1508_v14 = vadd.f32 %v7141_v41, %v7728_v53  ;;  %v12502_v51 = vld [vmem:[#allocation90_spill] sm:$0xff] }
 0x1c8   : > { %12491 = vst [vmem:[#allocation194_spill] sm:$0xff] %v8065_v26  ;;  %v1647_v20 = vmul.f32 0.2, %v7720_v3  ;;  %v1648_v16 = vmul.f32 0.2, %v1520_v22  ;;  %v2493_v30 = vmax.f32 %v2492_v42, %v8061_v49  ;;  %vm11973_vm5 = vcmp.gt.f32.partialorder %v12493_v1, 0.0 }
 0x1c9   : > { %v1649_v37 = vmul.f32 0.2, %v1521_v36  ;;  %v1774_v61 = vmax.f32 %v7711_v50, %v1646_v9  ;;  %vm11971_vm15 = vcmp.gt.f32.partialorder %v12494_v55, 0.0  ;;  %v1509_v50 = vadd.f32 %v7145_v11, %v7728_v53 }
 0x1ca   : > { %v1775_v43 = vmax.f32 %v7720_v3, %v1647_v20  ;;  %v1776_v54 = vmax.f32 %v1520_v22, %v1648_v16  ;;  %v2494_v42 = vmax.f32 %v2493_v30, %v8065_v26  ;;  %v1634_v49 = vmul.f32 0.2, %v7760_v44  ;;  %v8101_v3 = vpop.f32.mrf.mxu1  ;;  %v8176_v21 = vpop.permute.xlu0 %1418 }
 0x1cb   : > { %v1777_v57 = vmax.f32 %v1521_v36, %v1649_v37  ;;  %v8095_v9 = vsel %vm11950_vm10, %v1774_v61, -1e+30  ;;  %v1635_v56 = vmul.f32 0.2, %v7766_v12  ;;  %vm11967_vm2 = vcmp.gt.f32.partialorder %v12496_v23, 0.0  ;;  %v8122_v61 = vpop.permute.xlu1 %1393  ;;  %v12517_v23 = vld [vmem:[#allocation99_spill] sm:$0xff] }
 0x1cc   : > { %12495 = vst [vmem:[#allocation196_spill] sm:$0xff] %v8095_v9  ;;  %vm11970_vm3 = vcmp.gt.f32.partialorder %v12497_v31, 0.0  ;;  %v8105_v37 = vsel %vm11946_vm6, %v1775_v43, -1e+30  ;;  %v8109_v53 = vsel %vm11944_vm14, %v1776_v54, -1e+30  ;;  %v8117_v16 = vadd.f32 %v7115_v25, %v8085_v15  ;;  %2495 = vmax.xlane.f32.xlu1 %v2494_v42 }
 0x1cd   : > { %12498 = vst [vmem:[#allocation197_spill] sm:$0xff] %v8105_v37  ;;  %12499 = vst [vmem:[#allocation198_spill] sm:$0xff] %v8109_v53  ;;  %v8113_v30 = vsel %vm11942_vm12, %v1777_v57, -1e+30  ;;  %v2497_v22 = vmax.f32 %v8095_v9, %v8105_v37  ;;  %v1636_v36 = vmul.f32 0.2, %v1508_v14  ;;  %v1762_v43 = vmax.f32 %v7760_v44, %v1634_v49  ;;  %v8141_v37 = vpop.f32.mrf.mxu1 }
 0x1ce   : > { %12500 = vst [vmem:[#allocation199_spill] sm:$0xff] %v8113_v30  ;;  %v1637_v20 = vmul.f32 0.2, %v1509_v50  ;;  %v1763_v54 = vmax.f32 %v7766_v12, %v1635_v56  ;;  %v8127_v57 = vadd.f32 %v7133_v2, %v8085_v15  ;;  %v1512_v48 = vadd.f32 %v7141_v41, %v7779_v58  ;;  %v12504_v56 = vld [vmem:[#allocation91_spill] sm:$0xff]  ;;  %12505 = vst [vmem:[#allocation201_spill] sm:$0xff] %v8141_v37 }
 0x1cf   : > { %v1513_v42 = vadd.f32 %v7145_v11, %v7779_v58  ;;  %vm11987_vm12 = vcmp.gt.f32.partialorder %v12501_v46, 0.0  ;;  %vm11986_vm14 = vcmp.gt.f32.partialorder %v12502_v51, 0.0  ;;  %v2498_v44 = vmax.f32 %v2497_v22, %v8109_v53 }
 0x1d0   : > { %v1764_v49 = vmax.f32 %v1508_v14, %v1636_v36  ;;  %v1765_v62 = vmax.f32 %v1509_v50, %v1637_v20  ;;  %v8138_v12 = vsel %vm11960_vm13, %v1762_v43, -1e+30  ;;  %vm11982_vm6 = vcmp.gt.f32.partialorder %v12504_v56, 0.0  ;;  %v12507_v50 = vld [vmem:[#allocation92_spill] sm:$0xff] }
 0x1d1   : > { %12503 = vst [vmem:[#allocation200_spill] sm:$0xff] %v8138_v12  ;;  %v8145_v9 = vsel %vm11959_vm4, %v1763_v54, -1e+30  ;;  %v1638_v58 = vmul.f32 0.2, %v7807_v39  ;;  %v8151_v14 = vadd.f32 %v7115_v25, %v8122_v61  ;;  %vm11980_vm10 = vcmp.gt.f32.partialorder %v12507_v50, 0.0 }
 0x1d2   : > { %12506 = vst [vmem:[#allocation202_spill] sm:$0xff] %v8145_v9  ;;  %v1639_v26 = vmul.f32 0.2, %v7814_v5  ;;  %v2499_v22 = vmax.f32 %v2498_v44, %v8113_v30  ;;  %v8157_v36 = vsel %vm11958_vm0, %v1764_v49, -1e+30  ;;  %v2482_v43 = vmax.f32 %v8138_v12, %v8145_v9  ;;  %v12510_v30 = vld [vmem:[#allocation93_spill] sm:$0xff] }
 0x1d3   : > { %12508 = vst [vmem:[#allocation203_spill] sm:$0xff] %v8157_v36  ;;  %v8161_v20 = vsel %vm11957_vm8, %v1765_v62, -1e+30  ;;  %v1640_v54 = vmul.f32 0.2, %v1512_v48  ;;  %v1766_v33 = vmax.f32 %v7807_v39, %v1638_v58  ;;  %v8170_v49 = vadd.f32 %v7133_v2, %v8122_v61  ;;  %v12511_v39 = vld [vmem:[#allocation94_spill] sm:$0xff] }
 0x1d4   : > { %12509 = vst [vmem:[#allocation204_spill] sm:$0xff] %v8161_v20  ;;  %v1641_v10 = vmul.f32 0.2, %v1513_v42  ;;  %v1767_v53 = vmax.f32 %v7814_v5, %v1639_v26  ;;  %2500 = vmax.xlane.f32.xlu0 %v2499_v22  ;;  %v2483_v44 = vmax.f32 %v2482_v43, %v8157_v36  ;;  %v1532_v62 = vadd.f32 %v7141_v41, %v7818_v19  ;;  %v8180_v5 = vpop.f32.mrf.mxu1  ;;  %v12527_v50 = vld [vmem:[#allocation104_spill] sm:$0xff] }
 0x1d5   : > { %v1533_v52 = vadd.f32 %v7145_v11, %v7818_v19  ;;  %vm12000_vm8 = vcmp.gt.f32.partialorder %v12510_v30, 0.0  ;;  %vm11998_vm0 = vcmp.gt.f32.partialorder %v12511_v39, 0.0  ;;  %v1768_v26 = vmax.f32 %v1512_v48, %v1640_v54  ;;  %v12514_v19 = vld [vmem:[#allocation98_spill] sm:$0xff] }
 0x1d6   : > { %v1769_v58 = vmax.f32 %v1513_v42, %v1641_v10  ;;  %v8184_v22 = vsel %vm11973_vm5, %v1766_v33, -1e+30  ;;  %v8188_v43 = vsel %vm11971_vm15, %v1767_v53, -1e+30  ;;  %vm11993_vm4 = vcmp.gt.f32.partialorder %v7231_v6, 0.0  ;;  %v12535_v6 = vld [vmem:[#allocation107_spill] sm:$0xff] }
 0x1d7   : > { %12512 = vst [vmem:[#allocation205_spill] sm:$0xff] %v8184_v22  ;;  %12513 = vst [vmem:[#allocation206_spill] sm:$0xff] %v8188_v43  ;;  %vm11994_vm13 = vcmp.gt.f32.partialorder %v12514_v19, 0.0  ;;  %v2484_v36 = vmax.f32 %v2483_v44, %v8161_v20  ;;  %v2487_v9 = vmax.f32 %v8184_v22, %v8188_v43  ;;  %v1658_v48 = vmul.f32 0.2, %v7851_v8 }
 0x1d8   : > { %v1659_v10 = vmul.f32 0.2, %v7859_v38  ;;  %v8199_v33 = vsel %vm11967_vm2, %v1768_v26, -1e+30  ;;  %v8203_v53 = vsel %vm11970_vm3, %v1769_v58, -1e+30  ;;  %v8207_v54 = vadd.f32 %v7115_v25, %v8176_v21  ;;  %v8213_v26 = vpop.f32.mrf.mxu1 }
 0x1d9   : > { %12515 = vst [vmem:[#allocation207_spill] sm:$0xff] %v8199_v33  ;;  %12516 = vst [vmem:[#allocation208_spill] sm:$0xff] %v8203_v53  ;;  %v1660_v42 = vmul.f32 0.2, %v1532_v62  ;;  %2485 = vmax.xlane.f32.xlu1 %v2484_v36  ;;  %v2488_v44 = vmax.f32 %v2487_v9, %v8199_v33  ;;  %v1661_v55 = vmul.f32 0.2, %v1533_v52  ;;  %v1786_v1 = vmax.f32 %v7851_v8, %v1658_v48  ;;  %v8223_v36 = vpop.permute.xlu1 %1423 }
 0x1da   : > { %v1787_v43 = vmax.f32 %v7859_v38, %v1659_v10  ;;  %vm12010_vm2 = vcmp.gt.f32.partialorder %v12517_v23, 0.0  ;;  %v8217_v58 = vadd.f32 %v7133_v2, %v8176_v21  ;;  %v1536_v22 = vadd.f32 %v7141_v41, %v7861_v7  ;;  %v12518_v8 = vld [vmem:[#allocation100_spill] sm:$0xff]  ;;  %v12522_v33 = vld [vmem:[#allocation102_spill] sm:$0xff]  ;;  %v8255_v56 = vpop.f32.mrf.mxu1 }
 0x1db   : > { %v1788_v31 = vmax.f32 %v1532_v62, %v1660_v42  ;;  %v1537_v9 = vadd.f32 %v7145_v11, %v7861_v7  ;;  %vm12009_vm3 = vcmp.gt.f32.partialorder %v12518_v8, 0.0  ;;  %v2489_v38 = vmax.f32 %v2488_v44, %v8203_v53  ;;  %v12521_v42 = vld [vmem:[#allocation101_spill] sm:$0xff] }
 0x1dc   : > { %v1789_v48 = vmax.f32 %v1533_v52, %v1661_v55  ;;  %v8229_v62 = vsel %vm11987_vm12, %v1786_v1, -1e+30  ;;  %v8233_v10 = vsel %vm11986_vm14, %v1787_v43, -1e+30  ;;  %vm12008_vm15 = vcmp.gt.f32.partialorder %v12521_v42, 0.0  ;;  %v8245_v52 = vpop.f32.mrf.mxu0 }
 0x1dd   : > { %12519 = vst [vmem:[#allocation209_spill] sm:$0xff] %v8229_v62  ;;  %12520 = vst [vmem:[#allocation210_spill] sm:$0xff] %v8233_v10  ;;  %vm12006_vm5 = vcmp.gt.f32.partialorder %v12522_v33, 0.0  ;;  %v8239_v7 = vsel %vm11982_vm6, %v1788_v31, -1e+30  ;;  %v2512_v44 = vmax.f32 %v8229_v62, %v8233_v10  ;;  %2490 = vmax.xlane.f32.xlu0 %v2489_v38  ;;  %v8253_v31 = vadd.f32 %v7115_v25, %v8223_v36 }
 0x1de   : > { %12523 = vst [vmem:[#allocation211_spill] sm:$0xff] %v8239_v7  ;;  %v1662_v55 = vmul.f32 0.2, %v7891_v4  ;;  %v1663_v1 = vmul.f32 0.2, %v7905_v45  ;;  %12524 = vst [vmem:[#allocation212_spill] sm:$0xff] %v8245_v52  ;;  %v8262_v38 = vadd.f32 %v7133_v2, %v8223_v36  ;;  %v1524_v52 = vadd.f32 %v7141_v41, %v7899_v24 }
 0x1df   : > { %v8249_v43 = vsel %vm11980_vm10, %v1789_v48, -1e+30  ;;  %v1664_v51 = vmul.f32 0.2, %v1536_v22  ;;  %v1665_v46 = vmul.f32 0.2, %v1537_v9  ;;  %v2513_v10 = vmax.f32 %v2512_v44, %v8239_v7  ;;  %v8270_v7 = vpop.permute.xlu0 %1408 }
 0x1e0   : > { %12525 = vst [vmem:[#allocation213_spill] sm:$0xff] %v8249_v43  ;;  %v1790_v62 = vmax.f32 %v7891_v4, %v1662_v55  ;;  %v1791_v53 = vmax.f32 %v7905_v45, %v1663_v1  ;;  %v12526_v48 = vld [vmem:[#allocation103_spill] sm:$0xff]  ;;  %vm2199_vm6 = vcmp.gt.f32.partialorder %v12527_v50, 0.0  ;;  %v1525_v44 = vadd.f32 %v7145_v11, %v7899_v24  ;;  %v12528_v4 = vld [vmem:[#allocation105_spill] sm:$0xff]  ;;  %v8297_v1 = vpop.f32.mrf.mxu1 }
 0x1e1   : > { %vm2198_vm10 = vcmp.gt.f32.partialorder %v12526_v48, 0.0  ;;  %v1792_v20 = vmax.f32 %v1536_v22, %v1664_v51  ;;  %v1793_v12 = vmax.f32 %v1537_v9, %v1665_v46  ;;  %vm2200_vm14 = vcmp.gt.f32.partialorder %v12528_v4, 0.0  ;;  %v12531_v22 = vld [vmem:[#allocation106_spill] sm:$0xff]  ;;  %v8284_v9 = vpop.f32.mrf.mxu0 }
 0x1e2   : > { %v2514_v45 = vmax.f32 %v2513_v10, %v8249_v43  ;;  %v8276_v55 = vsel %vm12000_vm8, %v1790_v62, -1e+30  ;;  %v8280_v51 = vsel %vm11998_vm0, %v1791_v53, -1e+30  ;;  %v1650_v46 = vmul.f32 0.2, %v7928_v60 }
 0x1e3   : > { %12529 = vst [vmem:[#allocation214_spill] sm:$0xff] %v8276_v55  ;;  %12530 = vst [vmem:[#allocation215_spill] sm:$0xff] %v8280_v51  ;;  %vm2201_vm12 = vcmp.gt.f32.partialorder %v12531_v22, 0.0  ;;  %v8288_v24 = vsel %vm11993_vm4, %v1792_v20, -1e+30  ;;  %v2517_v62 = vmax.f32 %v8276_v55, %v8280_v51  ;;  %v8302_v20 = vadd.f32 %v7115_v25, %v8270_v7 }
 0x1e4   : > { %12532 = vst [vmem:[#allocation216_spill] sm:$0xff] %v8284_v9  ;;  %12533 = vst [vmem:[#allocation217_spill] sm:$0xff] %v8288_v24  ;;  %v8292_v10 = vsel %vm11994_vm13, %v1793_v12, -1e+30  ;;  %v1651_v53 = vmul.f32 0.2, %v7947_v63  ;;  %2515 = vmax.xlane.f32.xlu1 %v2514_v45  ;;  %v1778_v43 = vmax.f32 %v7928_v60, %v1650_v46  ;;  %v8310_v55 = vadd.f32 %v7133_v2, %v8270_v7 }
 0x1e5   : > { %12534 = vst [vmem:[#allocation218_spill] sm:$0xff] %v8292_v10  ;;  %v1652_v39 = vmul.f32 0.2, %v1524_v52  ;;  %v1653_v30 = vmul.f32 0.2, %v1525_v44  ;;  %vm12148_vm4 = vcmp.gt.f32.partialorder %v12535_v6, 0.0  ;;  %v2518_v19 = vmax.f32 %v2517_v62, %v8288_v24 }
 0x1e6   : > { %v12536_v12 = vld [vmem:[#allocation108_spill] sm:$0xff]  ;;  %v1779_v51 = vmax.f32 %v7947_v63, %v1651_v53  ;;  %v1528_v45 = vadd.f32 %v7141_v41, %v7953_v27  ;;  %v12537_v60 = vld [vmem:[#allocation109_spill] sm:$0xff]  ;;  %v8317_v37 = vsel %vm12010_vm2, %v1778_v43, -1e+30  ;;  %v1529_v62 = vadd.f32 %v7145_v11, %v7953_v27  ;;  %v12539_v24 = vld [vmem:[#allocation110_spill] sm:$0xff]  ;;  %v8322_v63 = vpop.f32.mrf.mxu0 }
 0x1e7   : > { %vm12031_vm13 = vcmp.gt.f32.partialorder %v12536_v12, 0.0  ;;  %vm12029_vm0 = vcmp.gt.f32.partialorder %v12537_v60, 0.0  ;;  %v1780_v46 = vmax.f32 %v1524_v52, %v1652_v39  ;;  %v1781_v9 = vmax.f32 %v1525_v44, %v1653_v30  ;;  %12538 = vst [vmem:[#allocation219_spill] sm:$0xff] %v8317_v37  ;;  %12540 = vst [vmem:[#allocation220_spill] sm:$0xff] %v8322_v63  ;;  %v8331_v52 = vpop.f32.mrf.mxu1  ;;  %v12544_v63 = vld [vmem:[#allocation111_spill] sm:$0xff] }
 0x1e8   : > { %vm12027_vm8 = vcmp.gt.f32.partialorder %v12539_v24, 0.0  ;;  %v2519_v53 = vmax.f32 %v2518_v19, %v8292_v10  ;;  %v8327_v32 = vsel %vm12009_vm3, %v1779_v51, -1e+30  ;;  %v1654_v39 = vmul.f32 0.2, %v7983_v29 }
 0x1e9   : > { %12541 = vst [vmem:[#allocation221_spill] sm:$0xff] %v8327_v32  ;;  %v1655_v30 = vmul.f32 0.2, %v7993_v17  ;;  %v8335_v43 = vsel %vm12008_vm15, %v1780_v46, -1e+30  ;;  %v2502_v19 = vmax.f32 %v8317_v37, %v8327_v32  ;;  %v1548_v10 = vadd.f32 %v7141_v41, %v8009_v35  ;;  %v12545_v32 = vld [vmem:[#allocation112_spill] sm:$0xff] }
 0x1ea   : > { %12542 = vst [vmem:[#allocation222_spill] sm:$0xff] %v8335_v43  ;;  %v8339_v27 = vsel %vm12006_vm5, %v1781_v9, -1e+30  ;;  %v1656_v44 = vmul.f32 0.2, %v1528_v45  ;;  %2520 = vmax.xlane.f32.xlu0 %v2519_v53  ;;  %v1782_v8 = vmax.f32 %v7983_v29, %v1654_v39  ;;  %v1549_v9 = vadd.f32 %v7145_v11, %v8009_v35  ;;  %v8353_v53 = vpop.f32.mrf.mxu0  ;;  %v8364_v35 = vpop.permute.xlu1 %1413 }
 0x1eb   : > { %12543 = vst [vmem:[#allocation223_spill] sm:$0xff] %v8339_v27  ;;  %v1657_v51 = vmul.f32 0.2, %v1529_v62  ;;  %v1783_v23 = vmax.f32 %v7993_v17, %v1655_v30  ;;  %v2503_v46 = vmax.f32 %v2502_v19, %v8335_v43  ;;  %v1674_v33 = vmul.f32 0.2, %v8034_v18  ;;  %v12548_v30 = vld [vmem:[#allocation113_spill] sm:$0xff] }
 0x1ec   : > { %v1784_v42 = vmax.f32 %v1528_v45, %v1656_v44  ;;  %vm2222_vm5 = vcmp.gt.f32.partialorder %v12544_v63, 0.0  ;;  %vm2223_vm15 = vcmp.gt.f32.partialorder %v12545_v32, 0.0  ;;  %v8357_v17 = vsel %vm2198_vm10, %v1782_v8, -1e+30  ;;  %v12549_v19 = vld [vmem:[#allocation114_spill] sm:$0xff]  ;;  %v8368_v44 = vpop.f32.mrf.mxu1  ;;  %v8392_v22 = vpop.f32.mrf.mxu0  ;;  %v12566_v32 = vld [vmem:[#allocation115_spill] sm:$0xff] }
 0x1ed   : > { %v1785_v29 = vmax.f32 %v1529_v62, %v1657_v51  ;;  %12546 = vst [vmem:[#allocation224_spill] sm:$0xff] %v8357_v17  ;;  %v8361_v39 = vsel %vm2199_vm6, %v1783_v23, -1e+30  ;;  %v1675_v45 = vmul.f32 0.2, %v8039_v59  ;;  %vm12159_vm3 = vcmp.gt.f32.partialorder %v12548_v30, 0.0 }
 0x1ee   : > { %12547 = vst [vmem:[#allocation225_spill] sm:$0xff] %v8361_v39  ;;  %vm12030_vm2 = vcmp.gt.f32.partialorder %v12549_v19, 0.0  ;;  %v2504_v62 = vmax.f32 %v2503_v46, %v8339_v27  ;;  %v8373_v8 = vsel %vm2200_vm14, %v1784_v42, -1e+30  ;;  %v2507_v23 = vmax.f32 %v8357_v17, %v8361_v39  ;;  %v12567_v63 = vld [vmem:[#allocation116_spill] sm:$0xff] }
 0x1ef   : > { %12550 = vst [vmem:[#allocation226_spill] sm:$0xff] %v8373_v8  ;;  %v1676_v51 = vmul.f32 0.2, %v1548_v10  ;;  %v8379_v50 = vsel %vm2201_vm12, %v1785_v29, -1e+30  ;;  %v1802_v43 = vmax.f32 %v8034_v18, %v1674_v33  ;;  %v1803_v37 = vmax.f32 %v8039_v59, %v1675_v45 }
 0x1f0   : > { %12551 = vst [vmem:[#allocation227_spill] sm:$0xff] %v8379_v50  ;;  %v1677_v48 = vmul.f32 0.2, %v1549_v9  ;;  %2505 = vmax.xlane.f32.xlu1 %v2504_v62  ;;  %v2508_v46 = vmax.f32 %v2507_v23, %v8373_v8  ;;  %v8386_v42 = vadd.f32 %v7115_v25, %v8364_v35  ;;  %v8390_v4 = vadd.f32 %v7133_v2, %v8364_v35  ;;  %v8404_v25 = vpop.f32.mrf.mxu1 }
 0x1f1   : > { %v1804_v27 = vmax.f32 %v1548_v10, %v1676_v51  ;;  %v8396_v18 = vsel %vm12148_vm4, %v1802_v43, -1e+30  ;;  %v8400_v59 = vsel %vm12031_vm13, %v1803_v37, -1e+30  ;;  %v1552_v33 = vadd.f32 %v7141_v41, %v8043_v0 }
 0x1f2   : > { %v1805_v29 = vmax.f32 %v1549_v9, %v1677_v48  ;;  %12552 = vst [vmem:[#allocation228_spill] sm:$0xff] %v8396_v18  ;;  %12553 = vst [vmem:[#allocation229_spill] sm:$0xff] %v8400_v59  ;;  %v2509_v10 = vmax.f32 %v2508_v46, %v8379_v50  ;;  %v2532_v48 = vmax.f32 %v8396_v18, %v8400_v59  ;;  %v1678_v9 = vmul.f32 0.2, %v8075_v47  ;;  %v8432_v6 = vpop.f32.mrf.mxu1 }
 0x1f3   : > { %v8409_v2 = vsel %vm12029_vm0, %v1804_v27, -1e+30  ;;  %v1553_v43 = vadd.f32 %v7145_v11, %v8043_v0  ;;  %v1679_v45 = vmul.f32 0.2, %v8081_v40  ;;  %v1540_v62 = vadd.f32 %v7141_v41, %v8085_v15  ;;  %v8426_v0 = vpop.f32.mrf.mxu0 }
 0x1f4   : > { %12554 = vst [vmem:[#allocation230_spill] sm:$0xff] %v8409_v2  ;;  %v8417_v37 = vsel %vm12027_vm8, %v1805_v29, -1e+30  ;;  %2510 = vmax.xlane.f32.xlu0 %v2509_v10  ;;  %v2533_v27 = vmax.f32 %v2532_v48, %v8409_v2  ;;  %v1680_v23 = vmul.f32 0.2, %v1552_v33  ;;  %v1541_v46 = vadd.f32 %v7145_v11, %v8085_v15  ;;  %v8465_v19 = vpop.f32.mrf.mxu1 }
 0x1f5   : > { %12555 = vst [vmem:[#allocation231_spill] sm:$0xff] %v8417_v37  ;;  %v1681_v51 = vmul.f32 0.2, %v1553_v43  ;;  %v1806_v29 = vmax.f32 %v8075_v47, %v1678_v9  ;;  %v1807_v24 = vmax.f32 %v8081_v40, %v1679_v45  ;;  %v1666_v60 = vmul.f32 0.2, %v8117_v16 }
 0x1f6   : > { %v1667_v12 = vmul.f32 0.2, %v8127_v57  ;;  %v2534_v10 = vmax.f32 %v2533_v27, %v8417_v37  ;;  %v1808_v48 = vmax.f32 %v1552_v33, %v1680_v23  ;;  %v1668_v59 = vmul.f32 0.2, %v1540_v62  ;;  %v8455_v23 = vpop.f32.mrf.mxu0  ;;  %v6456_v37 = vld [vmem:[%s6977_s30 + $0xd8] sm:$0xff] }
 0x1f7   : > { %v1809_v2 = vmax.f32 %v1553_v43, %v1681_v51  ;;  %v8437_v15 = vsel %vm2222_vm5, %v1806_v29, -1e+30  ;;  %v8441_v47 = vsel %vm2223_vm15, %v1807_v24, -1e+30  ;;  %v1669_v40 = vmul.f32 0.2, %v1541_v46 }
 0x1f8   : > { %12556 = vst [vmem:[#allocation232_spill] sm:$0xff] %v8437_v15  ;;  %12557 = vst [vmem:[#allocation233_spill] sm:$0xff] %v8441_v47  ;;  %v1794_v9 = vmax.f32 %v8117_v16, %v1666_v60  ;;  %2535 = vmax.xlane.f32.xlu1 %v2534_v10  ;;  %v8446_v45 = vsel %vm12159_vm3, %v1808_v48, -1e+30  ;;  %v2537_v43 = vmax.f32 %v8437_v15, %v8441_v47  ;;  %v12560_v29 = vld [vmem:[#allocation95_spill] sm:$0xff]  ;;  %v12563_v10 = vld [vmem:[#allocation96_spill] sm:$0xff] }
 0x1f9   : > { %12558 = vst [vmem:[#allocation234_spill] sm:$0xff] %v8446_v45  ;;  %v8450_v33 = vsel %vm12030_vm2, %v1809_v2, -1e+30  ;;  %v1795_v27 = vmax.f32 %v8127_v57, %v1667_v12  ;;  %v1796_v24 = vmax.f32 %v1540_v62, %v1668_v59  ;;  %v1797_v51 = vmax.f32 %v1541_v46, %v1669_v40 }
 0x1fa   : > { %12559 = vst [vmem:[#allocation235_spill] sm:$0xff] %v8450_v33  ;;  %v12561_v16 = vunpack.c.0.s8 %v12560_v29  ;;  %v12564_v48 = vunpack.c.0.s8 %v12563_v10  ;;  %v2538_v2 = vmax.f32 %v2537_v43, %v8446_v45  ;;  %vm12048_vm8 = vcmp.gt.f32.partialorder %v12566_v32, 0.0  ;;  %v8493_v43 = vpop.f32.mrf.mxu0 }
 0x1fb   : > { %vm12047_vm0 = vcmp.gt.f32.partialorder %v12567_v63, 0.0  ;;  %v1544_v57 = vadd.f32 %v7141_v41, %v8122_v61  ;;  %v8476_v12 = vsel %vm12048_vm8, %v1794_v9, -1e+30  ;;  %v1670_v29 = vmul.f32 0.2, %v8151_v14  ;;  %v6455_v63 = vld [vmem:[%s6977_s30 + $0xd0] sm:$0xff] }
 0x1fc   : > { %v8459_v60 = vcvt.s32.f32 %v12561_v16  ;;  %v8463_v30 = vcvt.s32.f32 %v12564_v48  ;;  %12568 = vst [vmem:[#allocation236_spill] sm:$0xff] %v8476_v12  ;;  %v8480_v59 = vsel %vm12047_vm0, %v1795_v27, -1e+30  ;;  %v2539_v62 = vmax.f32 %v2538_v2, %v8450_v33  ;;  %v6453_v48 = vld [vmem:[%s6977_s30 + $0xc0] sm:$0xff] }
 0x1fd   : > { %12569 = vst [vmem:[#allocation237_spill] sm:$0xff] %v8480_v59  ;;  %v2522_v9 = vmax.f32 %v8476_v12, %v8480_v59  ;;  %v1545_v27 = vadd.f32 %v7145_v11, %v8122_v61  ;;  %v1671_v16 = vmul.f32 0.2, %v8170_v49  ;;  %v1672_v10 = vmul.f32 0.2, %v1544_v57 }
 0x1fe   : > { %12562 = vst [vmem:[#allocation95_spill] sm:$0xff] %v8459_v60  ;;  %12565 = vst [vmem:[#allocation96_spill] sm:$0xff] %v8463_v30  ;;  %vm12046_vm2 = vcmp.gt.f32.partialorder %v8459_v60, 0.0  ;;  %vm12045_vm13 = vcmp.gt.f32.partialorder %v8463_v30, 0.0  ;;  %2540 = vmax.xlane.f32.xlu0 %v2539_v62  ;;  %v1958_v2 = vunpack.c.1.s8 %v6453_v48  ;;  %v6454_v30 = vld [vmem:[%s6977_s30 + $0xc8] sm:$0xff]  ;;  %v1960_v32 = vunpack.c.1.s8 %v6455_v63  ;;  %v8514_v48 = vld [vmem:[%s6977_s30 + $0xe0] sm:$0xff] }
 0x1ff   : > { %v8485_v46 = vsel %vm12046_vm2, %v1796_v24, -1e+30  ;;  %v8489_v40 = vsel %vm12045_vm13, %v1797_v51, -1e+30  ;;  %v8499_v24 = vpop.f32.mrf.mxu1  ;;  %v1959_v60 = vunpack.c.1.s8 %v6454_v30  ;;  %v1673_v33 = vmul.f32 0.2, %v1545_v27  ;;  %v8516_v30 = vpop.f32.mrf.mxu0 }
 0x200   : > { %12570 = vst [vmem:[#allocation238_spill] sm:$0xff] %v8485_v46  ;;  %12571 = vst [vmem:[#allocation239_spill] sm:$0xff] %v8489_v40  ;;  %v2523_v51 = vmax.f32 %v2522_v9, %v8485_v46  ;;  %v1798_v61 = vmax.f32 %v8151_v14, %v1670_v29  ;;  %v1799_v45 = vmax.f32 %v8170_v49, %v1671_v16  ;;  %v1961_v62 = vunpack.c.1.s8 %v6456_v37 }
 0x201   : > { %v1800_v47 = vmax.f32 %v1544_v57, %v1672_v10  ;;  %v8509_v18 = vcvt.s32.f32 %v1958_v2  ;;  %v8511_v9 = vcvt.s32.f32 %v1959_v60  ;;  %v1801_v63 = vmax.f32 %v1545_v27, %v1673_v33  ;;  %v8524_v57 = vpop.f32.mrf.mxu1  ;;  %v8558_v2 = vpop.f32.mrf.mxu0 }
 0x202   : > { %v2524_v15 = vmax.f32 %v2523_v51, %v8489_v40  ;;  %v8518_v46 = vcvt.s32.f32 %v1960_v32  ;;  %v1564_v14 = vadd.f32 %v7141_v41, %v8176_v21  ;;  %v1565_v49 = vadd.f32 %v7145_v11, %v8176_v21  ;;  %v8532_v32 = vld [vmem:[%s6977_s30 + $0xe8] sm:$0xff]  ;;  %v8556_v51 = vld [vmem:[%s6977_s30 + $0xf8] sm:$0xff] }
 0x203   : > { %12572 = vst [vmem:[#allocation240_spill] sm:$0xff] %v8509_v18  ;;  %12573 = vst [vmem:[#allocation241_spill] sm:$0xff] %v8511_v9  ;;  %v8526_v37 = vcvt.s32.f32 %v1961_v62  ;;  %vm12066_vm13 = vcmp.gt.f32.partialorder %v8509_v18, 0.0  ;;  %vm12065_vm2 = vcmp.gt.f32.partialorder %v8511_v9, 0.0  ;;  %v1690_v33 = vmul.f32 0.2, %v8207_v54 }
 0x204   : > { %12574 = vst [vmem:[#allocation242_spill] sm:$0xff] %v8518_v46  ;;  %2525 = vmax.xlane.f32.xlu1 %v2524_v15  ;;  %vm12064_vm0 = vcmp.gt.f32.partialorder %v8518_v46, 0.0  ;;  %v8537_v60 = vsel %vm12066_vm13, %v1798_v61, -1e+30  ;;  %v8541_v21 = vsel %vm12065_vm2, %v1799_v45, -1e+30  ;;  %v1978_v27 = vunpack.c.2.s8 %v8514_v48  ;;  %v8565_v46 = vpop.f32.mrf.mxu1 }
 0x205   : > { %12575 = vst [vmem:[#allocation243_spill] sm:$0xff] %v8526_v37  ;;  %12576 = vst [vmem:[#allocation244_spill] sm:$0xff] %v8537_v60  ;;  %v8544_v15 = vld [vmem:[%s6977_s30 + $0xf0] sm:$0xff]  ;;  %vm12063_vm8 = vcmp.gt.f32.partialorder %v8526_v37, 0.0  ;;  %v8550_v29 = vsel %vm12064_vm0, %v1800_v47, -1e+30  ;;  %v2527_v16 = vmax.f32 %v8537_v60, %v8541_v21  ;;  %v1818_v9 = vmax.f32 %v8207_v54, %v1690_v33 }
 0x206   : > { %12577 = vst [vmem:[#allocation245_spill] sm:$0xff] %v8541_v21  ;;  %12578 = vst [vmem:[#allocation246_spill] sm:$0xff] %v8550_v29  ;;  %v1691_v10 = vmul.f32 0.2, %v8217_v58  ;;  %v8562_v45 = vsel %vm12063_vm8, %v1801_v63, -1e+30  ;;  %v1979_v21 = vunpack.c.2.s8 %v8532_v32  ;;  %v1980_v60 = vunpack.c.2.s8 %v8544_v15 }
 0x207   : > { %12579 = vst [vmem:[#allocation247_spill] sm:$0xff] %v8562_v45  ;;  %v1692_v61 = vmul.f32 0.2, %v1564_v14  ;;  %v1693_v62 = vmul.f32 0.2, %v1565_v49  ;;  %v2528_v47 = vmax.f32 %v2527_v16, %v8550_v29  ;;  %v1981_v37 = vunpack.c.2.s8 %v8556_v51  ;;  %s6461_s30 = sshll.u32 %s6538_s23, 4  ;;  %s6462_s30 = int_to_ptr.vmem [resolvable:$false] %s6461_s30 }
 0x208   : > { %v1819_v18 = vmax.f32 %v8217_v58, %v1691_v10  ;;  %v8572_v63 = vcvt.s32.f32 %v1978_v27  ;;  %v8575_v50 = vcvt.s32.f32 %v1979_v21  ;;  %v8577_v54 = vcvt.s32.f32 %v1980_v60  ;;  %v8581_v58 = vpop.f32.mrf.mxu0  ;;  %v8589_v27 = vpop.f32.mrf.mxu1  ;;  %s6463_s8 = scalar_lea.vmem %s6462_s30, 8192  ;;  %p6464_p2 = scmp.lt.s32.totalorder %s11575_s19, %s6462_s30 }
 0x209   : > { %v1820_v40 = vmax.f32 %v1564_v14, %v1692_v61  ;;  %v1821_v59 = vmax.f32 %v1565_v49, %v1693_v62  ;;  %v2529_v12 = vmax.f32 %v2528_v47, %v8562_v45  ;;  %v1568_v33 = vadd.f32 %v7141_v41, %v8223_v36  ;;  %p6465_p3 = scmp.lt.s32.totalorder %s6463_s8, %s6457_s22 }
 0x20a   : > { %12580 = vst [vmem:[#allocation248_spill] sm:$0xff] %v8572_v63  ;;  %12581 = vst [vmem:[#allocation249_spill] sm:$0xff] %v8575_v50  ;;  %v8583_v16 = vcvt.s32.f32 %v1981_v37  ;;  %vm12082_vm8 = vcmp.gt.f32.partialorder %v8572_v63, 0.0  ;;  %v1569_v14 = vadd.f32 %v7145_v11, %v8223_v36  ;;  %v1694_v49 = vmul.f32 0.2, %v8253_v31  ;;  %v8614_v47 = vpop.f32.mrf.mxu0 }
 0x20b   : > { %12582 = vst [vmem:[#allocation250_spill] sm:$0xff] %v8577_v54  ;;  %2530 = vmax.xlane.f32.xlu0 %v2529_v12  ;;  %vm12081_vm0 = vcmp.gt.f32.partialorder %v8575_v50, 0.0  ;;  %vm12080_vm2 = vcmp.gt.f32.partialorder %v8577_v54, 0.0  ;;  %v8595_v60 = vsel %vm12082_vm8, %v1818_v9, -1e+30  ;;  %v1982_v50 = vunpack.c.3.s8 %v8514_v48  ;;  %p6466_p5 = por %p6465_p3, %p6464_p2 }
 0x20c   : > { %12583 = vst [vmem:[#allocation251_spill] sm:$0xff] %v8583_v16  ;;  %12584 = vst [vmem:[#allocation252_spill] sm:$0xff] %v8595_v60  ;;  %v1695_v37 = vmul.f32 0.2, %v8262_v38  ;;  %vm12079_vm13 = vcmp.gt.f32.partialorder %v8583_v16, 0.0  ;;  %v1822_v12 = vmax.f32 %v8253_v31, %v1694_v49  ;;  %v1984_v54 = vunpack.c.3.s8 %v8544_v15  ;;  %v8620_v31 = vpop.f32.mrf.mxu1 }
 0x20d   : > { %v8601_v36 = vsel %vm12081_vm0, %v1819_v18, -1e+30  ;;  %v8605_v21 = vsel %vm12080_vm2, %v1820_v40, -1e+30  ;;  %v8610_v10 = vsel %vm12079_vm13, %v1821_v59, -1e+30  ;;  %v1983_v40 = vunpack.c.3.s8 %v8532_v32  ;;  %p6467_p6 = pnand %p6466_p5, %p6460_p1 }
 0x20e   : > { %12585 = vst [vmem:[#allocation253_spill] sm:$0xff] %v8601_v36  ;;  %12586 = vst [vmem:[#allocation254_spill] sm:$0xff] %v8605_v21  ;;  %v2552_v9 = vmax.f32 %v8595_v60, %v8601_v36  ;;  %v1696_v61 = vmul.f32 0.2, %v1568_v33  ;;  %v1697_v62 = vmul.f32 0.2, %v1569_v14  ;;  %v1823_v18 = vmax.f32 %v8262_v38, %v1695_v37 }
 0x20f   : > { %12587 = vst [vmem:[#allocation255_spill] sm:$0xff] %v8610_v10  ;;  %v1985_v63 = vunpack.c.3.s8 %v8556_v51  ;;  %v8624_v36 = vcvt.s32.f32 %v1982_v50  ;;  %v8626_v60 = vcvt.s32.f32 %v1983_v40  ;;  %v8628_v45 = vcvt.s32.f32 %v1984_v54  ;;  %v8644_v54 = vpop.f32.mrf.mxu1 }
 0x210   : > { %v2553_v59 = vmax.f32 %v2552_v9, %v8605_v21  ;;  %v1824_v49 = vmax.f32 %v1568_v33, %v1696_v61  ;;  %v1825_v16 = vmax.f32 %v1569_v14, %v1697_v62  ;;  %v1556_v38 = vadd.f32 %v7141_v41, %v8270_v7  ;;  %v8638_v14 = vpop.f32.mrf.mxu0 }
 0x211   : > { %12588 = vst [vmem:[#allocation256_spill] sm:$0xff] %v8624_v36  ;;  %12589 = vst [vmem:[#allocation257_spill] sm:$0xff] %v8626_v60  ;;  %v8633_v29 = vcvt.s32.f32 %v1985_v63  ;;  %v1557_v9 = vadd.f32 %v7145_v11, %v8270_v7  ;;  %v1682_v33 = vmul.f32 0.2, %v8302_v20  ;;  %vm12098_vm13 = vcmp.gt.f32.partialorder %v8624_v36, 0.0 }
 0x212   : > { %12590 = vst [vmem:[#allocation258_spill] sm:$0xff] %v8628_v45  ;;  %v2554_v37 = vmax.f32 %v2553_v59, %v8610_v10  ;;  %vm12097_vm2 = vcmp.gt.f32.partialorder %v8626_v60, 0.0  ;;  %vm12096_vm0 = vcmp.gt.f32.partialorder %v8628_v45, 0.0  ;;  %v1683_v50 = vmul.f32 0.2, %v8310_v55  ;;  %v8674_v45 = vpop.f32.mrf.mxu1 }
 0x213   : > { %12591 = vst [vmem:[#allocation259_spill] sm:$0xff] %v8633_v29  ;;  %vm12095_vm8 = vcmp.gt.f32.partialorder %v8633_v29, 0.0  ;;  %v8649_v7 = vsel %vm12098_vm13, %v1822_v12, -1e+30  ;;  %v8653_v63 = vsel %vm12097_vm2, %v1823_v18, -1e+30  ;;  %v1810_v61 = vmax.f32 %v8302_v20, %v1682_v33  ;;  %v8669_v20 = vpop.f32.mrf.mxu0 }
 0x214   : > { %2555 = vmax.xlane.f32.xlu1 %v2554_v37  ;;  %12592 = vst [vmem:[#allocation260_spill] sm:$0xff] %v8649_v7  ;;  %12593 = vst [vmem:[#allocation261_spill] sm:$0xff] %v8653_v63  ;;  %v8658_v62 = vsel %vm12096_vm0, %v1824_v49, -1e+30  ;;  %v8662_v40 = vsel %vm12095_vm8, %v1825_v16, -1e+30  ;;  %v2557_v59 = vmax.f32 %v8649_v7, %v8653_v63  ;;  %v1811_v36 = vmax.f32 %v8310_v55, %v1683_v50 }
 0x215   : > { %12594 = vst [vmem:[#allocation262_spill] sm:$0xff] %v8658_v62  ;;  %12595 = vst [vmem:[#allocation263_spill] sm:$0xff] %v8662_v40  ;;  %v1684_v37 = vmul.f32 0.2, %v1556_v38  ;;  %v1685_v12 = vmul.f32 0.2, %v1557_v9  ;;  %v1970_v18 = vunpack.c.0.s8 %v8514_v48  ;;  %v1971_v60 = vunpack.c.0.s8 %v8532_v32 }
 0x216   : > { %v2558_v49 = vmax.f32 %v2557_v59, %v8658_v62  ;;  %v1972_v29 = vunpack.c.0.s8 %v8544_v15  ;;  %v1973_v16 = vunpack.c.0.s8 %v8556_v51  ;;  %v1560_v55 = vadd.f32 %v7141_v41, %v8364_v35  ;;  %v8697_v41 = vpop.f32.mrf.mxu0 }
 0x217   : > { %v1812_v33 = vmax.f32 %v1556_v38, %v1684_v37  ;;  %v1813_v63 = vmax.f32 %v1557_v9, %v1685_v12  ;;  %v8676_v7 = vcvt.s32.f32 %v1970_v18  ;;  %v8678_v10 = vcvt.s32.f32 %v1971_v60  ;;  %v8695_v37 = vpop.xlane.xlu0 %2415 }
 0x218   : > { %v2559_v50 = vmax.f32 %v2558_v49, %v8662_v40  ;;  %v8683_v21 = vcvt.s32.f32 %v1972_v29  ;;  %v8685_v59 = vcvt.s32.f32 %v1973_v16  ;;  %v8689_v38 = vadd.f32 %v7145_v11, %v8364_v35  ;;  %v8709_v29 = vpop.f32.mrf.mxu1 }
 0x219   : > { %12596 = vst [vmem:[#allocation264_spill] sm:$0xff] %v8676_v7  ;;  %12597 = vst [vmem:[#allocation265_spill] sm:$0xff] %v8678_v10  ;;  %vm12113_vm8 = vcmp.gt.f32.partialorder %v8676_v7, 0.0  ;;  %vm12112_vm0 = vcmp.gt.f32.partialorder %v8678_v10, 0.0  ;;  %v1686_v60 = vmul.f32 0.2, %v8386_v42  ;;  %v8729_v7 = vpop.f32.mrf.mxu0 }
 0x21a   : > { %12598 = vst [vmem:[#allocation266_spill] sm:$0xff] %v8683_v21  ;;  %12599 = vst [vmem:[#allocation267_spill] sm:$0xff] %v8685_v59  ;;  %v1687_v9 = vmul.f32 0.2, %v8390_v4  ;;  %2560 = vmax.xlane.f32.xlu0 %v2559_v50  ;;  %vm12111_vm2 = vcmp.gt.f32.partialorder %v8683_v21, 0.0  ;;  %vm12110_vm13 = vcmp.gt.f32.partialorder %v8685_v59, 0.0  ;;  %v1976_v21 = vunpack.c.1.s8 %v8544_v15 }
 0x21b   : > { %v8703_v11 = vsel %vm12113_vm8, %v1810_v61, -1e+30  ;;  %v8707_v35 = vsel %vm12112_vm0, %v1811_v36, -1e+30  ;;  %v8713_v12 = vsel %vm12111_vm2, %v1812_v33, -1e+30  ;;  %v1974_v36 = vunpack.c.1.s8 %v8514_v48  ;;  %v8737_v48 = vpop.f32.mrf.mxu1  ;;  %v8744_v15 = vpop.xlane.xlu0 %2405 }
 0x21c   : > { %12600 = vst [vmem:[#allocation268_spill] sm:$0xff] %v8703_v11  ;;  %12601 = vst [vmem:[#allocation269_spill] sm:$0xff] %v8707_v35  ;;  %v2542_v18 = vmax.f32 %v8703_v11, %v8707_v35  ;;  %v8719_v49 = vsel %vm12110_vm13, %v1813_v63, -1e+30  ;;  %v1688_v16 = vmul.f32 0.2, %v1560_v55  ;;  %v1814_v10 = vmax.f32 %v8386_v42, %v1686_v60 }
 0x21d   : > { %12602 = vst [vmem:[#allocation270_spill] sm:$0xff] %v8713_v12  ;;  %12603 = vst [vmem:[#allocation271_spill] sm:$0xff] %v8719_v49  ;;  %v8722_v61 = vmul.f32 0.2, %v8689_v38  ;;  %v1975_v33 = vunpack.c.1.s8 %v8532_v32  ;;  %v1815_v59 = vmax.f32 %v8390_v4, %v1687_v9  ;;  %v1977_v63 = vunpack.c.1.s8 %v8556_v51 }
 0x21e   : > { %v2543_v50 = vmax.f32 %v2542_v18, %v8713_v12  ;;  %v8733_v35 = vcvt.s32.f32 %v1974_v36  ;;  %v4259_v11 = vpack.c.bf16 %v7755_v34, %v7713_v13  ;;  %v8742_v32 = vcvt.s32.f32 %v1976_v21  ;;  %v8755_v13 = vpop.f32.mrf.mxu0  ;;  %v8763_v21 = vpop.xlane.xlu1 %2410 }
 0x21f   : > { %v8740_v42 = vcvt.s32.f32 %v1975_v33  ;;  %v1816_v60 = vmax.f32 %v1560_v55, %v1688_v16  ;;  %v8746_v12 = vcvt.s32.f32 %v1977_v63  ;;  %v1817_v4 = vmax.f32 %v8689_v38, %v8722_v61  ;;  %v5934_v55 = vpop.f32.mrf.mxu1  ;;  %v12612_v63 = vld [vmem:[#allocation153_spill] sm:$0xff] }
 0x220   : > { %12604 = vst [vmem:[#allocation272_spill] sm:$0xff] %v8733_v35  ;;  %v2544_v18 = vmax.f32 %v2543_v50, %v8719_v49  ;;  %12606 = vst [vmem:[#allocation274_spill] sm:$0xff] %v8742_v32  ;;  %vm12147_vm13 = vcmp.gt.f32.partialorder %v8733_v35, 0.0  ;;  %5607 = vmatprep.subr.bf16.mxu0 %v4259_v11  ;;  %vm12143_vm0 = vcmp.gt.f32.partialorder %v8742_v32, 0.0  ;;  %v6536_v16 = vmov -1e+30   ;;  %v8809_v61 = vpop.f32.mrf.mxu0 }
 0x221   : > { %12605 = vst [vmem:[#allocation273_spill] sm:$0xff] %v8740_v42  ;;  %12607 = vst [vmem:[#allocation275_spill] sm:$0xff] %v8746_v12  ;;  %vm12146_vm2 = vcmp.gt.f32.partialorder %v8740_v42, 0.0  ;;  %v8753_v34 = vsel %vm12147_vm13, %v1814_v10, -1e+30  ;;  %vm12142_vm8 = vcmp.gt.f32.partialorder %v8746_v12, 0.0  ;;  %v8772_v11 = vpop.f32.mrf.mxu1  ;;  %v4267_v50 = vpack.c.bf16 %v8255_v56, %v8180_v5 }
 0x222   : > { %2545 = vmax.xlane.f32.xlu1 %v2544_v18  ;;  %12608 = vst [vmem:[#allocation276_spill] sm:$0xff] %v8753_v34  ;;  %v8761_v51 = vsel %vm12146_vm2, %v1815_v59, -1e+30  ;;  %v8770_v10 = vsel %vm12143_vm0, %v1816_v60, -1e+30  ;;  %363 = vst.msk [vmem:[#allocation3 + $0x10] sm:$0xff] %vm12140_vm1, %v6536_v16  ;;  %v8807_v59 = vpop.xlane.xlu0 %2420  ;;  %v2436_v32 = vpop.xlane.xlu1 %2435  ;;  %v4251_v42 = vpack.c.bf16 %v8697_v41, %v8638_v14  ;;  %v4266_v56 = vpack.c.bf16 %v8297_v1, %v8213_v26 }
 0x223   : > { %12609 = vst [vmem:[#allocation277_spill] sm:$0xff] %v8761_v51  ;;  %v2547_v9 = vmax.f32 %v8753_v34, %v8761_v51  ;;  %12610 = vst [vmem:[#allocation278_spill] sm:$0xff] %v8770_v10  ;;  %v8813_v36 = vsel %vm12142_vm8, %v1817_v4, -1e+30  ;;  %v12613_v18 = vld [vmem:[#allocation158_spill] sm:$0xff]  ;;  %v8825_v4 = vpop.f32.mrf.mxu0  ;;  %v4250_v5 = vpack.c.bf16 %v8729_v7, %v8669_v20  ;;  %v4273_v1 = vpack.c.bf16 %v8644_v54, %v8589_v27 }
 0x224   : > { %361 = vst.msk [vmem:[#allocation3] sm:$0xff] %vm12140_vm1, %v6536_v16  ;;  %362 = vst.msk [vmem:[#allocation3 + $0x8] sm:$0xff] %vm12140_vm1, %v6536_v16  ;;  %v4258_v60 = vpack.c.bf16 %v12613_v18, %v12612_v63  ;;  %5608 = vmatpush3.bf16.msra.mxu0 %v4251_v42  ;;  %v4265_v14 = vpack.c.bf16 %v8101_v3, %v8027_v28  ;;  %v12617_v63 = vld [vmem:[#allocation181_spill] sm:$0xff] }
 0x225   : > { %v2548_v38 = vmax.f32 %v2547_v9, %v8770_v10  ;;  %364 = vst.msk [vmem:[#allocation3 + $0x18] sm:$0xff] %vm12140_vm1, %v6536_v16  ;;  %365 = vst.msk [vmem:[#allocation3 + $0x20] sm:$0xff] %vm12140_vm1, %v6536_v16  ;;  %v4275_v9 = vpack.c.bf16 %v5934_v55, %v8709_v29  ;;  %v6537_v29 = vmov 0.0   ;;  %v4272_v55 = vpack.c.bf16 %v8674_v45, %v8620_v31 }
 0x226   : > { %366 = vst.msk [vmem:[#allocation3 + $0x28] sm:$0xff] %vm12140_vm1, %v6536_v16  ;;  %367 = vst.msk [vmem:[#allocation3 + $0x30] sm:$0xff] %vm12140_vm1, %v6536_v16  ;;  %v2441_v26 = vpop.xlane.xlu0 %2440  ;;  %5609 = vmatprep.subr.bf16.mxu0 %v4258_v60 }
 0x227   : > { %368 = vst.msk [vmem:[#allocation3 + $0x38] sm:$0xff] %vm12140_vm1, %v6536_v16  ;;  %369 = vst.msk [vmem:[#allocation3 + $0x40] sm:$0xff] %vm12140_vm1, %v6536_v16  ;;  %v2549_v33 = vmax.f32 %v2548_v38, %v8813_v36  ;;  %5719 = vmatprep.subr.bf16.mxu1 %v4275_v9  ;;  %v12618_v9 = vld [vmem:[#allocation176_spill] sm:$0xff] }
 0x228   : > { %370 = vst.msk [vmem:[#allocation3 + $0x48] sm:$0xff] %vm12140_vm1, %v6536_v16  ;;  %371 = vst.msk [vmem:[#allocation3 + $0x50] sm:$0xff] %vm12140_vm1, %v6536_v16  ;;  %5720 = vmatpush3.bf16.msra.mxu1 %v4267_v50  ;;  %v2426_v50 = vpop.xlane.xlu1 %2425  ;;  %5610 = vmatpush3.bf16.msra.mxu0 %v4250_v5  ;;  %v12615_v5 = vld [vmem:[#allocation201_spill] sm:$0xff] }
 0x229   : > { %372 = vst.msk [vmem:[#allocation3 + $0x58] sm:$0xff] %vm12140_vm1, %v6536_v16  ;;  %373 = vst.msk [vmem:[#allocation3 + $0x60] sm:$0xff] %vm12140_vm1, %v6536_v16  ;;  %2550 = vmax.xlane.f32.xlu0 %v2549_v33  ;;  %v8867_v7 = vld [vmem:[#allocation3 + $0x10] sm:$0xff]  ;;  %v12619_v33 = vld [vmem:[#allocation186_spill] sm:$0xff] }
 0x22a   : > { %374 = vst.msk [vmem:[#allocation3 + $0x68] sm:$0xff] %vm12140_vm1, %v6536_v16  ;;  %375 = vst.msk [vmem:[#allocation3 + $0x70] sm:$0xff] %vm12140_vm1, %v6536_v16 }
 0x22b   : > { %376 = vst.msk [vmem:[#allocation3 + $0x78] sm:$0xff] %vm12140_vm1, %v6536_v16  ;;  %377 = vst.msk [vmem:[#allocation3 + $0x80] sm:$0xff] %vm12140_vm1, %v6536_v16  ;;  %v8869_v20 = vld [vmem:[#allocation3] sm:$0xff]  ;;  %v8871_v41 = vld [vmem:[#allocation3 + $0x8] sm:$0xff] }
 0x22c   : > { %378 = vst.msk [vmem:[#allocation3 + $0x88] sm:$0xff] %vm12140_vm1, %v6536_v16  ;;  %379 = vst.msk [vmem:[#allocation3 + $0x90] sm:$0xff] %vm12140_vm1, %v6536_v16  ;;  %v8879_v42 = vmax.f32 %v8869_v20, %v8744_v15  ;;  %v8883_v27 = vmax.f32 %v8871_v41, %v8763_v21  ;;  %v8885_v54 = vld [vmem:[#allocation3 + $0x18] sm:$0xff]  ;;  %v8905_v38 = vld [vmem:[#allocation3 + $0x20] sm:$0xff] }
 0x22d   : > { %380 = vst.msk [vmem:[#allocation3 + $0x98] sm:$0xff] %vm12140_vm1, %v6536_v16  ;;  %381 = vst.msk [vmem:[#allocation3 + $0xa0] sm:$0xff] %vm12140_vm1, %v6536_v16  ;;  %v8887_v28 = vld [vmem:[#allocation3 + $0x30] sm:$0xff]  ;;  %v8934_v60 = vld [vmem:[#allocation3 + $0x28] sm:$0xff] }
 0x22e   : > { %382 = vst.msk [vmem:[#allocation3 + $0xa8] sm:$0xff] %vm12140_vm1, %v6536_v16  ;;  %383 = vst.msk [vmem:[#allocation3 + $0xb0] sm:$0xff] %vm12140_vm1, %v6536_v16  ;;  %v8889_v3 = vld [vmem:[#allocation3 + $0x38] sm:$0xff]  ;;  %v8900_v15 = vmax.f32 %v8887_v28, %v2436_v32  ;;  %v4262_v32 = vpack.c.bf16 %v12619_v33, %v12618_v9  ;;  %v12620_v9 = vld [vmem:[#allocation161_spill] sm:$0xff] }
 0x22f   : > { %384 = vst.msk [vmem:[#allocation3 + $0xb8] sm:$0xff] %vm12140_vm1, %v6536_v16  ;;  %385 = vst.msk [vmem:[#allocation3 + $0xc0] sm:$0xff] %vm12140_vm1, %v6536_v16  ;;  %v8903_v21 = vmax.f32 %v8889_v3, %v2441_v26  ;;  %v2431_v26 = vpop.xlane.xlu0 %2430  ;;  %v8954_v18 = vld [vmem:[#allocation3 + $0x50] sm:$0xff]  ;;  %v9001_v45 = vld [vmem:[#allocation3 + $0x48] sm:$0xff] }
 0x230   : > { %386 = vst.msk [vmem:[#allocation3 + $0xc8] sm:$0xff] %vm12140_vm1, %v6536_v16  ;;  %387 = vst.msk [vmem:[#allocation3 + $0xd0] sm:$0xff] %vm12140_vm1, %v6536_v16 }
 0x231   : > { %388 = vst.msk [vmem:[#allocation3 + $0xd8] sm:$0xff] %vm12140_vm1, %v6536_v16  ;;  %389 = vst.msk [vmem:[#allocation3 + $0xe0] sm:$0xff] %vm12140_vm1, %v6536_v16 }
 0x232   : > { %390 = vst.msk [vmem:[#allocation3 + $0xe8] sm:$0xff] %vm12140_vm1, %v6536_v16  ;;  %391 = vst.msk [vmem:[#allocation3 + $0xf0] sm:$0xff] %vm12140_vm1, %v6536_v16 }
 0x233   : > { %392 = vst.msk [vmem:[#allocation3 + $0xf8] sm:$0xff] %vm12140_vm1, %v6536_v16  ;;  %12611 = vst [vmem:[#allocation279_spill] sm:$0xff] %v8813_v36  ;;  %v4274_v16 = vpack.c.bf16 %v8772_v11, %v8737_v48  ;;  %v8875_v48 = vmax.f32 %v8867_v7, %v8695_v37  ;;  %v8893_v11 = vpop.f32.mrf.mxu0  ;;  %v8897_v37 = vmax.f32 %v8885_v54, %v8807_v59  ;;  %2692 = vperm.xlu1 %6015, %v8879_v42  }
 0x234   : > { %395 = vst.msk [vmem:[#allocation4 + $0x10] sm:$0xff] %vm12140_vm1, %v6537_v29  ;;  %393 = vst.msk [vmem:[#allocation4] sm:$0xff] %vm12140_vm1, %v6537_v29  ;;  %v8920_v59 = vmax.f32 %v8905_v38, %v2426_v50  ;;  %v8948_v50 = vmax.f32 %v8934_v60, %v2431_v26 }
 0x235   : > { %394 = vst.msk [vmem:[#allocation4 + $0x8] sm:$0xff] %vm12140_vm1, %v6537_v29  ;;  %396 = vst.msk [vmem:[#allocation4 + $0x18] sm:$0xff] %vm12140_vm1, %v6537_v29  ;;  %5721 = vmatprep.subr.bf16.mxu1 %v4274_v16  ;;  %v8940_v16 = vpop.f32.mrf.mxu0  ;;  %v12630_v34 = vsub.f32 %v8885_v54, %v8897_v37 }
 0x236   : > { %397 = vst.msk [vmem:[#allocation4 + $0x20] sm:$0xff] %vm12140_vm1, %v6537_v29  ;;  %398 = vst.msk [vmem:[#allocation4 + $0x28] sm:$0xff] %vm12140_vm1, %v6537_v29  ;;  %5722 = vmatpush3.bf16.msra.mxu1 %v4266_v56  ;;  %v12614_v56 = vld [vmem:[#allocation195_spill] sm:$0xff]  ;;  %v9169_v10 = vld [vmem:[#allocation3 + $0xc0] sm:$0xff] }
 0x237   : > { %399 = vst.msk [vmem:[#allocation4 + $0x30] sm:$0xff] %vm12140_vm1, %v6537_v29  ;;  %400 = vst.msk [vmem:[#allocation4 + $0x38] sm:$0xff] %vm12140_vm1, %v6537_v29  ;;  %5723 = vmatprep.subr.bf16.mxu1 %v4273_v1  ;;  %v4271_v1 = vpack.c.bf16 %v8524_v57, %v8465_v19  ;;  %2702 = vperm.xlu1 %6015, %v8875_v48   ;;  %v4270_v19 = vpack.c.bf16 %v8565_v46, %v8499_v24  ;;  %v2456_v57 = vpop.xlane.xlu1 %2455  ;;  %v9189_v62 = vld [vmem:[#allocation3 + $0xc8] sm:$0xff]  ;;  %v2632_v39 = vmul.f32 1.442695, %v12630_v34 }
 0x238   : > { %401 = vst.msk [vmem:[#allocation4 + $0x40] sm:$0xff] %vm12140_vm1, %v6537_v29  ;;  %402 = vst.msk [vmem:[#allocation4 + $0x48] sm:$0xff] %vm12140_vm1, %v6537_v29  ;;  %v4269_v46 = vpack.c.bf16 %v8404_v25, %v8331_v52  ;;  %v8990_v25 = vld [vmem:[#allocation3 + $0x40] sm:$0xff] }
 0x239   : > { %403 = vst.msk [vmem:[#allocation4 + $0x50] sm:$0xff] %vm12140_vm1, %v6537_v29  ;;  %404 = vst.msk [vmem:[#allocation4 + $0x58] sm:$0xff] %vm12140_vm1, %v6537_v29 }
 0x23a   : > { %405 = vst.msk [vmem:[#allocation4 + $0x60] sm:$0xff] %vm12140_vm1, %v6537_v29  ;;  %406 = vst.msk [vmem:[#allocation4 + $0x68] sm:$0xff] %vm12140_vm1, %v6537_v29  ;;  %5724 = vmatpush3.bf16.msra.mxu1 %v4265_v14 }
 0x23b   : > { %407 = vst.msk [vmem:[#allocation4 + $0x70] sm:$0xff] %vm12140_vm1, %v6537_v29  ;;  %408 = vst.msk [vmem:[#allocation4 + $0x78] sm:$0xff] %vm12140_vm1, %v6537_v29  ;;  %5725 = vmatprep.subr.bf16.mxu1 %v4272_v55  ;;  %v8964_v55 = vmax.f32 %v8954_v18, %v2456_v57  ;;  %2707 = vperm.xlu1 %6015, %v8897_v37   ;;  %v12621_v57 = vld [vmem:[#allocation167_spill] sm:$0xff] }
 0x23c   : > { %409 = vst.msk [vmem:[#allocation4 + $0x80] sm:$0xff] %vm12140_vm1, %v6537_v29  ;;  %410 = vst.msk [vmem:[#allocation4 + $0x88] sm:$0xff] %vm12140_vm1, %v6537_v29  ;;  %v4261_v31 = vpack.c.bf16 %v12621_v57, %v12620_v9  ;;  %v12622_v9 = vld [vmem:[#allocation164_spill] sm:$0xff]  ;;  %v12623_v57 = vld [vmem:[#allocation170_spill] sm:$0xff] }
 0x23d   : > { %411 = vst.msk [vmem:[#allocation4 + $0x90] sm:$0xff] %vm12140_vm1, %v6537_v29  ;;  %412 = vst.msk [vmem:[#allocation4 + $0x98] sm:$0xff] %vm12140_vm1, %v6537_v29 }
 0x23e   : > { %413 = vst.msk [vmem:[#allocation4 + $0xa0] sm:$0xff] %vm12140_vm1, %v6537_v29  ;;  %414 = vst.msk [vmem:[#allocation4 + $0xa8] sm:$0xff] %vm12140_vm1, %v6537_v29 }
 0x23f   : > { %415 = vst.msk [vmem:[#allocation4 + $0xb0] sm:$0xff] %vm12140_vm1, %v6537_v29  ;;  %416 = vst.msk [vmem:[#allocation4 + $0xb8] sm:$0xff] %vm12140_vm1, %v6537_v29  ;;  %2717 = vperm.xlu1 %6015, %v8948_v50   ;;  %2697 = vperm.xlu0 %6016, %v8883_v27  }
 0x240   : > { %417 = vst.msk [vmem:[#allocation4 + $0xc0] sm:$0xff] %vm12140_vm1, %v6537_v29  ;;  %418 = vst.msk [vmem:[#allocation4 + $0xc8] sm:$0xff] %vm12140_vm1, %v6537_v29 }
 0x241   : > { %419 = vst.msk [vmem:[#allocation4 + $0xd0] sm:$0xff] %vm12140_vm1, %v6537_v29  ;;  %420 = vst.msk [vmem:[#allocation4 + $0xd8] sm:$0xff] %vm12140_vm1, %v6537_v29 }
 0x242   : > { %421 = vst.msk [vmem:[#allocation4 + $0xe0] sm:$0xff] %vm12140_vm1, %v6537_v29  ;;  %422 = vst.msk [vmem:[#allocation4 + $0xe8] sm:$0xff] %vm12140_vm1, %v6537_v29 }
 0x243   : > { %423 = vst.msk [vmem:[#allocation4 + $0xf0] sm:$0xff] %vm12140_vm1, %v6537_v29  ;;  %424 = vst.msk [vmem:[#allocation4 + $0xf8] sm:$0xff] %vm12140_vm1, %v6537_v29  ;;  %v4264_v29 = vpack.c.bf16 %v12615_v5, %v12614_v56  ;;  %v8956_v56 = vpop.f32.mrf.mxu0  ;;  %v12616_v5 = vld [vmem:[#allocation172_spill] sm:$0xff]  ;;  %2727 = vperm.xlu1 %6015, %v8903_v21   ;;  %2712 = vperm.xlu0 %6016, %v8920_v59  }
 0x244   : > { %4664 = vst.msk [vmem:[#allocation3 + $0x10] sm:$0xff] %vm12140_vm1, %v8875_v48  ;;  %4662 = vst.msk [vmem:[#allocation3] sm:$0xff] %vm12140_vm1, %v8879_v42  ;;  %v4263_v14 = vpack.c.bf16 %v12617_v63, %v12616_v5  ;;  %v4268_v63 = vpack.c.bf16 %v8432_v6, %v8368_v44  ;;  %v4260_v6 = vpack.c.bf16 %v12623_v57, %v12622_v9  ;;  %v12625_v57 = vld [vmem:[#allocation220_spill] sm:$0xff] }
 0x245   : > { %4663 = vst.msk [vmem:[#allocation3 + $0x8] sm:$0xff] %vm12140_vm1, %v8883_v27  ;;  %4665 = vst.msk [vmem:[#allocation3 + $0x18] sm:$0xff] %vm12140_vm1, %v8897_v37  ;;  %5726 = vmatpush3.bf16.msra.mxu1 %v4264_v29  ;;  %v5894_v26 = vpop.f32.mrf.mxu0  ;;  %v8973_v29 = vld [vmem:[#allocation3 + $0x58] sm:$0xff]  ;;  %v4248_v9 = vpack.c.bf16 %v8614_v47, %v8558_v2  ;;  %v4247_v2 = vpack.c.bf16 %v8455_v23, %v8392_v22  ;;  %v4253_v23 = vpack.c.bf16 %v8825_v4, %v8755_v13  ;;  %v9051_v4 = vld [vmem:[#allocation3 + $0x60] sm:$0xff] }
 0x246   : > { %4668 = vst.msk [vmem:[#allocation3 + $0x30] sm:$0xff] %vm12140_vm1, %v8900_v15  ;;  %4669 = vst.msk [vmem:[#allocation3 + $0x38] sm:$0xff] %vm12140_vm1, %v8903_v21  ;;  %5727 = vmatprep.subr.bf16.mxu1 %v4271_v1  ;;  %v2461_v1 = vpop.xlane.xlu0 %2460  ;;  %v4252_v13 = vpack.c.bf16 %v8893_v11, %v8809_v61  ;;  %v9138_v22 = vld [vmem:[#allocation3 + $0xa8] sm:$0xff]  ;;  %v9224_v37 = vld [vmem:[#allocation3 + $0xf0] sm:$0xff] }
 0x247   : > { %4666 = vst.msk [vmem:[#allocation3 + $0x20] sm:$0xff] %vm12140_vm1, %v8920_v59  ;;  %4667 = vst.msk [vmem:[#allocation3 + $0x28] sm:$0xff] %vm12140_vm1, %v8948_v50  ;;  %v3495_v24 = vpop.f32.mrf.mxu0  ;;  %v8978_v5 = vmax.f32 %v8973_v29, %v2461_v1  ;;  %v4249_v1 = vpack.c.bf16 %v8581_v58, %v8516_v30  ;;  %2722 = vperm.xlu0 %6016, %v8900_v15   ;;  %v9148_v30 = vld [vmem:[#allocation3 + $0xd0] sm:$0xff] }
 0x248   : > { %4672 = vst.msk [vmem:[#allocation3 + $0x50] sm:$0xff] %vm12140_vm1, %v8964_v55  ;;  %v4254_v47 = vpack.c.bf16 %v3495_v24, %v8956_v56  ;;  %12637 = vst [vmem:[#allocation153_spill] sm:$0xff] %v9224_v37 }
 0x249   : > { %5728 = vmatpush3.bf16.msra.mxu1 %v4263_v14  ;;  %v5897_v33 = vpop.f32.mrf.mxu0  ;;  %4673 = vst.msk [vmem:[#allocation3 + $0x58] sm:$0xff] %vm12140_vm1, %v8978_v5 }
 0x24a   : > { %5729 = vmatprep.subr.bf16.mxu1 %v4270_v19  ;;  %v2446_v19 = vpop.xlane.xlu1 %2445 }
 0x24b   : > { %v3508_v14 = vpop.f32.mrf.mxu0  ;;  %v8997_v44 = vmax.f32 %v8990_v25, %v2446_v19  ;;  %v2451_v19 = vpop.xlane.xlu0 %2450 }
 0x24d   : > { %5730 = vmatpush3.bf16.msra.mxu1 %v4262_v32  ;;  %v5898_v32 = vpop.f32.mrf.mxu0  ;;  %4670 = vst.msk [vmem:[#allocation3 + $0x40] sm:$0xff] %vm12140_vm1, %v8997_v44  ;;  %2732 = vperm.xlu0 %6016, %v8997_v44  }
 0x24e   : > { %5731 = vmatprep.subr.bf16.mxu1 %v4269_v46  ;;  %v4257_v52 = vpack.c.bf16 %v5898_v32, %v5897_v33  ;;  %v12624_v32 = vld [vmem:[#allocation212_spill] sm:$0xff] }
 0x24f   : > { %v3511_v46 = vpop.f32.mrf.mxu0  ;;  %v2481_v56 = vpop.xlane.xlu0 %2480 }
 0x250   : > { %5611 = vmatprep.subr.bf16.mxu0 %v4257_v52  ;;  %v4256_v58 = vpack.c.bf16 %v3511_v46, %v3508_v14  ;;  %v9019_v52 = vld [vmem:[#allocation3 + $0x70] sm:$0xff]  ;;  %v9029_v14 = vld [vmem:[#allocation3 + $0x78] sm:$0xff] }
 0x251   : > { %5732 = vmatpush3.bf16.msra.mxu1 %v4261_v31  ;;  %5612 = vmatpush3.bf16.msra.mxu0 %v4249_v1  ;;  %v9010_v31 = vmax.f32 %v9001_v45, %v2451_v19  ;;  %v4246_v1 = vpack.c.bf16 %v8493_v43, %v8426_v0  ;;  %v9041_v24 = vmax.f32 %v9029_v14, %v2481_v56 }
 0x252   : > { %5733 = vmatprep.subr.bf16.mxu1 %v4268_v63  ;;  %v4255_v63 = vpack.c.bf16 %v5894_v26, %v8940_v16  ;;  %5613 = vmatprep.subr.bf16.mxu0 %v4256_v58  ;;  %v2476_v16 = vpop.xlane.xlu1 %2475  ;;  %v4245_v0 = vpack.c.bf16 %v12625_v57, %v12624_v32  ;;  %v9089_v57 = vld [vmem:[#allocation3 + $0x80] sm:$0xff] }
 0x253   : > { %4671 = vst.msk [vmem:[#allocation3 + $0x48] sm:$0xff] %vm12140_vm1, %v9010_v31  ;;  %2737 = vperm.xlu1 %6015, %v9010_v31   ;;  %v9026_v26 = vmax.f32 %v9019_v52, %v2476_v16  ;;  %2742 = vperm.xlu0 %6016, %v8964_v55   ;;  %4677 = vst.msk [vmem:[#allocation3 + $0x78] sm:$0xff] %vm12140_vm1, %v9041_v24  ;;  %v2471_v61 = vpop.xlane.xlu0 %2470 }
 0x255   : > { %5734 = vmatpush3.bf16.msra.mxu1 %v4260_v6  ;;  %5614 = vmatpush3.bf16.msra.mxu0 %v4248_v9  ;;  %4676 = vst.msk [vmem:[#allocation3 + $0x70] sm:$0xff] %vm12140_vm1, %v9026_v26  ;;  %v12626_v6 = vld [vmem:[#allocation216_spill] sm:$0xff]  ;;  %v9058_v9 = vld [vmem:[#allocation3 + $0x68] sm:$0xff] }
 0x256   : > { %5615 = vmatprep.subr.bf16.mxu0 %v4255_v63  ;;  %v4244_v46 = vpack.c.bf16 %v8353_v53, %v12626_v6  ;;  %v2466_v58 = vpop.xlane.xlu1 %2465  ;;  %v9066_v11 = vmax.f32 %v9058_v9, %v2471_v61 }
 0x257   : > { %2747 = vperm.xlu1 %6015, %v8978_v5   ;;  %v9056_v19 = vmax.f32 %v9051_v4, %v2466_v58 }
 0x258   : > { %4675 = vst.msk [vmem:[#allocation3 + $0x68] sm:$0xff] %vm12140_vm1, %v9066_v11 }
 0x259   : > { %5616 = vmatpush3.bf16.msra.mxu0 %v4247_v2  ;;  %4674 = vst.msk [vmem:[#allocation3 + $0x60] sm:$0xff] %vm12140_vm1, %v9056_v19  ;;  %2752 = vperm.xlu0 %6016, %v9056_v19   ;;  %v9072_v2 = vld [vmem:[#allocation3 + $0x90] sm:$0xff] }
 0x25a   : > { %5617 = vmatprep.subr.bf16.mxu0 %v4254_v47  ;;  %v2496_v47 = vpop.xlane.xlu1 %2495 }
 0x25b   : > { %2757 = vperm.xlu1 %6015, %v9066_v11   ;;  %v9077_v16 = vmax.f32 %v9072_v2, %v2496_v47 }
 0x25d   : > { %5618 = vmatpush3.bf16.msra.mxu0 %v4246_v1  ;;  %2762 = vperm.xlu0 %6016, %v9026_v26   ;;  %4680 = vst.msk [vmem:[#allocation3 + $0x90] sm:$0xff] %vm12140_vm1, %v9077_v16  ;;  %v2501_v56 = vpop.xlane.xlu0 %2500 }
 0x25e   : > { %5619 = vmatprep.subr.bf16.mxu0 %v4253_v23  ;;  %v9084_v23 = vld [vmem:[#allocation3 + $0x98] sm:$0xff] }
 0x25f   : > { %2767 = vperm.xlu1 %6015, %v9041_v24   ;;  %v9087_v32 = vmax.f32 %v9084_v23, %v2501_v56  ;;  %v9124_v56 = vld [vmem:[#allocation3 + $0xb8] sm:$0xff] }
 0x261   : > { %5620 = vmatpush3.bf16.msra.mxu0 %v4245_v0  ;;  %4681 = vst.msk [vmem:[#allocation3 + $0x98] sm:$0xff] %vm12140_vm1, %v9087_v32 }
 0x262   : > { %5621 = vmatprep.subr.bf16.mxu0 %v4252_v13  ;;  %v2486_v13 = vpop.xlane.xlu1 %2485 }
 0x263   : > { %v9096_v6 = vmax.f32 %v9089_v57, %v2486_v13  ;;  %v9112_v13 = vld [vmem:[#allocation3 + $0xb0] sm:$0xff] }
 0x265   : > { %5622 = vmatpush3.bf16.msra.mxu0 %v4244_v46  ;;  %v9098_v46 = vld [vmem:[#allocation3 + $0x88] sm:$0xff]  ;;  %4678 = vst.msk [vmem:[#allocation3 + $0x80] sm:$0xff] %vm12140_vm1, %v9096_v6  ;;  %2772 = vperm.xlu0 %6016, %v9096_v6  }
 0x266   : > { %v2491_v61 = vpop.xlane.xlu0 %2490 }
 0x267   : > { %v9106_v47 = vmax.f32 %v9098_v46, %v2491_v61 }
 0x269   : > { %4679 = vst.msk [vmem:[#allocation3 + $0x88] sm:$0xff] %vm12140_vm1, %v9106_v47  ;;  %2777 = vperm.xlu1 %6015, %v9106_v47   ;;  %2782 = vperm.xlu0 %6016, %v9077_v16  }
 0x26d   : > { %v2516_v58 = vpop.xlane.xlu1 %2515  ;;  %2787 = vperm.xlu1 %6015, %v9087_v32  }
 0x26e   : > { %v9117_v0 = vmax.f32 %v9112_v13, %v2516_v58  ;;  %v9133_v58 = vld [vmem:[#allocation3 + $0xa0] sm:$0xff] }
 0x270   : > { %4684 = vst.msk [vmem:[#allocation3 + $0xb0] sm:$0xff] %vm12140_vm1, %v9117_v0 }
 0x273   : > { %v2521_v1 = vpop.xlane.xlu0 %2520 }
 0x274   : > { %v9127_v53 = vmax.f32 %v9124_v56, %v2521_v1 }
 0x276   : > { %4685 = vst.msk [vmem:[#allocation3 + $0xb8] sm:$0xff] %vm12140_vm1, %v9127_v53 }
 0x279   : > { %v2506_v43 = vpop.xlane.xlu1 %2505 }
 0x27a   : > { %v9136_v61 = vmax.f32 %v9133_v58, %v2506_v43  ;;  %v9164_v43 = vld [vmem:[#allocation3 + $0xd8] sm:$0xff] }
 0x27c   : > { %4682 = vst.msk [vmem:[#allocation3 + $0xa0] sm:$0xff] %vm12140_vm1, %v9136_v61  ;;  %2792 = vperm.xlu0 %6016, %v9136_v61  }
 0x27d   : > { %v2511_v1 = vpop.xlane.xlu0 %2510 }
 0x27e   : > { %v9146_v63 = vmax.f32 %v9138_v22, %v2511_v1 }
 0x280   : > { %4683 = vst.msk [vmem:[#allocation3 + $0xa8] sm:$0xff] %vm12140_vm1, %v9146_v63  ;;  %2797 = vperm.xlu1 %6015, %v9146_v63   ;;  %2802 = vperm.xlu0 %6016, %v9117_v0  }
 0x281   : > { %v2536_v33 = vpop.xlane.xlu1 %2535 }
 0x282   : > { %v9157_v12 = vmax.f32 %v9148_v30, %v2536_v33  ;;  %v12628_v33 = vsub.f32 %v8869_v20, %v8879_v42 }
 0x284   : > { %4688 = vst.msk [vmem:[#allocation3 + $0xd0] sm:$0xff] %vm12140_vm1, %v9157_v12  ;;  %2807 = vperm.xlu1 %6015, %v9127_v53   ;;  %v2626_v40 = vmul.f32 1.442695, %v12628_v33 }
 0x287   : > { %v2541_v35 = vpop.xlane.xlu0 %2540 }
 0x288   : > { %v9167_v36 = vmax.f32 %v9164_v43, %v2541_v35  ;;  %v12627_v35 = vsub.f32 %v8867_v7, %v8875_v48  ;;  %v12631_v7 = vsub.f32 %v8887_v28, %v8900_v15  ;;  %v12636_v28 = vsub.f32 %v8973_v29, %v8978_v5 }
 0x289   : > { %v12643_v5 = vsub.f32 %v9051_v4, %v9056_v19  ;;  %v12648_v4 = vsub.f32 %v9084_v23, %v9087_v32  ;;  %v12655_v32 = vsub.f32 %v9112_v13, %v9117_v0  ;;  %v12659_v0 = vsub.f32 %v9133_v58, %v9136_v61 }
 0x28a   : > { %4689 = vst.msk [vmem:[#allocation3 + $0xd8] sm:$0xff] %vm12140_vm1, %v9167_v36  ;;  %v2630_v49 = vmul.f32 1.442695, %v12627_v35  ;;  %v2638_v48 = vmul.f32 1.442695, %v12631_v7  ;;  %v12665_v61 = vsub.f32 %v9164_v43, %v9167_v36 }
 0x28b   : > { %v2664_v19 = vmul.f32 1.442695, %v12648_v4  ;;  %v2666_v13 = vmul.f32 1.442695, %v12659_v0  ;;  %v12684_v0 = vld [vmem:[#allocation120_spill] sm:$0xff] }
 0x28c   : > { %6069 = vpow2.f32 %v2630_v49  ;;  %v2680_v58 = vmul.f32 1.442695, %v12665_v61 }
 0x28d   : > { %v2526_v1 = vpop.xlane.xlu1 %2525  ;;  %6071 = vpow2.f32 %v2626_v40 }
 0x28e   : > { %v9176_v51 = vmax.f32 %v9169_v10, %v2526_v1  ;;  %v12629_v1 = vsub.f32 %v8871_v41, %v8883_v27  ;;  %v12632_v41 = vsub.f32 %v8889_v3, %v8903_v21  ;;  %v12633_v27 = vsub.f32 %v8905_v38, %v8920_v59 }
 0x28f   : > { %v2648_v3 = vmul.f32 1.442695, %v12636_v28  ;;  %v12639_v21 = vsub.f32 %v9001_v45, %v9010_v31  ;;  %v2650_v45 = vmul.f32 1.442695, %v12643_v5 }
 0x290   : > { %4686 = vst.msk [vmem:[#allocation3 + $0xc0] sm:$0xff] %vm12140_vm1, %v9176_v51  ;;  %2812 = vperm.xlu0 %6016, %v9176_v51   ;;  %v2628_v8 = vmul.f32 1.442695, %v12629_v1  ;;  %v2640_v42 = vmul.f32 1.442695, %v12632_v41 }
 0x291   : > { %v2634_v54 = vmul.f32 1.442695, %v12633_v27  ;;  %v2644_v38 = vmul.f32 1.442695, %v12639_v21  ;;  %v2398_v27 = vld [vmem:[#allocation3 + $0xe0] sm:$0xff] }
 0x292   : > { %6073 = vpow2.f32 %v2628_v8  ;;  %v12635_v8 = vsub.f32 %v8954_v18, %v8964_v55  ;;  %v12640_v18 = vsub.f32 %v9019_v52, %v9026_v26  ;;  %v12642_v55 = vsub.f32 %v9029_v14, %v9041_v24  ;;  %v9256_v14 = vld [vmem:[#allocation3 + $0xf8] sm:$0xff] }
 0x293   : > { %6075 = vpow2.f32 %v2632_v39  ;;  %v12638_v39 = vsub.f32 %v8990_v25, %v8997_v44  ;;  %v12644_v44 = vsub.f32 %v9058_v9, %v9066_v11  ;;  %v12645_v52 = vsub.f32 %v9072_v2, %v9077_v16  ;;  %12646 = vst [vmem:[#allocation195_spill] sm:$0xff] %v9256_v14 }
 0x294   : > { %2822 = vperm.xlu0 %6016, %v9157_v12   ;;  %v2531_v17 = vpop.xlane.xlu0 %2530  ;;  %6077 = vpow2.f32 %v2638_v48  ;;  %v2646_v34 = vmul.f32 1.442695, %v12635_v8  ;;  %v2656_v29 = vmul.f32 1.442695, %v12642_v55  ;;  %v12650_v9 = vsub.f32 %v9089_v57, %v9096_v6 }
 0x295   : > { %v9202_v20 = vmax.f32 %v9189_v62, %v2531_v17  ;;  %v12634_v17 = vsub.f32 %v8934_v60, %v8948_v50  ;;  %6079 = vpow2.f32 %v2640_v42  ;;  %v2642_v15 = vmul.f32 1.442695, %v12638_v39 }
 0x296   : > { %6081 = vpow2.f32 %v2634_v54  ;;  %v2654_v60 = vmul.f32 1.442695, %v12640_v18  ;;  %v2652_v31 = vmul.f32 1.442695, %v12644_v44  ;;  %v2662_v26 = vmul.f32 1.442695, %v12645_v52 }
 0x297   : > { %v2619_v49 = vsub.f32 %v9189_v62, %v9202_v20  ;;  %4687 = vst.msk [vmem:[#allocation3 + $0xc8] sm:$0xff] %vm12140_vm1, %v9202_v20  ;;  %2817 = vperm.xlu1 %6015, %v9202_v20   ;;  %v2636_v40 = vmul.f32 1.442695, %v12634_v17  ;;  %v2658_v11 = vmul.f32 1.442695, %v12650_v9  ;;  %v12652_v2 = vsub.f32 %v9098_v46, %v9106_v47  ;;  %v2399_v62 = vld [vmem:[#allocation3 + $0xe8] sm:$0xff] }
 0x298   : > { %v2670_v48 = vmul.f32 1.442695, %v12655_v32  ;;  %v12657_v6 = vsub.f32 %v9124_v56, %v9127_v53  ;;  %v12661_v53 = vsub.f32 %v9138_v22, %v9146_v63  ;;  %v12663_v17 = vsub.f32 %v9148_v30, %v9157_v12  ;;  %v12676_v20 = vld [vmem:[#allocation124_spill] sm:$0xff] }
 0x299   : > { %6083 = vpow2.f32 %v2636_v40  ;;  %v9258_v24 = vpop.eup %6069  ;;  %v2660_v16 = vmul.f32 1.442695, %v12652_v2 }
 0x29a   : > { %6085 = vpow2.f32 %v2646_v34  ;;  %12647 = vst [vmem:[#allocation201_spill] sm:$0xff] %v9258_v24  ;;  %v9263_v33 = vpop.eup %6071  ;;  %v2672_v41 = vmul.f32 1.442695, %v12657_v6  ;;  %v2668_v56 = vmul.f32 1.442695, %v12661_v53  ;;  %v12683_v6 = vld [vmem:[#allocation119_spill] sm:$0xff] }
 0x29b   : > { %2827 = vperm.xlu1 %6015, %v9167_v36   ;;  %6087 = vpow2.f32 %v2648_v3  ;;  %12649 = vst [vmem:[#allocation172_spill] sm:$0xff] %v9263_v33  ;;  %v2678_v40 = vmul.f32 1.442695, %v12663_v17  ;;  %v12668_v3 = vsub.f32 %v9169_v10, %v9176_v51  ;;  %v2676_v36 = vmul.f32 1.442695, %v2619_v49  ;;  %v12672_v51 = vld [vmem:[#allocation121_spill] sm:$0xff] }
 0x29c   : > { %6089 = vpow2.f32 %v2642_v15 }
 0x29d   : > { %v2556_v59 = vpop.xlane.xlu1 %2555  ;;  %6091 = vpow2.f32 %v2644_v38  ;;  %v2674_v12 = vmul.f32 1.442695, %v12668_v3  ;;  %v12688_v3 = vld [vmem:[#allocation129_spill] sm:$0xff] }
 0x29e   : > { %v9237_v50 = vmax.f32 %v9224_v37, %v2556_v59  ;;  %6093 = vpow2.f32 %v2654_v60  ;;  %v12673_v59 = vld [vmem:[#allocation122_spill] sm:$0xff]  ;;  %v12674_v60 = vld [vmem:[#allocation123_spill] sm:$0xff] }
 0x29f   : > { %6095 = vpow2.f32 %v2656_v29  ;;  %v9268_v1 = vpop.eup %6073 }
 0x2a0   : > { %12641 = vst [vmem:[#allocation158_spill] sm:$0xff] %v9237_v50  ;;  %4692 = vst.msk [vmem:[#allocation3 + $0xf0] sm:$0xff] %vm12140_vm1, %v9237_v50  ;;  %2842 = vperm.xlu0 %6016, %v9237_v50   ;;  %6097 = vpow2.f32 %v2650_v45  ;;  %v9276_v23 = vpop.eup %6075  ;;  %v12749_v50 = vld [vmem:[#allocation151_spill] sm:$0xff] }
 0x2a1   : > { %12651 = vst [vmem:[#allocation181_spill] sm:$0xff] %v9268_v1  ;;  %6099 = vpow2.f32 %v2652_v31  ;;  %12654 = vst [vmem:[#allocation186_spill] sm:$0xff] %v9276_v23  ;;  %v9281_v57 = vpop.eup %6077 }
 0x2a2   : > { %6101 = vpow2.f32 %v2662_v26  ;;  %12656 = vst [vmem:[#allocation161_spill] sm:$0xff] %v9281_v57  ;;  %v9291_v47 = vpop.eup %6079 }
 0x2a3   : > { %v2561_v35 = vpop.xlane.xlu0 %2560  ;;  %6103 = vpow2.f32 %v2664_v19  ;;  %12658 = vst [vmem:[#allocation167_spill] sm:$0xff] %v9291_v47  ;;  %v9296_v42 = vpop.eup %6081 }
 0x2a4   : > { %v9274_v7 = vmax.f32 %v9256_v14, %v2561_v35  ;;  %6105 = vpow2.f32 %v2658_v11  ;;  %12660 = vst [vmem:[#allocation164_spill] sm:$0xff] %v9296_v42  ;;  %v12680_v35 = vld [vmem:[#allocation117_spill] sm:$0xff]  ;;  %v12750_v14 = vld [vmem:[#allocation15_spill] sm:$0xff] }
 0x2a5   : > { %6107 = vpow2.f32 %v2660_v16  ;;  %v12681_v16 = vld [vmem:[#allocation118_spill] sm:$0xff] }
 0x2a6   : > { %12653 = vst [vmem:[#allocation176_spill] sm:$0xff] %v9274_v7  ;;  %4693 = vst.msk [vmem:[#allocation3 + $0xf8] sm:$0xff] %vm12140_vm1, %v9274_v7  ;;  %2847 = vperm.xlu1 %6015, %v9274_v7   ;;  %v9301_v54 = vpop.eup %6083  ;;  %6109 = vpow2.f32 %v2670_v48 }
 0x2a7   : > { %12662 = vst [vmem:[#allocation170_spill] sm:$0xff] %v9301_v54  ;;  %v9306_v8 = vpop.eup %6085  ;;  %6111 = vpow2.f32 %v2672_v41 }
 0x2a8   : > { %12664 = vst [vmem:[#allocation212_spill] sm:$0xff] %v9306_v8  ;;  %v9311_v28 = vpop.eup %6087  ;;  %6113 = vpow2.f32 %v2666_v13 }
 0x2a9   : > { %12666 = vst [vmem:[#allocation220_spill] sm:$0xff] %v9311_v28  ;;  %v9313_v63 = vpop.eup %6089  ;;  %6115 = vpow2.f32 %v2668_v56 }
 0x2aa   : > { %12667 = vst [vmem:[#allocation216_spill] sm:$0xff] %v9313_v63  ;;  %v9318_v30 = vpop.eup %6091  ;;  %6117 = vpow2.f32 %v2678_v40 }
 0x2ab   : > { %v2546_v34 = vpop.xlane.xlu1 %2545  ;;  %12669 = vst [vmem:[#allocation280_spill] sm:$0xff] %v9318_v30  ;;  %v9324_v39 = vpop.eup %6093  ;;  %6119 = vpow2.f32 %v2680_v58 }
 0x2ac   : > { %v2590_v22 = vmax.f32 %v2398_v27, %v2546_v34  ;;  %12670 = vst [vmem:[#allocation281_spill] sm:$0xff] %v9324_v39  ;;  %v9326_v21 = vpop.eup %6095  ;;  %6121 = vpow2.f32 %v2674_v12 }
 0x2ad   : > { %12671 = vst [vmem:[#allocation282_spill] sm:$0xff] %v9326_v21  ;;  %v9331_v29 = vpop.eup %6097  ;;  %6123 = vpow2.f32 %v2676_v36  ;;  %v12689_v36 = vld [vmem:[#allocation130_spill] sm:$0xff] }
 0x2ae   : > { %v2622_v43 = vsub.f32 %v2398_v27, %v2590_v22  ;;  %4690 = vst.msk [vmem:[#allocation3 + $0xe0] sm:$0xff] %vm12140_vm1, %v2590_v22  ;;  %2832 = vperm.xlu0 %6016, %v2590_v22   ;;  %12675 = vst [vmem:[#allocation121_spill] sm:$0xff] %v9331_v29  ;;  %v9334_v5 = vpop.eup %6099 }
 0x2af   : > { %v2693_v15 = vpop.permute.xlu1 %2692  ;;  %12677 = vst [vmem:[#allocation122_spill] sm:$0xff] %v9334_v5  ;;  %v9337_v52 = vpop.eup %6101 }
 0x2b0   : > { %v2682_v38 = vmul.f32 1.442695, %v2622_v43  ;;  %v2850_v10 = vsub.f32 %v12672_v51, %v2693_v15  ;;  %v2851_v18 = vsub.f32 %v12673_v59, %v2693_v15  ;;  %v2852_v55 = vsub.f32 %v12674_v60, %v2693_v15  ;;  %12678 = vst [vmem:[#allocation123_spill] sm:$0xff] %v9337_v52  ;;  %v9339_v9 = vpop.eup %6103  ;;  %v12693_v60 = vld [vmem:[#allocation131_spill] sm:$0xff] }
 0x2b1   : > { %v2853_v49 = vsub.f32 %v12676_v20, %v2693_v15  ;;  %12679 = vst [vmem:[#allocation124_spill] sm:$0xff] %v9339_v9  ;;  %v9343_v48 = vpop.eup %6105 }
 0x2b2   : > { %3995 = vperm.xlu0 %6016, %v9268_v1   ;;  %v2978_v45 = vmul.f32 1.442695, %v2850_v10  ;;  %v2980_v44 = vmul.f32 1.442695, %v2851_v18  ;;  %v2982_v31 = vmul.f32 1.442695, %v2852_v55  ;;  %6125 = vpow2.f32 %v2682_v38  ;;  %v2551_v26 = vpop.xlane.xlu0 %2550  ;;  %v9347_v53 = vpop.eup %6107 }
 0x2b3   : > { %v2984_v4 = vmul.f32 1.442695, %v2853_v49  ;;  %v2703_v19 = vpop.permute.xlu1 %2702  ;;  %v2591_v11 = vmax.f32 %v2399_v62, %v2551_v26  ;;  %12682 = vst [vmem:[#allocation117_spill] sm:$0xff] %v9343_v48  ;;  %12685 = vst [vmem:[#allocation118_spill] sm:$0xff] %v9347_v53  ;;  %v9351_v40 = vpop.eup %6109  ;;  %v12697_v26 = vld [vmem:[#allocation126_spill] sm:$0xff] }
 0x2b4   : > { %6127 = vpow2.f32 %v2978_v45  ;;  %v2858_v2 = vsub.f32 %v12680_v35, %v2703_v19  ;;  %v2859_v32 = vsub.f32 %v12681_v16, %v2703_v19  ;;  %v2860_v41 = vsub.f32 %v12683_v6, %v2703_v19  ;;  %12686 = vst [vmem:[#allocation119_spill] sm:$0xff] %v9351_v40  ;;  %v9353_v34 = vpop.eup %6111  ;;  %v12699_v35 = vld [vmem:[#allocation128_spill] sm:$0xff] }
 0x2b5   : > { %6129 = vpow2.f32 %v2980_v44  ;;  %v2861_v13 = vsub.f32 %v12684_v0, %v2703_v19  ;;  %v2623_v56 = vsub.f32 %v2399_v62, %v2591_v11  ;;  %4691 = vst.msk [vmem:[#allocation3 + $0xe8] sm:$0xff] %vm12140_vm1, %v2591_v11  ;;  %2837 = vperm.xlu1 %6015, %v2591_v11   ;;  %12687 = vst [vmem:[#allocation120_spill] sm:$0xff] %v9353_v34  ;;  %v9357_v15 = vpop.eup %6113  ;;  %v12694_v62 = vld [vmem:[#allocation132_spill] sm:$0xff]  ;;  %v12696_v44 = vld [vmem:[#allocation125_spill] sm:$0xff] }
 0x2b6   : > { %4010 = vperm.xlu0 %6016, %v9296_v42   ;;  %6131 = vpow2.f32 %v2982_v31  ;;  %v2994_v27 = vmul.f32 1.442695, %v2858_v2  ;;  %v2996_v17 = vmul.f32 1.442695, %v2859_v32  ;;  %v2998_v61 = vmul.f32 1.442695, %v2860_v41  ;;  %v9359_v51 = vpop.eup %6115  ;;  %vm9457_vm1 = vmpackc.low %vm2119_vm11, %vm2115_vm7 }
 0x2b7   : > { %6133 = vpow2.f32 %v2984_v4  ;;  %v2708_v58 = vpop.permute.xlu1 %2707  ;;  %v2684_v22 = vmul.f32 1.442695, %v2623_v56  ;;  %12690 = vst [vmem:[#allocation129_spill] sm:$0xff] %v9357_v15  ;;  %v3000_v38 = vmul.f32 1.442695, %v2861_v13  ;;  %12691 = vst [vmem:[#allocation130_spill] sm:$0xff] %v9359_v51  ;;  %v9363_v59 = vpop.eup %6117 }
 0x2b8   : > { %6135 = vpow2.f32 %v2994_v27  ;;  %v2862_v12 = vsub.f32 %v12688_v3, %v2708_v58  ;;  %v2863_v43 = vsub.f32 %v12689_v36, %v2708_v58  ;;  %12692 = vst [vmem:[#allocation283_spill] sm:$0xff] %v9363_v59  ;;  %v2864_v55 = vsub.f32 %v12693_v60, %v2708_v58  ;;  %v9367_v45 = vpop.eup %6119  ;;  %v12698_v19 = vld [vmem:[#allocation127_spill] sm:$0xff]  ;;  %v12721_v42 = vld [vmem:[#allocation160_spill] sm:$0xff] }
 0x2b9   : > { %6137 = vpow2.f32 %v2996_v17  ;;  %3990 = vperm.xlu1 %6015, %v9263_v33   ;;  %v2865_v20 = vsub.f32 %v12694_v62, %v2708_v58  ;;  %12695 = vst [vmem:[#allocation131_spill] sm:$0xff] %v9367_v45  ;;  %v9373_v32 = vpop.eup %6121  ;;  %v12707_v62 = vld [vmem:[#allocation145_spill] sm:$0xff] }
 0x2ba   : > { %6139 = vpow2.f32 %v2684_v22  ;;  %4020 = vperm.xlu0 %6016, %v9281_v57   ;;  %v3002_v10 = vmul.f32 1.442695, %v2862_v12  ;;  %v2698_v18 = vpop.permute.xlu0 %2697  ;;  %v3004_v49 = vmul.f32 1.442695, %v2863_v43  ;;  %12700 = vst [vmem:[#allocation132_spill] sm:$0xff] %v9373_v32  ;;  %v9377_v13 = vpop.eup %6123  ;;  %v12703_v22 = vld [vmem:[#allocation141_spill] sm:$0xff] }
 0x2bb   : > { %6141 = vpow2.f32 %v2998_v61  ;;  %v2854_v31 = vsub.f32 %v12696_v44, %v2698_v18  ;;  %v2855_v4 = vsub.f32 %v12697_v26, %v2698_v18  ;;  %v2856_v11 = vsub.f32 %v12698_v19, %v2698_v18  ;;  %v2718_v16 = vpop.permute.xlu1 %2717  ;;  %12701 = vst [vmem:[#allocation125_spill] sm:$0xff] %v9377_v13  ;;  %v12704_v12 = vld [vmem:[#allocation142_spill] sm:$0xff]  ;;  %v12705_v43 = vld [vmem:[#allocation143_spill] sm:$0xff]  ;;  %v12710_v19 = vld [vmem:[#allocation148_spill] sm:$0xff] }
 0x2bc   : > { %v2857_v2 = vsub.f32 %v12699_v35, %v2698_v18  ;;  %6143 = vpow2.f32 %v3000_v38  ;;  %v3006_v27 = vmul.f32 1.442695, %v2864_v55  ;;  %v3008_v17 = vmul.f32 1.442695, %v2865_v20  ;;  %v12709_v26 = vld [vmem:[#allocation147_spill] sm:$0xff]  ;;  %v12776_v13 = vld [vmem:[#allocation182_spill] sm:$0xff] }
 0x2bd   : > { %4000 = vperm.xlu1 %6015, %v9258_v24   ;;  %v2986_v6 = vmul.f32 1.442695, %v2854_v31  ;;  %v2988_v41 = vmul.f32 1.442695, %v2855_v4  ;;  %v2990_v0 = vmul.f32 1.442695, %v2856_v11  ;;  %6145 = vpow2.f32 %v3002_v10 }
 0x2be   : > { %4030 = vperm.xlu0 %6016, %v9313_v63   ;;  %v2992_v56 = vmul.f32 1.442695, %v2857_v2  ;;  %6147 = vpow2.f32 %v3004_v49  ;;  %v2713_v61 = vpop.permute.xlu0 %2712  ;;  %v12706_v10 = vld [vmem:[#allocation144_spill] sm:$0xff]  ;;  %v2870_v44 = vsub.f32 %v12707_v62, %v2718_v16  ;;  %v12708_v49 = vld [vmem:[#allocation146_spill] sm:$0xff]  ;;  %v2872_v4 = vsub.f32 %v12709_v26, %v2718_v16 }
 0x2bf   : > { %v9379_v58 = vpop.eup %6125  ;;  %6149 = vpow2.f32 %v2986_v6  ;;  %v2866_v3 = vsub.f32 %v12703_v22, %v2713_v61  ;;  %v2867_v36 = vsub.f32 %v12704_v12, %v2713_v61  ;;  %v2868_v38 = vsub.f32 %v12705_v43, %v2713_v61  ;;  %v2728_v35 = vpop.permute.xlu1 %2727  ;;  %v12711_v12 = vld [vmem:[#allocation133_spill] sm:$0xff] }
 0x2c0   : > { %12702 = vst [vmem:[#allocation126_spill] sm:$0xff] %v9379_v58  ;;  %6151 = vpow2.f32 %v2988_v41  ;;  %v2869_v60 = vsub.f32 %v12706_v10, %v2713_v61  ;;  %v2871_v55 = vsub.f32 %v12708_v49, %v2718_v16  ;;  %v2873_v11 = vsub.f32 %v12710_v19, %v2718_v16  ;;  %v12712_v10 = vld [vmem:[#allocation134_spill] sm:$0xff] }
 0x2c1   : > { %v9384_v18 = vpop.eup %6127  ;;  %4005 = vperm.xlu1 %6015, %v9276_v23   ;;  %6153 = vpow2.f32 %v2990_v0  ;;  %v3010_v31 = vmul.f32 1.442695, %v2866_v3  ;;  %v3012_v6 = vmul.f32 1.442695, %v2867_v36  ;;  %v3014_v41 = vmul.f32 1.442695, %v2868_v38 }
 0x2c2   : > { %v9389_v20 = vpop.eup %6129  ;;  %4040 = vperm.xlu0 %6016, %v9306_v8   ;;  %6155 = vpow2.f32 %v2992_v56  ;;  %v2723_v61 = vpop.permute.xlu0 %2722  ;;  %v12713_v0 = vld [vmem:[#allocation135_spill] sm:$0xff]  ;;  %v3016_v16 = vmul.f32 1.442695, %v2869_v60  ;;  %v3018_v26 = vmul.f32 1.442695, %v2870_v44  ;;  %v12714_v36 = vld [vmem:[#allocation136_spill] sm:$0xff] }
 0x2c3   : > { %v9395_v2 = vpop.eup %6131  ;;  %6157 = vpow2.f32 %v3006_v27  ;;  %v2874_v43 = vsub.f32 %v12711_v12, %v2723_v61  ;;  %v2875_v62 = vsub.f32 %v12712_v10, %v2723_v61  ;;  %v2876_v3 = vsub.f32 %v12713_v0, %v2723_v61  ;;  %v12716_v10 = vld [vmem:[#allocation137_spill] sm:$0xff]  ;;  %v12718_v44 = vld [vmem:[#allocation139_spill] sm:$0xff] }
 0x2c4   : > { %v9397_v22 = vpop.eup %6133  ;;  %6159 = vpow2.f32 %v3008_v17  ;;  %v3020_v19 = vmul.f32 1.442695, %v2871_v55  ;;  %v3022_v56 = vmul.f32 1.442695, %v2872_v4  ;;  %v3024_v27 = vmul.f32 1.442695, %v2873_v11 }
 0x2c5   : > { %v9402_v49 = vpop.eup %6135  ;;  %4015 = vperm.xlu1 %6015, %v9301_v54   ;;  %6161 = vpow2.f32 %v3010_v31  ;;  %v2877_v38 = vsub.f32 %v12714_v36, %v2723_v61  ;;  %v2878_v0 = vsub.f32 %v12716_v10, %v2728_v35  ;;  %v12717_v17 = vld [vmem:[#allocation138_spill] sm:$0xff]  ;;  %v2880_v55 = vsub.f32 %v12718_v44, %v2728_v35  ;;  %v12719_v11 = vld [vmem:[#allocation140_spill] sm:$0xff]  ;;  %v12720_v36 = vld [vmem:[#allocation159_spill] sm:$0xff] }
 0x2c6   : > { %v9404_v25 = vpop.eup %6137  ;;  %4050 = vperm.xlu0 %6016, %v9331_v29   ;;  %6163 = vpow2.f32 %v3012_v6  ;;  %v2879_v60 = vsub.f32 %v12717_v17, %v2728_v35  ;;  %v3026_v8 = vmul.f32 1.442695, %v2874_v43  ;;  %v3028_v29 = vmul.f32 1.442695, %v2875_v62  ;;  %v12722_v43 = vld [vmem:[#allocation162_spill] sm:$0xff] }
 0x2c7   : > { %v9409_v12 = vpop.eup %6139  ;;  %6165 = vpow2.f32 %v3014_v41  ;;  %v3030_v31 = vmul.f32 1.442695, %v2876_v3  ;;  %v2881_v61 = vsub.f32 %v12719_v11, %v2728_v35  ;;  %v3032_v41 = vmul.f32 1.442695, %v2877_v38  ;;  %v12723_v3 = vld [vmem:[#allocation163_spill] sm:$0xff]  ;;  %v12726_v38 = vld [vmem:[#allocation168_spill] sm:$0xff] }
 0x2c8   : > { %12715 = vst [vmem:[#allocation127_spill] sm:$0xff] %v9409_v12  ;;  %v2733_v46 = vpop.permute.xlu0 %2732  ;;  %v9414_v63 = vpop.eup %6141  ;;  %6167 = vpow2.f32 %v3016_v16  ;;  %v3034_v35 = vmul.f32 1.442695, %v2878_v0  ;;  %v12724_v16 = vld [vmem:[#allocation165_spill] sm:$0xff] }
 0x2c9   : > { %v2882_v6 = vsub.f32 %v12720_v36, %v2733_v46  ;;  %v2883_v10 = vsub.f32 %v12721_v42, %v2733_v46  ;;  %v9421_v57 = vpop.eup %6143  ;;  %4025 = vperm.xlu1 %6015, %v9291_v47   ;;  %6169 = vpow2.f32 %v3018_v26  ;;  %v2884_v62 = vsub.f32 %v12722_v43, %v2733_v46  ;;  %v12725_v42 = vld [vmem:[#allocation166_spill] sm:$0xff] }
 0x2ca   : > { %4060 = vperm.xlu0 %6016, %v9324_v39   ;;  %v2885_v17 = vsub.f32 %v12723_v3, %v2733_v46  ;;  %v9427_v44 = vpop.eup %6145  ;;  %6171 = vpow2.f32 %v3020_v19  ;;  %v3036_v39 = vmul.f32 1.442695, %v2879_v60  ;;  %v3038_v26 = vmul.f32 1.442695, %v2880_v55  ;;  %v12729_v55 = vld [vmem:[#allocation169_spill] sm:$0xff] }
 0x2cb   : > { %v9433_v1 = vpop.eup %6147  ;;  %6173 = vpow2.f32 %v3022_v56  ;;  %v3040_v19 = vmul.f32 1.442695, %v2881_v61  ;;  %v3042_v0 = vmul.f32 1.442695, %v2882_v6  ;;  %v9441_v3 = vmul.f32 1.442695, %v2883_v10 }
 0x2cc   : > { %v9439_v46 = vpop.eup %6149  ;;  %6175 = vpow2.f32 %v3024_v27  ;;  %v9447_v56 = vmul.f32 1.442695, %v2884_v62  ;;  %v9449_v60 = vmul.f32 1.442695, %v2885_v17  ;;  %v12735_v62 = vld [vmem:[#allocation149_spill] sm:$0xff] }
 0x2cd   : > { %12727 = vst [vmem:[#allocation128_spill] sm:$0xff] %v9439_v46  ;;  %4035 = vperm.xlu1 %6015, %v9318_v30   ;;  %6177 = vpow2.f32 %v3026_v8  ;;  %v5323_v33 = vpack.c.bf16 %v9439_v46, %v9384_v18  ;;  %v12768_v61 = vld [vmem:[#allocation157_spill] sm:$0xff]  ;;  %v12778_v46 = vld [vmem:[#allocation183_spill] sm:$0xff] }
 0x2ce   : > { %v9416_v4 = vpop.permute.xlu1 %2737  ;;  %v9437_v54 = vpop.permute.xlu0 %2742  ;;  %4070 = vperm.xlu0 %6016, %v9343_v48   ;;  %6179 = vpow2.f32 %v3028_v29 }
 0x2cf   : > { %v2886_v11 = vsub.f32 %v12724_v16, %v9416_v4  ;;  %v2887_v36 = vsub.f32 %v12725_v42, %v9416_v4  ;;  %v2888_v43 = vsub.f32 %v12726_v38, %v9416_v4  ;;  %v9443_v16 = vpop.eup %6151  ;;  %v2889_v42 = vsub.f32 %v12729_v55, %v9416_v4  ;;  %v12737_v4 = vld [vmem:[#allocation20_spill] sm:$0xff] }
 0x2d0   : > { %12728 = vst [vmem:[#allocation141_spill] sm:$0xff] %v9443_v16  ;;  %v9461_v6 = vpop.eup %6153  ;;  %v2890_v17 = vsub.f32 %v12735_v62, %v9437_v54  ;;  %vm12738_vm8 = vcmp.gt.f32.partialorder %v12737_v4, 0.0  ;;  %6181 = vpow2.f32 %v3030_v31  ;;  %v12744_v62 = vld [vmem:[#allocation17_spill] sm:$0xff]  ;;  %v12748_v31 = vld [vmem:[#allocation150_spill] sm:$0xff]  ;;  %v2892_v37 = vsub.f32 %v12749_v50, %v9437_v54  ;;  %v12752_v4 = vld [vmem:[#allocation19_spill] sm:$0xff] }
 0x2d1   : > { %12734 = vst [vmem:[#allocation142_spill] sm:$0xff] %v9461_v6  ;;  %v9463_v10 = vmul.f32 1.442695, %v2886_v11  ;;  %v9465_v8 = vmul.f32 1.442695, %v2887_v36  ;;  %vm9473_vm0 = vmpackc.low %vm12738_vm8, %vm2117_vm9  ;;  %v9477_v47 = vpop.eup %6155  ;;  %v5320_v11 = vpack.c.bf16 %v9443_v16, %v9389_v20  ;;  %v12742_v36 = vld [vmem:[#allocation13_spill] sm:$0xff]  ;;  %6183 = vpow2.f32 %v3032_v41  ;;  %4045 = vperm.xlu1 %6015, %v9311_v28  }
 0x2d2   : > { %v2748_v30 = vpop.permute.xlu1 %2747  ;;  %12741 = vst [vmem:[#allocation143_spill] sm:$0xff] %v9477_v47  ;;  %v9479_v29 = vmul.f32 1.442695, %v2888_v43  ;;  %vm12743_vm2 = vcmp.gt.f32.partialorder %v12742_v36, 0.0  ;;  %vm12745_vm13 = vcmp.gt.f32.partialorder %v12744_v62, 0.0  ;;  %v9493_v24 = vpop.eup %6157  ;;  %v2891_v43 = vsub.f32 %v12748_v31, %v9437_v54  ;;  %4080 = vperm.xlu0 %6016, %v9337_v52   ;;  %v12756_v50 = vld [vmem:[#allocation152_spill] sm:$0xff] }
 0x2d3   : > { %vm9487_vm4 = vmpackc.low %vm12745_vm13, %vm12743_vm2  ;;  %v5416_v7 = vpack.c.bf16 %v9477_v47, %v9397_v22  ;;  %vm12751_vm2 = vcmp.gt.f32.partialorder %v12750_v14, 0.0  ;;  %vm12753_vm8 = vcmp.gt.f32.partialorder %v12752_v4, 0.0  ;;  %v9509_v27 = vpop.eup %6159  ;;  %6185 = vpow2.f32 %v3034_v35  ;;  %v12757_v47 = vld [vmem:[#allocation154_spill] sm:$0xff]  ;;  %5321 = vmatprep.mubr.msk.bf16.mxu0 %vm9457_vm1, %v5320_v11 }
 0x2d4   : > { %vm9505_vm13 = vmpackc.low %vm12753_vm8, %vm12751_vm2  ;;  %v2893_v41 = vsub.f32 %v12756_v50, %v9437_v54  ;;  %v5419_v31 = vpack.c.bf16 %v9461_v6, %v9395_v2  ;;  %v2894_v16 = vsub.f32 %v12757_v47, %v2748_v30  ;;  %v12758_v4 = vld [vmem:[#allocation10_spill] sm:$0xff]  ;;  %v9526_v28 = vpop.eup %6161  ;;  %6187 = vpow2.f32 %v3036_v39  ;;  %v12765_v54 = vld [vmem:[#allocation155_spill] sm:$0xff]  ;;  %5324 = vmatmul.mubr.msk.bf16.vlgmr.msra.gmra.mxu0 %vm9487_vm4, %v5323_v33  ;;  %v2753_v55 = vpop.permute.xlu0 %2752 }
 0x2d5   : > { %vm12759_vm2 = vcmp.gt.f32.partialorder %v12758_v4, 0.0  ;;  %v12760_v62 = vld [vmem:[#allocation22_spill] sm:$0xff]  ;;  %12764 = vst [vmem:[#allocation144_spill] sm:$0xff] %v9526_v28  ;;  %v3056_v35 = vmul.f32 1.442695, %v2889_v42  ;;  %5417 = vmatprep.mubr.msk.bf16.mxu1 %vm9473_vm0, %v5416_v7  ;;  %v2895_v47 = vsub.f32 %v12765_v54, %v2748_v30  ;;  %v5326_v50 = vpack.c.bf16 %v9433_v1, %v9404_v25  ;;  %v9535_v52 = vpop.eup %6163  ;;  %v12767_v39 = vld [vmem:[#allocation156_spill] sm:$0xff]  ;;  %4055 = vperm.xlu1 %6015, %v9334_v5  }
 0x2d6   : > { %vm12761_vm8 = vcmp.gt.f32.partialorder %v12760_v62, 0.0  ;;  %12766 = vst [vmem:[#allocation145_spill] sm:$0xff] %v9535_v52  ;;  %6189 = vpow2.f32 %v3038_v26  ;;  %5420 = vmatmul.mubr.msk.bf16.vlgmr.msra.gmra.mxu1 %vm9505_vm13, %v5419_v31  ;;  %v2896_v42 = vsub.f32 %v12767_v39, %v2748_v30  ;;  %v2897_v11 = vsub.f32 %v12768_v61, %v2748_v30  ;;  %v12769_v7 = vld [vmem:[#allocation12_spill] sm:$0xff]  ;;  %v9553_v33 = vpop.eup %6165  ;;  %4090 = vperm.xlu0 %6016, %v9357_v15   ;;  %v2758_v5 = vpop.permute.xlu1 %2757  ;;  %v12783_v6 = vld [vmem:[#allocation189_spill] sm:$0xff] }
 0x2d7   : > { %vm9522_vm3 = vmpackc.low %vm12761_vm8, %vm12759_vm2  ;;  %vm12770_vm1 = vcmp.gt.f32.partialorder %v12769_v7, 0.0  ;;  %v12771_v54 = vld [vmem:[#allocation24_spill] sm:$0xff]  ;;  %v5422_v23 = vpack.c.bf16 %v9509_v27, %v9421_v57  ;;  %12775 = vst [vmem:[#allocation146_spill] sm:$0xff] %v9553_v33  ;;  %6191 = vpow2.f32 %v3040_v19  ;;  %v3058_v12 = vmul.f32 1.442695, %v2890_v17  ;;  %v9559_v30 = vpop.eup %6167 }
 0x2d8   : > { %vm12772_vm0 = vcmp.gt.f32.partialorder %v12771_v54, 0.0  ;;  %v3060_v26 = vmul.f32 1.442695, %v2891_v43  ;;  %v9555_v31 = vmul.f32 1.442695, %v2892_v37  ;;  %5327 = vmatprep.mubr.msk.bf16.mxu0 %vm9522_vm3, %v5326_v50  ;;  %6193 = vpow2.f32 %v3042_v0  ;;  %v9568_v17 = vpop.eup %6169  ;;  %v12779_v50 = vld [vmem:[#allocation184_spill] sm:$0xff]  ;;  %v2763_v28 = vpop.permute.xlu0 %2762 }
 0x2d9   : > { %vm9547_vm2 = vmpackc.low %vm12772_vm0, %vm12770_vm1  ;;  %v9563_v39 = vmul.f32 1.442695, %v2893_v41  ;;  %v9565_v61 = vmul.f32 1.442695, %v2894_v16  ;;  %v2898_v19 = vsub.f32 %v12776_v13, %v2753_v55  ;;  %12777 = vst [vmem:[#allocation147_spill] sm:$0xff] %v9568_v17  ;;  %6195 = vpow2.f32 %v9441_v3  ;;  %v9577_v0 = vpop.eup %6171  ;;  %v12780_v41 = vld [vmem:[#allocation185_spill] sm:$0xff]  ;;  %4065 = vperm.xlu1 %6015, %v9326_v21  }
 0x2da   : > { %v9571_v37 = vmul.f32 1.442695, %v2895_v47  ;;  %v2899_v43 = vsub.f32 %v12778_v46, %v2753_v55  ;;  %v2900_v33 = vsub.f32 %v12779_v50, %v2753_v55  ;;  %5423 = vmatprep.mubr.msk.bf16.mxu1 %vm9547_vm2, %v5422_v23  ;;  %6197 = vpow2.f32 %v9447_v56  ;;  %v9585_v47 = vpop.eup %6173  ;;  %v12781_v46 = vld [vmem:[#allocation187_spill] sm:$0xff]  ;;  %v12782_v15 = vld [vmem:[#allocation188_spill] sm:$0xff]  ;;  %4100 = vperm.xlu0 %6016, %v9351_v40   ;;  %v12790_v40 = vld [vmem:[#allocation173_spill] sm:$0xff] }
 0x2db   : > { %v9580_v16 = vmul.f32 1.442695, %v2896_v42  ;;  %v9582_v13 = vmul.f32 1.442695, %v2897_v11  ;;  %v2901_v3 = vsub.f32 %v12780_v41, %v2753_v55  ;;  %6199 = vpow2.f32 %v9449_v60  ;;  %v9591_v45 = vpop.eup %6175  ;;  %v12784_v42 = vld [vmem:[#allocation190_spill] sm:$0xff]  ;;  %v12785_v60 = vld [vmem:[#allocation9_spill] sm:$0xff] }
 0x2dc   : > { %v2902_v50 = vsub.f32 %v12781_v46, %v2758_v5  ;;  %v2903_v17 = vsub.f32 %v12782_v15, %v2758_v5  ;;  %v2904_v23 = vsub.f32 %v12783_v6, %v2758_v5  ;;  %6201 = vpow2.f32 %v9463_v10  ;;  %v9602_v15 = vpop.eup %6177  ;;  %v12789_v6 = vld [vmem:[#allocation171_spill] sm:$0xff] }
 0x2dd   : > { %v9596_v56 = vmul.f32 1.442695, %v2898_v19  ;;  %v2905_v11 = vsub.f32 %v12784_v42, %v2758_v5  ;;  %vm12786_vm3 = vcmp.gt.f32.partialorder %v12785_v60, 0.0  ;;  %12787 = vst [vmem:[#allocation148_spill] sm:$0xff] %v9602_v15  ;;  %6203 = vpow2.f32 %v9465_v8  ;;  %v9612_v19 = vpop.eup %6179  ;;  %4075 = vperm.xlu1 %6015, %v9347_v53   ;;  %v12802_v60 = vld [vmem:[#allocation23_spill] sm:$0xff] }
 0x2de   : > { %v3242_v55 = vsel %vm12786_vm3, %v9402_v49, 0.0  ;;  %v9605_v41 = vmul.f32 1.442695, %v2899_v43  ;;  %v9607_v46 = vmul.f32 1.442695, %v2900_v33  ;;  %vm12788_vm4 = vcmp.gt.f32.partialorder %v12758_v4, 0.0  ;;  %v9619_v15 = vpop.eup %6181  ;;  %vm12792_vm13 = vmmov %vm12786_vm3  ;;  %4120 = vperm.xlu0 %6016, %v9363_v59  }
 0x2df   : > { %v3243_v10 = vsel %vm12788_vm4, %v9404_v25, 0.0  ;;  %6205 = vpow2.f32 %v9479_v29  ;;  %v9615_v5 = vmul.f32 1.442695, %v2901_v3  ;;  %v2906_v42 = vsub.f32 %v12789_v6, %v2763_v28  ;;  %12791 = vst [vmem:[#allocation133_spill] sm:$0xff] %v9619_v15  ;;  %v12793_v25 = vld [vmem:[#allocation21_spill] sm:$0xff]  ;;  %v9635_v29 = vpop.eup %6183  ;;  %v12799_v3 = vld [vmem:[#allocation175_spill] sm:$0xff]  ;;  %v2768_v15 = vpop.permute.xlu1 %2767 }
 0x2e0   : > { %v2907_v21 = vsub.f32 %v12790_v40, %v2763_v28  ;;  %6207 = vpow2.f32 %v3056_v35  ;;  %v9621_v8 = vmul.f32 1.442695, %v2902_v50  ;;  %v9623_v33 = vmul.f32 1.442695, %v2903_v17  ;;  %12797 = vst [vmem:[#allocation134_spill] sm:$0xff] %v9635_v29  ;;  %v12798_v35 = vld [vmem:[#allocation174_spill] sm:$0xff]  ;;  %v9651_v29 = vpop.eup %6185  ;;  %v2773_v38 = vpop.permute.xlu0 %2772 }
 0x2e1   : > { %v9625_v43 = vmul.f32 1.442695, %v2904_v23  ;;  %vm12794_vm8 = vcmp.gt.f32.partialorder %v12793_v25, 0.0  ;;  %6209 = vpow2.f32 %v3058_v12  ;;  %v9639_v40 = vmul.f32 1.442695, %v2905_v11  ;;  %v12800_v23 = vld [vmem:[#allocation11_spill] sm:$0xff]  ;;  %4085 = vperm.xlu1 %6015, %v9339_v9  }
 0x2e2   : > { %vm9631_vm1 = vmpackc.low %vm12794_vm8, %vm12792_vm13  ;;  %v2908_v17 = vsub.f32 %v12798_v35, %v2763_v28  ;;  %v2909_v50 = vsub.f32 %v12799_v3, %v2763_v28  ;;  %vm12801_vm0 = vcmp.gt.f32.partialorder %v12800_v23, 0.0  ;;  %vm12803_vm2 = vcmp.gt.f32.partialorder %v12802_v60, 0.0  ;;  %v9657_v28 = vpop.eup %6187  ;;  %4110 = vperm.xlu0 %6016, %v9373_v32   ;;  %v12815_v6 = vld [vmem:[#allocation179_spill] sm:$0xff] }
 0x2e3   : > { %vm9647_vm3 = vmpackc.low %vm12803_vm2, %vm12801_vm0  ;;  %6211 = vpow2.f32 %v3060_v26  ;;  %v3741_v59 = vadd.f32 %v3243_v10, %v3242_v55  ;;  %v5329_v12 = vpack.c.bf16 %v9427_v44, %v9402_v49  ;;  %v5425_v11 = vpack.c.bf16 %v9493_v24, %v9414_v63  ;;  %v12807_v26 = vld [vmem:[#allocation34_spill] sm:$0xff]  ;;  %v9675_v10 = vpop.eup %6189 }
 0x2e4   : > { %6213 = vpow2.f32 %v9555_v31  ;;  %v9660_v35 = vmul.f32 1.442695, %v2906_v42  ;;  %v9662_v3 = vmul.f32 1.442695, %v2907_v21  ;;  %vm12806_vm4 = vmmov %vm12801_vm0  ;;  %vm12808_vm13 = vcmp.gt.f32.partialorder %v12807_v26, 0.0  ;;  %v12809_v55 = vld [vmem:[#allocation38_spill] sm:$0xff]  ;;  %v9686_v26 = vpop.eup %6191 }
 0x2e5   : > { %v3244_v53 = vsel %vm12806_vm4, %v9414_v63, 0.0  ;;  %vm12810_vm8 = vcmp.gt.f32.partialorder %v12809_v55, 0.0  ;;  %6215 = vpow2.f32 %v9563_v39  ;;  %5330 = vmatmul.mubr.msk.bf16.gmra.mxu0 %vm9631_vm1, %v5329_v12  ;;  %5426 = vmatmul.mubr.msk.bf16.gmra.mxu1 %vm9647_vm3, %v5425_v11  ;;  %v12813_v21 = vld [vmem:[#allocation177_spill] sm:$0xff]  ;;  %v12814_v31 = vld [vmem:[#allocation178_spill] sm:$0xff]  ;;  %v5332_v23 = vpack.c.bf16 %v9577_v0, %v9535_v52  ;;  %v12816_v11 = vld [vmem:[#allocation36_spill] sm:$0xff]  ;;  %v9704_v52 = vpop.eup %6193 }
 0x2e6   : > { %vm9671_vm0 = vmpackc.low %vm12810_vm8, %vm12808_vm13  ;;  %v2910_v63 = vsub.f32 %v12813_v21, %v2768_v15  ;;  %v2911_v42 = vsub.f32 %v12814_v31, %v2768_v15  ;;  %6217 = vpow2.f32 %v9565_v61  ;;  %v9691_v39 = vmul.f32 1.442695, %v2908_v17  ;;  %v12818_v21 = vld [vmem:[#allocation40_spill] sm:$0xff]  ;;  %12822 = vst [vmem:[#allocation135_spill] sm:$0xff] %v9704_v52  ;;  %4105 = vperm.xlu1 %6015, %v9353_v34   ;;  %4130 = vperm.xlu0 %6016, %v9379_v58   ;;  %v12867_v58 = vld [vmem:[#allocation146_spill] sm:$0xff] }
 0x2e7   : > { %v9693_v4 = vmul.f32 1.442695, %v2909_v50  ;;  %v2912_v12 = vsub.f32 %v12815_v6, %v2768_v15  ;;  %vm12817_vm1 = vcmp.gt.f32.partialorder %v12816_v11, 0.0  ;;  %vm12819_vm2 = vcmp.gt.f32.partialorder %v12818_v21, 0.0  ;;  %v12823_v61 = vld [vmem:[#allocation180_spill] sm:$0xff]  ;;  %5333 = vmatprep.mubr.msk.bf16.mxu0 %vm9671_vm0, %v5332_v23  ;;  %v9712_v6 = vpop.eup %6195  ;;  %v12869_v34 = vld [vmem:[#allocation125_spill] sm:$0xff] }
 0x2e8   : > { %vm9700_vm3 = vmpackc.low %vm12819_vm2, %vm12817_vm1  ;;  %6219 = vpow2.f32 %v9571_v37  ;;  %v3742_v32 = vadd.f32 %v3741_v59, %v3244_v53  ;;  %v2913_v17 = vsub.f32 %v12823_v61, %v2768_v15  ;;  %v5428_v50 = vpack.c.bf16 %v9591_v45, %v9559_v30  ;;  %v9724_v37 = vpop.eup %6197 }
 0x2e9   : > { %6221 = vpow2.f32 %v9580_v16  ;;  %vm12824_vm4 = vcmp.gt.f32.partialorder %v12769_v7, 0.0  ;;  %vm12825_vm13 = vcmp.gt.f32.partialorder %v12742_v36, 0.0  ;;  %v3235_v59 = vsel %vm2115_vm7, %v9389_v20, 0.0  ;;  %12826 = vst [vmem:[#allocation136_spill] sm:$0xff] %v9724_v37 }
 0x2ea   : > { %v3245_v9 = vsel %vm12824_vm4, %v9421_v57, 0.0  ;;  %v3234_v53 = vsel %vm12825_vm13, %v9384_v18, 0.0  ;;  %6223 = vpow2.f32 %v9582_v13  ;;  %v9727_v15 = vmul.f32 1.442695, %v2910_v63  ;;  %5429 = vmatprep.mubr.msk.bf16.mxu1 %vm9700_vm3, %v5428_v50  ;;  %v9736_v18 = vpop.eup %6199  ;;  %4095 = vperm.xlu1 %6015, %v9359_v51  }
 0x2eb   : > { %v9729_v49 = vmul.f32 1.442695, %v2911_v42  ;;  %vm12827_vm8 = vcmp.gt.f32.partialorder %v12793_v25, 0.0  ;;  %6225 = vpow2.f32 %v9596_v56  ;;  %v9741_v20 = vmul.f32 1.442695, %v2912_v12  ;;  %v9746_v16 = vpop.eup %6201  ;;  %v12830_v25 = vld [vmem:[#allocation200_spill] sm:$0xff] }
 0x2ec   : > { %v3246_v57 = vsel %vm12827_vm8, %v9427_v44, 0.0  ;;  %v3731_v36 = vadd.f32 %v3235_v59, %v3234_v53  ;;  %vm12828_vm7 = vcmp.gt.f32.partialorder %v12760_v62, 0.0  ;;  %12829 = vst [vmem:[#allocation137_spill] sm:$0xff] %v9746_v16  ;;  %6227 = vpow2.f32 %v9605_v41  ;;  %v9754_v42 = vpop.eup %6203  ;;  %v12831_v56 = vld [vmem:[#allocation202_spill] sm:$0xff]  ;;  %v12835_v41 = vld [vmem:[#allocation204_spill] sm:$0xff]  ;;  %v9785_v59 = vpop.permute.xlu0 %2782 }
 0x2ed   : > { %v3247_v7 = vsel %vm12828_vm7, %v9433_v1, 0.0  ;;  %v9749_v44 = vadd.f32 %v3742_v32, %v3245_v9  ;;  %v9751_v13 = vmul.f32 1.442695, %v2913_v17  ;;  %v2914_v63 = vsub.f32 %v12830_v25, %v2773_v38  ;;  %v9761_v12 = vpop.eup %6205  ;;  %v12834_v9 = vld [vmem:[#allocation203_spill] sm:$0xff]  ;;  %v12844_v25 = vld [vmem:[#allocation208_spill] sm:$0xff] }
 0x2ee   : > { %6229 = vpow2.f32 %v9607_v46  ;;  %v2915_v23 = vsub.f32 %v12831_v56, %v2773_v38  ;;  %vm12832_vm0 = vcmp.gt.f32.partialorder %v12750_v14, 0.0  ;;  %v3746_v62 = vadd.f32 %v3247_v7, %v3246_v57  ;;  %12833 = vst [vmem:[#allocation138_spill] sm:$0xff] %v9761_v12  ;;  %v9769_v46 = vpop.eup %6207 }
 0x2ef   : > { %v3236_v1 = vsel %vm12832_vm0, %v9395_v2, 0.0  ;;  %6231 = vpow2.f32 %v9615_v5  ;;  %v2916_v32 = vsub.f32 %v12834_v9, %v2773_v38  ;;  %v2917_v31 = vsub.f32 %v12835_v41, %v2773_v38  ;;  %v2778_v2 = vpop.permute.xlu1 %2777  ;;  %v9779_v50 = vpop.eup %6209  ;;  %v12848_v9 = vld [vmem:[#allocation192_spill] sm:$0xff] }
 0x2f0   : > { %v3237_v61 = vsel %vm2117_vm9, %v9397_v22, 0.0  ;;  %6233 = vpow2.f32 %v9621_v8  ;;  %v3732_v14 = vadd.f32 %v3731_v36, %v3236_v1  ;;  %vm12836_vm1 = vcmp.gt.f32.partialorder %v12802_v60, 0.0  ;;  %12838 = vst [vmem:[#allocation139_spill] sm:$0xff] %v9779_v50  ;;  %v12839_v22 = vld [vmem:[#allocation205_spill] sm:$0xff]  ;;  %v9787_v57 = vpop.eup %6211  ;;  %v12841_v60 = vld [vmem:[#allocation206_spill] sm:$0xff]  ;;  %v12846_v1 = vld [vmem:[#allocation131_spill] sm:$0xff] }
 0x2f1   : > { %v3248_v5 = vsel %vm12836_vm1, %v9493_v24, 0.0  ;;  %vm12837_vm2 = vcmp.gt.f32.partialorder %v12771_v54, 0.0  ;;  %6235 = vpow2.f32 %v9623_v33  ;;  %v9782_v48 = vmul.f32 1.442695, %v2914_v63  ;;  %12840 = vst [vmem:[#allocation140_spill] sm:$0xff] %v9787_v57  ;;  %v9794_v36 = vpop.eup %6213  ;;  %4125 = vperm.xlu1 %6015, %v12846_v1   ;;  %v12906_v50 = vld [vmem:[#allocation20_spill] sm:$0xff] }
 0x2f2   : > { %v3249_v17 = vsel %vm12837_vm2, %v9509_v27, 0.0  ;;  %v2918_v53 = vsub.f32 %v12839_v22, %v2778_v2  ;;  %v3747_v8 = vadd.f32 %v3746_v62, %v3248_v5  ;;  %6237 = vpow2.f32 %v9625_v43  ;;  %v12842_v27 = vld [vmem:[#allocation207_spill] sm:$0xff]  ;;  %12843 = vst [vmem:[#allocation159_spill] sm:$0xff] %v9794_v36  ;;  %v9802_v56 = vpop.eup %6215 }
 0x2f3   : > { %v9790_v24 = vmul.f32 1.442695, %v2915_v23  ;;  %v2919_v54 = vsub.f32 %v12841_v60, %v2778_v2  ;;  %v2920_v38 = vsub.f32 %v12842_v27, %v2778_v2  ;;  %6239 = vpow2.f32 %v9639_v40  ;;  %12845 = vst [vmem:[#allocation160_spill] sm:$0xff] %v9802_v56  ;;  %v12847_v23 = vld [vmem:[#allocation191_spill] sm:$0xff]  ;;  %v12857_v60 = vld [vmem:[#allocation144_spill] sm:$0xff]  ;;  %v12881_v56 = vld [vmem:[#allocation26_spill] sm:$0xff] }
 0x2f4   : > { %v9797_v33 = vmul.f32 1.442695, %v2916_v32  ;;  %v9799_v7 = vmul.f32 1.442695, %v2917_v31  ;;  %v2921_v63 = vsub.f32 %v12844_v25, %v2778_v2  ;;  %6241 = vpow2.f32 %v9660_v35  ;;  %v9812_v32 = vpop.eup %6217  ;;  %v12849_v31 = vld [vmem:[#allocation193_spill] sm:$0xff]  ;;  %v12858_v27 = vld [vmem:[#allocation147_spill] sm:$0xff] }
 0x2f5   : > { %v9806_v43 = vadd.f32 %v3732_v14, %v3237_v61  ;;  %v2922_v62 = vsub.f32 %v12847_v23, %v9785_v59  ;;  %v2923_v40 = vsub.f32 %v12848_v9, %v9785_v59  ;;  %6243 = vpow2.f32 %v9662_v3  ;;  %v12850_v35 = vld [vmem:[#allocation33_spill] sm:$0xff]  ;;  %v9829_v22 = vpop.eup %6219  ;;  %v12861_v25 = vld [vmem:[#allocation39_spill] sm:$0xff]  ;;  %v2788_v9 = vpop.permute.xlu1 %2787  ;;  %4115 = vperm.xlu1 %6015, %v12869_v34   ;;  %v12883_v23 = vld [vmem:[#allocation30_spill] sm:$0xff] }
 0x2f6   : > { %v9815_v41 = vmul.f32 1.442695, %v2918_v53  ;;  %v2924_v2 = vsub.f32 %v12849_v31, %v9785_v59  ;;  %v9819_v5 = vadd.f32 %v3747_v8, %v3249_v17  ;;  %vm12851_vm9 = vcmp.gt.f32.partialorder %v12850_v35, 0.0  ;;  %v12852_v61 = vld [vmem:[#allocation37_spill] sm:$0xff]  ;;  %12856 = vst [vmem:[#allocation162_spill] sm:$0xff] %v9829_v22  ;;  %v12859_v8 = vld [vmem:[#allocation35_spill] sm:$0xff]  ;;  %v9846_v31 = vpop.eup %6221 }
 0x2f7   : > { %vm12853_vm3 = vcmp.gt.f32.partialorder %v12852_v61, 0.0  ;;  %6245 = vpow2.f32 %v9691_v39  ;;  %v9832_v3 = vmul.f32 1.442695, %v2919_v54  ;;  %v9834_v53 = vmul.f32 1.442695, %v2920_v38  ;;  %12865 = vst [vmem:[#allocation163_spill] sm:$0xff] %v9846_v31  ;;  %v9855_v51 = vpop.eup %6223 }
 0x2f8   : > { %vm9825_vm4 = vmpackc.low %vm12853_vm3, %vm12851_vm9  ;;  %v5335_v17 = vpack.c.bf16 %v12858_v27, %v12857_v60  ;;  %vm12860_vm13 = vcmp.gt.f32.partialorder %v12859_v8, 0.0  ;;  %vm12862_vm8 = vcmp.gt.f32.partialorder %v12861_v25, 0.0  ;;  %6247 = vpow2.f32 %v9693_v4  ;;  %v12866_v54 = vld [vmem:[#allocation194_spill] sm:$0xff]  ;;  %12868 = vst [vmem:[#allocation165_spill] sm:$0xff] %v9855_v51  ;;  %v12870_v4 = vld [vmem:[#allocation128_spill] sm:$0xff] }
 0x2f9   : > { %vm9842_vm7 = vmpackc.low %vm12862_vm8, %vm12860_vm13  ;;  %v9849_v39 = vmul.f32 1.442695, %v2921_v63  ;;  %v2925_v38 = vsub.f32 %v12866_v54, %v9785_v59  ;;  %v5431_v1 = vpack.c.bf16 %v9585_v47, %v12867_v58  ;;  %6249 = vpow2.f32 %v9727_v15  ;;  %v12871_v63 = vld [vmem:[#allocation17_spill] sm:$0xff]  ;;  %v9868_v54 = vpop.eup %6225  ;;  %v12874_v15 = vld [vmem:[#allocation196_spill] sm:$0xff] }
 0x2fa   : > { %v9859_v37 = vmul.f32 1.442695, %v2922_v62  ;;  %v9861_v12 = vmul.f32 1.442695, %v2923_v40  ;;  %5336 = vmatmul.mubr.msk.bf16.gmra.mxu0 %vm9825_vm4, %v5335_v17  ;;  %vm12872_vm0 = vcmp.gt.f32.partialorder %v12871_v63, 0.0  ;;  %12873 = vst [vmem:[#allocation166_spill] sm:$0xff] %v9868_v54  ;;  %6251 = vpow2.f32 %v9729_v49  ;;  %v9879_v17 = vpop.eup %6227 }
 0x2fb   : > { %v3238_v59 = vsel %vm12872_vm0, %v12870_v4, 0.0  ;;  %v9871_v52 = vmul.f32 1.442695, %v2924_v2  ;;  %5432 = vmatmul.mubr.msk.bf16.gmra.mxu1 %vm9842_vm7, %v5431_v1  ;;  %v2926_v62 = vsub.f32 %v12874_v15, %v2788_v9  ;;  %v12875_v40 = vld [vmem:[#allocation141_spill] sm:$0xff]  ;;  %12877 = vst [vmem:[#allocation168_spill] sm:$0xff] %v9879_v17  ;;  %6253 = vpow2.f32 %v9741_v20  ;;  %v12879_v54 = vld [vmem:[#allocation198_spill] sm:$0xff]  ;;  %v9893_v34 = vpop.eup %6229 }
 0x2fc   : > { %v3239_v14 = vsel %vm2119_vm11, %v12875_v40, 0.0  ;;  %v12878_v4 = vld [vmem:[#allocation197_spill] sm:$0xff]  ;;  %v2928_v16 = vsub.f32 %v12879_v54, %v2788_v9  ;;  %v12880_v49 = vld [vmem:[#allocation199_spill] sm:$0xff]  ;;  %vm12882_vm1 = vcmp.gt.f32.partialorder %v12881_v56, 0.0  ;;  %vm12884_vm2 = vcmp.gt.f32.partialorder %v12883_v23, 0.0  ;;  %12887 = vst [vmem:[#allocation169_spill] sm:$0xff] %v9893_v34  ;;  %v9909_v36 = vpop.eup %6231 }
 0x2fd   : > { %v2927_v63 = vsub.f32 %v12878_v4, %v2788_v9  ;;  %v2929_v2 = vsub.f32 %v12880_v49, %v2788_v9  ;;  %vm9889_vm9 = vmpackc.low %vm12884_vm2, %vm12882_vm1  ;;  %6255 = vpow2.f32 %v9751_v13  ;;  %v12888_v15 = vld [vmem:[#allocation142_spill] sm:$0xff]  ;;  %v12889_v20 = vld [vmem:[#allocation19_spill] sm:$0xff]  ;;  %v3736_v4 = vadd.f32 %v3239_v14, %v3238_v59  ;;  %12897 = vst [vmem:[#allocation14_spill] sm:$0xff] %v9909_v36  ;;  %v9921_v51 = vpop.eup %6233 }
 0x2fe   : > { %vm12890_vm11 = vcmp.gt.f32.partialorder %v12889_v20, 0.0  ;;  %v5338_v9 = vpack.c.bf16 %v9657_v28, %v9612_v19  ;;  %v12891_v54 = vld [vmem:[#allocation28_spill] sm:$0xff]  ;;  %v12898_v34 = vld [vmem:[#allocation127_spill] sm:$0xff]  ;;  %6257 = vpow2.f32 %v9782_v48  ;;  %v12899_v13 = vld [vmem:[#allocation134_spill] sm:$0xff]  ;;  %12903 = vst [vmem:[#allocation149_spill] sm:$0xff] %v9921_v51  ;;  %v9926_v48 = vpop.eup %6235  ;;  %vm12907_vm0 = vcmp.gt.f32.partialorder %v12906_v50, 0.0  ;;  %v2793_v50 = vpop.permute.xlu0 %2792 }
 0x2ff   : > { %v3240_v40 = vsel %vm12890_vm11, %v12888_v15, 0.0  ;;  %vm12892_vm3 = vcmp.gt.f32.partialorder %v12891_v54, 0.0  ;;  %v12893_v49 = vld [vmem:[#allocation32_spill] sm:$0xff]  ;;  %4135 = vperm.xlu1 %6015, %v12898_v34   ;;  %v5434_v59 = vpack.c.bf16 %v9686_v26, %v12899_v13  ;;  %v12900_v14 = vld [vmem:[#allocation29_spill] sm:$0xff]  ;;  %vm12902_vm7 = vmmov %vm12884_vm2  ;;  %6259 = vpow2.f32 %v9790_v24  ;;  %12904 = vst [vmem:[#allocation16_spill] sm:$0xff] %v9926_v48 }
 0x300   : > { %vm12894_vm4 = vcmp.gt.f32.partialorder %v12893_v49, 0.0  ;;  %vm12901_vm8 = vcmp.gt.f32.partialorder %v12900_v14, 0.0  ;;  %v3263_v20 = vsel %vm12902_vm7, %v9657_v28, 0.0  ;;  %v3128_v36 = vmul.f32 1.442695, %v2925_v38  ;;  %5339 = vmatprep.mubr.msk.bf16.mxu0 %vm9889_vm9, %v5338_v9  ;;  %v12905_v31 = vld [vmem:[#allocation143_spill] sm:$0xff] }
 0x301   : > { %vm9905_vm13 = vmpackc.low %vm12894_vm4, %vm12892_vm3  ;;  %v3262_v15 = vsel %vm12901_vm8, %v9651_v29, 0.0  ;;  %v3130_v57 = vmul.f32 1.442695, %v2926_v62  ;;  %v3737_v34 = vadd.f32 %v3736_v4, %v3240_v40  ;;  %6261 = vpow2.f32 %v9797_v33  ;;  %v12908_v28 = vld [vmem:[#allocation148_spill] sm:$0xff]  ;;  %v12909_v23 = vld [vmem:[#allocation25_spill] sm:$0xff]  ;;  %v9940_v62 = vpop.eup %6237 }
 0x302   : > { %v3241_v22 = vsel %vm12907_vm0, %v12905_v31, 0.0  ;;  %5435 = vmatprep.mubr.msk.bf16.mxu1 %vm9905_vm13, %v5434_v59  ;;  %vm12910_vm1 = vcmp.gt.f32.partialorder %v12909_v23, 0.0  ;;  %vm12911_vm2 = vcmp.gt.f32.partialorder %v12881_v56, 0.0  ;;  %12912 = vst [vmem:[#allocation13_spill] sm:$0xff] %v9940_v62  ;;  %6263 = vpow2.f32 %v9799_v7  ;;  %v9945_v40 = vpop.eup %6239  ;;  %v12914_v9 = vld [vmem:[#allocation219_spill] sm:$0xff]  ;;  %v12917_v48 = vld [vmem:[#allocation222_spill] sm:$0xff]  ;;  %vm12922_vm11 = vmmov %vm12894_vm4 }
 0x303   : > { %v3258_v24 = vsel %vm12910_vm1, %v12908_v28, 0.0  ;;  %v3259_v38 = vsel %vm12911_vm2, %v9612_v19, 0.0  ;;  %v3132_v33 = vmul.f32 1.442695, %v2927_v63  ;;  %v9943_v1 = vadd.f32 %v3737_v34, %v3241_v22  ;;  %12913 = vst [vmem:[#allocation150_spill] sm:$0xff] %v9945_v40  ;;  %v9951_v56 = vpop.eup %6241  ;;  %v12916_v19 = vld [vmem:[#allocation221_spill] sm:$0xff]  ;;  %vm12942_vm7 = vmmov %vm12910_vm1 }
 0x304   : > { %v3766_v31 = vadd.f32 %v3263_v20, %v3262_v15  ;;  %6265 = vpow2.f32 %v9815_v41  ;;  %v3134_v17 = vmul.f32 1.442695, %v2928_v16  ;;  %v9948_v4 = vmul.f32 1.442695, %v2929_v2  ;;  %12915 = vst [vmem:[#allocation151_spill] sm:$0xff] %v9951_v56  ;;  %v12918_v63 = vld [vmem:[#allocation223_spill] sm:$0xff]  ;;  %v9956_v51 = vpop.eup %6243 }
 0x305   : > { %v2930_v59 = vsub.f32 %v12914_v9, %v2793_v50  ;;  %v2931_v62 = vsub.f32 %v12916_v19, %v2793_v50  ;;  %v2932_v7 = vsub.f32 %v12917_v48, %v2793_v50  ;;  %v2933_v22 = vsub.f32 %v12918_v63, %v2793_v50  ;;  %12919 = vst [vmem:[#allocation15_spill] sm:$0xff] %v9956_v51  ;;  %v12920_v41 = vld [vmem:[#allocation31_spill] sm:$0xff]  ;;  %v12923_v15 = vld [vmem:[#allocation133_spill] sm:$0xff]  ;;  %v9968_v48 = vpop.eup %6245  ;;  %v2803_v19 = vpop.permute.xlu0 %2802  ;;  %v12929_v49 = vld [vmem:[#allocation224_spill] sm:$0xff] }
 0x306   : > { %v3761_v34 = vadd.f32 %v3259_v38, %v3258_v24  ;;  %6267 = vpow2.f32 %v9832_v3  ;;  %vm12921_vm9 = vcmp.gt.f32.partialorder %v12920_v41, 0.0  ;;  %v3265_v2 = vsel %vm12922_vm11, %v9686_v26, 0.0  ;;  %v12924_v20 = vld [vmem:[#allocation27_spill] sm:$0xff]  ;;  %12926 = vst [vmem:[#allocation152_spill] sm:$0xff] %v9968_v48  ;;  %v2798_v38 = vpop.permute.xlu1 %2797  ;;  %v9974_v63 = vpop.eup %6247  ;;  %v12930_v51 = vld [vmem:[#allocation225_spill] sm:$0xff]  ;;  %3744 = vadd.xlane.f32.xlu0 %v9749_v44 }
 0x307   : > { %v3264_v16 = vsel %vm12921_vm9, %v9675_v10, 0.0  ;;  %vm12925_vm3 = vcmp.gt.f32.partialorder %v12924_v20, 0.0  ;;  %6269 = vpow2.f32 %v9834_v53  ;;  %vm12927_vm4 = vcmp.gt.f32.partialorder %v12891_v54, 0.0  ;;  %12928 = vst [vmem:[#allocation154_spill] sm:$0xff] %v9974_v63  ;;  %v9979_v48 = vpop.eup %6249  ;;  %v12952_v20 = vld [vmem:[#allocation214_spill] sm:$0xff] }
 0x308   : > { %v3260_v9 = vsel %vm12925_vm3, %v12923_v15, 0.0  ;;  %v3767_v24 = vadd.f32 %v3766_v31, %v3264_v16  ;;  %v3261_v3 = vsel %vm12927_vm4, %v12899_v13, 0.0  ;;  %6271 = vpow2.f32 %v9849_v39  ;;  %v9982_v54 = vpop.eup %6251  ;;  %v12932_v13 = vld [vmem:[#allocation226_spill] sm:$0xff]  ;;  %vm12947_vm2 = vmmov %vm12925_vm3 }
 0x309   : > { %v3762_v50 = vadd.f32 %v3761_v34, %v3260_v9  ;;  %v3138_v26 = vmul.f32 1.442695, %v2930_v59  ;;  %v2934_v40 = vsub.f32 %v12929_v49, %v2798_v38  ;;  %v2935_v56 = vsub.f32 %v12930_v51, %v2798_v38  ;;  %12931 = vst [vmem:[#allocation10_spill] sm:$0xff] %v9982_v54  ;;  %v12933_v9 = vld [vmem:[#allocation227_spill] sm:$0xff]  ;;  %v12934_v59 = vld [vmem:[#allocation209_spill] sm:$0xff]  ;;  %v9988_v49 = vpop.eup %6253  ;;  %vm10024_vm11 = vmpackc.low %vm12921_vm9, %vm12947_vm2 }
 0x30a   : > { %6273 = vpow2.f32 %v9859_v37  ;;  %v3140_v53 = vmul.f32 1.442695, %v2931_v62  ;;  %v3142_v31 = vmul.f32 1.442695, %v2932_v7  ;;  %v3144_v16 = vmul.f32 1.442695, %v2933_v22  ;;  %v9995_v7 = vpop.eup %6255  ;;  %3734 = vadd.xlane.f32.xlu0 %v9806_v43 }
 0x30b   : > { %6275 = vpow2.f32 %v9861_v12  ;;  %v2936_v34 = vsub.f32 %v12932_v13, %v2798_v38  ;;  %v2937_v39 = vsub.f32 %v12933_v9, %v2798_v38  ;;  %v2938_v63 = vsub.f32 %v12934_v59, %v2803_v19  ;;  %12935 = vst [vmem:[#allocation22_spill] sm:$0xff] %v9988_v49  ;;  %v12936_v12 = vld [vmem:[#allocation210_spill] sm:$0xff]  ;;  %v10001_v13 = vpop.eup %6257  ;;  %v12939_v9 = vld [vmem:[#allocation211_spill] sm:$0xff] }
 0x30c   : > { %6277 = vpow2.f32 %v9871_v52  ;;  %v9991_v51 = vadd.f32 %v3767_v24, %v3265_v2  ;;  %v3146_v37 = vmul.f32 1.442695, %v2934_v40  ;;  %v9993_v62 = vadd.f32 %v3762_v50, %v3261_v3  ;;  %12938 = vst [vmem:[#allocation155_spill] sm:$0xff] %v10001_v13  ;;  %v12940_v2 = vld [vmem:[#allocation213_spill] sm:$0xff]  ;;  %v12962_v59 = vld [vmem:[#allocation34_spill] sm:$0xff] }
 0x30d   : > { %6279 = vpow2.f32 %v3128_v36  ;;  %v3148_v22 = vmul.f32 1.442695, %v2935_v56  ;;  %v2939_v54 = vsub.f32 %v12936_v12, %v2803_v19  ;;  %vm12937_vm13 = vcmp.gt.f32.partialorder %v12852_v61, 0.0  ;;  %v10016_v61 = vpop.permute.xlu1 %2807 }
 0x30e   : > { %v3254_v38 = vsel %vm12937_vm13, %v12858_v27, 0.0  ;;  %6281 = vpow2.f32 %v3130_v57  ;;  %v2940_v52 = vsub.f32 %v12939_v9, %v2803_v19  ;;  %v2941_v24 = vsub.f32 %v12940_v2, %v2803_v19  ;;  %v10018_v27 = vpop.eup %6259  ;;  %v12967_v9 = vld [vmem:[#allocation54_spill] sm:$0xff]  ;;  %3749 = vadd.xlane.f32.xlu0 %v9819_v5 }
 0x30f   : > { %vm12941_vm8 = vcmp.gt.f32.partialorder %v12809_v55, 0.0  ;;  %vm12943_vm0 = vcmp.gt.f32.partialorder %v12900_v14, 0.0  ;;  %12946 = vst [vmem:[#allocation156_spill] sm:$0xff] %v10018_v27  ;;  %6283 = vpow2.f32 %v3132_v33  ;;  %v3150_v57 = vmul.f32 1.442695, %v2936_v34  ;;  %v10028_v55 = vpop.eup %6261  ;;  %v12990_v5 = vld [vmem:[#allocation238_spill] sm:$0xff] }
 0x310   : > { %v3255_v40 = vsel %vm12941_vm8, %v9577_v0, 0.0  ;;  %vm10012_vm1 = vmpackc.low %vm12943_vm0, %vm12942_vm7  ;;  %v3152_v56 = vmul.f32 1.442695, %v2937_v39  ;;  %v3154_v3 = vmul.f32 1.442695, %v2938_v63  ;;  %12950 = vst [vmem:[#allocation157_spill] sm:$0xff] %v10028_v55  ;;  %6285 = vpow2.f32 %v3134_v17  ;;  %v10035_v50 = vpop.eup %6263 }
 0x311   : > { %v3756_v14 = vadd.f32 %v3255_v40, %v3254_v38  ;;  %v5341_v23 = vpack.c.bf16 %v9651_v29, %v12908_v28  ;;  %v5437_v33 = vpack.c.bf16 %v9675_v10, %v12923_v15  ;;  %12951 = vst [vmem:[#allocation12_spill] sm:$0xff] %v10035_v50  ;;  %6287 = vpow2.f32 %v9948_v4  ;;  %v12953_v63 = vld [vmem:[#allocation215_spill] sm:$0xff]  ;;  %v10042_v44 = vpop.eup %6265  ;;  %v12958_v4 = vld [vmem:[#allocation217_spill] sm:$0xff]  ;;  %v12965_v38 = vld [vmem:[#allocation50_spill] sm:$0xff] }
 0x312   : > { %v3156_v41 = vmul.f32 1.442695, %v2939_v54  ;;  %v2942_v19 = vsub.f32 %v12952_v20, %v10016_v61  ;;  %v2943_v34 = vsub.f32 %v12953_v63, %v10016_v61  ;;  %12954 = vst [vmem:[#allocation24_spill] sm:$0xff] %v10042_v44  ;;  %6289 = vpow2.f32 %v3138_v26  ;;  %v12976_v40 = vld [vmem:[#allocation56_spill] sm:$0xff]  ;;  %v12986_v20 = vld [vmem:[#allocation162_spill] sm:$0xff]  ;;  %3769 = vadd.xlane.f32.xlu0 %v9991_v51  ;;  %v13010_v50 = vld [vmem:[#allocation43_spill] sm:$0xff] }
 0x313   : > { %v3158_v17 = vmul.f32 1.442695, %v2940_v52  ;;  %v3160_v39 = vmul.f32 1.442695, %v2941_v24  ;;  %5342 = vmatmul.mubr.msk.bf16.gmra.mxu0 %vm10012_vm1, %v5341_v23  ;;  %5438 = vmatmul.mubr.msk.bf16.gmra.mxu1 %vm10024_vm11, %v5437_v33  ;;  %vm12955_vm3 = vcmp.gt.f32.partialorder %v12850_v35, 0.0  ;;  %6291 = vpow2.f32 %v3140_v53  ;;  %v10059_v26 = vpop.eup %6267  ;;  %v12960_v35 = vld [vmem:[#allocation218_spill] sm:$0xff] }
 0x314   : > { %v3250_v29 = vsel %vm12955_vm3, %v12857_v60, 0.0  ;;  %vm12956_vm4 = vcmp.gt.f32.partialorder %v12861_v25, 0.0  ;;  %vm12957_vm13 = vcmp.gt.f32.partialorder %v12818_v21, 0.0  ;;  %v2944_v15 = vsub.f32 %v12958_v4, %v10016_v61  ;;  %12959 = vst [vmem:[#allocation182_spill] sm:$0xff] %v10059_v26  ;;  %v12961_v53 = vld [vmem:[#allocation145_spill] sm:$0xff]  ;;  %v10067_v25 = vpop.eup %6269  ;;  %v12974_v24 = vld [vmem:[#allocation52_spill] sm:$0xff] }
 0x315   : > { %v3256_v10 = vsel %vm12956_vm4, %v9585_v47, 0.0  ;;  %v3257_v28 = vsel %vm12957_vm13, %v9591_v45, 0.0  ;;  %6293 = vpow2.f32 %v3142_v31  ;;  %v2945_v60 = vsub.f32 %v12960_v35, %v10016_v61  ;;  %12964 = vst [vmem:[#allocation183_spill] sm:$0xff] %v10067_v25  ;;  %v10077_v31 = vpop.eup %6271  ;;  %v12984_v33 = vld [vmem:[#allocation45_spill] sm:$0xff]  ;;  %v13017_v27 = vld [vmem:[#allocation246_spill] sm:$0xff]  ;;  %v13018_v25 = vld [vmem:[#allocation247_spill] sm:$0xff] }
 0x316   : > { %v3757_v54 = vadd.f32 %v3756_v14, %v3256_v10  ;;  %vm12963_vm8 = vcmp.gt.f32.partialorder %v12962_v59, 0.0  ;;  %6295 = vpow2.f32 %v3144_v16  ;;  %v3162_v45 = vmul.f32 1.442695, %v2942_v19  ;;  %12971 = vst [vmem:[#allocation184_spill] sm:$0xff] %v10077_v31  ;;  %v12983_v14 = vld [vmem:[#allocation237_spill] sm:$0xff]  ;;  %v12987_v19 = vld [vmem:[#allocation46_spill] sm:$0xff] }
 0x317   : > { %v3251_v47 = vsel %vm12963_vm8, %v12961_v53, 0.0  ;;  %v3164_v21 = vmul.f32 1.442695, %v2943_v34  ;;  %vm12966_vm7 = vcmp.gt.f32.partialorder %v12965_v38, 0.0  ;;  %vm12968_vm0 = vcmp.gt.f32.partialorder %v12967_v9, 0.0  ;;  %v10095_v61 = vpop.eup %6273  ;;  %v12992_v59 = vld [vmem:[#allocation239_spill] sm:$0xff] }
 0x318   : > { %v3751_v12 = vadd.f32 %v3251_v47, %v3250_v29  ;;  %vm10073_vm1 = vmpackc.low %vm12968_vm0, %vm12966_vm7  ;;  %6297 = vpow2.f32 %v3146_v37  ;;  %vm12972_vm2 = vcmp.gt.f32.partialorder %v12859_v8, 0.0  ;;  %vm12973_vm9 = vcmp.gt.f32.partialorder %v12816_v11, 0.0  ;;  %v2813_v37 = vpop.permute.xlu0 %2812  ;;  %12980 = vst [vmem:[#allocation185_spill] sm:$0xff] %v10095_v61  ;;  %v10100_v0 = vpop.eup %6275  ;;  %v13023_v44 = vld [vmem:[#allocation229_spill] sm:$0xff] }
 0x319   : > { %v3252_v52 = vsel %vm12972_vm2, %v12867_v58, 0.0  ;;  %v3253_v16 = vsel %vm12973_vm9, %v9559_v30, 0.0  ;;  %v5344_v2 = vpack.c.bf16 %v9754_v42, %v9712_v6  ;;  %vm12975_vm11 = vcmp.gt.f32.partialorder %v12974_v24, 0.0  ;;  %v12981_v30 = vld [vmem:[#allocation236_spill] sm:$0xff]  ;;  %12982 = vst [vmem:[#allocation187_spill] sm:$0xff] %v10100_v0  ;;  %v10112_v34 = vpop.eup %6277 }
 0x31a   : > { %vm12977_vm3 = vcmp.gt.f32.partialorder %v12976_v40, 0.0  ;;  %6299 = vpow2.f32 %v3148_v22  ;;  %v3752_v58 = vadd.f32 %v3751_v12, %v3252_v52  ;;  %v5440_v11 = vpack.c.bf16 %v9769_v46, %v9736_v18  ;;  %12989 = vst [vmem:[#allocation188_spill] sm:$0xff] %v10112_v34  ;;  %v10119_v4 = vpop.eup %6279  ;;  %v12995_v52 = vld [vmem:[#allocation41_spill] sm:$0xff] }
 0x31b   : > { %vm10091_vm4 = vmpackc.low %vm12977_vm3, %vm12975_vm11  ;;  %v2946_v8 = vsub.f32 %v12981_v30, %v2813_v37  ;;  %6301 = vpow2.f32 %v3150_v57  ;;  %5345 = vmatprep.mubr.msk.bf16.mxu0 %vm10073_vm1, %v5344_v2  ;;  %v2947_v23 = vsub.f32 %v12983_v14, %v2813_v37  ;;  %vm12985_vm13 = vcmp.gt.f32.partialorder %v12984_v33, 0.0  ;;  %12991 = vst [vmem:[#allocation189_spill] sm:$0xff] %v10119_v4  ;;  %v10122_v12 = vpop.eup %6281 }
 0x31c   : > { %v3278_v22 = vsel %vm12985_vm13, %v9812_v32, 0.0  ;;  %vm12988_vm8 = vcmp.gt.f32.partialorder %v12987_v19, 0.0  ;;  %6303 = vpow2.f32 %v3152_v56  ;;  %v3166_v29 = vmul.f32 1.442695, %v2944_v15  ;;  %5441 = vmatprep.mubr.msk.bf16.mxu1 %vm10091_vm4, %v5440_v11  ;;  %12993 = vst [vmem:[#allocation190_spill] sm:$0xff] %v10122_v12  ;;  %v12994_v15 = vld [vmem:[#allocation139_spill] sm:$0xff]  ;;  %v10127_v2 = vpop.eup %6283 }
 0x31d   : > { %v3279_v63 = vsel %vm12988_vm8, %v12986_v20, 0.0  ;;  %v10114_v10 = vadd.f32 %v3752_v58, %v3253_v16  ;;  %v2948_v57 = vsub.f32 %v12990_v5, %v2813_v37  ;;  %6305 = vpow2.f32 %v3154_v3  ;;  %12997 = vst [vmem:[#allocation9_spill] sm:$0xff] %v10127_v2  ;;  %v12998_v3 = vld [vmem:[#allocation163_spill] sm:$0xff]  ;;  %v10136_v58 = vpop.permute.xlu0 %2822  ;;  %v10138_v11 = vpop.eup %6285 }
 0x31e   : > { %v3758_v35 = vadd.f32 %v3757_v54, %v3257_v28  ;;  %v3168_v53 = vmul.f32 1.442695, %v2945_v60  ;;  %v2949_v47 = vsub.f32 %v12992_v59, %v2813_v37  ;;  %6307 = vpow2.f32 %v3156_v41  ;;  %v12999_v28 = vld [vmem:[#allocation47_spill] sm:$0xff]  ;;  %v13001_v60 = vld [vmem:[#allocation140_spill] sm:$0xff]  ;;  %v13002_v37 = vld [vmem:[#allocation42_spill] sm:$0xff]  ;;  %13004 = vst [vmem:[#allocation171_spill] sm:$0xff] %v10138_v11  ;;  %v2818_v5 = vpop.permute.xlu1 %2817 }
 0x31f   : > { %v3170_v43 = vmul.f32 1.442695, %v2946_v8  ;;  %v3786_v56 = vadd.f32 %v3279_v63, %v3278_v22  ;;  %vm12996_vm7 = vcmp.gt.f32.partialorder %v12995_v52, 0.0  ;;  %6309 = vpow2.f32 %v3158_v17  ;;  %v10140_v22 = vpop.eup %6287  ;;  %v13006_v17 = vld [vmem:[#allocation165_spill] sm:$0xff]  ;;  %v13009_v59 = vld [vmem:[#allocation159_spill] sm:$0xff] }
 0x320   : > { %v3274_v16 = vsel %vm12996_vm7, %v12994_v15, 0.0  ;;  %v3172_v36 = vmul.f32 1.442695, %v2947_v23  ;;  %vm13000_vm0 = vcmp.gt.f32.partialorder %v12999_v28, 0.0  ;;  %vm13003_vm1 = vcmp.gt.f32.partialorder %v13002_v37, 0.0  ;;  %13005 = vst [vmem:[#allocation173_spill] sm:$0xff] %v10140_v22  ;;  %v10148_v31 = vpop.eup %6289  ;;  %3759 = vadd.xlane.f32.xlu0 %v3758_v35 }
 0x321   : > { %v3280_v54 = vsel %vm13000_vm0, %v12998_v3, 0.0  ;;  %v3275_v41 = vsel %vm13003_vm1, %v13001_v60, 0.0  ;;  %6311 = vpow2.f32 %v3160_v39  ;;  %v3174_v30 = vmul.f32 1.442695, %v2948_v57  ;;  %v13007_v23 = vld [vmem:[#allocation48_spill] sm:$0xff]  ;;  %13012 = vst [vmem:[#allocation21_spill] sm:$0xff] %v10148_v31 }
 0x322   : > { %v3787_v8 = vadd.f32 %v3786_v56, %v3280_v54  ;;  %v3781_v14 = vadd.f32 %v3275_v41, %v3274_v16  ;;  %6313 = vpow2.f32 %v3162_v45  ;;  %v3176_v51 = vmul.f32 1.442695, %v2949_v47  ;;  %v13013_v39 = vld [vmem:[#allocation244_spill] sm:$0xff]  ;;  %v13014_v56 = vld [vmem:[#allocation245_spill] sm:$0xff]  ;;  %v10154_v47 = vpop.eup %6291  ;;  %v13025_v35 = vld [vmem:[#allocation230_spill] sm:$0xff] }
 0x323   : > { %vm13008_vm2 = vcmp.gt.f32.partialorder %v13007_v23, 0.0  ;;  %vm13011_vm9 = vcmp.gt.f32.partialorder %v13010_v50, 0.0  ;;  %6315 = vpow2.f32 %v3164_v21  ;;  %v2950_v57 = vsub.f32 %v13013_v39, %v2818_v5  ;;  %v13015_v54 = vld [vmem:[#allocation228_spill] sm:$0xff]  ;;  %13016 = vst [vmem:[#allocation174_spill] sm:$0xff] %v10154_v47  ;;  %v10158_v26 = vpop.eup %6293  ;;  %3739 = vadd.xlane.f32.xlu1 %v9943_v1 }
 0x324   : > { %v3281_v63 = vsel %vm13008_vm2, %v13006_v17, 0.0  ;;  %v3276_v55 = vsel %vm13011_vm9, %v13009_v59, 0.0  ;;  %v2951_v16 = vsub.f32 %v13014_v56, %v2818_v5  ;;  %v2954_v45 = vsub.f32 %v13015_v54, %v10136_v58  ;;  %13019 = vst [vmem:[#allocation175_spill] sm:$0xff] %v10158_v26  ;;  %v13020_v21 = vld [vmem:[#allocation160_spill] sm:$0xff]  ;;  %v10165_v34 = vpop.eup %6295 }
 0x325   : > { %6317 = vpow2.f32 %v3166_v29  ;;  %v3788_v41 = vadd.f32 %v3787_v8, %v3281_v63  ;;  %v2952_v13 = vsub.f32 %v13017_v27, %v2818_v5  ;;  %v2953_v4 = vsub.f32 %v13018_v25, %v2818_v5  ;;  %v13021_v31 = vld [vmem:[#allocation44_spill] sm:$0xff]  ;;  %13024 = vst [vmem:[#allocation11_spill] sm:$0xff] %v10165_v34  ;;  %v13026_v25 = vld [vmem:[#allocation231_spill] sm:$0xff]  ;;  %v10171_v63 = vpop.eup %6297  ;;  %v13045_v34 = vld [vmem:[#allocation138_spill] sm:$0xff] }
 0x326   : > { %6319 = vpow2.f32 %v3168_v53  ;;  %vm13022_vm11 = vcmp.gt.f32.partialorder %v13021_v31, 0.0  ;;  %v3782_v56 = vadd.f32 %v3781_v14, %v3276_v55  ;;  %v2955_v54 = vsub.f32 %v13023_v44, %v10136_v58  ;;  %v10173_v55 = vpop.permute.xlu1 %2827 }
 0x327   : > { %v3277_v39 = vsel %vm13022_vm11, %v13020_v21, 0.0  ;;  %6321 = vpow2.f32 %v3170_v43  ;;  %v3178_v29 = vmul.f32 1.442695, %v2950_v57  ;;  %v2956_v27 = vsub.f32 %v13025_v35, %v10136_v58  ;;  %v10175_v14 = vpop.eup %6299  ;;  %3789 = vadd.xlane.f32.xlu0 %v3788_v41  ;;  %v13027_v43 = vld [vmem:[#allocation137_spill] sm:$0xff]  ;;  %3764 = vadd.xlane.f32.xlu1 %v9993_v62 }
 0x328   : > { %v2957_v8 = vsub.f32 %v13026_v25, %v10136_v58  ;;  %6323 = vpow2.f32 %v3172_v36  ;;  %v3180_v53 = vmul.f32 1.442695, %v2951_v16  ;;  %v3182_v5 = vmul.f32 1.442695, %v2952_v13  ;;  %v13028_v57 = vld [vmem:[#allocation53_spill] sm:$0xff]  ;;  %v10191_v36 = vpop.eup %6301  ;;  %v13037_v16 = vld [vmem:[#allocation135_spill] sm:$0xff] }
 0x329   : > { %v3186_v26 = vmul.f32 1.442695, %v2954_v45  ;;  %6325 = vpow2.f32 %v3174_v30  ;;  %v3184_v44 = vmul.f32 1.442695, %v2953_v4  ;;  %vm13029_vm3 = vcmp.gt.f32.partialorder %v13028_v57, 0.0  ;;  %v13031_v25 = vld [vmem:[#allocation49_spill] sm:$0xff]  ;;  %v10206_v57 = vpop.eup %6303 }
 0x32a   : > { %v3270_v35 = vsel %vm13029_vm3, %v13027_v43, 0.0  ;;  %vm13030_vm4 = vcmp.gt.f32.partialorder %v12967_v9, 0.0  ;;  %vm13032_vm13 = vcmp.gt.f32.partialorder %v13031_v25, 0.0  ;;  %vm13033_vm8 = vmmov %vm13029_vm3  ;;  %13036 = vst [vmem:[#allocation23_spill] sm:$0xff] %v10191_v36  ;;  %6327 = vpow2.f32 %v3176_v51  ;;  %v13040_v45 = vld [vmem:[#allocation55_spill] sm:$0xff]  ;;  %v13047_v51 = vld [vmem:[#allocation136_spill] sm:$0xff] }
 0x32b   : > { %v3271_v58 = vsel %vm13030_vm4, %v9754_v42, 0.0  ;;  %vm10187_vm7 = vmpackc.low %vm13033_vm8, %vm13032_vm13  ;;  %v10194_v4 = vadd.f32 %v3782_v56, %v3277_v39  ;;  %v5347_v9 = vpack.c.bf16 %v13027_v43, %v13037_v16  ;;  %v13038_v42 = vld [vmem:[#allocation51_spill] sm:$0xff]  ;;  %vm13041_vm1 = vcmp.gt.f32.partialorder %v13040_v45, 0.0  ;;  %13044 = vst [vmem:[#allocation38_spill] sm:$0xff] %v10206_v57  ;;  %v13048_v56 = vld [vmem:[#allocation232_spill] sm:$0xff]  ;;  %3754 = vadd.xlane.f32.xlu1 %v10114_v10 }
 0x32c   : > { %v3776_v30 = vadd.f32 %v3271_v58, %v3270_v35  ;;  %vm13039_vm0 = vcmp.gt.f32.partialorder %v13038_v42, 0.0  ;;  %6329 = vpow2.f32 %v3178_v29  ;;  %vm13046_vm9 = vmmov %vm13041_vm1  ;;  %v5443_v39 = vpack.c.bf16 %v13045_v34, %v13047_v51  ;;  %v10215_v35 = vpop.eup %6305  ;;  %v13050_v29 = vld [vmem:[#allocation233_spill] sm:$0xff] }
 0x32d   : > { %vm10202_vm2 = vmpackc.low %vm13041_vm1, %vm13039_vm0  ;;  %v3272_v1 = vsel %vm13046_vm9, %v13045_v34, 0.0  ;;  %v2958_v43 = vsub.f32 %v13048_v56, %v10173_v55  ;;  %13049 = vst [vmem:[#allocation177_spill] sm:$0xff] %v10215_v35  ;;  %6331 = vpow2.f32 %v3180_v53  ;;  %v3188_v58 = vmul.f32 1.442695, %v2955_v54  ;;  %5348 = vmatmul.mubr.msk.bf16.gmra.mxu0 %vm10187_vm7, %v5347_v9  ;;  %v10221_v36 = vpop.eup %6307  ;;  %v2843_v9 = vpop.permute.xlu0 %2842  ;;  %v13085_v62 = vld [vmem:[#allocation261_spill] sm:$0xff] }
 0x32e   : > { %v3777_v47 = vadd.f32 %v3776_v30, %v3272_v1  ;;  %v2959_v57 = vsub.f32 %v13050_v29, %v10173_v55  ;;  %6333 = vpow2.f32 %v3182_v5  ;;  %v3190_v45 = vmul.f32 1.442695, %v2956_v27  ;;  %5444 = vmatmul.mubr.msk.bf16.gmra.mxu1 %vm10202_vm2, %v5443_v39  ;;  %vm13052_vm3 = vmmov %vm13032_vm13  ;;  %v10231_v53 = vpop.eup %6309  ;;  %v13054_v27 = vld [vmem:[#allocation234_spill] sm:$0xff]  ;;  %v13076_v29 = vld [vmem:[#allocation255_spill] sm:$0xff] }
 0x32f   : > { %vm13051_vm11 = vcmp.gt.f32.partialorder %v12976_v40, 0.0  ;;  %v3266_v54 = vsel %vm13052_vm3, %v13037_v16, 0.0  ;;  %13053 = vst [vmem:[#allocation178_spill] sm:$0xff] %v10231_v53  ;;  %6335 = vpow2.f32 %v3184_v44  ;;  %v3192_v13 = vmul.f32 1.442695, %v2957_v8  ;;  %v10236_v40 = vpop.eup %6311  ;;  %v13067_v16 = vld [vmem:[#allocation253_spill] sm:$0xff]  ;;  %3784 = vadd.xlane.f32.xlu1 %v10194_v4 }
 0x330   : > { %v3273_v34 = vsel %vm13051_vm11, %v9769_v46, 0.0  ;;  %v2960_v5 = vsub.f32 %v13054_v27, %v10173_v55  ;;  %6337 = vpow2.f32 %v3186_v26  ;;  %v13055_v46 = vld [vmem:[#allocation235_spill] sm:$0xff]  ;;  %v3194_v1 = vmul.f32 1.442695, %v2958_v43  ;;  %v13068_v39 = vld [vmem:[#allocation254_spill] sm:$0xff] }
 0x331   : > { %v3778_v30 = vadd.f32 %v3777_v47, %v3273_v34  ;;  %v2961_v41 = vsub.f32 %v13055_v46, %v10173_v55  ;;  %vm13056_vm4 = vcmp.gt.f32.partialorder %v12965_v38, 0.0  ;;  %vm13057_vm13 = vcmp.gt.f32.partialorder %v13002_v37, 0.0  ;;  %v10251_v47 = vpop.eup %6313  ;;  %v13066_v37 = vld [vmem:[#allocation252_spill] sm:$0xff] }
 0x332   : > { %v3267_v25 = vsel %vm13056_vm4, %v9712_v6, 0.0  ;;  %vm13058_vm8 = vcmp.gt.f32.partialorder %v12987_v19, 0.0  ;;  %13061 = vst [vmem:[#allocation179_spill] sm:$0xff] %v10251_v47  ;;  %6339 = vpow2.f32 %v3188_v58  ;;  %v3196_v26 = vmul.f32 1.442695, %v2959_v57  ;;  %v10263_v38 = vpop.eup %6315 }
 0x333   : > { %vm10247_vm7 = vmpackc.low %vm13058_vm8, %vm13057_vm13  ;;  %3779 = vadd.xlane.f32.xlu0 %v3778_v30  ;;  %v3771_v8 = vadd.f32 %v3267_v25, %v3266_v54  ;;  %v5350_v55 = vpack.c.bf16 %v12986_v20, %v13001_v60  ;;  %vm13062_vm0 = vcmp.gt.f32.partialorder %v13021_v31, 0.0  ;;  %vm13063_vm1 = vcmp.gt.f32.partialorder %v13007_v23, 0.0  ;;  %v10270_v20 = vpop.eup %6317  ;;  %v13077_v54 = vld [vmem:[#allocation10_spill] sm:$0xff] }
 0x334   : > { %vm10259_vm2 = vmpackc.low %vm13063_vm1, %vm13062_vm0  ;;  %v5446_v19 = vpack.c.bf16 %v13006_v17, %v13020_v21  ;;  %v2970_v44 = vsub.f32 %v13066_v37, %v2843_v9  ;;  %v2971_v57 = vsub.f32 %v13067_v16, %v2843_v9  ;;  %v2972_v56 = vsub.f32 %v13068_v39, %v2843_v9  ;;  %13069 = vst [vmem:[#allocation36_spill] sm:$0xff] %v10270_v20  ;;  %v13071_v17 = vld [vmem:[#allocation61_spill] sm:$0xff]  ;;  %v10281_v21 = vpop.eup %6319  ;;  %v13078_v30 = vld [vmem:[#allocation62_spill] sm:$0xff] }
 0x335   : > { %6341 = vpow2.f32 %v3190_v45  ;;  %v3198_v31 = vmul.f32 1.442695, %v2960_v5  ;;  %vm13070_vm9 = vcmp.gt.f32.partialorder %v13038_v42, 0.0  ;;  %5351 = vmatprep.mubr.msk.bf16.mxu0 %vm10247_vm7, %v5350_v55  ;;  %vm13072_vm11 = vcmp.gt.f32.partialorder %v13071_v17, 0.0  ;;  %13073 = vst [vmem:[#allocation40_spill] sm:$0xff] %v10281_v21  ;;  %v2848_v42 = vpop.permute.xlu1 %2847  ;;  %v13088_v37 = vld [vmem:[#allocation57_spill] sm:$0xff] }
 0x336   : > { %v3268_v60 = vsel %vm13070_vm9, %v13047_v51, 0.0  ;;  %v3294_v23 = vsel %vm13072_vm11, %v9979_v48, 0.0  ;;  %6343 = vpow2.f32 %v3192_v13  ;;  %v3200_v43 = vmul.f32 1.442695, %v2961_v41  ;;  %5447 = vmatprep.mubr.msk.bf16.mxu1 %vm10259_vm2, %v5446_v19  ;;  %v10288_v51 = vpop.eup %6321  ;;  %v13082_v41 = vld [vmem:[#allocation63_spill] sm:$0xff] }
 0x337   : > { %vm13074_vm3 = vcmp.gt.f32.partialorder %v12974_v24, 0.0  ;;  %v3772_v58 = vadd.f32 %v3771_v8, %v3268_v60  ;;  %13075 = vst [vmem:[#allocation180_spill] sm:$0xff] %v10288_v51  ;;  %6345 = vpow2.f32 %v3194_v1  ;;  %v2973_v45 = vsub.f32 %v13076_v29, %v2843_v9  ;;  %v10294_v27 = vpop.eup %6323  ;;  %v13084_v1 = vld [vmem:[#allocation260_spill] sm:$0xff]  ;;  %v13087_v19 = vld [vmem:[#allocation151_spill] sm:$0xff] }
 0x338   : > { %v3269_v10 = vsel %vm13074_vm3, %v9736_v18, 0.0  ;;  %v3218_v34 = vmul.f32 1.442695, %v2970_v44  ;;  %vm13079_vm4 = vcmp.gt.f32.partialorder %v13078_v30, 0.0  ;;  %13080 = vst [vmem:[#allocation200_spill] sm:$0xff] %v10294_v27  ;;  %6347 = vpow2.f32 %v3196_v26  ;;  %v10296_v46 = vpop.eup %6325  ;;  %v13096_v29 = vld [vmem:[#allocation15_spill] sm:$0xff] }
 0x339   : > { %v3295_v13 = vsel %vm13079_vm4, %v13077_v54, 0.0  ;;  %v3220_v24 = vmul.f32 1.442695, %v2971_v57  ;;  %v3222_v18 = vmul.f32 1.442695, %v2972_v56  ;;  %13081 = vst [vmem:[#allocation202_spill] sm:$0xff] %v10296_v46  ;;  %6349 = vpow2.f32 %v3198_v31  ;;  %v10304_v55 = vpop.eup %6327 }
 0x33a   : > { %v3806_v5 = vadd.f32 %v3295_v13, %v3294_v23  ;;  %vm13083_vm13 = vcmp.gt.f32.partialorder %v13082_v41, 0.0  ;;  %v2974_v25 = vsub.f32 %v13084_v1, %v2848_v42  ;;  %v2975_v8 = vsub.f32 %v13085_v62, %v2848_v42  ;;  %13086 = vst [vmem:[#allocation203_spill] sm:$0xff] %v10304_v55  ;;  %v10309_v16 = vpop.eup %6329  ;;  %v13091_v57 = vld [vmem:[#allocation64_spill] sm:$0xff]  ;;  %v13093_v56 = vld [vmem:[#allocation262_spill] sm:$0xff]  ;;  %v13106_v46 = vld [vmem:[#allocation149_spill] sm:$0xff] }
 0x33b   : > { %v3296_v9 = vsel %vm13083_vm13, %v9988_v49, 0.0  ;;  %6351 = vpow2.f32 %v3200_v43  ;;  %v3773_v26 = vadd.f32 %v3772_v58, %v3269_v10  ;;  %vm13089_vm8 = vcmp.gt.f32.partialorder %v13088_v37, 0.0  ;;  %13090 = vst [vmem:[#allocation204_spill] sm:$0xff] %v10309_v16  ;;  %v10315_v60 = vpop.eup %6331  ;;  %v13095_v43 = vld [vmem:[#allocation263_spill] sm:$0xff]  ;;  %v13097_v13 = vld [vmem:[#allocation58_spill] sm:$0xff] }
 0x33c   : > { %v3807_v6 = vadd.f32 %v3806_v5, %v3296_v9  ;;  %v3290_v44 = vsel %vm13089_vm8, %v13087_v19, 0.0  ;;  %6353 = vpow2.f32 %v3218_v34  ;;  %v3224_v4 = vmul.f32 1.442695, %v2973_v45  ;;  %13094 = vst [vmem:[#allocation205_spill] sm:$0xff] %v10315_v60  ;;  %v10321_v9 = vpop.permute.xlu0 %2832  ;;  %v10323_v34 = vpop.eup %6333  ;;  %v13129_v60 = vld [vmem:[#allocation71_spill] sm:$0xff] }
 0x33d   : > { %vm13092_vm7 = vcmp.gt.f32.partialorder %v13091_v57, 0.0  ;;  %v2976_v31 = vsub.f32 %v13093_v56, %v2848_v42  ;;  %v2977_v10 = vsub.f32 %v13095_v43, %v2848_v42  ;;  %v3226_v58 = vmul.f32 1.442695, %v2974_v25  ;;  %13099 = vst [vmem:[#allocation206_spill] sm:$0xff] %v10323_v34  ;;  %3774 = vadd.xlane.f32.xlu1 %v3773_v26  ;;  %v10325_v62 = vpop.eup %6335  ;;  %v13104_v25 = vld [vmem:[#allocation268_spill] sm:$0xff]  ;;  %v13107_v26 = vld [vmem:[#allocation69_spill] sm:$0xff] }
 0x33e   : > { %v3297_v39 = vsel %vm13092_vm7, %v9995_v7, 0.0  ;;  %vm13098_vm0 = vcmp.gt.f32.partialorder %v13097_v13, 0.0  ;;  %6355 = vpow2.f32 %v3220_v24  ;;  %v3228_v45 = vmul.f32 1.442695, %v2975_v8  ;;  %13100 = vst [vmem:[#allocation207_spill] sm:$0xff] %v10325_v62  ;;  %v10332_v43 = vpop.eup %6337  ;;  %v13128_v34 = vld [vmem:[#allocation13_spill] sm:$0xff] }
 0x33f   : > { %v3808_v23 = vadd.f32 %v3807_v6, %v3297_v39  ;;  %v3291_v5 = vsel %vm13098_vm0, %v13096_v29, 0.0  ;;  %6357 = vpow2.f32 %v3222_v18  ;;  %v13101_v6 = vld [vmem:[#allocation152_spill] sm:$0xff]  ;;  %v13102_v39 = vld [vmem:[#allocation59_spill] sm:$0xff]  ;;  %v2962_v56 = vsub.f32 %v13104_v25, %v10321_v9  ;;  %13105 = vst [vmem:[#allocation208_spill] sm:$0xff] %v10332_v43  ;;  %v10337_v8 = vpop.eup %6339  ;;  %v13113_v25 = vld [vmem:[#allocation269_spill] sm:$0xff] }
 0x340   : > { %v3801_v1 = vadd.f32 %v3291_v5, %v3290_v44  ;;  %vm13103_vm1 = vcmp.gt.f32.partialorder %v13102_v39, 0.0  ;;  %6359 = vpow2.f32 %v3224_v4  ;;  %vm13108_vm2 = vcmp.gt.f32.partialorder %v13107_v26, 0.0  ;;  %13109 = vst [vmem:[#allocation191_spill] sm:$0xff] %v10337_v8  ;;  %v13111_v5 = vld [vmem:[#allocation60_spill] sm:$0xff]  ;;  %v13140_v8 = vld [vmem:[#allocation150_spill] sm:$0xff] }
 0x341   : > { %3809 = vadd.xlane.f32.xlu0 %v3808_v23  ;;  %v3292_v42 = vsel %vm13103_vm1, %v13101_v6, 0.0  ;;  %v3286_v24 = vsel %vm13108_vm2, %v13106_v46, 0.0  ;;  %6361 = vpow2.f32 %v3226_v58  ;;  %v3230_v18 = vmul.f32 1.442695, %v2976_v31  ;;  %v13110_v23 = vld [vmem:[#allocation154_spill] sm:$0xff]  ;;  %v13114_v4 = vld [vmem:[#allocation16_spill] sm:$0xff] }
 0x342   : > { %v3802_v55 = vadd.f32 %v3801_v1, %v3292_v42  ;;  %v3232_v44 = vmul.f32 1.442695, %v2977_v10  ;;  %vm13112_vm9 = vcmp.gt.f32.partialorder %v13111_v5, 0.0  ;;  %6363 = vpow2.f32 %v3228_v45  ;;  %v13115_v1 = vld [vmem:[#allocation70_spill] sm:$0xff]  ;;  %v10355_v10 = vpop.eup %6341  ;;  %v13141_v43 = vld [vmem:[#allocation72_spill] sm:$0xff] }
 0x343   : > { %v3293_v62 = vsel %vm13112_vm9, %v13110_v23, 0.0  ;;  %v2963_v51 = vsub.f32 %v13113_v25, %v10321_v9  ;;  %vm13116_vm11 = vcmp.gt.f32.partialorder %v13115_v1, 0.0  ;;  %vm13117_vm3 = vcmp.gt.f32.partialorder %v12995_v52, 0.0  ;;  %13121 = vst [vmem:[#allocation192_spill] sm:$0xff] %v10355_v10  ;;  %v13122_v58 = vld [vmem:[#allocation270_spill] sm:$0xff]  ;;  %v10369_v52 = vpop.eup %6343 }
 0x344   : > { %v3803_v27 = vadd.f32 %v3802_v55, %v3293_v62  ;;  %v3287_v42 = vsel %vm13116_vm11, %v13114_v4, 0.0  ;;  %vm13118_vm4 = vcmp.gt.f32.partialorder %v12984_v33, 0.0  ;;  %v2964_v55 = vsub.f32 %v13122_v58, %v10321_v9  ;;  %13127 = vst [vmem:[#allocation193_spill] sm:$0xff] %v10369_v52  ;;  %v10382_v16 = vpop.eup %6345 }
 0x345   : > { %vm10351_vm13 = vmpackc.low %vm13118_vm4, %vm13117_vm3  ;;  %v3202_v45 = vmul.f32 1.442695, %v2962_v56  ;;  %v3796_v62 = vadd.f32 %v3287_v42, %v3286_v24  ;;  %v5353_v25 = vpack.c.bf16 %v9812_v32, %v12994_v15  ;;  %vm13123_vm8 = vcmp.gt.f32.partialorder %v13010_v50, 0.0  ;;  %v13131_v24 = vld [vmem:[#allocation166_spill] sm:$0xff]  ;;  %v13132_v32 = vld [vmem:[#allocation65_spill] sm:$0xff]  ;;  %13137 = vst [vmem:[#allocation33_spill] sm:$0xff] %v10382_v16  ;;  %v10395_v16 = vpop.permute.xlu1 %2837 }
 0x346   : > { %vm13124_vm7 = vcmp.gt.f32.partialorder %v12999_v28, 0.0  ;;  %3804 = vadd.xlane.f32.xlu1 %v3803_v27  ;;  %vm13130_vm1 = vcmp.gt.f32.partialorder %v13129_v60, 0.0  ;;  %v5449_v56 = vpack.c.bf16 %v12998_v3, %v13009_v59  ;;  %vm13133_vm2 = vcmp.gt.f32.partialorder %v13132_v32, 0.0  ;;  %v13134_v15 = vld [vmem:[#allocation168_spill] sm:$0xff]  ;;  %v13135_v28 = vld [vmem:[#allocation66_spill] sm:$0xff]  ;;  %v10386_v27 = vpop.eup %6347  ;;  %v13139_v3 = vld [vmem:[#allocation271_spill] sm:$0xff] }
 0x347   : > { %vm10365_vm0 = vmpackc.low %vm13124_vm7, %vm13123_vm8  ;;  %v3288_v58 = vsel %vm13130_vm1, %v13128_v34, 0.0  ;;  %v3282_v50 = vsel %vm13133_vm2, %v13131_v24, 0.0  ;;  %vm13136_vm9 = vcmp.gt.f32.partialorder %v13135_v28, 0.0  ;;  %6365 = vpow2.f32 %v3230_v18  ;;  %5354 = vmatmul.mubr.msk.bf16.gmra.mxu0 %vm10351_vm13, %v5353_v25  ;;  %13138 = vst [vmem:[#allocation37_spill] sm:$0xff] %v10386_v27  ;;  %v13148_v25 = vld [vmem:[#allocation68_spill] sm:$0xff]  ;;  %v13155_v28 = vld [vmem:[#allocation14_spill] sm:$0xff] }
 0x348   : > { %v3283_v42 = vsel %vm13136_vm9, %v13134_v15, 0.0  ;;  %v3797_v52 = vadd.f32 %v3796_v62, %v3288_v58  ;;  %6367 = vpow2.f32 %v3232_v44  ;;  %v2965_v59 = vsub.f32 %v13139_v3, %v10321_v9  ;;  %5450 = vmatmul.mubr.msk.bf16.gmra.mxu1 %vm10365_vm0, %v5449_v56  ;;  %vm13143_vm3 = vmmov %vm13136_vm9  ;;  %v10405_v44 = vpop.eup %6349  ;;  %v13153_v58 = vld [vmem:[#allocation67_spill] sm:$0xff]  ;;  %v13165_v18 = vld [vmem:[#allocation278_spill] sm:$0xff] }
 0x349   : > { %v3204_v10 = vmul.f32 1.442695, %v2963_v51  ;;  %vm13142_vm11 = vcmp.gt.f32.partialorder %v13141_v43, 0.0  ;;  %vm13144_vm4 = vcmp.gt.f32.partialorder %v13115_v1, 0.0  ;;  %13147 = vst [vmem:[#allocation144_spill] sm:$0xff] %v10405_v44  ;;  %v3791_v31 = vadd.f32 %v3283_v42, %v3282_v50  ;;  %v10413_v33 = vpop.eup %6351  ;;  %v13152_v1 = vld [vmem:[#allocation169_spill] sm:$0xff] }
 0x34a   : > { %v3289_v49 = vsel %vm13142_vm11, %v13140_v8, 0.0  ;;  %vm10401_vm13 = vmpackc.low %vm13144_vm4, %vm13143_vm3  ;;  %v3206_v51 = vmul.f32 1.442695, %v2964_v55  ;;  %v5356_v62 = vpack.c.bf16 %v13114_v4, %v13134_v15  ;;  %vm13149_vm8 = vcmp.gt.f32.partialorder %v13148_v25, 0.0  ;;  %13151 = vst [vmem:[#allocation147_spill] sm:$0xff] %v10413_v33  ;;  %v13157_v4 = vld [vmem:[#allocation276_spill] sm:$0xff] }
 0x34b   : > { %v3798_v9 = vadd.f32 %v3797_v52, %v3289_v49  ;;  %vm13150_vm7 = vmmov %vm13142_vm11  ;;  %6369 = vpow2.f32 %v3202_v45  ;;  %vm13154_vm1 = vcmp.gt.f32.partialorder %v13153_v58, 0.0  ;;  %v5452_v55 = vpack.c.bf16 %v13140_v8, %v13155_v28  ;;  %v10420_v49 = vpop.eup %6353  ;;  %v13158_v50 = vld [vmem:[#allocation277_spill] sm:$0xff]  ;;  %v13168_v25 = vld [vmem:[#allocation79_spill] sm:$0xff] }
 0x34c   : > { %vm5451_vm0 = vmpackc.low %vm13150_vm7, %vm13149_vm8  ;;  %v3284_v56 = vsel %vm13154_vm1, %v13152_v1, 0.0  ;;  %13156 = vst [vmem:[#allocation35_spill] sm:$0xff] %v10420_v49  ;;  %v2966_v52 = vsub.f32 %v13157_v4, %v10395_v16  ;;  %v2967_v43 = vsub.f32 %v13158_v50, %v10395_v16  ;;  %5357 = vmatprep.mubr.msk.bf16.mxu0 %vm10401_vm13, %v5356_v62  ;;  %v13159_v45 = vld [vmem:[#allocation77_spill] sm:$0xff]  ;;  %6371 = vpow2.f32 %v3204_v10 }
 0x34d   : > { %3799 = vadd.xlane.f32.xlu0 %v3798_v9  ;;  %v3792_v15 = vadd.f32 %v3791_v31, %v3284_v56  ;;  %vm13160_vm2 = vcmp.gt.f32.partialorder %v13159_v45, 0.0  ;;  %v10431_v3 = vmul.f32 1.442695, %v2965_v59  ;;  %vm13161_vm9 = vmmov %vm13149_vm8  ;;  %5453 = vmatprep.mubr.msk.bf16.mxu1 %vm5451_vm0, %v5452_v55  ;;  %v13162_v9 = vld [vmem:[#allocation78_spill] sm:$0xff]  ;;  %v10439_v31 = vpop.eup %6355  ;;  %6373 = vpow2.f32 %v3206_v51  ;;  %v13167_v59 = vld [vmem:[#allocation279_spill] sm:$0xff] }
 0x34e   : > { %v3310_v42 = vsel %vm13160_vm2, %v10122_v12, 0.0  ;;  %v3285_v8 = vsel %vm13161_vm9, %v13155_v28, 0.0  ;;  %vm13163_vm11 = vcmp.gt.f32.partialorder %v13162_v9, 0.0  ;;  %13164 = vst [vmem:[#allocation39_spill] sm:$0xff] %v10439_v31  ;;  %v2968_v62 = vsub.f32 %v13165_v18, %v10395_v16  ;;  %v10443_v10 = vpop.eup %6357  ;;  %v13170_v55 = vld [vmem:[#allocation73_spill] sm:$0xff]  ;;  %v13172_v51 = vld [vmem:[#allocation74_spill] sm:$0xff] }
 0x34f   : > { %v3311_v4 = vsel %vm13163_vm11, %v10127_v2, 0.0  ;;  %v3793_v56 = vadd.f32 %v3792_v15, %v3285_v8  ;;  %13166 = vst [vmem:[#allocation194_spill] sm:$0xff] %v10443_v10  ;;  %v2969_v12 = vsub.f32 %v13167_v59, %v10395_v16  ;;  %vm13169_vm3 = vcmp.gt.f32.partialorder %v13168_v25, 0.0  ;;  %v10456_v18 = vpop.eup %6359  ;;  %v13176_v59 = vld [vmem:[#allocation80_spill] sm:$0xff]  ;;  %v13182_v49 = vld [vmem:[#allocation85_spill] sm:$0xff] }
 0x350   : > { %v3826_v50 = vadd.f32 %v3311_v4, %v3310_v42  ;;  %v3312_v28 = vsel %vm13169_vm3, %v10138_v11, 0.0  ;;  %vm13171_vm4 = vcmp.gt.f32.partialorder %v13170_v55, 0.0  ;;  %vm13173_vm13 = vcmp.gt.f32.partialorder %v13172_v51, 0.0  ;;  %13174 = vst [vmem:[#allocation146_spill] sm:$0xff] %v10456_v18  ;;  %v10458_v16 = vpop.eup %6361  ;;  %v13178_v25 = vld [vmem:[#allocation188_spill] sm:$0xff]  ;;  %v13179_v55 = vld [vmem:[#allocation75_spill] sm:$0xff] }
 0x351   : > { %v3306_v45 = vsel %vm13171_vm4, %v10095_v61, 0.0  ;;  %v3307_v31 = vsel %vm13173_vm13, %v10100_v0, 0.0  ;;  %v3210_v15 = vmul.f32 1.442695, %v2966_v52  ;;  %v3212_v42 = vmul.f32 1.442695, %v2967_v43  ;;  %3794 = vadd.xlane.f32.xlu1 %v3793_v56 }
 0x352   : > { %v3827_v8 = vadd.f32 %v3826_v50, %v3312_v28  ;;  %v3821_v4 = vadd.f32 %v3307_v31, %v3306_v45  ;;  %13175 = vst [vmem:[#allocation128_spill] sm:$0xff] %v10458_v16  ;;  %vm13177_vm8 = vcmp.gt.f32.partialorder %v13176_v59, 0.0  ;;  %vm13180_vm7 = vcmp.gt.f32.partialorder %v13179_v55, 0.0  ;;  %v13181_v10 = vld [vmem:[#allocation24_spill] sm:$0xff]  ;;  %v13184_v18 = vld [vmem:[#allocation182_spill] sm:$0xff]  ;;  %v10480_v31 = vpop.eup %6363  ;;  %v13192_v50 = vld [vmem:[#allocation189_spill] sm:$0xff] }
 0x353   : > { %v3313_v11 = vsel %vm13177_vm8, %v10140_v22, 0.0  ;;  %v3308_v61 = vsel %vm13180_vm7, %v13178_v25, 0.0  ;;  %vm13183_vm0 = vcmp.gt.f32.partialorder %v13182_v49, 0.0  ;;  %v13185_v52 = vld [vmem:[#allocation86_spill] sm:$0xff]  ;;  %vm13187_vm2 = vcmp.gt.f32.partialorder %v13132_v32, 0.0  ;;  %13191 = vst [vmem:[#allocation17_spill] sm:$0xff] %v10480_v31 }
 0x354   : > { %v3302_v2 = vsel %vm13183_vm0, %v13181_v10, 0.0  ;;  %vm13186_vm1 = vcmp.gt.f32.partialorder %v13185_v52, 0.0  ;;  %vm13188_vm9 = vcmp.gt.f32.partialorder %v13107_v26, 0.0  ;;  %v3828_v56 = vadd.f32 %v3827_v8, %v3313_v11  ;;  %v13193_v28 = vld [vmem:[#allocation76_spill] sm:$0xff]  ;;  %v10493_v26 = vpop.permute.xlu0 %3995  ;;  %v13200_v22 = vld [vmem:[#allocation183_spill] sm:$0xff]  ;;  %v13225_v45 = vld [vmem:[#allocation93_spill] sm:$0xff] }
 0x355   : > { %v3303_v43 = vsel %vm13186_vm1, %v13184_v18, 0.0  ;;  %vm10476_vm11 = vmpackc.low %vm13188_vm9, %vm13187_vm2  ;;  %vm13194_vm3 = vcmp.gt.f32.partialorder %v13193_v28, 0.0  ;;  %v3822_v55 = vadd.f32 %v3821_v4, %v3308_v61  ;;  %vm13195_vm4 = vcmp.gt.f32.partialorder %v13153_v58, 0.0  ;;  %13199 = vst [vmem:[#allocation196_spill] sm:$0xff] %v10493_v26  ;;  %v13201_v0 = vld [vmem:[#allocation87_spill] sm:$0xff]  ;;  %v13204_v58 = vld [vmem:[#allocation81_spill] sm:$0xff] }
 0x356   : > { %v3309_v25 = vsel %vm13194_vm3, %v13192_v50, 0.0  ;;  %v3816_v16 = vadd.f32 %v3303_v43, %v3302_v2  ;;  %vm13196_vm13 = vcmp.gt.f32.partialorder %v13129_v60, 0.0  ;;  %vm13202_vm7 = vcmp.gt.f32.partialorder %v13201_v0, 0.0  ;;  %v13203_v2 = vld [vmem:[#allocation155_spill] sm:$0xff]  ;;  %3829 = vadd.xlane.f32.xlu0 %v3828_v56  ;;  %v13219_v50 = vld [vmem:[#allocation88_spill] sm:$0xff]  ;;  %v13222_v56 = vld [vmem:[#allocation157_spill] sm:$0xff] }
 0x357   : > { %vm10489_vm8 = vmpackc.low %vm13196_vm13, %vm13195_vm4  ;;  %v3304_v11 = vsel %vm13202_vm7, %v13200_v22, 0.0  ;;  %v5359_v8 = vpack.c.bf16 %v13106_v46, %v13131_v24  ;;  %v5455_v61 = vpack.c.bf16 %v13128_v34, %v13152_v1  ;;  %vm13205_vm0 = vcmp.gt.f32.partialorder %v13204_v58, 0.0  ;;  %v13210_v46 = vld [vmem:[#allocation156_spill] sm:$0xff]  ;;  %v13211_v24 = vld [vmem:[#allocation82_spill] sm:$0xff] }
 0x358   : > { %v3298_v60 = vsel %vm13205_vm0, %v13203_v2, 0.0  ;;  %vm13206_vm1 = vcmp.gt.f32.partialorder %v13097_v13, 0.0  ;;  %vm13207_vm2 = vcmp.gt.f32.partialorder %v13078_v30, 0.0  ;;  %v3214_v43 = vmul.f32 1.442695, %v2968_v62  ;;  %v10524_v30 = vpop.eup %6365  ;;  %v13218_v1 = vld [vmem:[#allocation184_spill] sm:$0xff] }
 0x359   : > { %vm10509_vm9 = vmpackc.low %vm13207_vm2, %vm13206_vm1  ;;  %v3823_v26 = vadd.f32 %v3822_v55, %v3309_v25  ;;  %v3817_v31 = vadd.f32 %v3816_v16, %v3304_v11  ;;  %vm13212_vm3 = vcmp.gt.f32.partialorder %v13211_v24, 0.0  ;;  %vm13213_vm4 = vcmp.gt.f32.partialorder %v13111_v5, 0.0  ;;  %13217 = vst [vmem:[#allocation141_spill] sm:$0xff] %v10524_v30  ;;  %5360 = vmatmul.mubr.msk.bf16.gmra.mxu0 %vm10476_vm11, %v5359_v8  ;;  %5456 = vmatmul.mubr.msk.bf16.gmra.mxu1 %vm10489_vm8, %v5455_v61  ;;  %v10537_v55 = vpop.eup %6367  ;;  %v13223_v11 = vld [vmem:[#allocation83_spill] sm:$0xff]  ;;  %v13227_v8 = vld [vmem:[#allocation94_spill] sm:$0xff] }
 0x35a   : > { %v3299_v34 = vsel %vm13212_vm3, %v13210_v46, 0.0  ;;  %vm13214_vm13 = vcmp.gt.f32.partialorder %v13091_v57, 0.0  ;;  %vm13220_vm0 = vcmp.gt.f32.partialorder %v13219_v50, 0.0  ;;  %v5362_v57 = vpack.c.bf16 %v13077_v54, %v13096_v29  ;;  %13221 = vst [vmem:[#allocation18_spill] sm:$0xff] %v10537_v55 }
 0x35b   : > { %vm10520_vm7 = vmpackc.low %vm13214_vm13, %vm13213_vm4  ;;  %v3305_v62 = vsel %vm13220_vm0, %v13218_v1, 0.0  ;;  %v3811_v25 = vadd.f32 %v3299_v34, %v3298_v60  ;;  %v5458_v5 = vpack.c.bf16 %v9995_v7, %v13110_v23  ;;  %3824 = vadd.xlane.f32.xlu1 %v3823_v26  ;;  %vm13224_vm1 = vcmp.gt.f32.partialorder %v13223_v11, 0.0  ;;  %v10552_v23 = vpop.eup %6369  ;;  %v13230_v26 = vld [vmem:[#allocation84_spill] sm:$0xff]  ;;  %v13232_v34 = vld [vmem:[#allocation97_spill] sm:$0xff] }
 0x35c   : > { %v3818_v16 = vadd.f32 %v3817_v31, %v3305_v62  ;;  %v3300_v30 = vsel %vm13224_vm1, %v13222_v56, 0.0  ;;  %vm13226_vm11 = vcmp.gt.f32.partialorder %v13225_v45, 0.0  ;;  %vm13228_vm8 = vcmp.gt.f32.partialorder %v13227_v8, 0.0  ;;  %5363 = vmatprep.mubr.msk.bf16.mxu0 %vm10509_vm9, %v5362_v57  ;;  %v13229_v31 = vld [vmem:[#allocation12_spill] sm:$0xff]  ;;  %v10566_v62 = vpop.permute.xlu0 %4010 }
 0x35d   : > { %v3326_v32 = vsel %vm13226_vm11, %v10251_v47, 0.0  ;;  %v3327_v61 = vsel %vm13228_vm8, %v10263_v38, 0.0  ;;  %6375 = vpow2.f32 %v3210_v15  ;;  %v3216_v54 = vmul.f32 1.442695, %v2969_v12  ;;  %5459 = vmatprep.mubr.msk.bf16.mxu1 %vm10520_vm7, %v5458_v5  ;;  %v13234_v12 = vld [vmem:[#allocation89_spill] sm:$0xff]  ;;  %13238 = vst [vmem:[#allocation197_spill] sm:$0xff] %v10566_v62 }
 0x35e   : > { %v3812_v29 = vadd.f32 %v3811_v25, %v3300_v30  ;;  %v3846_v7 = vadd.f32 %v3327_v61, %v3326_v32  ;;  %3819 = vadd.xlane.f32.xlu0 %v3818_v16  ;;  %vm13231_vm2 = vcmp.gt.f32.partialorder %v13230_v26, 0.0  ;;  %vm13233_vm3 = vcmp.gt.f32.partialorder %v13232_v34, 0.0  ;;  %v13236_v30 = vld [vmem:[#allocation90_spill] sm:$0xff]  ;;  %v10568_v16 = vpop.eup %6371 }
 0x35f   : > { %v3301_v60 = vsel %vm13231_vm2, %v13229_v31, 0.0  ;;  %v3328_v15 = vsel %vm13233_vm3, %v10270_v20, 0.0  ;;  %vm13235_vm4 = vcmp.gt.f32.partialorder %v13234_v12, 0.0  ;;  %vm13237_vm9 = vcmp.gt.f32.partialorder %v13236_v30, 0.0  ;;  %v13239_v32 = vld [vmem:[#allocation98_spill] sm:$0xff]  ;;  %v13241_v20 = vld [vmem:[#allocation91_spill] sm:$0xff] }
 0x360   : > { %v3322_v4 = vsel %vm13235_vm4, %v10215_v35, 0.0  ;;  %v3323_v13 = vsel %vm13237_vm9, %v10221_v36, 0.0  ;;  %6377 = vpow2.f32 %v3212_v42  ;;  %v3813_v25 = vadd.f32 %v3812_v29, %v3301_v60  ;;  %v10590_v60 = vpop.eup %6373  ;;  %v13257_v12 = vld [vmem:[#allocation21_spill] sm:$0xff]  ;;  %v13396_v42 = vld [vmem:[#allocation275_spill] sm:$0xff] }
 0x361   : > { %v3847_v57 = vadd.f32 %v3846_v7, %v3328_v15  ;;  %v3841_v5 = vadd.f32 %v3323_v13, %v3322_v4  ;;  %vm13240_vm13 = vcmp.gt.f32.partialorder %v13239_v32, 0.0  ;;  %vm13242_vm7 = vcmp.gt.f32.partialorder %v13241_v20, 0.0  ;;  %v13249_v4 = vld [vmem:[#allocation92_spill] sm:$0xff]  ;;  %v13412_v20 = vld [vmem:[#allocation153_spill] sm:$0xff] }
 0x362   : > { %v3329_v61 = vsel %vm13240_vm13, %v10281_v21, 0.0  ;;  %v3324_v47 = vsel %vm13242_vm7, %v10231_v53, 0.0  ;;  %v3318_v34 = vsel %vm2198_vm10, %v10171_v63, 0.0  ;;  %v3319_v29 = vsel %vm2199_vm6, %v10175_v14, 0.0  ;;  %3814 = vadd.xlane.f32.xlu1 %v3813_v25 }
 0x363   : > { %vm13245_vm0 = vcmp.gt.f32.partialorder %v13088_v37, 0.0  ;;  %vm13246_vm1 = vcmp.gt.f32.partialorder %v13071_v17, 0.0  ;;  %v3848_v15 = vadd.f32 %v3847_v57, %v3329_v61  ;;  %vm13250_vm8 = vcmp.gt.f32.partialorder %v13249_v4, 0.0  ;;  %v10599_v17 = vpop.permute.xlu1 %3990  ;;  %v13254_v37 = vld [vmem:[#allocation23_spill] sm:$0xff]  ;;  %v13256_v57 = vld [vmem:[#allocation22_spill] sm:$0xff] }
 0x364   : > { %vm10586_vm11 = vmpackc.low %vm13246_vm1, %vm13245_vm0  ;;  %v3325_v13 = vsel %vm13250_vm8, %v10236_v40, 0.0  ;;  %v3842_v62 = vadd.f32 %v3841_v5, %v3324_v47  ;;  %v3836_v53 = vadd.f32 %v3319_v29, %v3318_v34  ;;  %vm13251_vm2 = vcmp.gt.f32.partialorder %v13102_v39, 0.0  ;;  %13253 = vst [vmem:[#allocation198_spill] sm:$0xff] %v10599_v17  ;;  %v13258_v47 = vld [vmem:[#allocation99_spill] sm:$0xff]  ;;  %v13277_v17 = vld [vmem:[#allocation33_spill] sm:$0xff] }
 0x365   : > { %vm13252_vm3 = vcmp.gt.f32.partialorder %v13082_v41, 0.0  ;;  %v3320_v45 = vsel %vm2200_vm14, %v13254_v37, 0.0  ;;  %v5365_v25 = vpack.c.bf16 %v9979_v48, %v13087_v19  ;;  %v5461_v61 = vpack.c.bf16 %v13256_v57, %v13101_v6  ;;  %3849 = vadd.xlane.f32.xlu0 %v3848_v15  ;;  %v13264_v48 = vld [vmem:[#allocation174_spill] sm:$0xff]  ;;  %v13265_v19 = vld [vmem:[#allocation100_spill] sm:$0xff]  ;;  %v13275_v15 = vld [vmem:[#allocation101_spill] sm:$0xff] }
 0x366   : > { %vm5460_vm4 = vmpackc.low %vm13252_vm3, %vm13251_vm2  ;;  %vm13259_vm9 = vcmp.gt.f32.partialorder %v13258_v47, 0.0  ;;  %vm13260_vm13 = vcmp.gt.f32.partialorder %v13211_v24, 0.0  ;;  %vm13261_vm7 = vcmp.gt.f32.partialorder %v13185_v52, 0.0  ;;  %6379 = vpow2.f32 %v3214_v43  ;;  %v13271_v52 = vld [vmem:[#allocation38_spill] sm:$0xff]  ;;  %v13289_v41 = vld [vmem:[#allocation108_spill] sm:$0xff] }
 0x367   : > { %v3314_v34 = vsel %vm13259_vm9, %v13257_v12, 0.0  ;;  %vm10615_vm0 = vmpackc.low %vm13261_vm7, %vm13260_vm13  ;;  %v3843_v39 = vadd.f32 %v3842_v62, %v3325_v13  ;;  %v3837_v5 = vadd.f32 %v3836_v53, %v3320_v45  ;;  %vm13266_vm1 = vcmp.gt.f32.partialorder %v13265_v19, 0.0  ;;  %5366 = vmatmul.mubr.msk.bf16.gmra.mxu0 %vm10586_vm11, %v5365_v25  ;;  %5462 = vmatmul.mubr.msk.bf16.gmra.mxu1 %vm5460_vm4, %v5461_v61  ;;  %v13274_v62 = vld [vmem:[#allocation175_spill] sm:$0xff]  ;;  %v10667_v24 = vpop.permute.xlu1 %4000  ;;  %v13341_v25 = vld [vmem:[#allocation128_spill] sm:$0xff] }
 0x368   : > { %v3315_v6 = vsel %vm13266_vm1, %v13264_v48, 0.0  ;;  %vm13267_vm8 = vcmp.gt.f32.partialorder %v13230_v26, 0.0  ;;  %vm13268_vm2 = vcmp.gt.f32.partialorder %v13219_v50, 0.0  ;;  %v3321_v57 = vsel %vm2201_vm12, %v13271_v52, 0.0  ;;  %v10639_v50 = vpop.permute.xlu0 %4020  ;;  %13291 = vst [vmem:[#allocation26_spill] sm:$0xff] %v10667_v24 }
 0x369   : > { %vm10626_vm3 = vmpackc.low %vm13268_vm2, %vm13267_vm8  ;;  %v3831_v53 = vadd.f32 %v3315_v6, %v3314_v34  ;;  %v5368_v43 = vpack.c.bf16 %v13184_v18, %v13210_v46  ;;  %v5464_v45 = vpack.c.bf16 %v13218_v1, %v13229_v31  ;;  %13273 = vst [vmem:[#allocation199_spill] sm:$0xff] %v10639_v50  ;;  %3844 = vadd.xlane.f32.xlu1 %v3843_v39  ;;  %vm13276_vm9 = vcmp.gt.f32.partialorder %v13275_v15, 0.0  ;;  %v13280_v1 = vld [vmem:[#allocation11_spill] sm:$0xff]  ;;  %v13281_v31 = vld [vmem:[#allocation102_spill] sm:$0xff] }
 0x36a   : > { %v3838_v26 = vadd.f32 %v3837_v5, %v3321_v57  ;;  %v3316_v13 = vsel %vm13276_vm9, %v13274_v62, 0.0  ;;  %v3342_v7 = vsel %vm2222_vm5, %v13277_v17, 0.0  ;;  %v3343_v61 = vsel %vm2223_vm15, %v10386_v27, 0.0  ;;  %v13283_v39 = vld [vmem:[#allocation113_spill] sm:$0xff]  ;;  %v13285_v6 = vld [vmem:[#allocation208_spill] sm:$0xff]  ;;  %v13286_v57 = vld [vmem:[#allocation107_spill] sm:$0xff] }
 0x36b   : > { %6381 = vpow2.f32 %v3216_v54  ;;  %v3832_v18 = vadd.f32 %v3831_v53, %v3316_v13  ;;  %5369 = vmatprep.mubr.msk.bf16.mxu0 %vm10615_vm0, %v5368_v43  ;;  %5465 = vmatprep.mubr.msk.bf16.mxu1 %vm10626_vm3, %v5464_v45  ;;  %v3866_v46 = vadd.f32 %v3343_v61, %v3342_v7  ;;  %vm13282_vm11 = vcmp.gt.f32.partialorder %v13281_v31, 0.0  ;;  %v13288_v53 = vld [vmem:[#allocation191_spill] sm:$0xff]  ;;  %v13292_v7 = vld [vmem:[#allocation114_spill] sm:$0xff]  ;;  %v13294_v50 = vld [vmem:[#allocation192_spill] sm:$0xff] }
 0x36c   : > { %3839 = vadd.xlane.f32.xlu0 %v3838_v26  ;;  %v3317_v34 = vsel %vm13282_vm11, %v13280_v1, 0.0  ;;  %vm13284_vm4 = vcmp.gt.f32.partialorder %v13283_v39, 0.0  ;;  %vm13287_vm13 = vcmp.gt.f32.partialorder %v13286_v57, 0.0  ;;  %vm13290_vm7 = vcmp.gt.f32.partialorder %v13289_v41, 0.0  ;;  %v13298_v39 = vld [vmem:[#allocation240_spill] sm:$0xff]  ;;  %v13300_v57 = vld [vmem:[#allocation205_spill] sm:$0xff] }
 0x36d   : > { %v3344_v5 = vsel %vm13284_vm4, %v10405_v44, 0.0  ;;  %v3338_v54 = vsel %vm13287_vm13, %v13285_v6, 0.0  ;;  %v3339_v43 = vsel %vm13290_vm7, %v13288_v53, 0.0  ;;  %6383 = vpow2.f32 %v10431_v3  ;;  %v13295_v44 = vld [vmem:[#allocation109_spill] sm:$0xff]  ;;  %v13297_v6 = vld [vmem:[#allocation204_spill] sm:$0xff] }
 0x36e   : > { %v3833_v45 = vadd.f32 %v3832_v18, %v3317_v34  ;;  %v3867_v26 = vadd.f32 %v3866_v46, %v3344_v5  ;;  %v3861_v13 = vadd.f32 %v3339_v43, %v3338_v54  ;;  %vm13293_vm0 = vcmp.gt.f32.partialorder %v13292_v7, 0.0  ;;  %v13301_v27 = vld [vmem:[#allocation241_spill] sm:$0xff]  ;;  %v10689_v46 = vpop.eup %6375  ;;  %v13309_v54 = vld [vmem:[#allocation110_spill] sm:$0xff]  ;;  %v10736_v7 = vpop.permute.xlu1 %4005  ;;  %v13342_v41 = vld [vmem:[#allocation256_spill] sm:$0xff] }
 0x36f   : > { %v3345_v61 = vsel %vm13293_vm0, %v10413_v33, 0.0  ;;  %vm13296_vm1 = vcmp.gt.f32.partialorder %v13295_v44, 0.0  ;;  %vm13299_vm8 = vcmp.gt.f32.partialorder %v13298_v39, 0.0  ;;  %vm13302_vm2 = vcmp.gt.f32.partialorder %v13301_v27, 0.0  ;;  %13307 = vst [vmem:[#allocation30_spill] sm:$0xff] %v10689_v46  ;;  %v13308_v5 = vld [vmem:[#allocation193_spill] sm:$0xff] }
 0x370   : > { %v3340_v17 = vsel %vm13296_vm1, %v13294_v50, 0.0  ;;  %v3334_v21 = vsel %vm13299_vm8, %v13297_v6, 0.0  ;;  %v3335_v3 = vsel %vm13302_vm2, %v13300_v57, 0.0  ;;  %vm13303_vm3 = vcmp.gt.f32.partialorder %v13204_v58, 0.0  ;;  %3834 = vadd.xlane.f32.xlu1 %v3833_v45  ;;  %v13314_v58 = vld [vmem:[#allocation206_spill] sm:$0xff]  ;;  %13337 = vst [vmem:[#allocation28_spill] sm:$0xff] %v10736_v7 }
 0x371   : > { %vm13304_vm9 = vcmp.gt.f32.partialorder %v13182_v49, 0.0  ;;  %v3868_v34 = vadd.f32 %v3867_v26, %v3345_v61  ;;  %vm13310_vm4 = vcmp.gt.f32.partialorder %v13309_v54, 0.0  ;;  %v3862_v24 = vadd.f32 %v3861_v13, %v3340_v17  ;;  %v10698_v49 = vpop.permute.xlu0 %4030  ;;  %v13315_v44 = vld [vmem:[#allocation242_spill] sm:$0xff]  ;;  %v13317_v61 = vld [vmem:[#allocation180_spill] sm:$0xff]  ;;  %v13318_v17 = vld [vmem:[#allocation115_spill] sm:$0xff] }
 0x372   : > { %vm10685_vm11 = vmpackc.low %vm13304_vm9, %vm13303_vm3  ;;  %v3341_v43 = vsel %vm13310_vm4, %v13308_v5, 0.0  ;;  %v3856_v50 = vadd.f32 %v3335_v3, %v3334_v21  ;;  %vm13311_vm13 = vcmp.gt.f32.partialorder %v13223_v11, 0.0  ;;  %vm13312_vm7 = vcmp.gt.f32.partialorder %v13201_v0, 0.0  ;;  %13313 = vst [vmem:[#allocation142_spill] sm:$0xff] %v10698_v49  ;;  %v10718_v11 = vpop.eup %6377  ;;  %v13326_v3 = vld [vmem:[#allocation116_spill] sm:$0xff]  ;;  %v13336_v49 = vld [vmem:[#allocation173_spill] sm:$0xff] }
 0x373   : > { %vm5466_vm0 = vmpackc.low %vm13312_vm7, %vm13311_vm13  ;;  %vm13316_vm1 = vcmp.gt.f32.partialorder %v13315_v44, 0.0  ;;  %v5371_v45 = vpack.c.bf16 %v13181_v10, %v13203_v2  ;;  %v5467_v26 = vpack.c.bf16 %v13200_v22, %v13222_v56  ;;  %vm13319_vm8 = vcmp.gt.f32.partialorder %v13318_v17, 0.0  ;;  %13324 = vst [vmem:[#allocation19_spill] sm:$0xff] %v10718_v11  ;;  %3869 = vadd.xlane.f32.xlu0 %v3868_v34  ;;  %v13325_v2 = vld [vmem:[#allocation200_spill] sm:$0xff]  ;;  %v13339_v54 = vld [vmem:[#allocation95_spill] sm:$0xff] }
 0x374   : > { %v3336_v33 = vsel %vm13316_vm1, %v13314_v58, 0.0  ;;  %v3330_v21 = vsel %vm13319_vm8, %v13317_v61, 0.0  ;;  %vm13320_vm2 = vcmp.gt.f32.partialorder %v13172_v51, 0.0  ;;  %vm13321_vm3 = vcmp.gt.f32.partialorder %v13162_v9, 0.0  ;;  %v13330_v51 = vld [vmem:[#allocation207_spill] sm:$0xff]  ;;  %v13357_v0 = vld [vmem:[#allocation249_spill] sm:$0xff] }
 0x375   : > { %vm10714_vm9 = vmpackc.low %vm13321_vm3, %vm13320_vm2  ;;  %v3863_v13 = vadd.f32 %v3862_v24, %v3341_v43  ;;  %v3857_v10 = vadd.f32 %v3856_v50, %v3336_v33  ;;  %vm13327_vm4 = vcmp.gt.f32.partialorder %v13326_v3, 0.0  ;;  %vm13328_vm13 = vcmp.gt.f32.partialorder %v13193_v28, 0.0  ;;  %v13331_v9 = vld [vmem:[#allocation243_spill] sm:$0xff]  ;;  %5372 = vmatmul.mubr.msk.bf16.gmra.mxu0 %vm10685_vm11, %v5371_v45  ;;  %5468 = vmatmul.mubr.msk.bf16.gmra.mxu1 %vm5466_vm0, %v5467_v26  ;;  %v13334_v33 = vld [vmem:[#allocation9_spill] sm:$0xff] }
 0x376   : > { %v3331_v22 = vsel %vm13327_vm4, %v13325_v2, 0.0  ;;  %vm13329_vm7 = vcmp.gt.f32.partialorder %v13176_v59, 0.0  ;;  %vm13332_vm8 = vcmp.gt.f32.partialorder %v13331_v9, 0.0  ;;  %v13333_v24 = vld [vmem:[#allocation187_spill] sm:$0xff]  ;;  %v13335_v43 = vld [vmem:[#allocation189_spill] sm:$0xff]  ;;  %v13338_v28 = vld [vmem:[#allocation202_spill] sm:$0xff]  ;;  %v5383_v35 = vpack.c.bf16 %v10171_v63, %v13257_v12 }
 0x377   : > { %vm5469_vm1 = vmpackc.low %vm13329_vm7, %vm13328_vm13  ;;  %v3337_v56 = vsel %vm13332_vm8, %v13330_v51, 0.0  ;;  %v3851_v34 = vadd.f32 %v3331_v22, %v3330_v21  ;;  %v5374_v50 = vpack.c.bf16 %v13334_v33, %v13333_v24  ;;  %v5470_v5 = vpack.c.bf16 %v13336_v49, %v13335_v43  ;;  %3864 = vadd.xlane.f32.xlu1 %v3863_v13  ;;  %v13344_v45 = vld [vmem:[#allocation17_spill] sm:$0xff]  ;;  %v10749_v13 = vpop.eup %6379  ;;  %v13351_v43 = vld [vmem:[#allocation258_spill] sm:$0xff] }
 0x378   : > { %v3858_v59 = vadd.f32 %v3857_v10, %v3337_v56  ;;  %vm13340_vm2 = vcmp.gt.f32.partialorder %v13339_v54, 0.0  ;;  %vm13343_vm3 = vcmp.gt.f32.partialorder %v13342_v41, 0.0  ;;  %v13345_v26 = vld [vmem:[#allocation257_spill] sm:$0xff]  ;;  %v13347_v10 = vld [vmem:[#allocation203_spill] sm:$0xff]  ;;  %v13348_v56 = vld [vmem:[#allocation96_spill] sm:$0xff]  ;;  %vm13352_vm4 = vcmp.gt.f32.partialorder %v13351_v43, 0.0 }
 0x379   : > { %v3332_v53 = vsel %vm13340_vm2, %v13338_v28, 0.0  ;;  %v3358_v18 = vsel %vm13343_vm3, %v13341_v25, 0.0  ;;  %vm13346_vm11 = vcmp.gt.f32.partialorder %v13345_v26, 0.0  ;;  %5375 = vmatprep.mubr.msk.bf16.mxu0 %vm10714_vm9, %v5374_v50  ;;  %5471 = vmatprep.mubr.msk.bf16.mxu1 %vm5469_vm1, %v5470_v5  ;;  %vm13349_vm0 = vcmp.gt.f32.partialorder %v13348_v56, 0.0  ;;  %v13350_v33 = vld [vmem:[#allocation141_spill] sm:$0xff]  ;;  %v13353_v41 = vld [vmem:[#allocation35_spill] sm:$0xff]  ;;  %v10763_v50 = vpop.permute.xlu0 %4040 }
 0x37a   : > { %v3359_v21 = vsel %vm13346_vm11, %v13344_v45, 0.0  ;;  %v3852_v22 = vadd.f32 %v3851_v34, %v3332_v53  ;;  %3859 = vadd.xlane.f32.xlu0 %v3858_v59  ;;  %v3333_v24 = vsel %vm13349_vm0, %v13347_v10, 0.0  ;;  %v3360_v7 = vsel %vm13352_vm4, %v13350_v33, 0.0  ;;  %v13354_v26 = vld [vmem:[#allocation248_spill] sm:$0xff]  ;;  %v13356_v34 = vld [vmem:[#allocation39_spill] sm:$0xff]  ;;  %13359 = vst [vmem:[#allocation32_spill] sm:$0xff] %v10763_v50 }
 0x37b   : > { %v3886_v49 = vadd.f32 %v3359_v21, %v3358_v18  ;;  %vm13355_vm13 = vcmp.gt.f32.partialorder %v13354_v26, 0.0  ;;  %vm13358_vm9 = vcmp.gt.f32.partialorder %v13357_v0, 0.0  ;;  %v13360_v45 = vld [vmem:[#allocation259_spill] sm:$0xff]  ;;  %v13362_v28 = vld [vmem:[#allocation194_spill] sm:$0xff]  ;;  %v13365_v26 = vld [vmem:[#allocation272_spill] sm:$0xff]  ;;  %v5413_v12 = vpack.c.bf16 %v13341_v25, %v13353_v41 }
 0x37c   : > { %v3354_v53 = vsel %vm13355_vm13, %v13353_v41, 0.0  ;;  %v3355_v5 = vsel %vm13358_vm9, %v13356_v34, 0.0  ;;  %v3853_v18 = vadd.f32 %v3852_v22, %v3333_v24  ;;  %vm13361_vm7 = vcmp.gt.f32.partialorder %v13360_v45, 0.0  ;;  %v13363_v43 = vld [vmem:[#allocation250_spill] sm:$0xff]  ;;  %v13367_v0 = vld [vmem:[#allocation273_spill] sm:$0xff]  ;;  %v13378_v45 = vld [vmem:[#allocation75_spill] sm:$0xff] }
 0x37d   : > { %v3887_v59 = vadd.f32 %v3886_v49, %v3360_v7  ;;  %v3881_v21 = vadd.f32 %v3355_v5, %v3354_v53  ;;  %v3361_v58 = vsel %vm13361_vm7, %v10537_v55, 0.0  ;;  %vm13364_vm1 = vcmp.gt.f32.partialorder %v13363_v43, 0.0  ;;  %v13369_v50 = vld [vmem:[#allocation73_spill] sm:$0xff]  ;;  %v10785_v49 = vpop.eup %6381  ;;  %v13375_v53 = vld [vmem:[#allocation146_spill] sm:$0xff]  ;;  %v13376_v5 = vld [vmem:[#allocation251_spill] sm:$0xff] }
 0x37e   : > { %v3356_v33 = vsel %vm13364_vm1, %v13362_v28, 0.0  ;;  %vm13366_vm8 = vcmp.gt.f32.partialorder %v13365_v26, 0.0  ;;  %vm13368_vm2 = vcmp.gt.f32.partialorder %v13367_v0, 0.0  ;;  %vm13370_vm3 = vcmp.gt.f32.partialorder %v13369_v50, 0.0  ;;  %v13371_v7 = vld [vmem:[#allocation77_spill] sm:$0xff]  ;;  %3854 = vadd.xlane.f32.xlu1 %v3853_v18  ;;  %v10794_v50 = vpop.permute.xlu1 %4015  ;;  %v13385_v18 = vld [vmem:[#allocation190_spill] sm:$0xff] }
 0x37f   : > { %v3350_v6 = vsel %vm13366_vm8, %v10689_v46, 0.0  ;;  %v3351_v34 = vsel %vm13368_vm2, %v10718_v11, 0.0  ;;  %vm13372_vm11 = vcmp.gt.f32.partialorder %v13371_v7, 0.0  ;;  %v3888_v24 = vadd.f32 %v3887_v59, %v3361_v58  ;;  %v13380_v46 = vld [vmem:[#allocation79_spill] sm:$0xff]  ;;  %v13382_v7 = vld [vmem:[#allocation274_spill] sm:$0xff]  ;;  %v13384_v11 = vld [vmem:[#allocation185_spill] sm:$0xff] }
 0x380   : > { %vm10781_vm0 = vmpackc.low %vm13372_vm11, %vm13370_vm3  ;;  %vm13377_vm4 = vcmp.gt.f32.partialorder %v13376_v5, 0.0  ;;  %v3882_v43 = vadd.f32 %v3881_v21, %v3356_v33  ;;  %v3876_v55 = vadd.f32 %v3351_v34, %v3350_v6  ;;  %vm13379_vm13 = vcmp.gt.f32.partialorder %v13378_v45, 0.0  ;;  %v13386_v59 = vld [vmem:[#allocation188_spill] sm:$0xff]  ;;  %v13387_v0 = vld [vmem:[#allocation171_spill] sm:$0xff]  ;;  %v10814_v45 = vpop.eup %6383 }
 0x381   : > { %v3357_v28 = vsel %vm13377_vm4, %v13375_v53, 0.0  ;;  %vm13381_vm9 = vcmp.gt.f32.partialorder %v13380_v46, 0.0  ;;  %vm13383_vm1 = vcmp.gt.f32.partialorder %v13382_v7, 0.0  ;;  %v5377_v58 = vpack.c.bf16 %v13385_v18, %v13384_v11  ;;  %v13388_v33 = vld [vmem:[#allocation264_spill] sm:$0xff]  ;;  %3889 = vadd.xlane.f32.xlu0 %v3888_v24  ;;  %v13393_v21 = vld [vmem:[#allocation265_spill] sm:$0xff]  ;;  %v13401_v22 = vld [vmem:[#allocation267_spill] sm:$0xff] }
 0x382   : > { %vm5472_vm7 = vmpackc.low %vm13381_vm9, %vm13379_vm13  ;;  %v3352_v26 = vsel %vm13383_vm1, %v10749_v13, 0.0  ;;  %v5473_v5 = vpack.c.bf16 %v13387_v0, %v13386_v59  ;;  %vm13389_vm8 = vcmp.gt.f32.partialorder %v13388_v33, 0.0  ;;  %vm13390_vm2 = vcmp.gt.f32.partialorder %v13265_v19, 0.0  ;;  %v13514_v41 = vld [vmem:[#allocation186_spill] sm:$0xff] }
 0x383   : > { %v3346_v6 = vsel %vm13389_vm8, %v10552_v23, 0.0  ;;  %vm10810_vm3 = vmpackc.low %vm2199_vm6, %vm13390_vm2  ;;  %v3883_v34 = vadd.f32 %v3882_v43, %v3357_v28  ;;  %v3877_v11 = vadd.f32 %v3876_v55, %v3352_v26  ;;  %vm13394_vm11 = vcmp.gt.f32.partialorder %v13393_v21, 0.0  ;;  %5378 = vmatmul.mubr.msk.bf16.gmra.mxu0 %vm10781_vm0, %v5377_v58  ;;  %v10832_v26 = vpop.permute.xlu0 %4050 }
 0x384   : > { %v3347_v0 = vsel %vm13394_vm11, %v10568_v16, 0.0  ;;  %vm13395_vm4 = vcmp.gt.f32.partialorder %v13281_v31, 0.0  ;;  %vm13397_vm6 = vcmp.gt.f32.partialorder %v13396_v42, 0.0  ;;  %5474 = vmatmul.mubr.msk.bf16.gmra.mxu1 %vm5472_vm7, %v5473_v5  ;;  %v5380_v55 = vpack.c.bf16 %v10175_v14, %v13264_v48  ;;  %13398 = vst [vmem:[#allocation134_spill] sm:$0xff] %v10832_v26  ;;  %v13399_v31 = vld [vmem:[#allocation266_spill] sm:$0xff]  ;;  %v10846_v48 = vpop.permute.xlu1 %4025  ;;  %v13406_v5 = vld [vmem:[#allocation176_spill] sm:$0xff] }
 0x385   : > { %vm5475_vm13 = vmpackc.low %vm2201_vm12, %vm13395_vm4  ;;  %v3353_v19 = vsel %vm13397_vm6, %v10785_v49, 0.0  ;;  %v3871_v24 = vadd.f32 %v3347_v0, %v3346_v6  ;;  %v5476_v28 = vpack.c.bf16 %v13271_v52, %v13280_v1  ;;  %3884 = vadd.xlane.f32.xlu1 %v3883_v34  ;;  %vm13400_vm12 = vcmp.gt.f32.partialorder %v13399_v31, 0.0  ;;  %v13405_v1 = vld [vmem:[#allocation195_spill] sm:$0xff]  ;;  %v13416_v34 = vld [vmem:[#allocation40_spill] sm:$0xff] }
 0x386   : > { %v3878_v29 = vadd.f32 %v3877_v11, %v3353_v19  ;;  %v3348_v43 = vsel %vm13400_vm12, %v10590_v60, 0.0  ;;  %5381 = vmatprep.mubr.msk.bf16.mxu0 %vm10810_vm3, %v5380_v55  ;;  %vm13402_vm0 = vcmp.gt.f32.partialorder %v13401_v22, 0.0  ;;  %vm13403_vm9 = vcmp.gt.f32.partialorder %v13258_v47, 0.0  ;;  %v13430_v11 = vld [vmem:[#allocation179_spill] sm:$0xff]  ;;  %v13431_v19 = vld [vmem:[#allocation178_spill] sm:$0xff] }
 0x387   : > { %v3872_v18 = vadd.f32 %v3871_v24, %v3348_v43  ;;  %5477 = vmatprep.mubr.msk.bf16.mxu1 %vm5475_vm13, %v5476_v28  ;;  %v3349_v14 = vsel %vm13402_vm0, %v10814_v45, 0.0  ;;  %vm5382_vm7 = vmpackc.low %vm2198_vm10, %vm13403_vm9  ;;  %vm13404_vm1 = vcmp.gt.f32.partialorder %v13275_v15, 0.0  ;;  %v13407_v58 = vsub.f32 %v13405_v1, %v13406_v5  ;;  %v13413_v15 = vld [vmem:[#allocation158_spill] sm:$0xff]  ;;  %v13432_v24 = vld [vmem:[#allocation36_spill] sm:$0xff] }
 0x388   : > { %3879 = vadd.xlane.f32.xlu0 %v3878_v29  ;;  %vm5478_vm8 = vmpackc.low %vm2200_vm14, %vm13404_vm1  ;;  %vm13408_vm2 = vcmp.gt.f32.partialorder %v13236_v30, 0.0  ;;  %vm13409_vm3 = vcmp.gt.f32.partialorder %v13227_v8, 0.0  ;;  %v5479_v47 = vpack.c.bf16 %v13254_v37, %v13274_v62  ;;  %vm13410_vm10 = vcmp.gt.f32.partialorder %v13249_v4, 0.0  ;;  %v10870_v30 = vpop.permute.xlu0 %4060  ;;  %v13418_v4 = vld [vmem:[#allocation89_spill] sm:$0xff]  ;;  %v13454_v5 = vld [vmem:[#allocation147_spill] sm:$0xff] }
 0x389   : > { %v3873_v52 = vadd.f32 %v3872_v18, %v3349_v14  ;;  %v2688_v59 = vmul.f32 1.442695, %v13407_v58  ;;  %vm5385_vm11 = vmpackc.low %vm13409_vm3, %vm13408_vm2  ;;  %vm13411_vm14 = vcmp.gt.f32.partialorder %v13239_v32, 0.0  ;;  %v13414_v6 = vsub.f32 %v13412_v20, %v13413_v15  ;;  %13415 = vst [vmem:[#allocation29_spill] sm:$0xff] %v10870_v30  ;;  %v10878_v32 = vpop.permute.xlu1 %4035  ;;  %v13420_v37 = vld [vmem:[#allocation93_spill] sm:$0xff]  ;;  %v13444_v18 = vld [vmem:[#allocation108_spill] sm:$0xff] }
 0x38a   : > { %vm5481_vm4 = vmpackc.low %vm13411_vm14, %vm13410_vm10  ;;  %v5386_v8 = vpack.c.bf16 %v10263_v38, %v10221_v36  ;;  %v5482_v63 = vpack.c.bf16 %v13416_v34, %v10236_v40  ;;  %13417 = vst [vmem:[#allocation143_spill] sm:$0xff] %v10878_v32  ;;  %vm13419_vm13 = vcmp.gt.f32.partialorder %v13418_v4, 0.0  ;;  %vm13421_vm6 = vcmp.gt.f32.partialorder %v13420_v37, 0.0  ;;  %v13422_v36 = vld [vmem:[#allocation91_spill] sm:$0xff]  ;;  %v13424_v38 = vld [vmem:[#allocation97_spill] sm:$0xff] }
 0x38b   : > { %3874 = vadd.xlane.f32.xlu1 %v3873_v52  ;;  %v2686_v46 = vmul.f32 1.442695, %v13414_v6  ;;  %5384 = vmatmul.mubr.msk.bf16.gmra.mxu0 %vm5382_vm7, %v5383_v35  ;;  %6385 = vpow2.f32 %v2688_v59  ;;  %vm5388_vm12 = vmpackc.low %vm13421_vm6, %vm13419_vm13  ;;  %vm13423_vm0 = vcmp.gt.f32.partialorder %v13422_v36, 0.0  ;;  %vm13425_vm9 = vcmp.gt.f32.partialorder %v13424_v38, 0.0  ;;  %v13429_v62 = vld [vmem:[#allocation177_spill] sm:$0xff]  ;;  %v13449_v14 = vld [vmem:[#allocation110_spill] sm:$0xff] }
 0x38c   : > { %5480 = vmatmul.mubr.msk.bf16.gmra.mxu1 %vm5478_vm8, %v5479_v47  ;;  %5387 = vmatprep.mubr.msk.bf16.mxu0 %vm5385_vm11, %v5386_v8  ;;  %vm5484_vm7 = vmpackc.low %vm13425_vm9, %vm13423_vm0  ;;  %v10888_v40 = vpop.permute.xlu0 %4070  ;;  %vm13427_vm1 = vcmp.gt.f32.partialorder %v13326_v3, 0.0  ;;  %vm13428_vm8 = vcmp.gt.f32.partialorder %v13301_v27, 0.0  ;;  %v5389_v0 = vpack.c.bf16 %v13430_v11, %v13429_v62  ;;  %v5485_v55 = vpack.c.bf16 %v13432_v24, %v13431_v19  ;;  %v13451_v52 = vld [vmem:[#allocation114_spill] sm:$0xff]  ;;  %v13456_v35 = vld [vmem:[#allocation107_spill] sm:$0xff] }
 0x38d   : > { %5483 = vmatprep.mubr.msk.bf16.mxu1 %vm5481_vm4, %v5482_v63  ;;  %6387 = vpow2.f32 %v2686_v46  ;;  %13426 = vst [vmem:[#allocation20_spill] sm:$0xff] %v10888_v40  ;;  %vm5391_vm2 = vmpackc.low %vm13428_vm8, %vm13427_vm1  ;;  %vm13433_vm3 = vcmp.gt.f32.partialorder %v13348_v56, 0.0  ;;  %vm13434_vm11 = vcmp.gt.f32.partialorder %v13331_v9, 0.0  ;;  %v5392_v28 = vpack.c.bf16 %v13300_v57, %v13325_v2  ;;  %v10906_v29 = vpop.permute.xlu1 %4045  ;;  %v13443_v56 = vld [vmem:[#allocation206_spill] sm:$0xff]  ;;  %v13460_v15 = vld [vmem:[#allocation109_spill] sm:$0xff] }
 0x38e   : > { %vm5487_vm10 = vmpackc.low %vm13434_vm11, %vm13433_vm3  ;;  %v5488_v3 = vpack.c.bf16 %v13330_v51, %v13347_v10  ;;  %vm13436_vm14 = vcmp.gt.f32.partialorder %v13318_v17, 0.0  ;;  %vm13437_vm4 = vcmp.gt.f32.partialorder %v13298_v39, 0.0  ;;  %vm13438_vm6 = vcmp.gt.f32.partialorder %v13339_v54, 0.0  ;;  %v13441_v51 = vld [vmem:[#allocation204_spill] sm:$0xff]  ;;  %v13442_v10 = vld [vmem:[#allocation202_spill] sm:$0xff] }
 0x38f   : > { %vm5394_vm13 = vmpackc.low %vm13437_vm4, %vm13436_vm14  ;;  %vm13439_vm0 = vcmp.gt.f32.partialorder %v13315_v44, 0.0  ;;  %v5395_v9 = vpack.c.bf16 %v13441_v51, %v13317_v61  ;;  %v5491_v43 = vpack.c.bf16 %v13443_v56, %v13442_v10  ;;  %v13447_v39 = vld [vmem:[#allocation191_spill] sm:$0xff]  ;;  %v13448_v44 = vld [vmem:[#allocation37_spill] sm:$0xff]  ;;  %vm13450_vm1 = vcmp.gt.f32.partialorder %v13449_v14, 0.0 }
 0x390   : > { %v10908_v27 = vpop.permute.xlu0 %4080  ;;  %vm5490_vm9 = vmpackc.low %vm13439_vm0, %vm13438_vm6  ;;  %v5398_v54 = vpack.c.bf16 %v13448_v44, %v13447_v39  ;;  %vm13452_vm8 = vcmp.gt.f32.partialorder %v13451_v52, 0.0  ;;  %v13453_v61 = vld [vmem:[#allocation193_spill] sm:$0xff]  ;;  %vm13461_vm11 = vcmp.gt.f32.partialorder %v13460_v15, 0.0  ;;  %vm13464_vm4 = vcmp.gt.f32.partialorder %v13393_v21, 0.0  ;;  %v13467_v8 = vld [vmem:[#allocation208_spill] sm:$0xff] }
 0x391   : > { %13435 = vst [vmem:[#allocation148_spill] sm:$0xff] %v10908_v27  ;;  %v10920_v2 = vpop.permute.xlu1 %4055  ;;  %v5494_v58 = vpack.c.bf16 %v13454_v5, %v13453_v61  ;;  %v13462_v6 = vld [vmem:[#allocation113_spill] sm:$0xff]  ;;  %v13469_v4 = vld [vmem:[#allocation192_spill] sm:$0xff]  ;;  %vm13472_vm0 = vcmp.gt.f32.partialorder %v13396_v42, 0.0  ;;  %v13474_v62 = vld [vmem:[#allocation19_spill] sm:$0xff]  ;;  %v5500_v21 = vpack.c.bf16 %v10785_v49, %v10814_v45 }
 0x392   : > { %13440 = vst [vmem:[#allocation25_spill] sm:$0xff] %v10920_v2  ;;  %v13465_v46 = vld [vmem:[#allocation273_spill] sm:$0xff]  ;;  %v13470_v37 = vld [vmem:[#allocation144_spill] sm:$0xff]  ;;  %v5404_v11 = vpack.c.bf16 %v13474_v62, %v10568_v16  ;;  %v13486_v45 = vld [vmem:[#allocation30_spill] sm:$0xff] }
 0x393   : > { %5390 = vmatmul.mubr.msk.bf16.gmra.mxu0 %vm5388_vm12, %v5389_v0  ;;  %vm13445_vm12 = vcmp.gt.f32.partialorder %v13444_v18, 0.0  ;;  %v13468_v34 = vld [vmem:[#allocation33_spill] sm:$0xff]  ;;  %v5497_v36 = vpack.c.bf16 %v13470_v37, %v13469_v4  ;;  %v5407_v19 = vpack.c.bf16 %v13486_v45, %v10552_v23  ;;  %v13487_v24 = vld [vmem:[#allocation251_spill] sm:$0xff]  ;;  %v13500_v10 = vld [vmem:[#allocation250_spill] sm:$0xff] }
 0x394   : > { %5486 = vmatmul.mubr.msk.bf16.gmra.mxu1 %vm5484_vm7, %v5485_v55  ;;  %5393 = vmatprep.mubr.msk.bf16.mxu0 %vm5391_vm2, %v5392_v28  ;;  %vm5397_vm7 = vmpackc.low %vm2223_vm15, %vm13445_vm12  ;;  %v10941_v59 = vpop.permute.xlu0 %4090  ;;  %vm13457_vm15 = vcmp.gt.f32.partialorder %v13456_v35, 0.0  ;;  %v5401_v63 = vpack.c.bf16 %v13468_v34, %v13467_v8  ;;  %vm13476_vm12 = vcmp.gt.f32.partialorder %v13388_v33, 0.0  ;;  %v13482_v42 = vld [vmem:[#allocation249_spill] sm:$0xff]  ;;  %v5503_v33 = vpack.c.bf16 %v10749_v13, %v10590_v60  ;;  %v13489_v55 = vld [vmem:[#allocation259_spill] sm:$0xff] }
 0x395   : > { %5489 = vmatprep.mubr.msk.bf16.mxu1 %vm5487_vm10, %v5488_v3  ;;  %vm5493_vm2 = vmpackc.low %vm13452_vm8, %vm13450_vm1  ;;  %13455 = vst [vmem:[#allocation219_spill] sm:$0xff] %v10941_v59  ;;  %v10948_v20 = vpop.permute.xlu1 %4065  ;;  %vm13463_vm10 = vcmp.gt.f32.partialorder %v13462_v6, 0.0  ;;  %vm13479_vm8 = vcmp.gt.f32.partialorder %v13399_v31, 0.0  ;;  %v13484_v49 = vld [vmem:[#allocation257_spill] sm:$0xff]  ;;  %v13493_v3 = vld [vmem:[#allocation18_spill] sm:$0xff] }
 0x396   : > { %vm5400_vm3 = vmpackc.low %vm2222_vm5, %vm13457_vm15  ;;  %13459 = vst [vmem:[#allocation221_spill] sm:$0xff] %v10948_v20  ;;  %vm13471_vm5 = vcmp.gt.f32.partialorder %v13401_v22, 0.0  ;;  %v13477_v22 = vld [vmem:[#allocation272_spill] sm:$0xff]  ;;  %v13492_v31 = vld [vmem:[#allocation17_spill] sm:$0xff]  ;;  %v5506_v51 = vpack.c.bf16 %v13493_v3, %v13375_v53 }
 0x397   : > { %vm5496_vm14 = vmpackc.low %vm13463_vm10, %vm13461_vm11  ;;  %vm13483_vm11 = vcmp.gt.f32.partialorder %v13482_v42, 0.0  ;;  %v13496_v60 = vld [vmem:[#allocation248_spill] sm:$0xff]  ;;  %v13502_v56 = vld [vmem:[#allocation258_spill] sm:$0xff] }
 0x398   : > { %v10918_v57 = vpop.eup %6385  ;;  %v10966_v38 = vpop.permute.xlu0 %4100  ;;  %v13498_v13 = vld [vmem:[#allocation256_spill] sm:$0xff]  ;;  %v13505_v53 = vld [vmem:[#allocation194_spill] sm:$0xff]  ;;  %v13506_v18 = vld [vmem:[#allocation141_spill] sm:$0xff] }
 0x399   : > { %13473 = vst [vmem:[#allocation222_spill] sm:$0xff] %v10966_v38  ;;  %v10972_v0 = vpop.permute.xlu1 %4075  ;;  %v5509_v17 = vpack.c.bf16 %v13506_v18, %v13505_v53  ;;  %v3669_v44 = vld [vmem:[#allocation4 + $0x10] sm:$0xff]  ;;  %v13509_v14 = vld [vmem:[#allocation201_spill] sm:$0xff]  ;;  %v13511_v35 = vld [vmem:[#allocation172_spill] sm:$0xff] }
 0x39a   : > { %v10937_v1 = vpop.eup %6387  ;;  %13475 = vst [vmem:[#allocation223_spill] sm:$0xff] %v10972_v0  ;;  %v3701_v52 = vmul.f32 %v13509_v14, %v3669_v44  ;;  %v3667_v5 = vld [vmem:[#allocation4] sm:$0xff]  ;;  %v3670_v6 = vld [vmem:[#allocation4 + $0x18] sm:$0xff]  ;;  %v3673_v18 = vld [vmem:[#allocation4 + $0x30] sm:$0xff] }
 0x39b   : > { %5396 = vmatmul.mubr.msk.bf16.gmra.mxu0 %vm5394_vm13, %v5395_v9  ;;  %vm13466_vm13 = vcmp.gt.f32.partialorder %v13465_v46, 0.0  ;;  %v3699_v47 = vmul.f32 %v13511_v35, %v3667_v5  ;;  %v3674_v34 = vld [vmem:[#allocation4 + $0x38] sm:$0xff]  ;;  %v3676_v14 = vld [vmem:[#allocation4 + $0x48] sm:$0xff]  ;;  %v13526_v5 = vld [vmem:[#allocation161_spill] sm:$0xff] }
 0x39c   : > { %4145 = vperm.xlu1 %6015, %v10918_v57   ;;  %5492 = vmatmul.mubr.msk.bf16.gmra.mxu1 %vm5490_vm9, %v5491_v43  ;;  %vm5403_vm6 = vmpackc.low %vm13466_vm13, %vm13464_vm4  ;;  %v10982_v16 = vpop.permute.xlu0 %4120  ;;  %vm13490_vm4 = vcmp.gt.f32.partialorder %v13489_v55, 0.0  ;;  %v3668_v55 = vld [vmem:[#allocation4 + $0x8] sm:$0xff] }
 0x39d   : > { %5399 = vmatprep.mubr.msk.bf16.mxu0 %vm5397_vm7, %v5398_v54  ;;  %5495 = vmatprep.mubr.msk.bf16.mxu1 %vm5493_vm2, %v5494_v58  ;;  %vm5499_vm9 = vmpackc.low %vm13472_vm0, %vm13471_vm5  ;;  %vm13478_vm7 = vcmp.gt.f32.partialorder %v13477_v22, 0.0  ;;  %vm13480_vm2 = vcmp.gt.f32.partialorder %v13382_v7, 0.0  ;;  %13481 = vst [vmem:[#allocation31_spill] sm:$0xff] %v10982_v16  ;;  %v13491_v7 = vld [vmem:[#allocation39_spill] sm:$0xff]  ;;  %v11000_v9 = vpop.permute.xlu1 %4085  ;;  %vm13499_vm5 = vcmp.gt.f32.partialorder %v13498_v13, 0.0 }
 0x39e   : > { %4140 = vperm.xlu0 %6016, %v10937_v1   ;;  %vm5406_vm1 = vmpackc.low %vm13478_vm7, %vm13476_vm12  ;;  %v5410_v28 = vpack.c.bf16 %v13492_v31, %v13491_v7  ;;  %13494 = vst [vmem:[#allocation133_spill] sm:$0xff] %v11000_v9  ;;  %vm13503_vm12 = vcmp.gt.f32.partialorder %v13502_v56, 0.0  ;;  %v11043_v56 = vpop.f32.mrf.mxu1 }
 0x39f   : > { %vm5502_vm15 = vmpackc.low %vm13480_vm2, %vm13479_vm8 }
 0x3a0   : > { %v11002_v23 = vpop.permute.xlu0 %4110  ;;  %v11050_v35 = vpop.f32.mrf.mxu1 }
 0x3a1   : > { %13495 = vst [vmem:[#allocation27_spill] sm:$0xff] %v11002_v23  ;;  %v11012_v43 = vpop.permute.xlu1 %4105 }
 0x3a2   : > { %13504 = vst [vmem:[#allocation224_spill] sm:$0xff] %v11012_v43 }
 0x3a3   : > { %5402 = vmatmul.mubr.msk.bf16.gmra.mxu0 %vm5400_vm3, %v5401_v63  ;;  %vm13485_vm3 = vcmp.gt.f32.partialorder %v13484_v49, 0.0  ;;  %v13519_v49 = vld [vmem:[#allocation170_spill] sm:$0xff] }
 0x3a4   : > { %5498 = vmatmul.mubr.msk.bf16.gmra.mxu1 %vm5496_vm14, %v5497_v36  ;;  %5405 = vmatprep.mubr.msk.bf16.mxu0 %vm5403_vm6, %v5404_v11  ;;  %vm5409_vm10 = vmpackc.low %vm13485_vm3, %vm13483_vm11  ;;  %vm13488_vm14 = vcmp.gt.f32.partialorder %v13487_v24, 0.0  ;;  %vm13497_vm6 = vcmp.gt.f32.partialorder %v13496_v60, 0.0  ;;  %v11019_v39 = vpop.permute.xlu0 %4130  ;;  %v13517_v36 = vld [vmem:[#allocation167_spill] sm:$0xff]  ;;  %v13523_v60 = vld [vmem:[#allocation181_spill] sm:$0xff] }
 0x3a5   : > { %5501 = vmatprep.mubr.msk.bf16.mxu1 %vm5499_vm9, %v5500_v21  ;;  %vm5505_vm13 = vmpackc.low %vm13490_vm4, %vm13488_vm14  ;;  %vm13501_vm9 = vcmp.gt.f32.partialorder %v13500_v10, 0.0  ;;  %13507 = vst [vmem:[#allocation225_spill] sm:$0xff] %v11019_v39  ;;  %v11021_v54 = vpop.permute.xlu1 %4095  ;;  %v3706_v62 = vmul.f32 %v13517_v36, %v3674_v34  ;;  %v3672_v21 = vld [vmem:[#allocation4 + $0x28] sm:$0xff]  ;;  %v3700_v13 = vmul.f32 %v13523_v60, %v3668_v55  ;;  %v3682_v60 = vld [vmem:[#allocation4 + $0x78] sm:$0xff] }
 0x3a6   : > { %vm5412_vm0 = vmpackc.low %vm13499_vm5, %vm13497_vm6  ;;  %13508 = vst [vmem:[#allocation226_spill] sm:$0xff] %v11021_v54  ;;  %v3704_v45 = vmul.f32 %v13519_v49, %v3672_v21  ;;  %v3677_v21 = vld [vmem:[#allocation4 + $0x50] sm:$0xff] }
 0x3a7   : > { %vm5508_vm7 = vmpackc.low %vm13503_vm12, %vm13501_vm9 }
 0x3a8   : > { %v3745_v61 = vpop.xlane.xlu0 %3744 }
 0x3a9   : > { %v3893_v58 = vadd.f32 %v3745_v61, %v3701_v52  ;;  %v11026_v46 = vpop.permute.xlu1 %4125 }
 0x3aa   : > { %13512 = vst [vmem:[#allocation227_spill] sm:$0xff] %v11026_v46 }
 0x3ab   : > { %5408 = vmatmul.mubr.msk.bf16.gmra.mxu0 %vm5406_vm1, %v5407_v19  ;;  %vm13510_vm1 = vcmask 7168  }
 0x3ac   : > { %5504 = vmatmul.mubr.msk.bf16.gmra.mxu1 %vm5502_vm15, %v5503_v33  ;;  %5411 = vmatprep.mubr.msk.bf16.mxu0 %vm5409_vm10, %v5410_v28  ;;  %3926 = vst.msk [vmem:[#allocation4 + $0x10] sm:$0xff] %vm13510_vm1, %v3893_v58  ;;  %v3735_v15 = vpop.xlane.xlu0 %3734  ;;  %vm13513_vm8 = vmmov %vm13510_vm1  ;;  %v3678_v33 = vld [vmem:[#allocation4 + $0x58] sm:$0xff]  ;;  %v3705_v58 = vmul.f32 %v13526_v5, %v3673_v18 }
 0x3ad   : > { %5507 = vmatprep.mubr.msk.bf16.mxu1 %vm5505_vm13, %v5506_v51  ;;  %v3891_v25 = vadd.f32 %v3735_v15, %v3699_v47  ;;  %v11030_v37 = vpop.permute.xlu1 %4115  ;;  %vm13516_vm2 = vmmov %vm13510_vm1  ;;  %v13522_v28 = vld [vmem:[#allocation220_spill] sm:$0xff]  ;;  %v11040_v51 = vpop.f32.mrf.mxu0  ;;  %v3671_v15 = vld [vmem:[#allocation4 + $0x20] sm:$0xff] }
 0x3ae   : > { %13515 = vst [vmem:[#allocation209_spill] sm:$0xff] %v11030_v37  ;;  %vm13518_vm15 = vmmov %vm13510_vm1  ;;  %v3710_v3 = vmul.f32 %v13522_v28, %v3678_v33  ;;  %v13532_v33 = vld [vmem:[#allocation212_spill] sm:$0xff]  ;;  %v3675_v28 = vld [vmem:[#allocation4 + $0x40] sm:$0xff] }
 0x3af   : > { %3924 = vst.msk [vmem:[#allocation4] sm:$0xff] %vm13513_vm8, %v3891_v25  ;;  %vm13521_vm11 = vmmov %vm13510_vm1  ;;  %v11046_v52 = vpop.f32.mrf.mxu0  ;;  %v13527_v25 = vld [vmem:[#allocation280_spill] sm:$0xff]  ;;  %v3709_v55 = vmul.f32 %v13532_v33, %v3677_v21 }
 0x3b0   : > { %v3750_v8 = vpop.xlane.xlu0 %3749  ;;  %vm13524_vm3 = vmmov %vm13510_vm1  ;;  %v13534_v18 = vld [vmem:[#allocation216_spill] sm:$0xff] }
 0x3b1   : > { %v11036_v24 = vpop.permute.xlu1 %4135  ;;  %vm13525_vm10 = vmmov %vm13510_vm1 }
 0x3b2   : > { %13520 = vst [vmem:[#allocation210_spill] sm:$0xff] %v11036_v24  ;;  %vm13528_vm14 = vmmov %vm13510_vm1  ;;  %v3687_v24 = vld [vmem:[#allocation4 + $0xa0] sm:$0xff] }
 0x3b3   : > { %5414 = vmatmul.mubr.msk.bf16.gmra.mxu0 %vm5412_vm0, %v5413_v12  ;;  %v3702_v12 = vmul.f32 %v13514_v41, %v3670_v6  ;;  %v4699_v4 = vld [vmem:[#allocation4 + $0x10] sm:$0xff]  ;;  %v3708_v41 = vmul.f32 %v13527_v25, %v3676_v14  ;;  %vm13530_vm4 = vmmov %vm13510_vm1 }
 0x3b4   : > { %5510 = vmatmul.mubr.msk.bf16.gmra.mxu1 %vm5508_vm7, %v5509_v17  ;;  %6389 = vrcp.f32 %v4699_v4  ;;  %v3770_v11 = vpop.xlane.xlu0 %3769  ;;  %vm13531_vm13 = vmmov %vm13510_vm1  ;;  %v3681_v25 = vld [vmem:[#allocation4 + $0x70] sm:$0xff] }
 0x3b5   : > { %v3894_v63 = vadd.f32 %v3750_v8, %v3702_v12  ;;  %v3898_v22 = vadd.f32 %v3770_v11, %v3706_v62  ;;  %v3740_v53 = vpop.xlane.xlu1 %3739  ;;  %v11053_v8 = vpop.f32.mrf.mxu0  ;;  %vm13533_vm6 = vmmov %vm13510_vm1 }
 0x3b6   : > { %v4697_v42 = vld [vmem:[#allocation4] sm:$0xff]  ;;  %v3892_v44 = vadd.f32 %v3740_v53, %v3700_v13  ;;  %v11057_v62 = vpop.f32.mrf.mxu1  ;;  %vm13536_vm5 = vmmov %vm13510_vm1 }
 0x3b7   : > { %3927 = vst.msk [vmem:[#allocation4 + $0x18] sm:$0xff] %vm13516_vm2, %v3894_v63  ;;  %6391 = vrcp.f32 %v4697_v42  ;;  %v13529_v63 = vld [vmem:[#allocation164_spill] sm:$0xff]  ;;  %v11060_v49 = vpop.f32.mrf.mxu0  ;;  %vm13537_vm0 = vmmov %vm13510_vm1 }
 0x3b8   : > { %3931 = vst.msk [vmem:[#allocation4 + $0x38] sm:$0xff] %vm13518_vm15, %v3898_v22  ;;  %v3760_v19 = vpop.xlane.xlu0 %3759  ;;  %v3703_v4 = vmul.f32 %v13529_v63, %v3671_v15  ;;  %v13538_v63 = vld [vmem:[#allocation281_spill] sm:$0xff]  ;;  %vm13539_vm9 = vmmov %vm13537_vm0 }
 0x3b9   : > { %v3896_v7 = vadd.f32 %v3760_v19, %v3704_v45  ;;  %3925 = vst.msk [vmem:[#allocation4 + $0x8] sm:$0xff] %vm13525_vm10, %v3892_v44  ;;  %v3765_v47 = vpop.xlane.xlu1 %3764  ;;  %vm13541_vm12 = vmmov %vm13537_vm0 }
 0x3ba   : > { %v3897_v6 = vadd.f32 %v3765_v47, %v3705_v58  ;;  %vm13543_vm7 = vmmov %vm13537_vm0 }
 0x3bb   : > { %3929 = vst.msk [vmem:[#allocation4 + $0x28] sm:$0xff] %vm13521_vm11, %v3896_v7  ;;  %v11064_v7 = vpop.f32.mrf.mxu1  ;;  %vm13546_vm1 = vmmov %vm13537_vm0 }
 0x3bc   : > { %v3790_v10 = vpop.xlane.xlu0 %3789  ;;  %3930 = vst.msk [vmem:[#allocation4 + $0x30] sm:$0xff] %vm13528_vm14, %v3897_v6  ;;  %vm13548_vm8 = vmmov %vm13537_vm0 }
 0x3bd   : > { %v3902_v17 = vadd.f32 %v3790_v10, %v3710_v3  ;;  %v3755_v11 = vpop.xlane.xlu1 %3754  ;;  %v11066_v10 = vpop.f32.mrf.mxu0  ;;  %vm13550_vm2 = vmmov %vm13537_vm0 }
 0x3be   : > { %v4700_v31 = vld [vmem:[#allocation4 + $0x18] sm:$0xff]  ;;  %v3895_v22 = vadd.f32 %v3755_v11, %v3703_v4  ;;  %v11070_v44 = vpop.f32.mrf.mxu1  ;;  %v3713_v4 = vmul.f32 %v13538_v63, %v3681_v25  ;;  %vm13552_vm15 = vmmov %vm13537_vm0 }
 0x3bf   : > { %6393 = vrcp.f32 %v4700_v31  ;;  %3935 = vst.msk [vmem:[#allocation4 + $0x58] sm:$0xff] %vm13524_vm3, %v3902_v17  ;;  %v4704_v19 = vld [vmem:[#allocation4 + $0x38] sm:$0xff]  ;;  %v3707_v17 = vmul.f32 %v13534_v18, %v3675_v28  ;;  %vm13554_vm11 = vmmov %vm13537_vm0 }
 0x3c0   : > { %v3780_v12 = vpop.xlane.xlu0 %3779  ;;  %v4698_v42 = vld [vmem:[#allocation4 + $0x8] sm:$0xff]  ;;  %3928 = vst.msk [vmem:[#allocation4 + $0x20] sm:$0xff] %vm13531_vm13, %v3895_v22  ;;  %v3686_v25 = vld [vmem:[#allocation4 + $0x98] sm:$0xff]  ;;  %vm13556_vm3 = vmmov %vm13537_vm0 }
 0x3c1   : > { %v6390_v61 = vpop.eup %6389  ;;  %v3900_v36 = vadd.f32 %v3780_v12, %v3708_v41  ;;  %6395 = vrcp.f32 %v4698_v42  ;;  %v3785_v31 = vpop.xlane.xlu1 %3784  ;;  %vm13558_vm10 = vmmov %vm13537_vm0 }
 0x3c2   : > { %4805 = vperm.xlu0 %6016, %v6390_v61   ;;  %v3901_v3 = vadd.f32 %v3785_v31, %v3709_v55  ;;  %6397 = vrcp.f32 %v4704_v19  ;;  %v4702_v53 = vld [vmem:[#allocation4 + $0x28] sm:$0xff]  ;;  %v11073_v41 = vpop.f32.mrf.mxu0  ;;  %vm13560_vm14 = vmmov %vm13537_vm0 }
 0x3c3   : > { %3933 = vst.msk [vmem:[#allocation4 + $0x48] sm:$0xff] %vm13530_vm4, %v3900_v36  ;;  %v4703_v13 = vld [vmem:[#allocation4 + $0x30] sm:$0xff]  ;;  %v13535_v61 = vld [vmem:[#allocation282_spill] sm:$0xff]  ;;  %vm13562_vm4 = vmmov %vm13537_vm0  ;;  %v5631_v32 = vadd.f32 %v11073_v41, %v11066_v10 }
 0x3c4   : > { %v6392_v34 = vpop.eup %6391  ;;  %6399 = vrcp.f32 %v4703_v13  ;;  %3934 = vst.msk [vmem:[#allocation4 + $0x50] sm:$0xff] %vm13533_vm6, %v3901_v3  ;;  %v3714_v5 = vmul.f32 %v13535_v61, %v3682_v60  ;;  %v11080_v21 = vpop.f32.mrf.mxu0  ;;  %v13540_v31 = vld [vmem:[#allocation122_spill] sm:$0xff]  ;;  %vm13564_vm13 = vmmov %vm13537_vm0 }
 0x3c5   : > { %6401 = vrcp.f32 %v4702_v53  ;;  %v3679_v53 = vld [vmem:[#allocation4 + $0x60] sm:$0xff]  ;;  %vm13566_vm6 = vmmov %vm13537_vm0  ;;  %v13600_v41 = vld [vmem:[#allocation26_spill] sm:$0xff] }
 0x3c6   : > { %4795 = vperm.xlu0 %6016, %v6392_v34   ;;  %v3775_v14 = vpop.xlane.xlu1 %3774  ;;  %v4708_v12 = vld [vmem:[#allocation4 + $0x58] sm:$0xff]  ;;  %v11076_v34 = vpop.f32.mrf.mxu1 }
 0x3c7   : > { %v3899_v58 = vadd.f32 %v3775_v14, %v3707_v17  ;;  %v4701_v15 = vld [vmem:[#allocation4 + $0x20] sm:$0xff]  ;;  %v11086_v3 = vpop.f32.mrf.mxu0 }
 0x3c8   : > { %6403 = vrcp.f32 %v4701_v15  ;;  %v11082_v19 = vpop.f32.mrf.mxu1 }
 0x3c9   : > { %3932 = vst.msk [vmem:[#allocation4 + $0x40] sm:$0xff] %vm13536_vm5, %v3899_v58  ;;  %6405 = vrcp.f32 %v4708_v12  ;;  %vm13567_vm5 = vmmov %vm13537_vm0 }
 0x3ca   : > { %v3810_v47 = vpop.xlane.xlu0 %3809  ;;  %v4706_v22 = vld [vmem:[#allocation4 + $0x48] sm:$0xff]  ;;  %v11088_v18 = vpop.f32.mrf.mxu1 }
 0x3cb   : > { %v3906_v6 = vadd.f32 %v3810_v47, %v3714_v5  ;;  %v4707_v36 = vld [vmem:[#allocation4 + $0x50] sm:$0xff]  ;;  %v13542_v5 = vld [vmem:[#allocation121_spill] sm:$0xff]  ;;  %v11092_v47 = vpop.f32.mrf.mxu0 }
 0x3cc   : > { %v6394_v45 = vpop.eup %6393  ;;  %6407 = vrcp.f32 %v4707_v36  ;;  %v3711_v58 = vmul.f32 %v13542_v5, %v3679_v53  ;;  %v11094_v12 = vpop.f32.mrf.mxu1  ;;  %v13545_v53 = vld [vmem:[#allocation123_spill] sm:$0xff] }
 0x3cd   : > { %4810 = vperm.xlu1 %6015, %v6394_v45   ;;  %3939 = vst.msk [vmem:[#allocation4 + $0x78] sm:$0xff] %vm13537_vm0, %v3906_v6  ;;  %v3680_v45 = vld [vmem:[#allocation4 + $0x68] sm:$0xff]  ;;  %6409 = vrcp.f32 %v4706_v22  ;;  %v13544_v22 = vld [vmem:[#allocation124_spill] sm:$0xff] }
 0x3ce   : > { %v6396_v33 = vpop.eup %6395  ;;  %v3712_v28 = vmul.f32 %v13540_v31, %v3680_v45  ;;  %v11098_v45 = vpop.f32.mrf.mxu0  ;;  %v3684_v31 = vld [vmem:[#allocation4 + $0x88] sm:$0xff] }
 0x3cf   : > { %v3805_v11 = vpop.xlane.xlu1 %3804  ;;  %v6398_v60 = vpop.eup %6397 }
 0x3d0   : > { %v3905_v42 = vadd.f32 %v3805_v11, %v3713_v4  ;;  %v4705_v55 = vld [vmem:[#allocation4 + $0x40] sm:$0xff]  ;;  %v3685_v11 = vld [vmem:[#allocation4 + $0x90] sm:$0xff] }
 0x3d1   : > { %4800 = vperm.xlu1 %6015, %v6396_v33   ;;  %6411 = vrcp.f32 %v4705_v55  ;;  %v6400_v17 = vpop.eup %6399 }
 0x3d2   : > { %3938 = vst.msk [vmem:[#allocation4 + $0x70] sm:$0xff] %vm13539_vm9, %v3905_v42  ;;  %4825 = vperm.xlu0 %6016, %v6400_v17   ;;  %v6402_v15 = vpop.eup %6401  ;;  %v3718_v42 = vmul.f32 %v13544_v22, %v3686_v25  ;;  %v3717_v17 = vmul.f32 %v13545_v53, %v3685_v11  ;;  %v11105_v25 = vpop.f32.mrf.mxu0  ;;  %vm13569_vm9 = vmmov %vm13537_vm0 }
 0x3d4   : > { %v4712_v14 = vld [vmem:[#allocation4 + $0x78] sm:$0xff]  ;;  %v11112_v53 = vpop.f32.mrf.mxu0 }
 0x3d5   : > { %4830 = vperm.xlu1 %6015, %v6398_v60   ;;  %6413 = vrcp.f32 %v4712_v14  ;;  %v6404_v63 = vpop.eup %6403 }
 0x3d6   : > { %v3800_v13 = vpop.xlane.xlu0 %3799  ;;  %4815 = vperm.xlu0 %6016, %v6404_v63   ;;  %v6406_v33 = vpop.eup %6405 }
 0x3d7   : > { %v3904_v61 = vadd.f32 %v3800_v13, %v3712_v28  ;;  %v11100_v28 = vpop.f32.mrf.mxu1 }
 0x3d9   : > { %3937 = vst.msk [vmem:[#allocation4 + $0x68] sm:$0xff] %vm13541_vm12, %v3904_v61  ;;  %v4711_v4 = vld [vmem:[#allocation4 + $0x70] sm:$0xff]  ;;  %4820 = vperm.xlu1 %6015, %v6402_v15   ;;  %v6408_v60 = vpop.eup %6407  ;;  %vm13571_vm12 = vmmov %vm13537_vm0 }
 0x3da   : > { %v3795_v6 = vpop.xlane.xlu1 %3794  ;;  %6415 = vrcp.f32 %v4711_v4  ;;  %4845 = vperm.xlu0 %6016, %v6408_v60   ;;  %v6410_v63 = vpop.eup %6409 }
 0x3db   : > { %v3903_v36 = vadd.f32 %v3795_v6, %v3711_v58  ;;  %v13547_v58 = vld [vmem:[#allocation118_spill] sm:$0xff]  ;;  %v3683_v6 = vld [vmem:[#allocation4 + $0x80] sm:$0xff] }
 0x3dc   : > { %v3716_v15 = vmul.f32 %v13547_v58, %v3684_v31 }
 0x3dd   : > { %3936 = vst.msk [vmem:[#allocation4 + $0x60] sm:$0xff] %vm13543_vm7, %v3903_v36  ;;  %4850 = vperm.xlu1 %6015, %v6406_v33   ;;  %v11107_v36 = vpop.f32.mrf.mxu1  ;;  %v13549_v33 = vld [vmem:[#allocation117_spill] sm:$0xff]  ;;  %vm13572_vm7 = vmmov %vm13537_vm0 }
 0x3de   : > { %v6412_v22 = vpop.eup %6411  ;;  %v3715_v60 = vmul.f32 %v13549_v33, %v3683_v6  ;;  %v11119_v33 = vpop.f32.mrf.mxu0 }
 0x3df   : > { %v3830_v55 = vpop.xlane.xlu0 %3829  ;;  %4835 = vperm.xlu0 %6016, %v6412_v22   ;;  %v11115_v58 = vpop.f32.mrf.mxu1 }
 0x3e0   : > { %v3910_v13 = vadd.f32 %v3830_v55, %v3718_v42  ;;  %v4710_v14 = vld [vmem:[#allocation4 + $0x68] sm:$0xff]  ;;  %v3690_v42 = vld [vmem:[#allocation4 + $0xb8] sm:$0xff] }
 0x3e1   : > { %6417 = vrcp.f32 %v4710_v14  ;;  %4840 = vperm.xlu1 %6015, %v6410_v63   ;;  %v13551_v14 = vld [vmem:[#allocation120_spill] sm:$0xff]  ;;  %v13553_v63 = vld [vmem:[#allocation119_spill] sm:$0xff]  ;;  %v11123_v23 = vpop.f32.mrf.mxu1 }
 0x3e2   : > { %3943 = vst.msk [vmem:[#allocation4 + $0x98] sm:$0xff] %vm13546_vm1, %v3910_v13  ;;  %v3689_v13 = vld [vmem:[#allocation4 + $0xb0] sm:$0xff] }
 0x3e3   : > { %v3721_v22 = vmul.f32 %v13553_v63, %v3689_v13  ;;  %v11127_v63 = vpop.f32.mrf.mxu0 }
 0x3e4   : > { %v3825_v61 = vpop.xlane.xlu1 %3824  ;;  %v4709_v55 = vld [vmem:[#allocation4 + $0x60] sm:$0xff] }
 0x3e5   : > { %v3909_v5 = vadd.f32 %v3825_v61, %v3717_v17  ;;  %6419 = vrcp.f32 %v4709_v55  ;;  %v3722_v61 = vmul.f32 %v13551_v14, %v3690_v42  ;;  %v11135_v16 = vpop.f32.mrf.mxu0 }
 0x3e7   : > { %v3820_v4 = vpop.xlane.xlu0 %3819  ;;  %3942 = vst.msk [vmem:[#allocation4 + $0x90] sm:$0xff] %vm13548_vm8, %v3909_v5  ;;  %v6414_v5 = vpop.eup %6413 }
 0x3e8   : > { %v3908_v11 = vadd.f32 %v3820_v4, %v3716_v15  ;;  %v3688_v4 = vld [vmem:[#allocation4 + $0xa8] sm:$0xff]  ;;  %4870 = vperm.xlu1 %6015, %v6414_v5   ;;  %v13557_v5 = vld [vmem:[#allocation129_spill] sm:$0xff] }
 0x3e9   : > { %v4716_v39 = vld [vmem:[#allocation4 + $0x98] sm:$0xff] }
 0x3ea   : > { %3941 = vst.msk [vmem:[#allocation4 + $0x88] sm:$0xff] %vm13550_vm2, %v3908_v11  ;;  %v6416_v11 = vpop.eup %6415  ;;  %6421 = vrcp.f32 %v4716_v39  ;;  %v3694_v39 = vld [vmem:[#allocation4 + $0xd8] sm:$0xff] }
 0x3eb   : > { %v3815_v31 = vpop.xlane.xlu1 %3814  ;;  %4865 = vperm.xlu0 %6016, %v6416_v11   ;;  %v11130_v11 = vpop.f32.mrf.mxu1 }
 0x3ec   : > { %v3907_v17 = vadd.f32 %v3815_v31, %v3715_v60  ;;  %v13555_v31 = vld [vmem:[#allocation130_spill] sm:$0xff] }
 0x3ed   : > { %v3720_v14 = vmul.f32 %v13555_v31, %v3688_v4  ;;  %v13559_v31 = vld [vmem:[#allocation131_spill] sm:$0xff]  ;;  %v11137_v59 = vpop.f32.mrf.mxu1 }
 0x3ee   : > { %v3850_v15 = vpop.xlane.xlu0 %3849  ;;  %3940 = vst.msk [vmem:[#allocation4 + $0x80] sm:$0xff] %vm13552_vm15, %v3907_v17  ;;  %v4715_v60 = vld [vmem:[#allocation4 + $0x90] sm:$0xff]  ;;  %v3726_v37 = vmul.f32 %v13559_v31, %v3694_v39  ;;  %v3698_v31 = vld [vmem:[#allocation4 + $0xf8] sm:$0xff] }
 0x3ef   : > { %v3914_v6 = vadd.f32 %v3850_v15, %v3722_v61  ;;  %6423 = vrcp.f32 %v4715_v60  ;;  %v3719_v15 = vmul.f32 %v13557_v5, %v3687_v24  ;;  %v11145_v38 = vpop.f32.mrf.mxu1 }
 0x3f1   : > { %3947 = vst.msk [vmem:[#allocation4 + $0xb8] sm:$0xff] %vm13554_vm11, %v3914_v6  ;;  %v4714_v61 = vld [vmem:[#allocation4 + $0x88] sm:$0xff]  ;;  %v6418_v6 = vpop.eup %6417 }
 0x3f2   : > { %v3845_v55 = vpop.xlane.xlu1 %3844  ;;  %6425 = vrcp.f32 %v4714_v61  ;;  %4860 = vperm.xlu1 %6015, %v6418_v6   ;;  %v13561_v61 = vld [vmem:[#allocation283_spill] sm:$0xff]  ;;  %v13563_v6 = vld [vmem:[#allocation125_spill] sm:$0xff] }
 0x3f3   : > { %v3913_v42 = vadd.f32 %v3845_v55, %v3721_v22  ;;  %v3693_v22 = vld [vmem:[#allocation4 + $0xd0] sm:$0xff] }
 0x3f4   : > { %v3725_v5 = vmul.f32 %v13561_v61, %v3693_v22  ;;  %v13565_v61 = vld [vmem:[#allocation132_spill] sm:$0xff] }
 0x3f5   : > { %v3840_v17 = vpop.xlane.xlu0 %3839  ;;  %3946 = vst.msk [vmem:[#allocation4 + $0xb0] sm:$0xff] %vm13556_vm3, %v3913_v42  ;;  %v4713_v55 = vld [vmem:[#allocation4 + $0x80] sm:$0xff] }
 0x3f6   : > { %v3912_v13 = vadd.f32 %v3840_v17, %v3720_v14  ;;  %6427 = vrcp.f32 %v4713_v55  ;;  %v3692_v14 = vld [vmem:[#allocation4 + $0xc8] sm:$0xff]  ;;  %v3691_v55 = vld [vmem:[#allocation4 + $0xc0] sm:$0xff] }
 0x3f7   : > { %v3723_v54 = vmul.f32 %v13565_v61, %v3691_v55  ;;  %v11153_v61 = vpop.f32.mrf.mxu1 }
 0x3f8   : > { %3945 = vst.msk [vmem:[#allocation4 + $0xa8] sm:$0xff] %vm13558_vm10, %v3912_v13  ;;  %v4720_v17 = vld [vmem:[#allocation4 + $0xb8] sm:$0xff]  ;;  %v6420_v13 = vpop.eup %6419 }
 0x3f9   : > { %v3835_v4 = vpop.xlane.xlu1 %3834  ;;  %6429 = vrcp.f32 %v4720_v17  ;;  %4855 = vperm.xlu0 %6016, %v6420_v13   ;;  %v6422_v17 = vpop.eup %6421 }
 0x3fa   : > { %v3911_v60 = vadd.f32 %v3835_v4, %v3719_v15  ;;  %v3724_v4 = vmul.f32 %v13563_v6, %v3692_v14  ;;  %v3697_v14 = vld [vmem:[#allocation4 + $0xf0] sm:$0xff]  ;;  %4890 = vperm.xlu1 %6015, %v6422_v17   ;;  %v3696_v6 = vld [vmem:[#allocation4 + $0xe8] sm:$0xff] }
 0x3fc   : > { %v3870_v42 = vpop.xlane.xlu0 %3869  ;;  %3944 = vst.msk [vmem:[#allocation4 + $0xa0] sm:$0xff] %vm13560_vm14, %v3911_v60  ;;  %v4719_v15 = vld [vmem:[#allocation4 + $0xb0] sm:$0xff] }
 0x3fd   : > { %v3918_v24 = vadd.f32 %v3870_v42, %v3726_v37  ;;  %6431 = vrcp.f32 %v4719_v15  ;;  %v11142_v42 = vpop.f32.mrf.mxu0  ;;  %v3730_v15 = vmul.f32 %v10918_v57, %v3698_v31  ;;  %v13568_v31 = vld [vmem:[#allocation127_spill] sm:$0xff] }
 0x3ff   : > { %3951 = vst.msk [vmem:[#allocation4 + $0xd8] sm:$0xff] %vm13562_vm4, %v3918_v24  ;;  %v4718_v37 = vld [vmem:[#allocation4 + $0xa8] sm:$0xff]  ;;  %v6424_v24 = vpop.eup %6423 }
 0x400   : > { %v3865_v46 = vpop.xlane.xlu1 %3864  ;;  %6433 = vrcp.f32 %v4718_v37  ;;  %4885 = vperm.xlu0 %6016, %v6424_v24   ;;  %v3695_v24 = vld [vmem:[#allocation4 + $0xe0] sm:$0xff] }
 0x401   : > { %v3917_v39 = vadd.f32 %v3865_v46, %v3725_v5 }
 0x403   : > { %v3860_v60 = vpop.xlane.xlu0 %3859  ;;  %3950 = vst.msk [vmem:[#allocation4 + $0xd0] sm:$0xff] %vm13564_vm13, %v3917_v39  ;;  %v4717_v5 = vld [vmem:[#allocation4 + $0xa0] sm:$0xff] }
 0x404   : > { %v3916_v22 = vadd.f32 %v3860_v60, %v3724_v4  ;;  %6435 = vrcp.f32 %v4717_v5  ;;  %v11149_v4 = vpop.f32.mrf.mxu0  ;;  %v6426_v60 = vpop.eup %6425 }
 0x405   : > { %4880 = vperm.xlu1 %6015, %v6426_v60   ;;  %v6428_v5 = vpop.eup %6427 }
 0x406   : > { %3949 = vst.msk [vmem:[#allocation4 + $0xc8] sm:$0xff] %vm13566_vm6, %v3916_v22  ;;  %v4724_v55 = vld [vmem:[#allocation4 + $0xd8] sm:$0xff]  ;;  %v3729_v22 = vmul.f32 %v10937_v1, %v3697_v14  ;;  %v11157_v40 = vpop.f32.mrf.mxu0  ;;  %4875 = vperm.xlu0 %6016, %v6428_v5   ;;  %v11160_v14 = vpop.f32.mrf.mxu1 }
 0x407   : > { %v3855_v46 = vpop.xlane.xlu1 %3854  ;;  %6437 = vrcp.f32 %v4724_v55 }
 0x408   : > { %v3915_v13 = vadd.f32 %v3855_v46, %v3723_v54  ;;  %v3728_v46 = vmul.f32 %v13568_v31, %v3696_v6 }
 0x40a   : > { %v3890_v39 = vpop.xlane.xlu0 %3889  ;;  %3948 = vst.msk [vmem:[#allocation4 + $0xc0] sm:$0xff] %vm13567_vm5, %v3915_v13  ;;  %v4723_v54 = vld [vmem:[#allocation4 + $0xd0] sm:$0xff] }
 0x40b   : > { %v3922_v37 = vadd.f32 %v3890_v39, %v3730_v15  ;;  %6439 = vrcp.f32 %v4723_v54  ;;  %v6430_v15 = vpop.eup %6429  ;;  %v13570_v39 = vld [vmem:[#allocation126_spill] sm:$0xff]  ;;  %v11166_v54 = vpop.f32.mrf.mxu1 }
 0x40c   : > { %v3727_v60 = vmul.f32 %v13570_v39, %v3695_v24  ;;  %4910 = vperm.xlu1 %6015, %v6430_v15   ;;  %v6432_v55 = vpop.eup %6431 }
 0x40d   : > { %3955 = vst.msk [vmem:[#allocation4 + $0xf8] sm:$0xff] %vm13537_vm0, %v3922_v37  ;;  %v4722_v13 = vld [vmem:[#allocation4 + $0xc8] sm:$0xff]  ;;  %4905 = vperm.xlu0 %6016, %v6432_v55  }
 0x40e   : > { %v3885_v17 = vpop.xlane.xlu1 %3884  ;;  %6441 = vrcp.f32 %v4722_v13 }
 0x40f   : > { %v3921_v57 = vadd.f32 %v3885_v17, %v3729_v22  ;;  %v11164_v17 = vpop.f32.mrf.mxu0 }
 0x411   : > { %v3880_v43 = vpop.xlane.xlu0 %3879  ;;  %3954 = vst.msk [vmem:[#allocation4 + $0xf0] sm:$0xff] %vm13569_vm9, %v3921_v57  ;;  %v4721_v37 = vld [vmem:[#allocation4 + $0xc0] sm:$0xff]  ;;  %v11169_v57 = vpop.f32.mrf.mxu0 }
 0x412   : > { %v3920_v1 = vadd.f32 %v3880_v43, %v3728_v46  ;;  %6443 = vrcp.f32 %v4721_v37  ;;  %v6434_v43 = vpop.eup %6433  ;;  %v11171_v46 = vpop.f32.mrf.mxu1 }
 0x413   : > { %4900 = vperm.xlu1 %6015, %v6434_v43   ;;  %v6436_v31 = vpop.eup %6435 }
 0x414   : > { %3953 = vst.msk [vmem:[#allocation4 + $0xe8] sm:$0xff] %vm13571_vm12, %v3920_v1  ;;  %v3875_v6 = vpop.xlane.xlu1 %3874  ;;  %4895 = vperm.xlu0 %6016, %v6436_v31   ;;  %v6438_v5 = vpop.eup %6437  ;;  %v4728_v13 = vld [vmem:[#allocation4 + $0xf8] sm:$0xff] }
 0x415   : > { %v3919_v22 = vadd.f32 %v3875_v6, %v3727_v60  ;;  %v11173_v1 = vpop.f32.mrf.mxu0  ;;  %v11175_v60 = vpop.f32.mrf.mxu1 }
 0x417   : > { %3952 = vst.msk [vmem:[#allocation4 + $0xe0] sm:$0xff] %vm13572_vm7, %v3919_v22  ;;  %4930 = vperm.xlu1 %6015, %v6438_v5   ;;  %v11177_v6 = vpop.f32.mrf.mxu0  ;;  %v11179_v22 = vpop.f32.mrf.mxu1 }
 0x418   : > { %v6440_v15 = vpop.eup %6439  ;;  %v4727_v37 = vld [vmem:[#allocation4 + $0xf0] sm:$0xff] }
 0x419   : > { %4925 = vperm.xlu0 %6016, %v6440_v15   ;;  %v11181_v43 = vpop.f32.mrf.mxu0  ;;  %v11183_v31 = vpop.f32.mrf.mxu1 }
 0x41b   : > { %v4726_v24 = vld [vmem:[#allocation4 + $0xe8] sm:$0xff]  ;;  %v6442_v55 = vpop.eup %6441  ;;  %v11185_v5 = vpop.f32.mrf.mxu0 }
 0x41c   : > { %6445 = vrcp.f32 %v4726_v24  ;;  %4920 = vperm.xlu1 %6015, %v6442_v55   ;;  %v11187_v0 = vpop.f32.mrf.mxu1 }
 0x41e   : > { %v4725_v39 = vld [vmem:[#allocation4 + $0xe0] sm:$0xff] }
 0x41f   : > { %6447 = vrcp.f32 %v4725_v39  ;;  %v6444_v24 = vpop.eup %6443  ;;  %v11189_v39 = vpop.f32.mrf.mxu0 }
 0x420   : > { %6449 = vrcp.f32 %v4728_v13  ;;  %4915 = vperm.xlu0 %6016, %v6444_v24   ;;  %13573 = vst [vmem:[#allocation211_spill] sm:$0xff] %v11189_v39  ;;  %v11191_v13 = vpop.f32.mrf.mxu1 }
 0x421   : > { %6451 = vrcp.f32 %v4727_v37  ;;  %13574 = vst [vmem:[#allocation213_spill] sm:$0xff] %v11191_v13  ;;  %v11193_v9 = vpop.f32.mrf.mxu0 }
 0x422   : > { %13575 = vst [vmem:[#allocation214_spill] sm:$0xff] %v11193_v9  ;;  %v11195_v55 = vpop.f32.mrf.mxu1 }
 0x423   : > { %13576 = vst [vmem:[#allocation215_spill] sm:$0xff] %v11195_v55  ;;  %v11197_v37 = vpop.f32.mrf.mxu0 }
 0x424   : > { %13577 = vst [vmem:[#allocation217_spill] sm:$0xff] %v11197_v37  ;;  %v11199_v24 = vpop.f32.mrf.mxu1 }
 0x425   : > { %13578 = vst [vmem:[#allocation218_spill] sm:$0xff] %v11199_v24  ;;  %v11201_v30 = vpop.f32.mrf.mxu0 }
 0x426   : > { %13579 = vst [vmem:[#allocation145_spill] sm:$0xff] %v11201_v30 }
 0x427   : > { %v11205_v39 = vpop.f32.mrf.mxu0 }
 0x428   : > { %13581 = vst [vmem:[#allocation50_spill] sm:$0xff] %v11205_v39 }
 0x429   : > { %v6446_v15 = vpop.eup %6445  ;;  %v11209_v9 = vpop.f32.mrf.mxu0 }
 0x42a   : > { %4940 = vperm.xlu1 %6015, %v6446_v15   ;;  %v11203_v15 = vpop.f32.mrf.mxu1  ;;  %13583 = vst [vmem:[#allocation52_spill] sm:$0xff] %v11209_v9 }
 0x42b   : > { %13580 = vst [vmem:[#allocation34_spill] sm:$0xff] %v11203_v15 }
 0x42c   : > { %v6448_v27 = vpop.eup %6447  ;;  %v11207_v13 = vpop.f32.mrf.mxu1 }
 0x42d   : > { %v6450_v26 = vpop.eup %6449  ;;  %4935 = vperm.xlu0 %6016, %v6448_v27   ;;  %13582 = vst [vmem:[#allocation54_spill] sm:$0xff] %v11207_v13  ;;  %v11213_v27 = vpop.f32.mrf.mxu0 }
 0x42e   : > { %4950 = vperm.xlu1 %6015, %v6450_v26   ;;  %v6452_v2 = vpop.eup %6451  ;;  %v11211_v55 = vpop.f32.mrf.mxu1 }
 0x42f   : > { %13584 = vst [vmem:[#allocation56_spill] sm:$0xff] %v11211_v55  ;;  %v11217_v37 = vpop.f32.mrf.mxu0 }
 0x430   : > { %v11215_v26 = vpop.f32.mrf.mxu1 }
 0x431   : > { %4945 = vperm.xlu0 %6016, %v6452_v2  }
 0x432   : > { %v11219_v24 = vpop.f32.mrf.mxu1 }
 0x433   : > { %13585 = vst [vmem:[#allocation236_spill] sm:$0xff] %v11219_v24 }
 0x435   : > { %v11221_v30 = vpop.f32.mrf.mxu0  ;;  %v11223_v15 = vpop.f32.mrf.mxu1 }
 0x436   : > { %13586 = vst [vmem:[#allocation237_spill] sm:$0xff] %v11221_v30  ;;  %13587 = vst [vmem:[#allocation45_spill] sm:$0xff] %v11223_v15  ;;  %v5743_v30 = vadd.f32 %v11076_v34, %v11070_v44  ;;  %v11257_v44 = vpop.permute.xlu0 %4140  ;;  %v4150_v34 = vmul.f32 0.0, %v13600_v41 }
 0x437   : > { %v11225_v2 = vpop.f32.mrf.mxu0  ;;  %v11227_v20 = vpop.f32.mrf.mxu1  ;;  %13599 = vst [vmem:[#allocation48_spill] sm:$0xff] %v11257_v44  ;;  %v13605_v44 = vld [vmem:[#allocation198_spill] sm:$0xff] }
 0x438   : > { %13588 = vst [vmem:[#allocation162_spill] sm:$0xff] %v11225_v2  ;;  %13589 = vst [vmem:[#allocation46_spill] sm:$0xff] %v11227_v20 }
 0x439   : > { %v11229_v13 = vpop.f32.mrf.mxu0  ;;  %v11231_v9 = vpop.f32.mrf.mxu1 }
 0x43a   : > { %13590 = vst [vmem:[#allocation238_spill] sm:$0xff] %v11229_v13  ;;  %13591 = vst [vmem:[#allocation239_spill] sm:$0xff] %v11231_v9  ;;  %v5625_v9 = vadd.f32 %v11046_v52, %v11040_v51  ;;  %v5634_v51 = vadd.f32 %v11086_v3, %v11080_v21 }
 0x43b   : > { %v11233_v55 = vpop.f32.mrf.mxu0  ;;  %v11235_v39 = vpop.f32.mrf.mxu1 }
 0x43c   : > { %13592 = vst [vmem:[#allocation139_spill] sm:$0xff] %v11233_v55  ;;  %13593 = vst [vmem:[#allocation41_spill] sm:$0xff] %v11235_v39  ;;  %v5737_v39 = vadd.f32 %v11050_v35, %v11043_v56  ;;  %v4480_v55 = vadd.f32 %v5743_v30, %v5631_v32  ;;  %v5746_v30 = vadd.f32 %v11088_v18, %v11082_v19  ;;  %v11276_v35 = vld [vmem:[%s11631_s6] ss:$0 sm:$0xff] }
 0x43d   : > { %v4806_v41 = vpop.permute.xlu0 %4805 }
 0x43e   : > { %v4600_v52 = vadd.f32 %v4480_v55, %v4150_v34  ;;  %v4483_v19 = vadd.f32 %v5746_v30, %v5634_v51 }
 0x440   : > { %v4955_v21 = vmul.f32 %v4806_v41, %v4600_v52 }
 0x442   : > { %v4994_v55 = vadd.f32 %v11276_v35, %v4955_v21 }
 0x443   : > { %v11241_v15 = vpop.f32.mrf.mxu0 }
 0x444   : > { %13594 = vst [vmem:[#allocation163_spill] sm:$0xff] %v11241_v15  ;;  %v11243_v2 = vpop.f32.mrf.mxu1  ;;  %v4148_v15 = vmul.f32 0.0, %v13605_v44 }
 0x445   : > { %13595 = vst [vmem:[#allocation47_spill] sm:$0xff] %v11243_v2  ;;  %v11245_v20 = vpop.f32.mrf.mxu0 }
 0x446   : > { %13596 = vst [vmem:[#allocation140_spill] sm:$0xff] %v11245_v20  ;;  %v11247_v13 = vpop.f32.mrf.mxu1 }
 0x447   : > { %13597 = vst [vmem:[#allocation42_spill] sm:$0xff] %v11247_v13  ;;  %v11253_v24 = vpop.f32.mrf.mxu0  ;;  %v4472_v13 = vadd.f32 %v5737_v39, %v5625_v9 }
 0x448   : > { %v11255_v10 = vpop.f32.mrf.mxu1 }
 0x449   : > { %13598 = vst [vmem:[#allocation165_spill] sm:$0xff] %v11255_v10  ;;  %v11260_v2 = vpop.f32.mrf.mxu0  ;;  %v4598_v34 = vadd.f32 %v4472_v13, %v4148_v15 }
 0x44a   : > { %13601 = vst [vmem:[#allocation159_spill] sm:$0xff] %v11260_v2  ;;  %v11262_v20 = vpop.f32.mrf.mxu1 }
 0x44b   : > { %13602 = vst [vmem:[#allocation43_spill] sm:$0xff] %v11262_v20  ;;  %v11269_v32 = vpop.f32.mrf.mxu0  ;;  %v13609_v20 = vld [vmem:[#allocation28_spill] sm:$0xff] }
 0x44c   : > { %13603 = vst [vmem:[#allocation244_spill] sm:$0xff] %v11269_v32  ;;  %v11271_v56 = vpop.f32.mrf.mxu1  ;;  %v4796_v32 = vpop.permute.xlu0 %4795  ;;  %v4151_v44 = vmul.f32 0.0, %v13609_v20 }
 0x44d   : > { %13604 = vst [vmem:[#allocation245_spill] sm:$0xff] %v11271_v56  ;;  %v11279_v9 = vpop.f32.mrf.mxu0  ;;  %v11290_v56 = vpop.permute.xlu1 %4145  ;;  %v4953_v2 = vmul.f32 %v4796_v32, %v4598_v34 }
 0x44e   : > { %13606 = vst [vmem:[#allocation228_spill] sm:$0xff] %v11279_v9  ;;  %v11281_v39 = vpop.f32.mrf.mxu1  ;;  %13608 = vst [vmem:[#allocation247_spill] sm:$0xff] %v11290_v56  ;;  %v4601_v15 = vadd.f32 %v4483_v19, %v4151_v44 }
 0x44f   : > { %13607 = vst [vmem:[#allocation246_spill] sm:$0xff] %v11281_v39  ;;  %v11285_v3 = vpop.f32.mrf.mxu0  ;;  %v5026_v39 = vmax.f32 %v4994_v55, 0.0  ;;  %v4992_v13 = vadd.f32 %v11276_v35, %v4953_v2  ;;  %v5740_v2 = vadd.f32 %v11064_v7, %v11057_v62 }
 0x450   : > { %v11287_v18 = vpop.f32.mrf.mxu1 }
 0x451   : > { %v11293_v10 = vpop.f32.mrf.mxu0  ;;  %5058 = vst [vmem:[%s11301_s15 + $0x10] sm:$0xff] %v5026_v39  ;;  %v4811_v20 = vpop.permute.xlu1 %4810  ;;  %v5024_v21 = vmax.f32 %v4992_v13, 0.0  ;;  %v5628_v39 = vadd.f32 %v11060_v49, %v11053_v8  ;;  %v5758_v8 = vadd.f32 %v11145_v38, %v11137_v59  ;;  %v13611_v49 = vld [vmem:[#allocation196_spill] sm:$0xff] }
 0x452   : > { %v11295_v9 = vpop.f32.mrf.mxu1  ;;  %v4956_v32 = vmul.f32 %v4811_v20, %v4601_v15  ;;  %v5643_v15 = vadd.f32 %v11127_v63, %v11119_v33  ;;  %v5755_v20 = vadd.f32 %v11130_v11, %v11123_v23  ;;  %v4149_v7 = vmul.f32 0.0, %v13611_v49 }
 0x453   : > { %13610 = vst [vmem:[#allocation160_spill] sm:$0xff] %v11295_v9  ;;  %v11297_v52 = vpop.f32.mrf.mxu0  ;;  %5056 = vst [vmem:[%s11301_s15] sm:$0xff] %v5024_v21  ;;  %v4475_v13 = vadd.f32 %v5740_v2, %v5628_v39  ;;  %v5646_v21 = vadd.f32 %v11142_v42, %v11135_v16  ;;  %v5640_v23 = vadd.f32 %v11112_v53, %v11105_v25  ;;  %v13612_v39 = vld [vmem:[#allocation199_spill] sm:$0xff] }
 0x454   : > { %v11299_v51 = vpop.f32.mrf.mxu1  ;;  %v4995_v56 = vadd.f32 %v11276_v35, %v4956_v32  ;;  %v5749_v32 = vadd.f32 %v11100_v28, %v11094_v12  ;;  %v5752_v16 = vadd.f32 %v11115_v58, %v11107_v36  ;;  %v4496_v63 = vadd.f32 %v5755_v20, %v5643_v15 }
 0x455   : > { %v11305_v30 = vpop.f32.mrf.mxu0  ;;  %v4499_v59 = vadd.f32 %v5758_v8, %v5646_v21  ;;  %v4599_v11 = vadd.f32 %v4475_v13, %v4149_v7  ;;  %v4801_v42 = vpop.permute.xlu1 %4800  ;;  %v4154_v2 = vmul.f32 0.0, %v13612_v39  ;;  %v5655_v25 = vadd.f32 %v11177_v6, %v11173_v1  ;;  %v13613_v21 = vld [vmem:[#allocation197_spill] sm:$0xff] }
 0x456   : > { %v11307_v41 = vpop.f32.mrf.mxu1  ;;  %v5027_v44 = vmax.f32 %v4995_v56, 0.0  ;;  %v5637_v56 = vadd.f32 %v11098_v45, %v11092_v47  ;;  %v4155_v47 = vmul.f32 0.0, %v10846_v48  ;;  %v5767_v36 = vadd.f32 %v11179_v22, %v11175_v60  ;;  %v4826_v6 = vpop.permute.xlu0 %4825 }
 0x457   : > { %v11309_v55 = vpop.f32.mrf.mxu0  ;;  %v4954_v28 = vmul.f32 %v4801_v42, %v4599_v11  ;;  %v5658_v53 = vadd.f32 %v11185_v5, %v11181_v43  ;;  %v5770_v58 = vadd.f32 %v11187_v0, %v11183_v31  ;;  %v4604_v15 = vadd.f32 %v4496_v63, %v4154_v2 }
 0x458   : > { %v11311_v34 = vpop.f32.mrf.mxu1  ;;  %5059 = vst [vmem:[%s11301_s15 + $0x18] sm:$0xff] %v5027_v44  ;;  %v4488_v45 = vadd.f32 %v5749_v32, %v5637_v56  ;;  %v4491_v44 = vadd.f32 %v5752_v16, %v5640_v23  ;;  %v4605_v20 = vadd.f32 %v4499_v59, %v4155_v47  ;;  %v4152_v8 = vmul.f32 0.0, %v13613_v21  ;;  %v13614_v16 = vld [vmem:[#allocation32_spill] sm:$0xff] }
 0x459   : > { %v11319_v19 = vpop.f32.mrf.mxu0  ;;  %v4993_v48 = vadd.f32 %v11276_v35, %v4954_v28  ;;  %v4153_v1 = vmul.f32 0.0, %v10794_v50  ;;  %v5649_v60 = vadd.f32 %v11157_v40, %v11149_v4  ;;  %v4831_v22 = vpop.permute.xlu1 %4830  ;;  %v5761_v0 = vadd.f32 %v11160_v14, %v11153_v61 }
 0x45a   : > { %v11321_v9 = vpop.f32.mrf.mxu1  ;;  %v4959_v5 = vmul.f32 %v4826_v6, %v4604_v15  ;;  %v4960_v49 = vmul.f32 %v4831_v22, %v4605_v20  ;;  %v5652_v7 = vadd.f32 %v11169_v57, %v11164_v17  ;;  %v5764_v56 = vadd.f32 %v11171_v46, %v11166_v54  ;;  %v4816_v17 = vpop.permute.xlu0 %4815  ;;  %v13617_v20 = vld [vmem:[#allocation143_spill] sm:$0xff] }
 0x45b   : > { %v11332_v62 = vpop.f32.mrf.mxu0  ;;  %v5025_v31 = vmax.f32 %v4993_v48, 0.0  ;;  %v4512_v50 = vadd.f32 %v5767_v36, %v5655_v25  ;;  %v4515_v32 = vadd.f32 %v5770_v58, %v5658_v53  ;;  %v4602_v61 = vadd.f32 %v4488_v45, %v4152_v8  ;;  %v13615_v36 = vld [vmem:[#allocation236_spill] sm:$0xff]  ;;  %v13616_v48 = vld [vmem:[#allocation142_spill] sm:$0xff] }
 0x45c   : > { %v11339_v33 = vpop.f32.mrf.mxu1  ;;  %v4998_v40 = vadd.f32 %v11276_v35, %v4959_v5  ;;  %v4999_v4 = vadd.f32 %v11276_v35, %v4960_v49  ;;  %v4603_v14 = vadd.f32 %v4491_v44, %v4153_v1  ;;  %v4158_v63 = vmul.f32 0.0, %v13614_v16  ;;  %v13618_v8 = vld [vmem:[#allocation50_spill] sm:$0xff]  ;;  %v13619_v1 = vld [vmem:[#allocation52_spill] sm:$0xff] }
 0x45d   : > { %v11345_v38 = vpop.f32.mrf.mxu0  ;;  %5057 = vst [vmem:[%s11301_s15 + $0x8] sm:$0xff] %v5025_v31  ;;  %v4159_v59 = vmul.f32 0.0, %v10906_v29  ;;  %v4821_v57 = vpop.permute.xlu1 %4820  ;;  %v4957_v42 = vmul.f32 %v4816_v17, %v4602_v61  ;;  %v4504_v2 = vadd.f32 %v5761_v0, %v5649_v60  ;;  %v4507_v47 = vadd.f32 %v5764_v56, %v5652_v7  ;;  %v13621_v60 = vld [vmem:[#allocation56_spill] sm:$0xff] }
 0x45e   : > { %v11349_v12 = vpop.f32.mrf.mxu1  ;;  %v5030_v46 = vmax.f32 %v4998_v40, 0.0  ;;  %v5031_v11 = vmax.f32 %v4999_v4, 0.0  ;;  %v4958_v39 = vmul.f32 %v4821_v57, %v4603_v14  ;;  %v4608_v28 = vadd.f32 %v4512_v50, %v4158_v63  ;;  %v4846_v6 = vpop.permute.xlu0 %4845  ;;  %v13622_v14 = vld [vmem:[#allocation221_spill] sm:$0xff]  ;;  %v13625_v57 = vld [vmem:[#allocation218_spill] sm:$0xff] }
 0x45f   : > { %v11359_v13 = vpop.f32.mrf.mxu0  ;;  %v4609_v25 = vadd.f32 %v4515_v32, %v4159_v59  ;;  %v5670_v45 = vadd.f32 %v11217_v37, %v11213_v27  ;;  %v5782_v53 = vadd.f32 %v13615_v36, %v11215_v26  ;;  %v4996_v58 = vadd.f32 %v11276_v35, %v4957_v42  ;;  %v13620_v27 = vld [vmem:[#allocation54_spill] sm:$0xff]  ;;  %v13623_v63 = vld [vmem:[#allocation217_spill] sm:$0xff] }
 0x460   : > { %v11368_v43 = vpop.f32.mrf.mxu1  ;;  %5062 = vst [vmem:[%s11301_s15 + $0x30] sm:$0xff] %v5030_v46  ;;  %5063 = vst [vmem:[%s11301_s15 + $0x38] sm:$0xff] %v5031_v11  ;;  %v4997_v44 = vadd.f32 %v11276_v35, %v4958_v39  ;;  %v4156_v15 = vmul.f32 0.0, %v13616_v48  ;;  %v4157_v21 = vmul.f32 0.0, %v13617_v20  ;;  %v5667_v37 = vadd.f32 %v13619_v1, %v13618_v8  ;;  %v13624_v59 = vld [vmem:[#allocation145_spill] sm:$0xff]  ;;  %v13626_v46 = vld [vmem:[#allocation34_spill] sm:$0xff] }
 0x461   : > { %v11374_v23 = vpop.f32.mrf.mxu0  ;;  %v5779_v26 = vadd.f32 %v13621_v60, %v13620_v27  ;;  %v4851_v22 = vpop.permute.xlu1 %4850  ;;  %v5028_v31 = vmax.f32 %v4996_v58, 0.0  ;;  %v4963_v49 = vmul.f32 %v4846_v6, %v4608_v28  ;;  %v4531_v50 = vadd.f32 %v5782_v53, %v5670_v45  ;;  %v13627_v58 = vld [vmem:[#allocation29_spill] sm:$0xff]  ;;  %v13628_v20 = vld [vmem:[#allocation211_spill] sm:$0xff] }
 0x462   : > { %v11381_v54 = vpop.f32.mrf.mxu1  ;;  %v5029_v5 = vmax.f32 %v4997_v44, 0.0  ;;  %v4964_v7 = vmul.f32 %v4851_v22, %v4609_v25  ;;  %v4606_v56 = vadd.f32 %v4504_v2, %v4156_v15  ;;  %v4607_v61 = vadd.f32 %v4507_v47, %v4157_v21  ;;  %v4836_v39 = vpop.permute.xlu0 %4835  ;;  %v13629_v21 = vld [vmem:[#allocation214_spill] sm:$0xff]  ;;  %v13630_v1 = vld [vmem:[#allocation213_spill] sm:$0xff] }
 0x463   : > { %v11387_v29 = vpop.f32.mrf.mxu0  ;;  %5060 = vst [vmem:[%s11301_s15 + $0x20] sm:$0xff] %v5028_v31  ;;  %v5002_v40 = vadd.f32 %v11276_v35, %v4963_v49  ;;  %v4163_v16 = vmul.f32 0.0, %v13622_v14  ;;  %v5664_v17 = vadd.f32 %v13624_v59, %v13623_v63  ;;  %v5776_v11 = vadd.f32 %v13626_v46, %v13625_v57  ;;  %v13633_v59 = vld [vmem:[#allocation159_spill] sm:$0xff]  ;;  %v13634_v57 = vld [vmem:[#allocation165_spill] sm:$0xff] }
 0x464   : > { %v11399_v0 = vpop.f32.mrf.mxu1  ;;  %5061 = vst [vmem:[%s11301_s15 + $0x28] sm:$0xff] %v5029_v5  ;;  %v5003_v4 = vadd.f32 %v11276_v35, %v4964_v7  ;;  %v4528_v42 = vadd.f32 %v5779_v26, %v5667_v37  ;;  %v4961_v36 = vmul.f32 %v4836_v39, %v4606_v56  ;;  %v4162_v44 = vmul.f32 0.0, %v13627_v58  ;;  %v13631_v37 = vld [vmem:[#allocation215_spill] sm:$0xff]  ;;  %v13632_v56 = vld [vmem:[#allocation25_spill] sm:$0xff]  ;;  %v13638_v58 = vld [vmem:[#allocation140_spill] sm:$0xff] }
 0x465   : > { %v11401_v32 = vpop.f32.mrf.mxu0  ;;  %v4841_v2 = vpop.permute.xlu1 %4840  ;;  %v5034_v25 = vmax.f32 %v5002_v40, 0.0  ;;  %v4613_v15 = vadd.f32 %v4531_v50, %v4163_v16  ;;  %v5661_v8 = vadd.f32 %v13629_v21, %v13628_v20  ;;  %v5773_v27 = vadd.f32 %v13631_v37, %v13630_v1  ;;  %v13635_v46 = vld [vmem:[#allocation43_spill] sm:$0xff]  ;;  %v13641_v1 = vld [vmem:[#allocation238_spill] sm:$0xff] }
 0x466   : > { %v11412_v28 = vpop.f32.mrf.mxu1  ;;  %v5035_v45 = vmax.f32 %v5003_v4, 0.0  ;;  %v4962_v53 = vmul.f32 %v4841_v2, %v4607_v61  ;;  %v5000_v47 = vadd.f32 %v11276_v35, %v4961_v36  ;;  %v4523_v60 = vadd.f32 %v5776_v11, %v5664_v17  ;;  %v4866_v4 = vpop.permute.xlu0 %4865  ;;  %v13642_v37 = vld [vmem:[#allocation139_spill] sm:$0xff] }
 0x467   : > { %5066 = vst [vmem:[%s11301_s15 + $0x50] sm:$0xff] %v5034_v25  ;;  %v11423_v26 = vpop.f32.mrf.mxu0  ;;  %v4612_v49 = vadd.f32 %v4528_v42, %v4162_v44  ;;  %v4161_v40 = vmul.f32 0.0, %v13632_v56  ;;  %v4520_v14 = vadd.f32 %v5773_v27, %v5661_v8  ;;  %v5682_v17 = vadd.f32 %v13633_v59, %v11253_v24  ;;  %v13636_v25 = vld [vmem:[#allocation134_spill] sm:$0xff] }
 0x468   : > { %5067 = vst [vmem:[%s11301_s15 + $0x58] sm:$0xff] %v5035_v45  ;;  %v5001_v48 = vadd.f32 %v11276_v35, %v4962_v53  ;;  %v11425_v22 = vpop.f32.mrf.mxu1  ;;  %v5032_v31 = vmax.f32 %v5000_v47, 0.0  ;;  %v5794_v11 = vadd.f32 %v13635_v46, %v13634_v57  ;;  %v4160_v45 = vmul.f32 0.0, %v13636_v25  ;;  %v13637_v53 = vld [vmem:[#allocation163_spill] sm:$0xff]  ;;  %v13647_v59 = vld [vmem:[#allocation162_spill] sm:$0xff]  ;;  %v13648_v46 = vld [vmem:[#allocation45_spill] sm:$0xff] }
 0x469   : > { %v4871_v6 = vpop.permute.xlu1 %4870  ;;  %v4967_v50 = vmul.f32 %v4866_v4, %v4612_v49  ;;  %v11431_v16 = vpop.f32.mrf.mxu0  ;;  %v4611_v63 = vadd.f32 %v4523_v60, %v4161_v40  ;;  %v5679_v44 = vadd.f32 %v13638_v58, %v13637_v53  ;;  %v13639_v47 = vld [vmem:[#allocation47_spill] sm:$0xff]  ;;  %v5676_v27 = vadd.f32 %v13642_v37, %v13641_v1  ;;  %v13645_v40 = vld [vmem:[#allocation133_spill] sm:$0xff] }
 0x46a   : > { %v5033_v5 = vmax.f32 %v5001_v48, 0.0  ;;  %v4968_v7 = vmul.f32 %v4871_v6, %v4613_v15  ;;  %5064 = vst [vmem:[%s11301_s15 + $0x40] sm:$0xff] %v5032_v31  ;;  %v11437_v42 = vpop.f32.mrf.mxu1  ;;  %v13640_v48 = vld [vmem:[#allocation42_spill] sm:$0xff]  ;;  %v4610_v8 = vadd.f32 %v4520_v14, %v4160_v45  ;;  %v13643_v60 = vld [vmem:[#allocation239_spill] sm:$0xff]  ;;  %v13644_v6 = vld [vmem:[#allocation41_spill] sm:$0xff]  ;;  %v4167_v4 = vmul.f32 0.0, %v13645_v40 }
 0x46b   : > { %v5006_v39 = vadd.f32 %v11276_v35, %v4967_v50  ;;  %v5791_v15 = vadd.f32 %v13640_v48, %v13639_v47  ;;  %v11446_v21 = vpop.f32.mrf.mxu0  ;;  %v5788_v31 = vadd.f32 %v13644_v6, %v13643_v60  ;;  %v13646_v14 = vld [vmem:[#allocation237_spill] sm:$0xff]  ;;  %v5806_v47 = vadd.f32 %v11321_v9, %v11311_v34 }
 0x46c   : > { %5065 = vst [vmem:[%s11301_s15 + $0x48] sm:$0xff] %v5033_v5  ;;  %v5007_v61 = vadd.f32 %v11276_v35, %v4968_v7  ;;  %v4547_v5 = vadd.f32 %v5794_v11, %v5682_v17  ;;  %v11452_v49 = vpop.f32.mrf.mxu1  ;;  %v5673_v57 = vadd.f32 %v13647_v59, %v13646_v14  ;;  %v13650_v17 = vld [vmem:[#allocation148_spill] sm:$0xff]  ;;  %v5803_v60 = vadd.f32 %v11307_v41, %v11299_v51 }
 0x46d   : > { %v4861_v36 = vpop.permute.xlu1 %4860  ;;  %v5038_v20 = vmax.f32 %v5006_v39, 0.0  ;;  %v4544_v50 = vadd.f32 %v5791_v15, %v5679_v44  ;;  %v13649_v39 = vld [vmem:[#allocation46_spill] sm:$0xff]  ;;  %v11461_v25 = vpop.f32.mrf.mxu0  ;;  %v4166_v11 = vmul.f32 0.0, %v13650_v17  ;;  %v4539_v45 = vadd.f32 %v5788_v31, %v5676_v27  ;;  %v13651_v15 = vld [vmem:[#allocation223_spill] sm:$0xff] }
 0x46e   : > { %v5039_v2 = vmax.f32 %v5007_v61, 0.0  ;;  %v4966_v24 = vmul.f32 %v4861_v36, %v4611_v63  ;;  %v11464_v36 = vpop.f32.mrf.mxu1  ;;  %v4617_v58 = vadd.f32 %v4547_v5, %v4167_v4  ;;  %v5694_v44 = vadd.f32 %v11319_v19, %v11309_v55  ;;  %v13652_v5 = vld [vmem:[#allocation20_spill] sm:$0xff] }
 0x46f   : > { %5070 = vst [vmem:[%s11301_s15 + $0x70] sm:$0xff] %v5038_v20  ;;  %v4165_v20 = vmul.f32 0.0, %v13651_v15  ;;  %v5691_v27 = vadd.f32 %v11305_v30, %v11297_v52  ;;  %v11477_v6 = vpop.f32.mrf.mxu0  ;;  %v13653_v52 = vld [vmem:[#allocation160_spill] sm:$0xff] }
 0x470   : > { %5071 = vst [vmem:[%s11301_s15 + $0x78] sm:$0xff] %v5039_v2  ;;  %v5005_v7 = vadd.f32 %v11276_v35, %v4966_v24  ;;  %v5785_v2 = vadd.f32 %v13649_v39, %v13648_v46  ;;  %v11479_v55 = vpop.f32.mrf.mxu1  ;;  %v5800_v30 = vadd.f32 %v13653_v52, %v11287_v18  ;;  %v4563_v51 = vadd.f32 %v5806_v47, %v5694_v44  ;;  %v13655_v46 = vld [vmem:[#allocation244_spill] sm:$0xff] }
 0x471   : > { %v4615_v19 = vadd.f32 %v4539_v45, %v4165_v20  ;;  %v4560_v14 = vadd.f32 %v5803_v60, %v5691_v27  ;;  %v11490_v59 = vpop.f32.mrf.mxu0  ;;  %v13656_v39 = vld [vmem:[#allocation228_spill] sm:$0xff]  ;;  %v5706_v20 = vadd.f32 %v11431_v16, %v11423_v26  ;;  %v5815_v26 = vadd.f32 %v11412_v28, %v11399_v0 }
 0x472   : > { %v5037_v63 = vmax.f32 %v5005_v7, 0.0  ;;  %v4536_v37 = vadd.f32 %v5785_v2, %v5673_v57  ;;  %v4164_v7 = vmul.f32 0.0, %v13652_v5  ;;  %v5685_v2 = vadd.f32 %v13656_v39, %v13655_v46  ;;  %v11496_v18 = vpop.f32.mrf.mxu1 }
 0x473   : > { %v11507_v60 = vpop.f32.mrf.mxu0  ;;  %v5703_v5 = vadd.f32 %v11401_v32, %v11387_v29  ;;  %v5812_v29 = vadd.f32 %v11381_v54, %v11368_v43  ;;  %v5809_v43 = vadd.f32 %v11349_v12, %v11339_v33 }
 0x474   : > { %v4856_v56 = vpop.permute.xlu0 %4855  ;;  %5069 = vst [vmem:[%s11301_s15 + $0x68] sm:$0xff] %v5037_v63  ;;  %v4614_v57 = vadd.f32 %v4536_v37, %v4164_v7  ;;  %v13660_v37 = vld [vmem:[#allocation226_spill] sm:$0xff] }
 0x475   : > { %v4965_v61 = vmul.f32 %v4856_v56, %v4610_v8  ;;  %v4891_v48 = vpop.permute.xlu1 %4890  ;;  %v4616_v8 = vadd.f32 %v4544_v50, %v4166_v11  ;;  %v5688_v56 = vadd.f32 %v11293_v10, %v11285_v3  ;;  %v13657_v10 = vld [vmem:[#allocation245_spill] sm:$0xff]  ;;  %v13658_v3 = vld [vmem:[#allocation246_spill] sm:$0xff]  ;;  %v4169_v27 = vmul.f32 0.0, %v13660_v37  ;;  %v13665_v37 = vld [vmem:[#allocation27_spill] sm:$0xff] }
 0x476   : > { %v4972_v1 = vmul.f32 %v4891_v48, %v4617_v58  ;;  %v5797_v17 = vadd.f32 %v13658_v3, %v13657_v10  ;;  %v13659_v58 = vld [vmem:[#allocation222_spill] sm:$0xff] }
 0x477   : > { %v5004_v53 = vadd.f32 %v11276_v35, %v4965_v61  ;;  %v13654_v61 = vld [vmem:[#allocation224_spill] sm:$0xff]  ;;  %v4170_v44 = vmul.f32 0.0, %v13659_v58  ;;  %v4555_v47 = vadd.f32 %v5800_v30, %v5688_v56  ;;  %v13661_v30 = vld [vmem:[#allocation219_spill] sm:$0xff]  ;;  %v13664_v58 = vld [vmem:[#allocation209_spill] sm:$0xff] }
 0x478   : > { %v5011_v34 = vadd.f32 %v11276_v35, %v4972_v1  ;;  %v4171_v63 = vmul.f32 0.0, %v13654_v61 }
 0x479   : > { %v5036_v24 = vmax.f32 %v5004_v53, 0.0  ;;  %v4619_v52 = vadd.f32 %v4555_v47, %v4169_v27  ;;  %v4172_v27 = vmul.f32 0.0, %v13665_v37 }
 0x47a   : > { %v5043_v4 = vmax.f32 %v5011_v34, 0.0  ;;  %v4621_v15 = vadd.f32 %v4563_v51, %v4171_v63  ;;  %v4168_v51 = vmul.f32 0.0, %v13661_v30  ;;  %v4576_v63 = vadd.f32 %v5815_v26, %v5703_v5 }
 0x47b   : > { %v4886_v31 = vpop.permute.xlu0 %4885  ;;  %5068 = vst [vmem:[%s11301_s15 + $0x60] sm:$0xff] %v5036_v24  ;;  %v5818_v24 = vadd.f32 %v11437_v42, %v11425_v22  ;;  %v11514_v22 = vpop.f32.mrf.mxu1 }
 0x47c   : > { %v4971_v9 = vmul.f32 %v4886_v31, %v4616_v8  ;;  %5075 = vst [vmem:[%s11301_s15 + $0x98] sm:$0xff] %v5043_v4 }
 0x47d   : > { %v4579_v32 = vadd.f32 %v5818_v24, %v5706_v20 }
 0x47e   : > { %v5010_v40 = vadd.f32 %v11276_v35, %v4971_v9  ;;  %v4620_v9 = vadd.f32 %v4560_v14, %v4170_v44  ;;  %v5714_v14 = vpop.f32.mrf.mxu0  ;;  %v4173_v44 = vmul.f32 0.0, %v13664_v58 }
 0x480   : > { %v4881_v41 = vpop.permute.xlu1 %4880  ;;  %v5042_v11 = vmax.f32 %v5010_v40, 0.0 }
 0x481   : > { %v4970_v50 = vmul.f32 %v4881_v41, %v4615_v19  ;;  %v4876_v45 = vpop.permute.xlu0 %4875  ;;  %v4552_v19 = vadd.f32 %v5797_v17, %v5685_v2  ;;  %v5700_v41 = vadd.f32 %v11374_v23, %v11359_v13  ;;  %v5697_v13 = vadd.f32 %v11345_v38, %v11332_v62  ;;  %v13663_v2 = vld [vmem:[#allocation31_spill] sm:$0xff]  ;;  %v5716_v62 = vpop.f32.mrf.mxu0 }
 0x482   : > { %v4969_v48 = vmul.f32 %v4876_v45, %v4614_v57  ;;  %5074 = vst [vmem:[%s11301_s15 + $0x90] sm:$0xff] %v5042_v11  ;;  %v5826_v57 = vpop.f32.mrf.mxu1  ;;  %v4174_v10 = vmul.f32 0.0, %v13663_v2 }
 0x483   : > { %v5009_v53 = vadd.f32 %v11276_v35, %v4970_v50  ;;  %v13662_v50 = vld [vmem:[#allocation227_spill] sm:$0xff]  ;;  %v4618_v46 = vadd.f32 %v4552_v19, %v4168_v51  ;;  %v4571_v3 = vadd.f32 %v5812_v29, %v5700_v41  ;;  %v5717_v19 = vpop.f32.mrf.mxu0 }
 0x484   : > { %v5008_v31 = vadd.f32 %v11276_v35, %v4969_v48  ;;  %v4175_v61 = vmul.f32 0.0, %v13662_v50  ;;  %v5828_v38 = vpop.f32.mrf.mxu1  ;;  %v4624_v12 = vadd.f32 %v4576_v63, %v4174_v10  ;;  %v4568_v48 = vadd.f32 %v5809_v43, %v5697_v13  ;;  %v13667_v50 = vld [vmem:[#allocation225_spill] sm:$0xff] }
 0x485   : > { %v5041_v8 = vmax.f32 %v5009_v53, 0.0  ;;  %v5718_v30 = vadd.f32 %v5717_v19, %v5716_v62 }
 0x486   : > { %v5040_v42 = vmax.f32 %v5008_v31, 0.0  ;;  %v4625_v11 = vadd.f32 %v4579_v32, %v4175_v61  ;;  %v5712_v31 = vadd.f32 %v11490_v59, %v11477_v6  ;;  %v5829_v5 = vpop.f32.mrf.mxu1  ;;  %v13666_v32 = vld [vmem:[#allocation210_spill] sm:$0xff]  ;;  %v4176_v61 = vmul.f32 0.0, %v13667_v50 }
 0x487   : > { %v4911_v1 = vpop.permute.xlu1 %4910  ;;  %5073 = vst [vmem:[%s11301_s15 + $0x88] sm:$0xff] %v5041_v8  ;;  %v5830_v51 = vadd.f32 %v5829_v5, %v5828_v38 }
 0x488   : > { %v4976_v34 = vmul.f32 %v4911_v1, %v4621_v15  ;;  %v4906_v16 = vpop.permute.xlu0 %4905  ;;  %5072 = vst [vmem:[%s11301_s15 + $0x80] sm:$0xff] %v5040_v42  ;;  %v4623_v1 = vadd.f32 %v4571_v3, %v4173_v44 }
 0x489   : > { %v4975_v7 = vmul.f32 %v4906_v16, %v4620_v9  ;;  %v5824_v9 = vadd.f32 %v11496_v18, %v11479_v55 }
 0x48a   : > { %v5015_v56 = vadd.f32 %v11276_v35, %v4976_v34 }
 0x48b   : > { %v5014_v28 = vadd.f32 %v11276_v35, %v4975_v7  ;;  %v4622_v7 = vadd.f32 %v4568_v48, %v4172_v27  ;;  %v4587_v18 = vadd.f32 %v5824_v9, %v5712_v31 }
 0x48c   : > { %v5047_v40 = vmax.f32 %v5015_v56, 0.0  ;;  %v5709_v56 = vadd.f32 %v11461_v25, %v11446_v21 }
 0x48d   : > { %v5046_v23 = vmax.f32 %v5014_v28, 0.0  ;;  %v4595_v28 = vadd.f32 %v5830_v51, %v5718_v30 }
 0x48e   : > { %v4901_v0 = vpop.permute.xlu1 %4900  ;;  %5079 = vst [vmem:[%s11301_s15 + $0xb8] sm:$0xff] %v5047_v40 }
 0x48f   : > { %v4974_v4 = vmul.f32 %v4901_v0, %v4619_v52  ;;  %v4896_v54 = vpop.permute.xlu0 %4895  ;;  %5078 = vst [vmem:[%s11301_s15 + $0xb0] sm:$0xff] %v5046_v23  ;;  %v5821_v52 = vadd.f32 %v11464_v36, %v11452_v49  ;;  %v4177_v0 = vmul.f32 0.0, %v13666_v32  ;;  %v5715_v49 = vadd.f32 %v5714_v14, %v11507_v60  ;;  %v13669_v14 = vld [vmem:[#allocation48_spill] sm:$0xff] }
 0x490   : > { %v4973_v17 = vmul.f32 %v4896_v54, %v4618_v46  ;;  %v5827_v36 = vadd.f32 %v5826_v57, %v11514_v22  ;;  %v13668_v46 = vld [vmem:[#allocation247_spill] sm:$0xff]  ;;  %v4178_v57 = vmul.f32 0.0, %v13669_v14 }
 0x491   : > { %v5013_v39 = vadd.f32 %v11276_v35, %v4974_v4  ;;  %v4584_v25 = vadd.f32 %v5821_v52, %v5709_v56  ;;  %v4627_v4 = vadd.f32 %v4587_v18, %v4177_v0  ;;  %v4179_v13 = vmul.f32 0.0, %v13668_v46 }
 0x492   : > { %v4931_v53 = vpop.permute.xlu1 %4930  ;;  %v5012_v33 = vadd.f32 %v11276_v35, %v4973_v17  ;;  %v4592_v23 = vadd.f32 %v5827_v36, %v5715_v49 }
 0x493   : > { %v5045_v45 = vmax.f32 %v5013_v39, 0.0  ;;  %v4980_v47 = vmul.f32 %v4931_v53, %v4625_v11  ;;  %v4626_v54 = vadd.f32 %v4584_v25, %v4176_v61  ;;  %v4629_v22 = vadd.f32 %v4595_v28, %v4179_v13 }
 0x494   : > { %v4926_v15 = vpop.permute.xlu0 %4925  ;;  %v5044_v20 = vmax.f32 %v5012_v33, 0.0 }
 0x495   : > { %5077 = vst [vmem:[%s11301_s15 + $0xa8] sm:$0xff] %v5045_v45  ;;  %v4979_v24 = vmul.f32 %v4926_v15, %v4624_v12  ;;  %v5019_v8 = vadd.f32 %v11276_v35, %v4980_v47  ;;  %v4628_v45 = vadd.f32 %v4592_v23, %v4178_v57 }
 0x496   : > { %5076 = vst [vmem:[%s11301_s15 + $0xa0] sm:$0xff] %v5044_v20 }
 0x497   : > { %v4921_v34 = vpop.permute.xlu1 %4920  ;;  %v5018_v26 = vadd.f32 %v11276_v35, %v4979_v24  ;;  %v5051_v16 = vmax.f32 %v5019_v8, 0.0 }
 0x498   : > { %v4978_v42 = vmul.f32 %v4921_v34, %v4623_v1 }
 0x499   : > { %v5050_v6 = vmax.f32 %v5018_v26, 0.0  ;;  %5083 = vst [vmem:[%s11301_s15 + $0xd8] sm:$0xff] %v5051_v16 }
 0x49a   : > { %v5017_v59 = vadd.f32 %v11276_v35, %v4978_v42 }
 0x49b   : > { %v4916_v55 = vpop.permute.xlu0 %4915  ;;  %5082 = vst [vmem:[%s11301_s15 + $0xd0] sm:$0xff] %v5050_v6 }
 0x49c   : > { %v4977_v41 = vmul.f32 %v4916_v55, %v4622_v7  ;;  %v5049_v29 = vmax.f32 %v5017_v59, 0.0 }
 0x49e   : > { %v5016_v21 = vadd.f32 %v11276_v35, %v4977_v41  ;;  %5081 = vst [vmem:[%s11301_s15 + $0xc8] sm:$0xff] %v5049_v29 }
 0x4a0   : > { %v5048_v40 = vmax.f32 %v5016_v21, 0.0 }
 0x4a2   : > { %5080 = vst [vmem:[%s11301_s15 + $0xc0] sm:$0xff] %v5048_v40 }
 0x4a5   : > { %v4941_v63 = vpop.permute.xlu1 %4940 }
 0x4a6   : > { %v4982_v43 = vmul.f32 %v4941_v63, %v4627_v4 }
 0x4a8   : > { %v5021_v39 = vadd.f32 %v11276_v35, %v4982_v43  ;;  %v4936_v60 = vpop.permute.xlu0 %4935 }
 0x4a9   : > { %v4981_v2 = vmul.f32 %v4936_v60, %v4626_v54  ;;  %v4951_v10 = vpop.permute.xlu1 %4950 }
 0x4aa   : > { %v5053_v3 = vmax.f32 %v5021_v39, 0.0  ;;  %v4984_v17 = vmul.f32 %v4951_v10, %v4629_v22 }
 0x4ab   : > { %v5020_v11 = vadd.f32 %v11276_v35, %v4981_v2 }
 0x4ac   : > { %5085 = vst [vmem:[%s11301_s15 + $0xe8] sm:$0xff] %v5053_v3  ;;  %v5023_v53 = vadd.f32 %v11276_v35, %v4984_v17  ;;  %v4946_v58 = vpop.permute.xlu0 %4945 }
 0x4ad   : > { %v5052_v44 = vmax.f32 %v5020_v11, 0.0  ;;  %v4983_v62 = vmul.f32 %v4946_v58, %v4628_v45 }
 0x4ae   : > { %v5055_v38 = vmax.f32 %v5023_v53, 0.0 }
 0x4af   : > { %5084 = vst [vmem:[%s11301_s15 + $0xe0] sm:$0xff] %v5052_v44  ;;  %v5022_v33 = vadd.f32 %v11276_v35, %v4983_v62 }
 0x4b0   : > { %5087 = vst [vmem:[%s11301_s15 + $0xf8] sm:$0xff] %v5055_v38 }
 0x4b1   : > { %v5054_v12 = vmax.f32 %v5022_v33, 0.0 }
 0x4b3   : > { %5086 = vst [vmem:[%s11301_s15 + $0xf0] sm:$0xff] %v5054_v12 }
 0x4b4   : > { %6470 = shalt.err (!%p6467_p6)
}
 0x4b5   : > { %s6471_s16 = scalar_lea.hbm %s11573_s21, 4096  ;;  %s6475_s15 = scalar_lea.hbm %s11632_s7, 8192 }
 0x4b6   : > { %p6472_p7 = scmp.ne.s32.totalorder %s11573_s21, %s6471_s16  ;;  %p6476_p11 = scmp.lt.s32.totalorder %s11573_s21, %s11632_s7 }
 0x4b7   : > { %p6477_p12 = scmp.lt.s32.totalorder %s6475_s15, %s6471_s16 }
 0x4b8   : > { %p6473_p9 = pnand %p6472_p7, %p6621_p4 }
 0x4b9   : > { %p6478_p13 = por %p6477_p12, %p6476_p11 }
 0x4ba   : > { %p6474_p10 = pneg %p6473_p9 }
 0x4bc   : > { %p6479_p0 = pnand %p6478_p13, %p6474_p10 }
 0x4be   : > { %6482 = shalt.err (!%p6479_p0)
}
 0x4bf   : > { %s6539_s20 = smov 128   ;;  %s6540_s22 = smov 8  }
 0x4c0   : > { %5955 = dma.vmem_to_hbm [thread:$0]  (%p6621_p4), %s11575_s19, 4096, %s11573_s21, %s11580_s27, %s6539_s20, %s6539_s20, %s6540_s22  }
 0x4c1 PF: > { %p5961_p1 = scmp.ge.s32.totalorder %s6533_s29, 2  ;;  %s5117_s23 = sand.u32 1, %s6513_s24  }
 0x4c2   : > { %s5118_s30 = scalar_lea.sflag [#allocation7], %s5117_s23 }
 0x4c3   : > { %p5958_p2 = pnand %p5961_p1, %p6628_p8 }
 0x4c5   : > { %p5959_p3 = pneg %p5958_p2 }
 0x4c7   : > { %6508 = dma.done.wait (%p5959_p3), %s5118_s30, 4096  }
 0x4c8   : > { %6510 = vsyncadd (%p5959_p3), %s5118_s30, 4294963200  ;;  %s20_s29 = sadd.s32 1, %s6533_s29   ;;  %s13670_s24 = smov %s6517_s25 }
 0x4c9   : > { %p17_p5 = scmp.ge.s32.totalorder %s20_s29, 4   ;;  %s13671_s25 = smov %s6521_s26 }
 0x4ca   : > { %s13672_s26 = smov %s6634_s14  ;;  %s13673_s27 = smov %s6529_s28 }
 0x4cb   : > { %s13674_s28 = smov %s13676_s9  ;;  %19 = sbr.rel (!%p17_p5) target bundleno = 4 (0x4), region = 97 }
 0x4d0   :  { %5123 = vsyncpa [#allocation7], 1 }
 0x4d1   :  { %5125 = vsyncpa [#allocation7 + $0x1], 1 }

</bundles_post_ra>
